<compile_context>
chip_gen: v7x
topology: tpu7x:2x2x1
jax: 0.10.0
libtpu: 0.0.40
codegen_flags: <defaults>
</compile_context>

<pallas_src>
import jax
import jax.numpy as jnp
from jax.experimental import pallas as pl
from jax.experimental.pallas import tpu as pltpu


def resblock2_kernel(x_ref, w1_ref, b1_ref, alpha_ref, w2_ref, b2_ref,
                     out_ref, pad_ref):
    """One batch element per grid step (NCHW layout, lane axis = W).

    x_ref    : (1, C, H, W)   VMEM input tile (also the residual identity)
    w1_ref   : (C*C*9,)       SMEM conv1 weights, flat OIHW order
    b1_ref   : (C,)           SMEM conv1 bias
    alpha_ref: (1,)           SMEM PReLU parameter (single shared param)
    w2_ref   : (C*C*9,)       SMEM conv2 weights, flat OIHW order
    b2_ref   : (C,)           SMEM conv2 bias
    out_ref  : (1, C, H, W)   VMEM output tile
    pad_ref  : (C, H+2, W+2)  VMEM zero-padded scratch shared by both convs
    """
    _, C, H, W = x_ref.shape

    # Re-establish the zero halo every step (one cheap VMEM fill).  Doing this
    # only under pl.when(program_id == 0) would be wrong when the "parallel"
    # batch axis is sharded across TensorCores (each core has its own scratch).
    pad_ref[...] = jnp.zeros_like(pad_ref)

    x = x_ref[0]                                   # (C, H, W) f32, identity
    pad_ref[:, 1:H + 1, 1:W + 1] = x               # stage conv1 input (interior)

    def conv3x3(w_ref, b_ref):
        # 3x3 conv, stride 1, pad 1, reading shifted windows straight from the
        # padded scratch.  Scalar weights from SMEM broadcast against whole
        # (H, W) planes (VPU multiply-adds; an MXU matmul would be <4%
        # utilized at C=4 and would need im2col relayouts).
        acc = [jnp.full((H, W), b_ref[co], jnp.float32) for co in range(C)]
        for kh in range(3):
            for kw in range(3):
                tap = pad_ref[:, kh:kh + H, kw:kw + W]     # (C, H, W)
                for ci in range(C):
                    plane = tap[ci]
                    for co in range(C):
                        wv = w_ref[((co * C + ci) * 3 + kh) * 3 + kw]
                        acc[co] = acc[co] + wv * plane
        return acc

    # ---- conv1 + PReLU (single shared alpha). The activated result overwrites
    # the scratch interior (halo stays zero) so conv2 reuses the same buffer. --
    a1 = conv3x3(w1_ref, b1_ref)
    alpha = alpha_ref[0]
    for c in range(C):
        p = a1[c]
        pad_ref[c, 1:H + 1, 1:W + 1] = jnp.where(p > 0.0, p, alpha * p)

    # ---- conv2 + residual add (identity is the raw input block) -------------
    a2 = conv3x3(w2_ref, b2_ref)
    for c in range(C):
        out_ref[0, c] = (x[c] + a2[c]).astype(out_ref.dtype)


@jax.jit
def resblock2_forward(x_nchw, w1, b1, alpha, w2, b2):
    """Pallas-backed ResBlock2 forward.  x_nchw: (N, C, H, W) float32 (NCHW)."""
    N, C, H, W = x_nchw.shape
    Cout = w1.shape[0]
    assert Cout == C, "residual add requires in_channels == out_channels"

    x = x_nchw.astype(jnp.float32)
    # Small parameters go to SMEM as flat 32-bit scalars (no per-tap weight
    # slicing / relayout in VMEM).
    w1f = w1.astype(jnp.float32).reshape(-1)            # OIHW flat: ((co*C+ci)*3+kh)*3+kw
    w2f = w2.astype(jnp.float32).reshape(-1)
    b1f = b1.astype(jnp.float32).reshape(-1)
    b2f = b2.astype(jnp.float32).reshape(-1)
    af = jnp.asarray(alpha, jnp.float32).reshape(-1)[:1]  # nn.PReLU() single param

    img_in = pl.BlockSpec((1, C, H, W), lambda n: (n, 0, 0, 0))
    img_out = pl.BlockSpec((1, C, H, W), lambda n: (n, 0, 0, 0))
    smem = pl.BlockSpec(memory_space=pltpu.MemorySpace.SMEM)

    return pl.pallas_call(
        resblock2_kernel,
        out_shape=jax.ShapeDtypeStruct((N, C, H, W), x.dtype),
        grid=(N,),
        in_specs=[img_in, smem, smem, smem, smem, smem],
        out_specs=img_out,
        scratch_shapes=[pltpu.VMEM((C, H + 2, W + 2), jnp.float32)],
        compiler_params=pltpu.CompilerParams(
            dimension_semantics=("parallel",),          # batch is independent (v7x 2-TC)
            vmem_limit_bytes=32 * 1024 * 1024,
        ),
    )(x, w1f, b1f, af, w2f, b2f)


def resblock2_reference(x, w1, b1, alpha, w2, b2):
    """Pure-JAX reference matching PyTorch semantics (NCHW, OIHW)."""
    dn = ('NCHW', 'OIHW', 'NCHW')
    r = jax.lax.conv_general_dilated(x, w1, (1, 1), ((1, 1), (1, 1)),
                                     dimension_numbers=dn)
    r = r + b1[None, :, None, None]
    r = jnp.where(r > 0, r, alpha * r)                   # PReLU, single shared param
    r = jax.lax.conv_general_dilated(r, w2, (1, 1), ((1, 1), (1, 1)),
                                     dimension_numbers=dn)
    r = r + b2[None, :, None, None]
    return x + r


if __name__ == "__main__":
    # Small shapes consistent with the module: batch=2, channels=4, 16x16.
    N, C, H, W = 2, 4, 16, 16

    key = jax.random.PRNGKey(0)
    kx, kw1, kb1, kw2, kb2 = jax.random.split(key, 5)

    x = jax.random.normal(kx, (N, C, H, W), jnp.float32)

    # Deterministic synthetic parameters (shapes from nn.Conv2d / nn.PReLU).
    w1 = 0.1 * jax.random.normal(kw1, (C, C, 3, 3), jnp.float32)   # OIHW
    b1 = 0.01 * jax.random.normal(kb1, (C,), jnp.float32)
    w2 = 0.1 * jax.random.normal(kw2, (C, C, 3, 3), jnp.float32)
    b2 = 0.01 * jax.random.normal(kb2, (C,), jnp.float32)
    alpha = jnp.float32(0.25)                                      # nn.PReLU() default init

    out = jax.block_until_ready(resblock2_forward(x, w1, b1, alpha, w2, b2))

    ref = resblock2_reference(x, w1, b1, alpha, w2, b2)
    assert out.shape == ref.shape == (N, C, H, W)
    max_err = float(jnp.max(jnp.abs(out - ref)))
    assert jnp.allclose(out, ref, atol=1e-4, rtol=1e-4), f"max err {max_err}"

    print("KERNEL_OK")
</pallas_src>

<mosaic_0001>
module attributes {stable_mosaic.version = 11 : i64} {
  func.func @resblock2_kernel(%arg0: i32, %arg1: memref<1x4x16x16xf32, #tpu.memory_space<vmem>>, %arg2: memref<144xf32, #tpu.memory_space<smem>>, %arg3: memref<4xf32, #tpu.memory_space<smem>>, %arg4: memref<1xf32, #tpu.memory_space<smem>>, %arg5: memref<144xf32, #tpu.memory_space<smem>>, %arg6: memref<4xf32, #tpu.memory_space<smem>>, %arg7: memref<1x4x16x16xf32, #tpu.memory_space<vmem>>, %arg8: memref<4x18x18xf32, #tpu.memory_space<vmem>>) attributes {dimension_semantics = [#tpu.dimension_semantics<parallel>], iteration_bounds = array<i64: 2>, scalar_prefetch = 0 : i64, scratch_operands = 1 : i64, tpu.core_type = #tpu.core_type<tc>, window_params = [{transform_indices = @transform_0, window_bounds = array<i64: 1, 4, 16, 16>}, {transform_indices = @transform_1, window_bounds = array<i64: 144>}, {transform_indices = @transform_2, window_bounds = array<i64: 4>}, {transform_indices = @transform_3, window_bounds = array<i64: 1>}, {transform_indices = @transform_4, window_bounds = array<i64: 144>}, {transform_indices = @transform_5, window_bounds = array<i64: 4>}, {transform_indices = @transform_6, window_bounds = array<i64: 1, 4, 16, 16>}]} {
    %cst = arith.constant 0.000000e+00 : f32
    %0 = vector.broadcast %cst : f32 to vector<4x18x18xf32>
    %c0 = arith.constant 0 : index
    %c0_0 = arith.constant 0 : index
    %c0_1 = arith.constant 0 : index
    %1 = vector.load %arg8[%c0, %c0_0, %c0_1] : memref<4x18x18xf32, #tpu.memory_space<vmem>>, vector<4x18x18xf32>
    tpu.vector_store %arg8[%c0, %c0_0, %c0_1], %0 {strides = array<i32>} : memref<4x18x18xf32, #tpu.memory_space<vmem>>, vector<4x18x18xf32>,
    %c0_2 = arith.constant 0 : index
    %c0_3 = arith.constant 0 : index
    %c0_4 = arith.constant 0 : index
    %c0_5 = arith.constant 0 : index
    %2 = vector.load %arg1[%c0_2, %c0_3, %c0_4, %c0_5] : memref<1x4x16x16xf32, #tpu.memory_space<vmem>>, vector<1x4x16x16xf32>
    %3 = vector.shape_cast %2 : vector<1x4x16x16xf32> to vector<4x16x16xf32>
    %c0_6 = arith.constant 0 : index
    %c1 = arith.constant 1 : index
    %c1_7 = arith.constant 1 : index
    %4 = vector.load %arg8[%c0_6, %c1, %c1_7] : memref<4x18x18xf32, #tpu.memory_space<vmem>>, vector<4x16x16xf32>
    tpu.vector_store %arg8[%c0_6, %c1, %c1_7], %3 {strides = array<i32>} : memref<4x18x18xf32, #tpu.memory_space<vmem>>, vector<4x16x16xf32>,
    %c0_8 = arith.constant 0 : index
    %5 = memref.load %arg3[%c0_8] : memref<4xf32, #tpu.memory_space<smem>>
    %6 = vector.broadcast %5 : f32 to vector<16x16xf32>
    %c1_9 = arith.constant 1 : index
    %7 = memref.load %arg3[%c1_9] : memref<4xf32, #tpu.memory_space<smem>>
    %8 = vector.broadcast %7 : f32 to vector<16x16xf32>
    %c2 = arith.constant 2 : index
    %9 = memref.load %arg3[%c2] : memref<4xf32, #tpu.memory_space<smem>>
    %10 = vector.broadcast %9 : f32 to vector<16x16xf32>
    %c3 = arith.constant 3 : index
    %11 = memref.load %arg3[%c3] : memref<4xf32, #tpu.memory_space<smem>>
    %12 = vector.broadcast %11 : f32 to vector<16x16xf32>
    %c0_10 = arith.constant 0 : index
    %c0_11 = arith.constant 0 : index
    %c0_12 = arith.constant 0 : index
    %13 = vector.load %arg8[%c0_10, %c0_11, %c0_12] : memref<4x18x18xf32, #tpu.memory_space<vmem>>, vector<4x16x16xf32>
    %14 = vector.extract_strided_slice %13 {offsets = [0, 0, 0], sizes = [1, 16, 16], strides = [1, 1, 1]} : vector<4x16x16xf32> to vector<1x16x16xf32>
    %15 = vector.shape_cast %14 : vector<1x16x16xf32> to vector<16x16xf32>
    %c0_13 = arith.constant 0 : index
    %16 = memref.load %arg2[%c0_13] : memref<144xf32, #tpu.memory_space<smem>>
    %17 = vector.broadcast %16 : f32 to vector<16x16xf32>
    %18 = arith.mulf %17, %15 : vector<16x16xf32>
    %19 = arith.addf %6, %18 : vector<16x16xf32>
    %c36 = arith.constant 36 : index
    %20 = memref.load %arg2[%c36] : memref<144xf32, #tpu.memory_space<smem>>
    %21 = vector.broadcast %20 : f32 to vector<16x16xf32>
    %22 = arith.mulf %21, %15 : vector<16x16xf32>
    %23 = arith.addf %8, %22 : vector<16x16xf32>
    %c72 = arith.constant 72 : index
    %24 = memref.load %arg2[%c72] : memref<144xf32, #tpu.memory_space<smem>>
    %25 = vector.broadcast %24 : f32 to vector<16x16xf32>
    %26 = arith.mulf %25, %15 : vector<16x16xf32>
    %27 = arith.addf %10, %26 : vector<16x16xf32>
    %c108 = arith.constant 108 : index
    %28 = memref.load %arg2[%c108] : memref<144xf32, #tpu.memory_space<smem>>
    %29 = vector.broadcast %28 : f32 to vector<16x16xf32>
    %30 = arith.mulf %29, %15 : vector<16x16xf32>
    %31 = arith.addf %12, %30 : vector<16x16xf32>
    %32 = vector.extract_strided_slice %13 {offsets = [1, 0, 0], sizes = [1, 16, 16], strides = [1, 1, 1]} : vector<4x16x16xf32> to vector<1x16x16xf32>
    %33 = vector.shape_cast %32 : vector<1x16x16xf32> to vector<16x16xf32>
    %c9 = arith.constant 9 : index
    %34 = memref.load %arg2[%c9] : memref<144xf32, #tpu.memory_space<smem>>
    %35 = vector.broadcast %34 : f32 to vector<16x16xf32>
    %36 = arith.mulf %35, %33 : vector<16x16xf32>
    %37 = arith.addf %19, %36 : vector<16x16xf32>
    %c45 = arith.constant 45 : index
    %38 = memref.load %arg2[%c45] : memref<144xf32, #tpu.memory_space<smem>>
    %39 = vector.broadcast %38 : f32 to vector<16x16xf32>
    %40 = arith.mulf %39, %33 : vector<16x16xf32>
    %41 = arith.addf %23, %40 : vector<16x16xf32>
    %c81 = arith.constant 81 : index
    %42 = memref.load %arg2[%c81] : memref<144xf32, #tpu.memory_space<smem>>
    %43 = vector.broadcast %42 : f32 to vector<16x16xf32>
    %44 = arith.mulf %43, %33 : vector<16x16xf32>
    %45 = arith.addf %27, %44 : vector<16x16xf32>
    %c117 = arith.constant 117 : index
    %46 = memref.load %arg2[%c117] : memref<144xf32, #tpu.memory_space<smem>>
    %47 = vector.broadcast %46 : f32 to vector<16x16xf32>
    %48 = arith.mulf %47, %33 : vector<16x16xf32>
    %49 = arith.addf %31, %48 : vector<16x16xf32>
    %50 = vector.extract_strided_slice %13 {offsets = [2, 0, 0], sizes = [1, 16, 16], strides = [1, 1, 1]} : vector<4x16x16xf32> to vector<1x16x16xf32>
    %51 = vector.shape_cast %50 : vector<1x16x16xf32> to vector<16x16xf32>
    %c18 = arith.constant 18 : index
    %52 = memref.load %arg2[%c18] : memref<144xf32, #tpu.memory_space<smem>>
    %53 = vector.broadcast %52 : f32 to vector<16x16xf32>
    %54 = arith.mulf %53, %51 : vector<16x16xf32>
    %55 = arith.addf %37, %54 : vector<16x16xf32>
    %c54 = arith.constant 54 : index
    %56 = memref.load %arg2[%c54] : memref<144xf32, #tpu.memory_space<smem>>
    %57 = vector.broadcast %56 : f32 to vector<16x16xf32>
    %58 = arith.mulf %57, %51 : vector<16x16xf32>
    %59 = arith.addf %41, %58 : vector<16x16xf32>
    %c90 = arith.constant 90 : index
    %60 = memref.load %arg2[%c90] : memref<144xf32, #tpu.memory_space<smem>>
    %61 = vector.broadcast %60 : f32 to vector<16x16xf32>
    %62 = arith.mulf %61, %51 : vector<16x16xf32>
    %63 = arith.addf %45, %62 : vector<16x16xf32>
    %c126 = arith.constant 126 : index
    %64 = memref.load %arg2[%c126] : memref<144xf32, #tpu.memory_space<smem>>
    %65 = vector.broadcast %64 : f32 to vector<16x16xf32>
    %66 = arith.mulf %65, %51 : vector<16x16xf32>
    %67 = arith.addf %49, %66 : vector<16x16xf32>
    %68 = vector.extract_strided_slice %13 {offsets = [3, 0, 0], sizes = [1, 16, 16], strides = [1, 1, 1]} : vector<4x16x16xf32> to vector<1x16x16xf32>
    %69 = vector.shape_cast %68 : vector<1x16x16xf32> to vector<16x16xf32>
    %c27 = arith.constant 27 : index
    %70 = memref.load %arg2[%c27] : memref<144xf32, #tpu.memory_space<smem>>
    %71 = vector.broadcast %70 : f32 to vector<16x16xf32>
    %72 = arith.mulf %71, %69 : vector<16x16xf32>
    %73 = arith.addf %55, %72 : vector<16x16xf32>
    %c63 = arith.constant 63 : index
    %74 = memref.load %arg2[%c63] : memref<144xf32, #tpu.memory_space<smem>>
    %75 = vector.broadcast %74 : f32 to vector<16x16xf32>
    %76 = arith.mulf %75, %69 : vector<16x16xf32>
    %77 = arith.addf %59, %76 : vector<16x16xf32>
    %c99 = arith.constant 99 : index
    %78 = memref.load %arg2[%c99] : memref<144xf32, #tpu.memory_space<smem>>
    %79 = vector.broadcast %78 : f32 to vector<16x16xf32>
    %80 = arith.mulf %79, %69 : vector<16x16xf32>
    %81 = arith.addf %63, %80 : vector<16x16xf32>
    %c135 = arith.constant 135 : index
    %82 = memref.load %arg2[%c135] : memref<144xf32, #tpu.memory_space<smem>>
    %83 = vector.broadcast %82 : f32 to vector<16x16xf32>
    %84 = arith.mulf %83, %69 : vector<16x16xf32>
    %85 = arith.addf %67, %84 : vector<16x16xf32>
    %c0_14 = arith.constant 0 : index
    %c0_15 = arith.constant 0 : index
    %c1_16 = arith.constant 1 : index
    %86 = vector.load %arg8[%c0_14, %c0_15, %c1_16] : memref<4x18x18xf32, #tpu.memory_space<vmem>>, vector<4x16x16xf32>
    %87 = vector.extract_strided_slice %86 {offsets = [0, 0, 0], sizes = [1, 16, 16], strides = [1, 1, 1]} : vector<4x16x16xf32> to vector<1x16x16xf32>
    %88 = vector.shape_cast %87 : vector<1x16x16xf32> to vector<16x16xf32>
    %c1_17 = arith.constant 1 : index
    %89 = memref.load %arg2[%c1_17] : memref<144xf32, #tpu.memory_space<smem>>
    %90 = vector.broadcast %89 : f32 to vector<16x16xf32>
    %91 = arith.mulf %90, %88 : vector<16x16xf32>
    %92 = arith.addf %73, %91 : vector<16x16xf32>
    %c37 = arith.constant 37 : index
    %93 = memref.load %arg2[%c37] : memref<144xf32, #tpu.memory_space<smem>>
    %94 = vector.broadcast %93 : f32 to vector<16x16xf32>
    %95 = arith.mulf %94, %88 : vector<16x16xf32>
    %96 = arith.addf %77, %95 : vector<16x16xf32>
    %c73 = arith.constant 73 : index
    %97 = memref.load %arg2[%c73] : memref<144xf32, #tpu.memory_space<smem>>
    %98 = vector.broadcast %97 : f32 to vector<16x16xf32>
    %99 = arith.mulf %98, %88 : vector<16x16xf32>
    %100 = arith.addf %81, %99 : vector<16x16xf32>
    %c109 = arith.constant 109 : index
    %101 = memref.load %arg2[%c109] : memref<144xf32, #tpu.memory_space<smem>>
    %102 = vector.broadcast %101 : f32 to vector<16x16xf32>
    %103 = arith.mulf %102, %88 : vector<16x16xf32>
    %104 = arith.addf %85, %103 : vector<16x16xf32>
    %105 = vector.extract_strided_slice %86 {offsets = [1, 0, 0], sizes = [1, 16, 16], strides = [1, 1, 1]} : vector<4x16x16xf32> to vector<1x16x16xf32>
    %106 = vector.shape_cast %105 : vector<1x16x16xf32> to vector<16x16xf32>
    %c10 = arith.constant 10 : index
    %107 = memref.load %arg2[%c10] : memref<144xf32, #tpu.memory_space<smem>>
    %108 = vector.broadcast %107 : f32 to vector<16x16xf32>
    %109 = arith.mulf %108, %106 : vector<16x16xf32>
    %110 = arith.addf %92, %109 : vector<16x16xf32>
    %c46 = arith.constant 46 : index
    %111 = memref.load %arg2[%c46] : memref<144xf32, #tpu.memory_space<smem>>
    %112 = vector.broadcast %111 : f32 to vector<16x16xf32>
    %113 = arith.mulf %112, %106 : vector<16x16xf32>
    %114 = arith.addf %96, %113 : vector<16x16xf32>
    %c82 = arith.constant 82 : index
    %115 = memref.load %arg2[%c82] : memref<144xf32, #tpu.memory_space<smem>>
    %116 = vector.broadcast %115 : f32 to vector<16x16xf32>
    %117 = arith.mulf %116, %106 : vector<16x16xf32>
    %118 = arith.addf %100, %117 : vector<16x16xf32>
    %c118 = arith.constant 118 : index
    %119 = memref.load %arg2[%c118] : memref<144xf32, #tpu.memory_space<smem>>
    %120 = vector.broadcast %119 : f32 to vector<16x16xf32>
    %121 = arith.mulf %120, %106 : vector<16x16xf32>
    %122 = arith.addf %104, %121 : vector<16x16xf32>
    %123 = vector.extract_strided_slice %86 {offsets = [2, 0, 0], sizes = [1, 16, 16], strides = [1, 1, 1]} : vector<4x16x16xf32> to vector<1x16x16xf32>
    %124 = vector.shape_cast %123 : vector<1x16x16xf32> to vector<16x16xf32>
    %c19 = arith.constant 19 : index
    %125 = memref.load %arg2[%c19] : memref<144xf32, #tpu.memory_space<smem>>
    %126 = vector.broadcast %125 : f32 to vector<16x16xf32>
    %127 = arith.mulf %126, %124 : vector<16x16xf32>
    %128 = arith.addf %110, %127 : vector<16x16xf32>
    %c55 = arith.constant 55 : index
    %129 = memref.load %arg2[%c55] : memref<144xf32, #tpu.memory_space<smem>>
    %130 = vector.broadcast %129 : f32 to vector<16x16xf32>
    %131 = arith.mulf %130, %124 : vector<16x16xf32>
    %132 = arith.addf %114, %131 : vector<16x16xf32>
    %c91 = arith.constant 91 : index
    %133 = memref.load %arg2[%c91] : memref<144xf32, #tpu.memory_space<smem>>
    %134 = vector.broadcast %133 : f32 to vector<16x16xf32>
    %135 = arith.mulf %134, %124 : vector<16x16xf32>
    %136 = arith.addf %118, %135 : vector<16x16xf32>
    %c127 = arith.constant 127 : index
    %137 = memref.load %arg2[%c127] : memref<144xf32, #tpu.memory_space<smem>>
    %138 = vector.broadcast %137 : f32 to vector<16x16xf32>
    %139 = arith.mulf %138, %124 : vector<16x16xf32>
    %140 = arith.addf %122, %139 : vector<16x16xf32>
    %141 = vector.extract_strided_slice %86 {offsets = [3, 0, 0], sizes = [1, 16, 16], strides = [1, 1, 1]} : vector<4x16x16xf32> to vector<1x16x16xf32>
    %142 = vector.shape_cast %141 : vector<1x16x16xf32> to vector<16x16xf32>
    %c28 = arith.constant 28 : index
    %143 = memref.load %arg2[%c28] : memref<144xf32, #tpu.memory_space<smem>>
    %144 = vector.broadcast %143 : f32 to vector<16x16xf32>
    %145 = arith.mulf %144, %142 : vector<16x16xf32>
    %146 = arith.addf %128, %145 : vector<16x16xf32>
    %c64 = arith.constant 64 : index
    %147 = memref.load %arg2[%c64] : memref<144xf32, #tpu.memory_space<smem>>
    %148 = vector.broadcast %147 : f32 to vector<16x16xf32>
    %149 = arith.mulf %148, %142 : vector<16x16xf32>
    %150 = arith.addf %132, %149 : vector<16x16xf32>
    %c100 = arith.constant 100 : index
    %151 = memref.load %arg2[%c100] : memref<144xf32, #tpu.memory_space<smem>>
    %152 = vector.broadcast %151 : f32 to vector<16x16xf32>
    %153 = arith.mulf %152, %142 : vector<16x16xf32>
    %154 = arith.addf %136, %153 : vector<16x16xf32>
    %c136 = arith.constant 136 : index
    %155 = memref.load %arg2[%c136] : memref<144xf32, #tpu.memory_space<smem>>
    %156 = vector.broadcast %155 : f32 to vector<16x16xf32>
    %157 = arith.mulf %156, %142 : vector<16x16xf32>
    %158 = arith.addf %140, %157 : vector<16x16xf32>
    %c0_18 = arith.constant 0 : index
    %c0_19 = arith.constant 0 : index
    %c2_20 = arith.constant 2 : index
    %159 = vector.load %arg8[%c0_18, %c0_19, %c2_20] : memref<4x18x18xf32, #tpu.memory_space<vmem>>, vector<4x16x16xf32>
    %160 = vector.extract_strided_slice %159 {offsets = [0, 0, 0], sizes = [1, 16, 16], strides = [1, 1, 1]} : vector<4x16x16xf32> to vector<1x16x16xf32>
    %161 = vector.shape_cast %160 : vector<1x16x16xf32> to vector<16x16xf32>
    %c2_21 = arith.constant 2 : index
    %162 = memref.load %arg2[%c2_21] : memref<144xf32, #tpu.memory_space<smem>>
    %163 = vector.broadcast %162 : f32 to vector<16x16xf32>
    %164 = arith.mulf %163, %161 : vector<16x16xf32>
    %165 = arith.addf %146, %164 : vector<16x16xf32>
    %c38 = arith.constant 38 : index
    %166 = memref.load %arg2[%c38] : memref<144xf32, #tpu.memory_space<smem>>
    %167 = vector.broadcast %166 : f32 to vector<16x16xf32>
    %168 = arith.mulf %167, %161 : vector<16x16xf32>
    %169 = arith.addf %150, %168 : vector<16x16xf32>
    %c74 = arith.constant 74 : index
    %170 = memref.load %arg2[%c74] : memref<144xf32, #tpu.memory_space<smem>>
    %171 = vector.broadcast %170 : f32 to vector<16x16xf32>
    %172 = arith.mulf %171, %161 : vector<16x16xf32>
    %173 = arith.addf %154, %172 : vector<16x16xf32>
    %c110 = arith.constant 110 : index
    %174 = memref.load %arg2[%c110] : memref<144xf32, #tpu.memory_space<smem>>
    %175 = vector.broadcast %174 : f32 to vector<16x16xf32>
    %176 = arith.mulf %175, %161 : vector<16x16xf32>
    %177 = arith.addf %158, %176 : vector<16x16xf32>
    %178 = vector.extract_strided_slice %159 {offsets = [1, 0, 0], sizes = [1, 16, 16], strides = [1, 1, 1]} : vector<4x16x16xf32> to vector<1x16x16xf32>
    %179 = vector.shape_cast %178 : vector<1x16x16xf32> to vector<16x16xf32>
    %c11 = arith.constant 11 : index
    %180 = memref.load %arg2[%c11] : memref<144xf32, #tpu.memory_space<smem>>
    %181 = vector.broadcast %180 : f32 to vector<16x16xf32>
    %182 = arith.mulf %181, %179 : vector<16x16xf32>
    %183 = arith.addf %165, %182 : vector<16x16xf32>
    %c47 = arith.constant 47 : index
    %184 = memref.load %arg2[%c47] : memref<144xf32, #tpu.memory_space<smem>>
    %185 = vector.broadcast %184 : f32 to vector<16x16xf32>
    %186 = arith.mulf %185, %179 : vector<16x16xf32>
    %187 = arith.addf %169, %186 : vector<16x16xf32>
    %c83 = arith.constant 83 : index
    %188 = memref.load %arg2[%c83] : memref<144xf32, #tpu.memory_space<smem>>
    %189 = vector.broadcast %188 : f32 to vector<16x16xf32>
    %190 = arith.mulf %189, %179 : vector<16x16xf32>
    %191 = arith.addf %173, %190 : vector<16x16xf32>
    %c119 = arith.constant 119 : index
    %192 = memref.load %arg2[%c119] : memref<144xf32, #tpu.memory_space<smem>>
    %193 = vector.broadcast %192 : f32 to vector<16x16xf32>
    %194 = arith.mulf %193, %179 : vector<16x16xf32>
    %195 = arith.addf %177, %194 : vector<16x16xf32>
    %196 = vector.extract_strided_slice %159 {offsets = [2, 0, 0], sizes = [1, 16, 16], strides = [1, 1, 1]} : vector<4x16x16xf32> to vector<1x16x16xf32>
    %197 = vector.shape_cast %196 : vector<1x16x16xf32> to vector<16x16xf32>
    %c20 = arith.constant 20 : index
    %198 = memref.load %arg2[%c20] : memref<144xf32, #tpu.memory_space<smem>>
    %199 = vector.broadcast %198 : f32 to vector<16x16xf32>
    %200 = arith.mulf %199, %197 : vector<16x16xf32>
    %201 = arith.addf %183, %200 : vector<16x16xf32>
    %c56 = arith.constant 56 : index
    %202 = memref.load %arg2[%c56] : memref<144xf32, #tpu.memory_space<smem>>
    %203 = vector.broadcast %202 : f32 to vector<16x16xf32>
    %204 = arith.mulf %203, %197 : vector<16x16xf32>
    %205 = arith.addf %187, %204 : vector<16x16xf32>
    %c92 = arith.constant 92 : index
    %206 = memref.load %arg2[%c92] : memref<144xf32, #tpu.memory_space<smem>>
    %207 = vector.broadcast %206 : f32 to vector<16x16xf32>
    %208 = arith.mulf %207, %197 : vector<16x16xf32>
    %209 = arith.addf %191, %208 : vector<16x16xf32>
    %c128 = arith.constant 128 : index
    %210 = memref.load %arg2[%c128] : memref<144xf32, #tpu.memory_space<smem>>
    %211 = vector.broadcast %210 : f32 to vector<16x16xf32>
    %212 = arith.mulf %211, %197 : vector<16x16xf32>
    %213 = arith.addf %195, %212 : vector<16x16xf32>
    %214 = vector.extract_strided_slice %159 {offsets = [3, 0, 0], sizes = [1, 16, 16], strides = [1, 1, 1]} : vector<4x16x16xf32> to vector<1x16x16xf32>
    %215 = vector.shape_cast %214 : vector<1x16x16xf32> to vector<16x16xf32>
    %c29 = arith.constant 29 : index
    %216 = memref.load %arg2[%c29] : memref<144xf32, #tpu.memory_space<smem>>
    %217 = vector.broadcast %216 : f32 to vector<16x16xf32>
    %218 = arith.mulf %217, %215 : vector<16x16xf32>
    %219 = arith.addf %201, %218 : vector<16x16xf32>
    %c65 = arith.constant 65 : index
    %220 = memref.load %arg2[%c65] : memref<144xf32, #tpu.memory_space<smem>>
    %221 = vector.broadcast %220 : f32 to vector<16x16xf32>
    %222 = arith.mulf %221, %215 : vector<16x16xf32>
    %223 = arith.addf %205, %222 : vector<16x16xf32>
    %c101 = arith.constant 101 : index
    %224 = memref.load %arg2[%c101] : memref<144xf32, #tpu.memory_space<smem>>
    %225 = vector.broadcast %224 : f32 to vector<16x16xf32>
    %226 = arith.mulf %225, %215 : vector<16x16xf32>
    %227 = arith.addf %209, %226 : vector<16x16xf32>
    %c137 = arith.constant 137 : index
    %228 = memref.load %arg2[%c137] : memref<144xf32, #tpu.memory_space<smem>>
    %229 = vector.broadcast %228 : f32 to vector<16x16xf32>
    %230 = arith.mulf %229, %215 : vector<16x16xf32>
    %231 = arith.addf %213, %230 : vector<16x16xf32>
    %c0_22 = arith.constant 0 : index
    %c1_23 = arith.constant 1 : index
    %c0_24 = arith.constant 0 : index
    %232 = vector.load %arg8[%c0_22, %c1_23, %c0_24] : memref<4x18x18xf32, #tpu.memory_space<vmem>>, vector<4x16x16xf32>
    %233 = vector.extract_strided_slice %232 {offsets = [0, 0, 0], sizes = [1, 16, 16], strides = [1, 1, 1]} : vector<4x16x16xf32> to vector<1x16x16xf32>
    %234 = vector.shape_cast %233 : vector<1x16x16xf32> to vector<16x16xf32>
    %c3_25 = arith.constant 3 : index
    %235 = memref.load %arg2[%c3_25] : memref<144xf32, #tpu.memory_space<smem>>
    %236 = vector.broadcast %235 : f32 to vector<16x16xf32>
    %237 = arith.mulf %236, %234 : vector<16x16xf32>
    %238 = arith.addf %219, %237 : vector<16x16xf32>
    %c39 = arith.constant 39 : index
    %239 = memref.load %arg2[%c39] : memref<144xf32, #tpu.memory_space<smem>>
    %240 = vector.broadcast %239 : f32 to vector<16x16xf32>
    %241 = arith.mulf %240, %234 : vector<16x16xf32>
    %242 = arith.addf %223, %241 : vector<16x16xf32>
    %c75 = arith.constant 75 : index
    %243 = memref.load %arg2[%c75] : memref<144xf32, #tpu.memory_space<smem>>
    %244 = vector.broadcast %243 : f32 to vector<16x16xf32>
    %245 = arith.mulf %244, %234 : vector<16x16xf32>
    %246 = arith.addf %227, %245 : vector<16x16xf32>
    %c111 = arith.constant 111 : index
    %247 = memref.load %arg2[%c111] : memref<144xf32, #tpu.memory_space<smem>>
    %248 = vector.broadcast %247 : f32 to vector<16x16xf32>
    %249 = arith.mulf %248, %234 : vector<16x16xf32>
    %250 = arith.addf %231, %249 : vector<16x16xf32>
    %251 = vector.extract_strided_slice %232 {offsets = [1, 0, 0], sizes = [1, 16, 16], strides = [1, 1, 1]} : vector<4x16x16xf32> to vector<1x16x16xf32>
    %252 = vector.shape_cast %251 : vector<1x16x16xf32> to vector<16x16xf32>
    %c12 = arith.constant 12 : index
    %253 = memref.load %arg2[%c12] : memref<144xf32, #tpu.memory_space<smem>>
    %254 = vector.broadcast %253 : f32 to vector<16x16xf32>
    %255 = arith.mulf %254, %252 : vector<16x16xf32>
    %256 = arith.addf %238, %255 : vector<16x16xf32>
    %c48 = arith.constant 48 : index
    %257 = memref.load %arg2[%c48] : memref<144xf32, #tpu.memory_space<smem>>
    %258 = vector.broadcast %257 : f32 to vector<16x16xf32>
    %259 = arith.mulf %258, %252 : vector<16x16xf32>
    %260 = arith.addf %242, %259 : vector<16x16xf32>
    %c84 = arith.constant 84 : index
    %261 = memref.load %arg2[%c84] : memref<144xf32, #tpu.memory_space<smem>>
    %262 = vector.broadcast %261 : f32 to vector<16x16xf32>
    %263 = arith.mulf %262, %252 : vector<16x16xf32>
    %264 = arith.addf %246, %263 : vector<16x16xf32>
    %c120 = arith.constant 120 : index
    %265 = memref.load %arg2[%c120] : memref<144xf32, #tpu.memory_space<smem>>
    %266 = vector.broadcast %265 : f32 to vector<16x16xf32>
    %267 = arith.mulf %266, %252 : vector<16x16xf32>
    %268 = arith.addf %250, %267 : vector<16x16xf32>
    %269 = vector.extract_strided_slice %232 {offsets = [2, 0, 0], sizes = [1, 16, 16], strides = [1, 1, 1]} : vector<4x16x16xf32> to vector<1x16x16xf32>
    %270 = vector.shape_cast %269 : vector<1x16x16xf32> to vector<16x16xf32>
    %c21 = arith.constant 21 : index
    %271 = memref.load %arg2[%c21] : memref<144xf32, #tpu.memory_space<smem>>
    %272 = vector.broadcast %271 : f32 to vector<16x16xf32>
    %273 = arith.mulf %272, %270 : vector<16x16xf32>
    %274 = arith.addf %256, %273 : vector<16x16xf32>
    %c57 = arith.constant 57 : index
    %275 = memref.load %arg2[%c57] : memref<144xf32, #tpu.memory_space<smem>>
    %276 = vector.broadcast %275 : f32 to vector<16x16xf32>
    %277 = arith.mulf %276, %270 : vector<16x16xf32>
    %278 = arith.addf %260, %277 : vector<16x16xf32>
    %c93 = arith.constant 93 : index
    %279 = memref.load %arg2[%c93] : memref<144xf32, #tpu.memory_space<smem>>
    %280 = vector.broadcast %279 : f32 to vector<16x16xf32>
    %281 = arith.mulf %280, %270 : vector<16x16xf32>
    %282 = arith.addf %264, %281 : vector<16x16xf32>
    %c129 = arith.constant 129 : index
    %283 = memref.load %arg2[%c129] : memref<144xf32, #tpu.memory_space<smem>>
    %284 = vector.broadcast %283 : f32 to vector<16x16xf32>
    %285 = arith.mulf %284, %270 : vector<16x16xf32>
    %286 = arith.addf %268, %285 : vector<16x16xf32>
    %287 = vector.extract_strided_slice %232 {offsets = [3, 0, 0], sizes = [1, 16, 16], strides = [1, 1, 1]} : vector<4x16x16xf32> to vector<1x16x16xf32>
    %288 = vector.shape_cast %287 : vector<1x16x16xf32> to vector<16x16xf32>
    %c30 = arith.constant 30 : index
    %289 = memref.load %arg2[%c30] : memref<144xf32, #tpu.memory_space<smem>>
    %290 = vector.broadcast %289 : f32 to vector<16x16xf32>
    %291 = arith.mulf %290, %288 : vector<16x16xf32>
    %292 = arith.addf %274, %291 : vector<16x16xf32>
    %c66 = arith.constant 66 : index
    %293 = memref.load %arg2[%c66] : memref<144xf32, #tpu.memory_space<smem>>
    %294 = vector.broadcast %293 : f32 to vector<16x16xf32>
    %295 = arith.mulf %294, %288 : vector<16x16xf32>
    %296 = arith.addf %278, %295 : vector<16x16xf32>
    %c102 = arith.constant 102 : index
    %297 = memref.load %arg2[%c102] : memref<144xf32, #tpu.memory_space<smem>>
    %298 = vector.broadcast %297 : f32 to vector<16x16xf32>
    %299 = arith.mulf %298, %288 : vector<16x16xf32>
    %300 = arith.addf %282, %299 : vector<16x16xf32>
    %c138 = arith.constant 138 : index
    %301 = memref.load %arg2[%c138] : memref<144xf32, #tpu.memory_space<smem>>
    %302 = vector.broadcast %301 : f32 to vector<16x16xf32>
    %303 = arith.mulf %302, %288 : vector<16x16xf32>
    %304 = arith.addf %286, %303 : vector<16x16xf32>
    %c0_26 = arith.constant 0 : index
    %c1_27 = arith.constant 1 : index
    %c1_28 = arith.constant 1 : index
    %305 = vector.load %arg8[%c0_26, %c1_27, %c1_28] : memref<4x18x18xf32, #tpu.memory_space<vmem>>, vector<4x16x16xf32>
    %306 = vector.extract_strided_slice %305 {offsets = [0, 0, 0], sizes = [1, 16, 16], strides = [1, 1, 1]} : vector<4x16x16xf32> to vector<1x16x16xf32>
    %307 = vector.shape_cast %306 : vector<1x16x16xf32> to vector<16x16xf32>
    %c4 = arith.constant 4 : index
    %308 = memref.load %arg2[%c4] : memref<144xf32, #tpu.memory_space<smem>>
    %309 = vector.broadcast %308 : f32 to vector<16x16xf32>
    %310 = arith.mulf %309, %307 : vector<16x16xf32>
    %311 = arith.addf %292, %310 : vector<16x16xf32>
    %c40 = arith.constant 40 : index
    %312 = memref.load %arg2[%c40] : memref<144xf32, #tpu.memory_space<smem>>
    %313 = vector.broadcast %312 : f32 to vector<16x16xf32>
    %314 = arith.mulf %313, %307 : vector<16x16xf32>
    %315 = arith.addf %296, %314 : vector<16x16xf32>
    %c76 = arith.constant 76 : index
    %316 = memref.load %arg2[%c76] : memref<144xf32, #tpu.memory_space<smem>>
    %317 = vector.broadcast %316 : f32 to vector<16x16xf32>
    %318 = arith.mulf %317, %307 : vector<16x16xf32>
    %319 = arith.addf %300, %318 : vector<16x16xf32>
    %c112 = arith.constant 112 : index
    %320 = memref.load %arg2[%c112] : memref<144xf32, #tpu.memory_space<smem>>
    %321 = vector.broadcast %320 : f32 to vector<16x16xf32>
    %322 = arith.mulf %321, %307 : vector<16x16xf32>
    %323 = arith.addf %304, %322 : vector<16x16xf32>
    %324 = vector.extract_strided_slice %305 {offsets = [1, 0, 0], sizes = [1, 16, 16], strides = [1, 1, 1]} : vector<4x16x16xf32> to vector<1x16x16xf32>
    %325 = vector.shape_cast %324 : vector<1x16x16xf32> to vector<16x16xf32>
    %c13 = arith.constant 13 : index
    %326 = memref.load %arg2[%c13] : memref<144xf32, #tpu.memory_space<smem>>
    %327 = vector.broadcast %326 : f32 to vector<16x16xf32>
    %328 = arith.mulf %327, %325 : vector<16x16xf32>
    %329 = arith.addf %311, %328 : vector<16x16xf32>
    %c49 = arith.constant 49 : index
    %330 = memref.load %arg2[%c49] : memref<144xf32, #tpu.memory_space<smem>>
    %331 = vector.broadcast %330 : f32 to vector<16x16xf32>
    %332 = arith.mulf %331, %325 : vector<16x16xf32>
    %333 = arith.addf %315, %332 : vector<16x16xf32>
    %c85 = arith.constant 85 : index
    %334 = memref.load %arg2[%c85] : memref<144xf32, #tpu.memory_space<smem>>
    %335 = vector.broadcast %334 : f32 to vector<16x16xf32>
    %336 = arith.mulf %335, %325 : vector<16x16xf32>
    %337 = arith.addf %319, %336 : vector<16x16xf32>
    %c121 = arith.constant 121 : index
    %338 = memref.load %arg2[%c121] : memref<144xf32, #tpu.memory_space<smem>>
    %339 = vector.broadcast %338 : f32 to vector<16x16xf32>
    %340 = arith.mulf %339, %325 : vector<16x16xf32>
    %341 = arith.addf %323, %340 : vector<16x16xf32>
    %342 = vector.extract_strided_slice %305 {offsets = [2, 0, 0], sizes = [1, 16, 16], strides = [1, 1, 1]} : vector<4x16x16xf32> to vector<1x16x16xf32>
    %343 = vector.shape_cast %342 : vector<1x16x16xf32> to vector<16x16xf32>
    %c22 = arith.constant 22 : index
    %344 = memref.load %arg2[%c22] : memref<144xf32, #tpu.memory_space<smem>>
    %345 = vector.broadcast %344 : f32 to vector<16x16xf32>
    %346 = arith.mulf %345, %343 : vector<16x16xf32>
    %347 = arith.addf %329, %346 : vector<16x16xf32>
    %c58 = arith.constant 58 : index
    %348 = memref.load %arg2[%c58] : memref<144xf32, #tpu.memory_space<smem>>
    %349 = vector.broadcast %348 : f32 to vector<16x16xf32>
    %350 = arith.mulf %349, %343 : vector<16x16xf32>
    %351 = arith.addf %333, %350 : vector<16x16xf32>
    %c94 = arith.constant 94 : index
    %352 = memref.load %arg2[%c94] : memref<144xf32, #tpu.memory_space<smem>>
    %353 = vector.broadcast %352 : f32 to vector<16x16xf32>
    %354 = arith.mulf %353, %343 : vector<16x16xf32>
    %355 = arith.addf %337, %354 : vector<16x16xf32>
    %c130 = arith.constant 130 : index
    %356 = memref.load %arg2[%c130] : memref<144xf32, #tpu.memory_space<smem>>
    %357 = vector.broadcast %356 : f32 to vector<16x16xf32>
    %358 = arith.mulf %357, %343 : vector<16x16xf32>
    %359 = arith.addf %341, %358 : vector<16x16xf32>
    %360 = vector.extract_strided_slice %305 {offsets = [3, 0, 0], sizes = [1, 16, 16], strides = [1, 1, 1]} : vector<4x16x16xf32> to vector<1x16x16xf32>
    %361 = vector.shape_cast %360 : vector<1x16x16xf32> to vector<16x16xf32>
    %c31 = arith.constant 31 : index
    %362 = memref.load %arg2[%c31] : memref<144xf32, #tpu.memory_space<smem>>
    %363 = vector.broadcast %362 : f32 to vector<16x16xf32>
    %364 = arith.mulf %363, %361 : vector<16x16xf32>
    %365 = arith.addf %347, %364 : vector<16x16xf32>
    %c67 = arith.constant 67 : index
    %366 = memref.load %arg2[%c67] : memref<144xf32, #tpu.memory_space<smem>>
    %367 = vector.broadcast %366 : f32 to vector<16x16xf32>
    %368 = arith.mulf %367, %361 : vector<16x16xf32>
    %369 = arith.addf %351, %368 : vector<16x16xf32>
    %c103 = arith.constant 103 : index
    %370 = memref.load %arg2[%c103] : memref<144xf32, #tpu.memory_space<smem>>
    %371 = vector.broadcast %370 : f32 to vector<16x16xf32>
    %372 = arith.mulf %371, %361 : vector<16x16xf32>
    %373 = arith.addf %355, %372 : vector<16x16xf32>
    %c139 = arith.constant 139 : index
    %374 = memref.load %arg2[%c139] : memref<144xf32, #tpu.memory_space<smem>>
    %375 = vector.broadcast %374 : f32 to vector<16x16xf32>
    %376 = arith.mulf %375, %361 : vector<16x16xf32>
    %377 = arith.addf %359, %376 : vector<16x16xf32>
    %c0_29 = arith.constant 0 : index
    %c1_30 = arith.constant 1 : index
    %c2_31 = arith.constant 2 : index
    %378 = vector.load %arg8[%c0_29, %c1_30, %c2_31] : memref<4x18x18xf32, #tpu.memory_space<vmem>>, vector<4x16x16xf32>
    %379 = vector.extract_strided_slice %378 {offsets = [0, 0, 0], sizes = [1, 16, 16], strides = [1, 1, 1]} : vector<4x16x16xf32> to vector<1x16x16xf32>
    %380 = vector.shape_cast %379 : vector<1x16x16xf32> to vector<16x16xf32>
    %c5 = arith.constant 5 : index
    %381 = memref.load %arg2[%c5] : memref<144xf32, #tpu.memory_space<smem>>
    %382 = vector.broadcast %381 : f32 to vector<16x16xf32>
    %383 = arith.mulf %382, %380 : vector<16x16xf32>
    %384 = arith.addf %365, %383 : vector<16x16xf32>
    %c41 = arith.constant 41 : index
    %385 = memref.load %arg2[%c41] : memref<144xf32, #tpu.memory_space<smem>>
    %386 = vector.broadcast %385 : f32 to vector<16x16xf32>
    %387 = arith.mulf %386, %380 : vector<16x16xf32>
    %388 = arith.addf %369, %387 : vector<16x16xf32>
    %c77 = arith.constant 77 : index
    %389 = memref.load %arg2[%c77] : memref<144xf32, #tpu.memory_space<smem>>
    %390 = vector.broadcast %389 : f32 to vector<16x16xf32>
    %391 = arith.mulf %390, %380 : vector<16x16xf32>
    %392 = arith.addf %373, %391 : vector<16x16xf32>
    %c113 = arith.constant 113 : index
    %393 = memref.load %arg2[%c113] : memref<144xf32, #tpu.memory_space<smem>>
    %394 = vector.broadcast %393 : f32 to vector<16x16xf32>
    %395 = arith.mulf %394, %380 : vector<16x16xf32>
    %396 = arith.addf %377, %395 : vector<16x16xf32>
    %397 = vector.extract_strided_slice %378 {offsets = [1, 0, 0], sizes = [1, 16, 16], strides = [1, 1, 1]} : vector<4x16x16xf32> to vector<1x16x16xf32>
    %398 = vector.shape_cast %397 : vector<1x16x16xf32> to vector<16x16xf32>
    %c14 = arith.constant 14 : index
    %399 = memref.load %arg2[%c14] : memref<144xf32, #tpu.memory_space<smem>>
    %400 = vector.broadcast %399 : f32 to vector<16x16xf32>
    %401 = arith.mulf %400, %398 : vector<16x16xf32>
    %402 = arith.addf %384, %401 : vector<16x16xf32>
    %c50 = arith.constant 50 : index
    %403 = memref.load %arg2[%c50] : memref<144xf32, #tpu.memory_space<smem>>
    %404 = vector.broadcast %403 : f32 to vector<16x16xf32>
    %405 = arith.mulf %404, %398 : vector<16x16xf32>
    %406 = arith.addf %388, %405 : vector<16x16xf32>
    %c86 = arith.constant 86 : index
    %407 = memref.load %arg2[%c86] : memref<144xf32, #tpu.memory_space<smem>>
    %408 = vector.broadcast %407 : f32 to vector<16x16xf32>
    %409 = arith.mulf %408, %398 : vector<16x16xf32>
    %410 = arith.addf %392, %409 : vector<16x16xf32>
    %c122 = arith.constant 122 : index
    %411 = memref.load %arg2[%c122] : memref<144xf32, #tpu.memory_space<smem>>
    %412 = vector.broadcast %411 : f32 to vector<16x16xf32>
    %413 = arith.mulf %412, %398 : vector<16x16xf32>
    %414 = arith.addf %396, %413 : vector<16x16xf32>
    %415 = vector.extract_strided_slice %378 {offsets = [2, 0, 0], sizes = [1, 16, 16], strides = [1, 1, 1]} : vector<4x16x16xf32> to vector<1x16x16xf32>
    %416 = vector.shape_cast %415 : vector<1x16x16xf32> to vector<16x16xf32>
    %c23 = arith.constant 23 : index
    %417 = memref.load %arg2[%c23] : memref<144xf32, #tpu.memory_space<smem>>
    %418 = vector.broadcast %417 : f32 to vector<16x16xf32>
    %419 = arith.mulf %418, %416 : vector<16x16xf32>
    %420 = arith.addf %402, %419 : vector<16x16xf32>
    %c59 = arith.constant 59 : index
    %421 = memref.load %arg2[%c59] : memref<144xf32, #tpu.memory_space<smem>>
    %422 = vector.broadcast %421 : f32 to vector<16x16xf32>
    %423 = arith.mulf %422, %416 : vector<16x16xf32>
    %424 = arith.addf %406, %423 : vector<16x16xf32>
    %c95 = arith.constant 95 : index
    %425 = memref.load %arg2[%c95] : memref<144xf32, #tpu.memory_space<smem>>
    %426 = vector.broadcast %425 : f32 to vector<16x16xf32>
    %427 = arith.mulf %426, %416 : vector<16x16xf32>
    %428 = arith.addf %410, %427 : vector<16x16xf32>
    %c131 = arith.constant 131 : index
    %429 = memref.load %arg2[%c131] : memref<144xf32, #tpu.memory_space<smem>>
    %430 = vector.broadcast %429 : f32 to vector<16x16xf32>
    %431 = arith.mulf %430, %416 : vector<16x16xf32>
    %432 = arith.addf %414, %431 : vector<16x16xf32>
    %433 = vector.extract_strided_slice %378 {offsets = [3, 0, 0], sizes = [1, 16, 16], strides = [1, 1, 1]} : vector<4x16x16xf32> to vector<1x16x16xf32>
    %434 = vector.shape_cast %433 : vector<1x16x16xf32> to vector<16x16xf32>
    %c32 = arith.constant 32 : index
    %435 = memref.load %arg2[%c32] : memref<144xf32, #tpu.memory_space<smem>>
    %436 = vector.broadcast %435 : f32 to vector<16x16xf32>
    %437 = arith.mulf %436, %434 : vector<16x16xf32>
    %438 = arith.addf %420, %437 : vector<16x16xf32>
    %c68 = arith.constant 68 : index
    %439 = memref.load %arg2[%c68] : memref<144xf32, #tpu.memory_space<smem>>
    %440 = vector.broadcast %439 : f32 to vector<16x16xf32>
    %441 = arith.mulf %440, %434 : vector<16x16xf32>
    %442 = arith.addf %424, %441 : vector<16x16xf32>
    %c104 = arith.constant 104 : index
    %443 = memref.load %arg2[%c104] : memref<144xf32, #tpu.memory_space<smem>>
    %444 = vector.broadcast %443 : f32 to vector<16x16xf32>
    %445 = arith.mulf %444, %434 : vector<16x16xf32>
    %446 = arith.addf %428, %445 : vector<16x16xf32>
    %c140 = arith.constant 140 : index
    %447 = memref.load %arg2[%c140] : memref<144xf32, #tpu.memory_space<smem>>
    %448 = vector.broadcast %447 : f32 to vector<16x16xf32>
    %449 = arith.mulf %448, %434 : vector<16x16xf32>
    %450 = arith.addf %432, %449 : vector<16x16xf32>
    %c0_32 = arith.constant 0 : index
    %c2_33 = arith.constant 2 : index
    %c0_34 = arith.constant 0 : index
    %451 = vector.load %arg8[%c0_32, %c2_33, %c0_34] : memref<4x18x18xf32, #tpu.memory_space<vmem>>, vector<4x16x16xf32>
    %452 = vector.extract_strided_slice %451 {offsets = [0, 0, 0], sizes = [1, 16, 16], strides = [1, 1, 1]} : vector<4x16x16xf32> to vector<1x16x16xf32>
    %453 = vector.shape_cast %452 : vector<1x16x16xf32> to vector<16x16xf32>
    %c6 = arith.constant 6 : index
    %454 = memref.load %arg2[%c6] : memref<144xf32, #tpu.memory_space<smem>>
    %455 = vector.broadcast %454 : f32 to vector<16x16xf32>
    %456 = arith.mulf %455, %453 : vector<16x16xf32>
    %457 = arith.addf %438, %456 : vector<16x16xf32>
    %c42 = arith.constant 42 : index
    %458 = memref.load %arg2[%c42] : memref<144xf32, #tpu.memory_space<smem>>
    %459 = vector.broadcast %458 : f32 to vector<16x16xf32>
    %460 = arith.mulf %459, %453 : vector<16x16xf32>
    %461 = arith.addf %442, %460 : vector<16x16xf32>
    %c78 = arith.constant 78 : index
    %462 = memref.load %arg2[%c78] : memref<144xf32, #tpu.memory_space<smem>>
    %463 = vector.broadcast %462 : f32 to vector<16x16xf32>
    %464 = arith.mulf %463, %453 : vector<16x16xf32>
    %465 = arith.addf %446, %464 : vector<16x16xf32>
    %c114 = arith.constant 114 : index
    %466 = memref.load %arg2[%c114] : memref<144xf32, #tpu.memory_space<smem>>
    %467 = vector.broadcast %466 : f32 to vector<16x16xf32>
    %468 = arith.mulf %467, %453 : vector<16x16xf32>
    %469 = arith.addf %450, %468 : vector<16x16xf32>
    %470 = vector.extract_strided_slice %451 {offsets = [1, 0, 0], sizes = [1, 16, 16], strides = [1, 1, 1]} : vector<4x16x16xf32> to vector<1x16x16xf32>
    %471 = vector.shape_cast %470 : vector<1x16x16xf32> to vector<16x16xf32>
    %c15 = arith.constant 15 : index
    %472 = memref.load %arg2[%c15] : memref<144xf32, #tpu.memory_space<smem>>
    %473 = vector.broadcast %472 : f32 to vector<16x16xf32>
    %474 = arith.mulf %473, %471 : vector<16x16xf32>
    %475 = arith.addf %457, %474 : vector<16x16xf32>
    %c51 = arith.constant 51 : index
    %476 = memref.load %arg2[%c51] : memref<144xf32, #tpu.memory_space<smem>>
    %477 = vector.broadcast %476 : f32 to vector<16x16xf32>
    %478 = arith.mulf %477, %471 : vector<16x16xf32>
    %479 = arith.addf %461, %478 : vector<16x16xf32>
    %c87 = arith.constant 87 : index
    %480 = memref.load %arg2[%c87] : memref<144xf32, #tpu.memory_space<smem>>
    %481 = vector.broadcast %480 : f32 to vector<16x16xf32>
    %482 = arith.mulf %481, %471 : vector<16x16xf32>
    %483 = arith.addf %465, %482 : vector<16x16xf32>
    %c123 = arith.constant 123 : index
    %484 = memref.load %arg2[%c123] : memref<144xf32, #tpu.memory_space<smem>>
    %485 = vector.broadcast %484 : f32 to vector<16x16xf32>
    %486 = arith.mulf %485, %471 : vector<16x16xf32>
    %487 = arith.addf %469, %486 : vector<16x16xf32>
    %488 = vector.extract_strided_slice %451 {offsets = [2, 0, 0], sizes = [1, 16, 16], strides = [1, 1, 1]} : vector<4x16x16xf32> to vector<1x16x16xf32>
    %489 = vector.shape_cast %488 : vector<1x16x16xf32> to vector<16x16xf32>
    %c24 = arith.constant 24 : index
    %490 = memref.load %arg2[%c24] : memref<144xf32, #tpu.memory_space<smem>>
    %491 = vector.broadcast %490 : f32 to vector<16x16xf32>
    %492 = arith.mulf %491, %489 : vector<16x16xf32>
    %493 = arith.addf %475, %492 : vector<16x16xf32>
    %c60 = arith.constant 60 : index
    %494 = memref.load %arg2[%c60] : memref<144xf32, #tpu.memory_space<smem>>
    %495 = vector.broadcast %494 : f32 to vector<16x16xf32>
    %496 = arith.mulf %495, %489 : vector<16x16xf32>
    %497 = arith.addf %479, %496 : vector<16x16xf32>
    %c96 = arith.constant 96 : index
    %498 = memref.load %arg2[%c96] : memref<144xf32, #tpu.memory_space<smem>>
    %499 = vector.broadcast %498 : f32 to vector<16x16xf32>
    %500 = arith.mulf %499, %489 : vector<16x16xf32>
    %501 = arith.addf %483, %500 : vector<16x16xf32>
    %c132 = arith.constant 132 : index
    %502 = memref.load %arg2[%c132] : memref<144xf32, #tpu.memory_space<smem>>
    %503 = vector.broadcast %502 : f32 to vector<16x16xf32>
    %504 = arith.mulf %503, %489 : vector<16x16xf32>
    %505 = arith.addf %487, %504 : vector<16x16xf32>
    %506 = vector.extract_strided_slice %451 {offsets = [3, 0, 0], sizes = [1, 16, 16], strides = [1, 1, 1]} : vector<4x16x16xf32> to vector<1x16x16xf32>
    %507 = vector.shape_cast %506 : vector<1x16x16xf32> to vector<16x16xf32>
    %c33 = arith.constant 33 : index
    %508 = memref.load %arg2[%c33] : memref<144xf32, #tpu.memory_space<smem>>
    %509 = vector.broadcast %508 : f32 to vector<16x16xf32>
    %510 = arith.mulf %509, %507 : vector<16x16xf32>
    %511 = arith.addf %493, %510 : vector<16x16xf32>
    %c69 = arith.constant 69 : index
    %512 = memref.load %arg2[%c69] : memref<144xf32, #tpu.memory_space<smem>>
    %513 = vector.broadcast %512 : f32 to vector<16x16xf32>
    %514 = arith.mulf %513, %507 : vector<16x16xf32>
    %515 = arith.addf %497, %514 : vector<16x16xf32>
    %c105 = arith.constant 105 : index
    %516 = memref.load %arg2[%c105] : memref<144xf32, #tpu.memory_space<smem>>
    %517 = vector.broadcast %516 : f32 to vector<16x16xf32>
    %518 = arith.mulf %517, %507 : vector<16x16xf32>
    %519 = arith.addf %501, %518 : vector<16x16xf32>
    %c141 = arith.constant 141 : index
    %520 = memref.load %arg2[%c141] : memref<144xf32, #tpu.memory_space<smem>>
    %521 = vector.broadcast %520 : f32 to vector<16x16xf32>
    %522 = arith.mulf %521, %507 : vector<16x16xf32>
    %523 = arith.addf %505, %522 : vector<16x16xf32>
    %c0_35 = arith.constant 0 : index
    %c2_36 = arith.constant 2 : index
    %c1_37 = arith.constant 1 : index
    %524 = vector.load %arg8[%c0_35, %c2_36, %c1_37] : memref<4x18x18xf32, #tpu.memory_space<vmem>>, vector<4x16x16xf32>
    %525 = vector.extract_strided_slice %524 {offsets = [0, 0, 0], sizes = [1, 16, 16], strides = [1, 1, 1]} : vector<4x16x16xf32> to vector<1x16x16xf32>
    %526 = vector.shape_cast %525 : vector<1x16x16xf32> to vector<16x16xf32>
    %c7 = arith.constant 7 : index
    %527 = memref.load %arg2[%c7] : memref<144xf32, #tpu.memory_space<smem>>
    %528 = vector.broadcast %527 : f32 to vector<16x16xf32>
    %529 = arith.mulf %528, %526 : vector<16x16xf32>
    %530 = arith.addf %511, %529 : vector<16x16xf32>
    %c43 = arith.constant 43 : index
    %531 = memref.load %arg2[%c43] : memref<144xf32, #tpu.memory_space<smem>>
    %532 = vector.broadcast %531 : f32 to vector<16x16xf32>
    %533 = arith.mulf %532, %526 : vector<16x16xf32>
    %534 = arith.addf %515, %533 : vector<16x16xf32>
    %c79 = arith.constant 79 : index
    %535 = memref.load %arg2[%c79] : memref<144xf32, #tpu.memory_space<smem>>
    %536 = vector.broadcast %535 : f32 to vector<16x16xf32>
    %537 = arith.mulf %536, %526 : vector<16x16xf32>
    %538 = arith.addf %519, %537 : vector<16x16xf32>
    %c115 = arith.constant 115 : index
    %539 = memref.load %arg2[%c115] : memref<144xf32, #tpu.memory_space<smem>>
    %540 = vector.broadcast %539 : f32 to vector<16x16xf32>
    %541 = arith.mulf %540, %526 : vector<16x16xf32>
    %542 = arith.addf %523, %541 : vector<16x16xf32>
    %543 = vector.extract_strided_slice %524 {offsets = [1, 0, 0], sizes = [1, 16, 16], strides = [1, 1, 1]} : vector<4x16x16xf32> to vector<1x16x16xf32>
    %544 = vector.shape_cast %543 : vector<1x16x16xf32> to vector<16x16xf32>
    %c16 = arith.constant 16 : index
    %545 = memref.load %arg2[%c16] : memref<144xf32, #tpu.memory_space<smem>>
    %546 = vector.broadcast %545 : f32 to vector<16x16xf32>
    %547 = arith.mulf %546, %544 : vector<16x16xf32>
    %548 = arith.addf %530, %547 : vector<16x16xf32>
    %c52 = arith.constant 52 : index
    %549 = memref.load %arg2[%c52] : memref<144xf32, #tpu.memory_space<smem>>
    %550 = vector.broadcast %549 : f32 to vector<16x16xf32>
    %551 = arith.mulf %550, %544 : vector<16x16xf32>
    %552 = arith.addf %534, %551 : vector<16x16xf32>
    %c88 = arith.constant 88 : index
    %553 = memref.load %arg2[%c88] : memref<144xf32, #tpu.memory_space<smem>>
    %554 = vector.broadcast %553 : f32 to vector<16x16xf32>
    %555 = arith.mulf %554, %544 : vector<16x16xf32>
    %556 = arith.addf %538, %555 : vector<16x16xf32>
    %c124 = arith.constant 124 : index
    %557 = memref.load %arg2[%c124] : memref<144xf32, #tpu.memory_space<smem>>
    %558 = vector.broadcast %557 : f32 to vector<16x16xf32>
    %559 = arith.mulf %558, %544 : vector<16x16xf32>
    %560 = arith.addf %542, %559 : vector<16x16xf32>
    %561 = vector.extract_strided_slice %524 {offsets = [2, 0, 0], sizes = [1, 16, 16], strides = [1, 1, 1]} : vector<4x16x16xf32> to vector<1x16x16xf32>
    %562 = vector.shape_cast %561 : vector<1x16x16xf32> to vector<16x16xf32>
    %c25 = arith.constant 25 : index
    %563 = memref.load %arg2[%c25] : memref<144xf32, #tpu.memory_space<smem>>
    %564 = vector.broadcast %563 : f32 to vector<16x16xf32>
    %565 = arith.mulf %564, %562 : vector<16x16xf32>
    %566 = arith.addf %548, %565 : vector<16x16xf32>
    %c61 = arith.constant 61 : index
    %567 = memref.load %arg2[%c61] : memref<144xf32, #tpu.memory_space<smem>>
    %568 = vector.broadcast %567 : f32 to vector<16x16xf32>
    %569 = arith.mulf %568, %562 : vector<16x16xf32>
    %570 = arith.addf %552, %569 : vector<16x16xf32>
    %c97 = arith.constant 97 : index
    %571 = memref.load %arg2[%c97] : memref<144xf32, #tpu.memory_space<smem>>
    %572 = vector.broadcast %571 : f32 to vector<16x16xf32>
    %573 = arith.mulf %572, %562 : vector<16x16xf32>
    %574 = arith.addf %556, %573 : vector<16x16xf32>
    %c133 = arith.constant 133 : index
    %575 = memref.load %arg2[%c133] : memref<144xf32, #tpu.memory_space<smem>>
    %576 = vector.broadcast %575 : f32 to vector<16x16xf32>
    %577 = arith.mulf %576, %562 : vector<16x16xf32>
    %578 = arith.addf %560, %577 : vector<16x16xf32>
    %579 = vector.extract_strided_slice %524 {offsets = [3, 0, 0], sizes = [1, 16, 16], strides = [1, 1, 1]} : vector<4x16x16xf32> to vector<1x16x16xf32>
    %580 = vector.shape_cast %579 : vector<1x16x16xf32> to vector<16x16xf32>
    %c34 = arith.constant 34 : index
    %581 = memref.load %arg2[%c34] : memref<144xf32, #tpu.memory_space<smem>>
    %582 = vector.broadcast %581 : f32 to vector<16x16xf32>
    %583 = arith.mulf %582, %580 : vector<16x16xf32>
    %584 = arith.addf %566, %583 : vector<16x16xf32>
    %c70 = arith.constant 70 : index
    %585 = memref.load %arg2[%c70] : memref<144xf32, #tpu.memory_space<smem>>
    %586 = vector.broadcast %585 : f32 to vector<16x16xf32>
    %587 = arith.mulf %586, %580 : vector<16x16xf32>
    %588 = arith.addf %570, %587 : vector<16x16xf32>
    %c106 = arith.constant 106 : index
    %589 = memref.load %arg2[%c106] : memref<144xf32, #tpu.memory_space<smem>>
    %590 = vector.broadcast %589 : f32 to vector<16x16xf32>
    %591 = arith.mulf %590, %580 : vector<16x16xf32>
    %592 = arith.addf %574, %591 : vector<16x16xf32>
    %c142 = arith.constant 142 : index
    %593 = memref.load %arg2[%c142] : memref<144xf32, #tpu.memory_space<smem>>
    %594 = vector.broadcast %593 : f32 to vector<16x16xf32>
    %595 = arith.mulf %594, %580 : vector<16x16xf32>
    %596 = arith.addf %578, %595 : vector<16x16xf32>
    %c0_38 = arith.constant 0 : index
    %c2_39 = arith.constant 2 : index
    %c2_40 = arith.constant 2 : index
    %597 = vector.load %arg8[%c0_38, %c2_39, %c2_40] : memref<4x18x18xf32, #tpu.memory_space<vmem>>, vector<4x16x16xf32>
    %598 = vector.extract_strided_slice %597 {offsets = [0, 0, 0], sizes = [1, 16, 16], strides = [1, 1, 1]} : vector<4x16x16xf32> to vector<1x16x16xf32>
    %599 = vector.shape_cast %598 : vector<1x16x16xf32> to vector<16x16xf32>
    %c8 = arith.constant 8 : index
    %600 = memref.load %arg2[%c8] : memref<144xf32, #tpu.memory_space<smem>>
    %601 = vector.broadcast %600 : f32 to vector<16x16xf32>
    %602 = arith.mulf %601, %599 : vector<16x16xf32>
    %603 = arith.addf %584, %602 : vector<16x16xf32>
    %c44 = arith.constant 44 : index
    %604 = memref.load %arg2[%c44] : memref<144xf32, #tpu.memory_space<smem>>
    %605 = vector.broadcast %604 : f32 to vector<16x16xf32>
    %606 = arith.mulf %605, %599 : vector<16x16xf32>
    %607 = arith.addf %588, %606 : vector<16x16xf32>
    %c80 = arith.constant 80 : index
    %608 = memref.load %arg2[%c80] : memref<144xf32, #tpu.memory_space<smem>>
    %609 = vector.broadcast %608 : f32 to vector<16x16xf32>
    %610 = arith.mulf %609, %599 : vector<16x16xf32>
    %611 = arith.addf %592, %610 : vector<16x16xf32>
    %c116 = arith.constant 116 : index
    %612 = memref.load %arg2[%c116] : memref<144xf32, #tpu.memory_space<smem>>
    %613 = vector.broadcast %612 : f32 to vector<16x16xf32>
    %614 = arith.mulf %613, %599 : vector<16x16xf32>
    %615 = arith.addf %596, %614 : vector<16x16xf32>
    %616 = vector.extract_strided_slice %597 {offsets = [1, 0, 0], sizes = [1, 16, 16], strides = [1, 1, 1]} : vector<4x16x16xf32> to vector<1x16x16xf32>
    %617 = vector.shape_cast %616 : vector<1x16x16xf32> to vector<16x16xf32>
    %c17 = arith.constant 17 : index
    %618 = memref.load %arg2[%c17] : memref<144xf32, #tpu.memory_space<smem>>
    %619 = vector.broadcast %618 : f32 to vector<16x16xf32>
    %620 = arith.mulf %619, %617 : vector<16x16xf32>
    %621 = arith.addf %603, %620 : vector<16x16xf32>
    %c53 = arith.constant 53 : index
    %622 = memref.load %arg2[%c53] : memref<144xf32, #tpu.memory_space<smem>>
    %623 = vector.broadcast %622 : f32 to vector<16x16xf32>
    %624 = arith.mulf %623, %617 : vector<16x16xf32>
    %625 = arith.addf %607, %624 : vector<16x16xf32>
    %c89 = arith.constant 89 : index
    %626 = memref.load %arg2[%c89] : memref<144xf32, #tpu.memory_space<smem>>
    %627 = vector.broadcast %626 : f32 to vector<16x16xf32>
    %628 = arith.mulf %627, %617 : vector<16x16xf32>
    %629 = arith.addf %611, %628 : vector<16x16xf32>
    %c125 = arith.constant 125 : index
    %630 = memref.load %arg2[%c125] : memref<144xf32, #tpu.memory_space<smem>>
    %631 = vector.broadcast %630 : f32 to vector<16x16xf32>
    %632 = arith.mulf %631, %617 : vector<16x16xf32>
    %633 = arith.addf %615, %632 : vector<16x16xf32>
    %634 = vector.extract_strided_slice %597 {offsets = [2, 0, 0], sizes = [1, 16, 16], strides = [1, 1, 1]} : vector<4x16x16xf32> to vector<1x16x16xf32>
    %635 = vector.shape_cast %634 : vector<1x16x16xf32> to vector<16x16xf32>
    %c26 = arith.constant 26 : index
    %636 = memref.load %arg2[%c26] : memref<144xf32, #tpu.memory_space<smem>>
    %637 = vector.broadcast %636 : f32 to vector<16x16xf32>
    %638 = arith.mulf %637, %635 : vector<16x16xf32>
    %639 = arith.addf %621, %638 : vector<16x16xf32>
    %c62 = arith.constant 62 : index
    %640 = memref.load %arg2[%c62] : memref<144xf32, #tpu.memory_space<smem>>
    %641 = vector.broadcast %640 : f32 to vector<16x16xf32>
    %642 = arith.mulf %641, %635 : vector<16x16xf32>
    %643 = arith.addf %625, %642 : vector<16x16xf32>
    %c98 = arith.constant 98 : index
    %644 = memref.load %arg2[%c98] : memref<144xf32, #tpu.memory_space<smem>>
    %645 = vector.broadcast %644 : f32 to vector<16x16xf32>
    %646 = arith.mulf %645, %635 : vector<16x16xf32>
    %647 = arith.addf %629, %646 : vector<16x16xf32>
    %c134 = arith.constant 134 : index
    %648 = memref.load %arg2[%c134] : memref<144xf32, #tpu.memory_space<smem>>
    %649 = vector.broadcast %648 : f32 to vector<16x16xf32>
    %650 = arith.mulf %649, %635 : vector<16x16xf32>
    %651 = arith.addf %633, %650 : vector<16x16xf32>
    %652 = vector.extract_strided_slice %597 {offsets = [3, 0, 0], sizes = [1, 16, 16], strides = [1, 1, 1]} : vector<4x16x16xf32> to vector<1x16x16xf32>
    %653 = vector.shape_cast %652 : vector<1x16x16xf32> to vector<16x16xf32>
    %c35 = arith.constant 35 : index
    %654 = memref.load %arg2[%c35] : memref<144xf32, #tpu.memory_space<smem>>
    %655 = vector.broadcast %654 : f32 to vector<16x16xf32>
    %656 = arith.mulf %655, %653 : vector<16x16xf32>
    %657 = arith.addf %639, %656 : vector<16x16xf32>
    %c71 = arith.constant 71 : index
    %658 = memref.load %arg2[%c71] : memref<144xf32, #tpu.memory_space<smem>>
    %659 = vector.broadcast %658 : f32 to vector<16x16xf32>
    %660 = arith.mulf %659, %653 : vector<16x16xf32>
    %661 = arith.addf %643, %660 : vector<16x16xf32>
    %c107 = arith.constant 107 : index
    %662 = memref.load %arg2[%c107] : memref<144xf32, #tpu.memory_space<smem>>
    %663 = vector.broadcast %662 : f32 to vector<16x16xf32>
    %664 = arith.mulf %663, %653 : vector<16x16xf32>
    %665 = arith.addf %647, %664 : vector<16x16xf32>
    %c143 = arith.constant 143 : index
    %666 = memref.load %arg2[%c143] : memref<144xf32, #tpu.memory_space<smem>>
    %667 = vector.broadcast %666 : f32 to vector<16x16xf32>
    %668 = arith.mulf %667, %653 : vector<16x16xf32>
    %669 = arith.addf %651, %668 : vector<16x16xf32>
    %c0_41 = arith.constant 0 : index
    %670 = memref.load %arg4[%c0_41] : memref<1xf32, #tpu.memory_space<smem>>
    %cst_42 = arith.constant 0.000000e+00 : f32
    %671 = vector.broadcast %cst_42 : f32 to vector<16x16xf32>
    %672 = arith.cmpf ogt, %657, %671 : vector<16x16xf32>
    %673 = vector.broadcast %670 : f32 to vector<16x16xf32>
    %674 = arith.mulf %673, %657 : vector<16x16xf32>
    %675 = arith.select %672, %657, %674 : vector<16x16xi1>, vector<16x16xf32>
    %c0_43 = arith.constant 0 : index
    %c1_44 = arith.constant 1 : index
    %c1_45 = arith.constant 1 : index
    %676 = vector.load %arg8[%c0_43, %c1_44, %c1_45] : memref<4x18x18xf32, #tpu.memory_space<vmem>>, vector<1x16x16xf32>
    %677 = vector.shape_cast %676 : vector<1x16x16xf32> to vector<16x16xf32>
    %678 = vector.shape_cast %675 : vector<16x16xf32> to vector<1x16x16xf32>
    tpu.vector_store %arg8[%c0_43, %c1_44, %c1_45], %678 {strides = array<i32>} : memref<4x18x18xf32, #tpu.memory_space<vmem>>, vector<1x16x16xf32>,
    %cst_46 = arith.constant 0.000000e+00 : f32
    %679 = vector.broadcast %cst_46 : f32 to vector<16x16xf32>
    %680 = arith.cmpf ogt, %661, %679 : vector<16x16xf32>
    %681 = vector.broadcast %670 : f32 to vector<16x16xf32>
    %682 = arith.mulf %681, %661 : vector<16x16xf32>
    %683 = arith.select %680, %661, %682 : vector<16x16xi1>, vector<16x16xf32>
    %c1_47 = arith.constant 1 : index
    %c1_48 = arith.constant 1 : index
    %c1_49 = arith.constant 1 : index
    %684 = vector.load %arg8[%c1_47, %c1_48, %c1_49] : memref<4x18x18xf32, #tpu.memory_space<vmem>>, vector<1x16x16xf32>
    %685 = vector.shape_cast %684 : vector<1x16x16xf32> to vector<16x16xf32>
    %686 = vector.shape_cast %683 : vector<16x16xf32> to vector<1x16x16xf32>
    tpu.vector_store %arg8[%c1_47, %c1_48, %c1_49], %686 {strides = array<i32>} : memref<4x18x18xf32, #tpu.memory_space<vmem>>, vector<1x16x16xf32>,
    %cst_50 = arith.constant 0.000000e+00 : f32
    %687 = vector.broadcast %cst_50 : f32 to vector<16x16xf32>
    %688 = arith.cmpf ogt, %665, %687 : vector<16x16xf32>
    %689 = vector.broadcast %670 : f32 to vector<16x16xf32>
    %690 = arith.mulf %689, %665 : vector<16x16xf32>
    %691 = arith.select %688, %665, %690 : vector<16x16xi1>, vector<16x16xf32>
    %c2_51 = arith.constant 2 : index
    %c1_52 = arith.constant 1 : index
    %c1_53 = arith.constant 1 : index
    %692 = vector.load %arg8[%c2_51, %c1_52, %c1_53] : memref<4x18x18xf32, #tpu.memory_space<vmem>>, vector<1x16x16xf32>
    %693 = vector.shape_cast %692 : vector<1x16x16xf32> to vector<16x16xf32>
    %694 = vector.shape_cast %691 : vector<16x16xf32> to vector<1x16x16xf32>
    tpu.vector_store %arg8[%c2_51, %c1_52, %c1_53], %694 {strides = array<i32>} : memref<4x18x18xf32, #tpu.memory_space<vmem>>, vector<1x16x16xf32>,
    %cst_54 = arith.constant 0.000000e+00 : f32
    %695 = vector.broadcast %cst_54 : f32 to vector<16x16xf32>
    %696 = arith.cmpf ogt, %669, %695 : vector<16x16xf32>
    %697 = vector.broadcast %670 : f32 to vector<16x16xf32>
    %698 = arith.mulf %697, %669 : vector<16x16xf32>
    %699 = arith.select %696, %669, %698 : vector<16x16xi1>, vector<16x16xf32>
    %c3_55 = arith.constant 3 : index
    %c1_56 = arith.constant 1 : index
    %c1_57 = arith.constant 1 : index
    %700 = vector.load %arg8[%c3_55, %c1_56, %c1_57] : memref<4x18x18xf32, #tpu.memory_space<vmem>>, vector<1x16x16xf32>
    %701 = vector.shape_cast %700 : vector<1x16x16xf32> to vector<16x16xf32>
    %702 = vector.shape_cast %699 : vector<16x16xf32> to vector<1x16x16xf32>
    tpu.vector_store %arg8[%c3_55, %c1_56, %c1_57], %702 {strides = array<i32>} : memref<4x18x18xf32, #tpu.memory_space<vmem>>, vector<1x16x16xf32>,
    %c0_58 = arith.constant 0 : index
    %703 = memref.load %arg6[%c0_58] : memref<4xf32, #tpu.memory_space<smem>>
    %704 = vector.broadcast %703 : f32 to vector<16x16xf32>
    %c1_59 = arith.constant 1 : index
    %705 = memref.load %arg6[%c1_59] : memref<4xf32, #tpu.memory_space<smem>>
    %706 = vector.broadcast %705 : f32 to vector<16x16xf32>
    %c2_60 = arith.constant 2 : index
    %707 = memref.load %arg6[%c2_60] : memref<4xf32, #tpu.memory_space<smem>>
    %708 = vector.broadcast %707 : f32 to vector<16x16xf32>
    %c3_61 = arith.constant 3 : index
    %709 = memref.load %arg6[%c3_61] : memref<4xf32, #tpu.memory_space<smem>>
    %710 = vector.broadcast %709 : f32 to vector<16x16xf32>
    %c0_62 = arith.constant 0 : index
    %c0_63 = arith.constant 0 : index
    %c0_64 = arith.constant 0 : index
    %711 = vector.load %arg8[%c0_62, %c0_63, %c0_64] : memref<4x18x18xf32, #tpu.memory_space<vmem>>, vector<4x16x16xf32>
    %712 = vector.extract_strided_slice %711 {offsets = [0, 0, 0], sizes = [1, 16, 16], strides = [1, 1, 1]} : vector<4x16x16xf32> to vector<1x16x16xf32>
    %713 = vector.shape_cast %712 : vector<1x16x16xf32> to vector<16x16xf32>
    %c0_65 = arith.constant 0 : index
    %714 = memref.load %arg5[%c0_65] : memref<144xf32, #tpu.memory_space<smem>>
    %715 = vector.broadcast %714 : f32 to vector<16x16xf32>
    %716 = arith.mulf %715, %713 : vector<16x16xf32>
    %717 = arith.addf %704, %716 : vector<16x16xf32>
    %c36_66 = arith.constant 36 : index
    %718 = memref.load %arg5[%c36_66] : memref<144xf32, #tpu.memory_space<smem>>
    %719 = vector.broadcast %718 : f32 to vector<16x16xf32>
    %720 = arith.mulf %719, %713 : vector<16x16xf32>
    %721 = arith.addf %706, %720 : vector<16x16xf32>
    %c72_67 = arith.constant 72 : index
    %722 = memref.load %arg5[%c72_67] : memref<144xf32, #tpu.memory_space<smem>>
    %723 = vector.broadcast %722 : f32 to vector<16x16xf32>
    %724 = arith.mulf %723, %713 : vector<16x16xf32>
    %725 = arith.addf %708, %724 : vector<16x16xf32>
    %c108_68 = arith.constant 108 : index
    %726 = memref.load %arg5[%c108_68] : memref<144xf32, #tpu.memory_space<smem>>
    %727 = vector.broadcast %726 : f32 to vector<16x16xf32>
    %728 = arith.mulf %727, %713 : vector<16x16xf32>
    %729 = arith.addf %710, %728 : vector<16x16xf32>
    %730 = vector.extract_strided_slice %711 {offsets = [1, 0, 0], sizes = [1, 16, 16], strides = [1, 1, 1]} : vector<4x16x16xf32> to vector<1x16x16xf32>
    %731 = vector.shape_cast %730 : vector<1x16x16xf32> to vector<16x16xf32>
    %c9_69 = arith.constant 9 : index
    %732 = memref.load %arg5[%c9_69] : memref<144xf32, #tpu.memory_space<smem>>
    %733 = vector.broadcast %732 : f32 to vector<16x16xf32>
    %734 = arith.mulf %733, %731 : vector<16x16xf32>
    %735 = arith.addf %717, %734 : vector<16x16xf32>
    %c45_70 = arith.constant 45 : index
    %736 = memref.load %arg5[%c45_70] : memref<144xf32, #tpu.memory_space<smem>>
    %737 = vector.broadcast %736 : f32 to vector<16x16xf32>
    %738 = arith.mulf %737, %731 : vector<16x16xf32>
    %739 = arith.addf %721, %738 : vector<16x16xf32>
    %c81_71 = arith.constant 81 : index
    %740 = memref.load %arg5[%c81_71] : memref<144xf32, #tpu.memory_space<smem>>
    %741 = vector.broadcast %740 : f32 to vector<16x16xf32>
    %742 = arith.mulf %741, %731 : vector<16x16xf32>
    %743 = arith.addf %725, %742 : vector<16x16xf32>
    %c117_72 = arith.constant 117 : index
    %744 = memref.load %arg5[%c117_72] : memref<144xf32, #tpu.memory_space<smem>>
    %745 = vector.broadcast %744 : f32 to vector<16x16xf32>
    %746 = arith.mulf %745, %731 : vector<16x16xf32>
    %747 = arith.addf %729, %746 : vector<16x16xf32>
    %748 = vector.extract_strided_slice %711 {offsets = [2, 0, 0], sizes = [1, 16, 16], strides = [1, 1, 1]} : vector<4x16x16xf32> to vector<1x16x16xf32>
    %749 = vector.shape_cast %748 : vector<1x16x16xf32> to vector<16x16xf32>
    %c18_73 = arith.constant 18 : index
    %750 = memref.load %arg5[%c18_73] : memref<144xf32, #tpu.memory_space<smem>>
    %751 = vector.broadcast %750 : f32 to vector<16x16xf32>
    %752 = arith.mulf %751, %749 : vector<16x16xf32>
    %753 = arith.addf %735, %752 : vector<16x16xf32>
    %c54_74 = arith.constant 54 : index
    %754 = memref.load %arg5[%c54_74] : memref<144xf32, #tpu.memory_space<smem>>
    %755 = vector.broadcast %754 : f32 to vector<16x16xf32>
    %756 = arith.mulf %755, %749 : vector<16x16xf32>
    %757 = arith.addf %739, %756 : vector<16x16xf32>
    %c90_75 = arith.constant 90 : index
    %758 = memref.load %arg5[%c90_75] : memref<144xf32, #tpu.memory_space<smem>>
    %759 = vector.broadcast %758 : f32 to vector<16x16xf32>
    %760 = arith.mulf %759, %749 : vector<16x16xf32>
    %761 = arith.addf %743, %760 : vector<16x16xf32>
    %c126_76 = arith.constant 126 : index
    %762 = memref.load %arg5[%c126_76] : memref<144xf32, #tpu.memory_space<smem>>
    %763 = vector.broadcast %762 : f32 to vector<16x16xf32>
    %764 = arith.mulf %763, %749 : vector<16x16xf32>
    %765 = arith.addf %747, %764 : vector<16x16xf32>
    %766 = vector.extract_strided_slice %711 {offsets = [3, 0, 0], sizes = [1, 16, 16], strides = [1, 1, 1]} : vector<4x16x16xf32> to vector<1x16x16xf32>
    %767 = vector.shape_cast %766 : vector<1x16x16xf32> to vector<16x16xf32>
    %c27_77 = arith.constant 27 : index
    %768 = memref.load %arg5[%c27_77] : memref<144xf32, #tpu.memory_space<smem>>
    %769 = vector.broadcast %768 : f32 to vector<16x16xf32>
    %770 = arith.mulf %769, %767 : vector<16x16xf32>
    %771 = arith.addf %753, %770 : vector<16x16xf32>
    %c63_78 = arith.constant 63 : index
    %772 = memref.load %arg5[%c63_78] : memref<144xf32, #tpu.memory_space<smem>>
    %773 = vector.broadcast %772 : f32 to vector<16x16xf32>
    %774 = arith.mulf %773, %767 : vector<16x16xf32>
    %775 = arith.addf %757, %774 : vector<16x16xf32>
    %c99_79 = arith.constant 99 : index
    %776 = memref.load %arg5[%c99_79] : memref<144xf32, #tpu.memory_space<smem>>
    %777 = vector.broadcast %776 : f32 to vector<16x16xf32>
    %778 = arith.mulf %777, %767 : vector<16x16xf32>
    %779 = arith.addf %761, %778 : vector<16x16xf32>
    %c135_80 = arith.constant 135 : index
    %780 = memref.load %arg5[%c135_80] : memref<144xf32, #tpu.memory_space<smem>>
    %781 = vector.broadcast %780 : f32 to vector<16x16xf32>
    %782 = arith.mulf %781, %767 : vector<16x16xf32>
    %783 = arith.addf %765, %782 : vector<16x16xf32>
    %c0_81 = arith.constant 0 : index
    %c0_82 = arith.constant 0 : index
    %c1_83 = arith.constant 1 : index
    %784 = vector.load %arg8[%c0_81, %c0_82, %c1_83] : memref<4x18x18xf32, #tpu.memory_space<vmem>>, vector<4x16x16xf32>
    %785 = vector.extract_strided_slice %784 {offsets = [0, 0, 0], sizes = [1, 16, 16], strides = [1, 1, 1]} : vector<4x16x16xf32> to vector<1x16x16xf32>
    %786 = vector.shape_cast %785 : vector<1x16x16xf32> to vector<16x16xf32>
    %c1_84 = arith.constant 1 : index
    %787 = memref.load %arg5[%c1_84] : memref<144xf32, #tpu.memory_space<smem>>
    %788 = vector.broadcast %787 : f32 to vector<16x16xf32>
    %789 = arith.mulf %788, %786 : vector<16x16xf32>
    %790 = arith.addf %771, %789 : vector<16x16xf32>
    %c37_85 = arith.constant 37 : index
    %791 = memref.load %arg5[%c37_85] : memref<144xf32, #tpu.memory_space<smem>>
    %792 = vector.broadcast %791 : f32 to vector<16x16xf32>
    %793 = arith.mulf %792, %786 : vector<16x16xf32>
    %794 = arith.addf %775, %793 : vector<16x16xf32>
    %c73_86 = arith.constant 73 : index
    %795 = memref.load %arg5[%c73_86] : memref<144xf32, #tpu.memory_space<smem>>
    %796 = vector.broadcast %795 : f32 to vector<16x16xf32>
    %797 = arith.mulf %796, %786 : vector<16x16xf32>
    %798 = arith.addf %779, %797 : vector<16x16xf32>
    %c109_87 = arith.constant 109 : index
    %799 = memref.load %arg5[%c109_87] : memref<144xf32, #tpu.memory_space<smem>>
    %800 = vector.broadcast %799 : f32 to vector<16x16xf32>
    %801 = arith.mulf %800, %786 : vector<16x16xf32>
    %802 = arith.addf %783, %801 : vector<16x16xf32>
    %803 = vector.extract_strided_slice %784 {offsets = [1, 0, 0], sizes = [1, 16, 16], strides = [1, 1, 1]} : vector<4x16x16xf32> to vector<1x16x16xf32>
    %804 = vector.shape_cast %803 : vector<1x16x16xf32> to vector<16x16xf32>
    %c10_88 = arith.constant 10 : index
    %805 = memref.load %arg5[%c10_88] : memref<144xf32, #tpu.memory_space<smem>>
    %806 = vector.broadcast %805 : f32 to vector<16x16xf32>
    %807 = arith.mulf %806, %804 : vector<16x16xf32>
    %808 = arith.addf %790, %807 : vector<16x16xf32>
    %c46_89 = arith.constant 46 : index
    %809 = memref.load %arg5[%c46_89] : memref<144xf32, #tpu.memory_space<smem>>
    %810 = vector.broadcast %809 : f32 to vector<16x16xf32>
    %811 = arith.mulf %810, %804 : vector<16x16xf32>
    %812 = arith.addf %794, %811 : vector<16x16xf32>
    %c82_90 = arith.constant 82 : index
    %813 = memref.load %arg5[%c82_90] : memref<144xf32, #tpu.memory_space<smem>>
    %814 = vector.broadcast %813 : f32 to vector<16x16xf32>
    %815 = arith.mulf %814, %804 : vector<16x16xf32>
    %816 = arith.addf %798, %815 : vector<16x16xf32>
    %c118_91 = arith.constant 118 : index
    %817 = memref.load %arg5[%c118_91] : memref<144xf32, #tpu.memory_space<smem>>
    %818 = vector.broadcast %817 : f32 to vector<16x16xf32>
    %819 = arith.mulf %818, %804 : vector<16x16xf32>
    %820 = arith.addf %802, %819 : vector<16x16xf32>
    %821 = vector.extract_strided_slice %784 {offsets = [2, 0, 0], sizes = [1, 16, 16], strides = [1, 1, 1]} : vector<4x16x16xf32> to vector<1x16x16xf32>
    %822 = vector.shape_cast %821 : vector<1x16x16xf32> to vector<16x16xf32>
    %c19_92 = arith.constant 19 : index
    %823 = memref.load %arg5[%c19_92] : memref<144xf32, #tpu.memory_space<smem>>
    %824 = vector.broadcast %823 : f32 to vector<16x16xf32>
    %825 = arith.mulf %824, %822 : vector<16x16xf32>
    %826 = arith.addf %808, %825 : vector<16x16xf32>
    %c55_93 = arith.constant 55 : index
    %827 = memref.load %arg5[%c55_93] : memref<144xf32, #tpu.memory_space<smem>>
    %828 = vector.broadcast %827 : f32 to vector<16x16xf32>
    %829 = arith.mulf %828, %822 : vector<16x16xf32>
    %830 = arith.addf %812, %829 : vector<16x16xf32>
    %c91_94 = arith.constant 91 : index
    %831 = memref.load %arg5[%c91_94] : memref<144xf32, #tpu.memory_space<smem>>
    %832 = vector.broadcast %831 : f32 to vector<16x16xf32>
    %833 = arith.mulf %832, %822 : vector<16x16xf32>
    %834 = arith.addf %816, %833 : vector<16x16xf32>
    %c127_95 = arith.constant 127 : index
    %835 = memref.load %arg5[%c127_95] : memref<144xf32, #tpu.memory_space<smem>>
    %836 = vector.broadcast %835 : f32 to vector<16x16xf32>
    %837 = arith.mulf %836, %822 : vector<16x16xf32>
    %838 = arith.addf %820, %837 : vector<16x16xf32>
    %839 = vector.extract_strided_slice %784 {offsets = [3, 0, 0], sizes = [1, 16, 16], strides = [1, 1, 1]} : vector<4x16x16xf32> to vector<1x16x16xf32>
    %840 = vector.shape_cast %839 : vector<1x16x16xf32> to vector<16x16xf32>
    %c28_96 = arith.constant 28 : index
    %841 = memref.load %arg5[%c28_96] : memref<144xf32, #tpu.memory_space<smem>>
    %842 = vector.broadcast %841 : f32 to vector<16x16xf32>
    %843 = arith.mulf %842, %840 : vector<16x16xf32>
    %844 = arith.addf %826, %843 : vector<16x16xf32>
    %c64_97 = arith.constant 64 : index
    %845 = memref.load %arg5[%c64_97] : memref<144xf32, #tpu.memory_space<smem>>
    %846 = vector.broadcast %845 : f32 to vector<16x16xf32>
    %847 = arith.mulf %846, %840 : vector<16x16xf32>
    %848 = arith.addf %830, %847 : vector<16x16xf32>
    %c100_98 = arith.constant 100 : index
    %849 = memref.load %arg5[%c100_98] : memref<144xf32, #tpu.memory_space<smem>>
    %850 = vector.broadcast %849 : f32 to vector<16x16xf32>
    %851 = arith.mulf %850, %840 : vector<16x16xf32>
    %852 = arith.addf %834, %851 : vector<16x16xf32>
    %c136_99 = arith.constant 136 : index
    %853 = memref.load %arg5[%c136_99] : memref<144xf32, #tpu.memory_space<smem>>
    %854 = vector.broadcast %853 : f32 to vector<16x16xf32>
    %855 = arith.mulf %854, %840 : vector<16x16xf32>
    %856 = arith.addf %838, %855 : vector<16x16xf32>
    %c0_100 = arith.constant 0 : index
    %c0_101 = arith.constant 0 : index
    %c2_102 = arith.constant 2 : index
    %857 = vector.load %arg8[%c0_100, %c0_101, %c2_102] : memref<4x18x18xf32, #tpu.memory_space<vmem>>, vector<4x16x16xf32>
    %858 = vector.extract_strided_slice %857 {offsets = [0, 0, 0], sizes = [1, 16, 16], strides = [1, 1, 1]} : vector<4x16x16xf32> to vector<1x16x16xf32>
    %859 = vector.shape_cast %858 : vector<1x16x16xf32> to vector<16x16xf32>
    %c2_103 = arith.constant 2 : index
    %860 = memref.load %arg5[%c2_103] : memref<144xf32, #tpu.memory_space<smem>>
    %861 = vector.broadcast %860 : f32 to vector<16x16xf32>
    %862 = arith.mulf %861, %859 : vector<16x16xf32>
    %863 = arith.addf %844, %862 : vector<16x16xf32>
    %c38_104 = arith.constant 38 : index
    %864 = memref.load %arg5[%c38_104] : memref<144xf32, #tpu.memory_space<smem>>
    %865 = vector.broadcast %864 : f32 to vector<16x16xf32>
    %866 = arith.mulf %865, %859 : vector<16x16xf32>
    %867 = arith.addf %848, %866 : vector<16x16xf32>
    %c74_105 = arith.constant 74 : index
    %868 = memref.load %arg5[%c74_105] : memref<144xf32, #tpu.memory_space<smem>>
    %869 = vector.broadcast %868 : f32 to vector<16x16xf32>
    %870 = arith.mulf %869, %859 : vector<16x16xf32>
    %871 = arith.addf %852, %870 : vector<16x16xf32>
    %c110_106 = arith.constant 110 : index
    %872 = memref.load %arg5[%c110_106] : memref<144xf32, #tpu.memory_space<smem>>
    %873 = vector.broadcast %872 : f32 to vector<16x16xf32>
    %874 = arith.mulf %873, %859 : vector<16x16xf32>
    %875 = arith.addf %856, %874 : vector<16x16xf32>
    %876 = vector.extract_strided_slice %857 {offsets = [1, 0, 0], sizes = [1, 16, 16], strides = [1, 1, 1]} : vector<4x16x16xf32> to vector<1x16x16xf32>
    %877 = vector.shape_cast %876 : vector<1x16x16xf32> to vector<16x16xf32>
    %c11_107 = arith.constant 11 : index
    %878 = memref.load %arg5[%c11_107] : memref<144xf32, #tpu.memory_space<smem>>
    %879 = vector.broadcast %878 : f32 to vector<16x16xf32>
    %880 = arith.mulf %879, %877 : vector<16x16xf32>
    %881 = arith.addf %863, %880 : vector<16x16xf32>
    %c47_108 = arith.constant 47 : index
    %882 = memref.load %arg5[%c47_108] : memref<144xf32, #tpu.memory_space<smem>>
    %883 = vector.broadcast %882 : f32 to vector<16x16xf32>
    %884 = arith.mulf %883, %877 : vector<16x16xf32>
    %885 = arith.addf %867, %884 : vector<16x16xf32>
    %c83_109 = arith.constant 83 : index
    %886 = memref.load %arg5[%c83_109] : memref<144xf32, #tpu.memory_space<smem>>
    %887 = vector.broadcast %886 : f32 to vector<16x16xf32>
    %888 = arith.mulf %887, %877 : vector<16x16xf32>
    %889 = arith.addf %871, %888 : vector<16x16xf32>
    %c119_110 = arith.constant 119 : index
    %890 = memref.load %arg5[%c119_110] : memref<144xf32, #tpu.memory_space<smem>>
    %891 = vector.broadcast %890 : f32 to vector<16x16xf32>
    %892 = arith.mulf %891, %877 : vector<16x16xf32>
    %893 = arith.addf %875, %892 : vector<16x16xf32>
    %894 = vector.extract_strided_slice %857 {offsets = [2, 0, 0], sizes = [1, 16, 16], strides = [1, 1, 1]} : vector<4x16x16xf32> to vector<1x16x16xf32>
    %895 = vector.shape_cast %894 : vector<1x16x16xf32> to vector<16x16xf32>
    %c20_111 = arith.constant 20 : index
    %896 = memref.load %arg5[%c20_111] : memref<144xf32, #tpu.memory_space<smem>>
    %897 = vector.broadcast %896 : f32 to vector<16x16xf32>
    %898 = arith.mulf %897, %895 : vector<16x16xf32>
    %899 = arith.addf %881, %898 : vector<16x16xf32>
    %c56_112 = arith.constant 56 : index
    %900 = memref.load %arg5[%c56_112] : memref<144xf32, #tpu.memory_space<smem>>
    %901 = vector.broadcast %900 : f32 to vector<16x16xf32>
    %902 = arith.mulf %901, %895 : vector<16x16xf32>
    %903 = arith.addf %885, %902 : vector<16x16xf32>
    %c92_113 = arith.constant 92 : index
    %904 = memref.load %arg5[%c92_113] : memref<144xf32, #tpu.memory_space<smem>>
    %905 = vector.broadcast %904 : f32 to vector<16x16xf32>
    %906 = arith.mulf %905, %895 : vector<16x16xf32>
    %907 = arith.addf %889, %906 : vector<16x16xf32>
    %c128_114 = arith.constant 128 : index
    %908 = memref.load %arg5[%c128_114] : memref<144xf32, #tpu.memory_space<smem>>
    %909 = vector.broadcast %908 : f32 to vector<16x16xf32>
    %910 = arith.mulf %909, %895 : vector<16x16xf32>
    %911 = arith.addf %893, %910 : vector<16x16xf32>
    %912 = vector.extract_strided_slice %857 {offsets = [3, 0, 0], sizes = [1, 16, 16], strides = [1, 1, 1]} : vector<4x16x16xf32> to vector<1x16x16xf32>
    %913 = vector.shape_cast %912 : vector<1x16x16xf32> to vector<16x16xf32>
    %c29_115 = arith.constant 29 : index
    %914 = memref.load %arg5[%c29_115] : memref<144xf32, #tpu.memory_space<smem>>
    %915 = vector.broadcast %914 : f32 to vector<16x16xf32>
    %916 = arith.mulf %915, %913 : vector<16x16xf32>
    %917 = arith.addf %899, %916 : vector<16x16xf32>
    %c65_116 = arith.constant 65 : index
    %918 = memref.load %arg5[%c65_116] : memref<144xf32, #tpu.memory_space<smem>>
    %919 = vector.broadcast %918 : f32 to vector<16x16xf32>
    %920 = arith.mulf %919, %913 : vector<16x16xf32>
    %921 = arith.addf %903, %920 : vector<16x16xf32>
    %c101_117 = arith.constant 101 : index
    %922 = memref.load %arg5[%c101_117] : memref<144xf32, #tpu.memory_space<smem>>
    %923 = vector.broadcast %922 : f32 to vector<16x16xf32>
    %924 = arith.mulf %923, %913 : vector<16x16xf32>
    %925 = arith.addf %907, %924 : vector<16x16xf32>
    %c137_118 = arith.constant 137 : index
    %926 = memref.load %arg5[%c137_118] : memref<144xf32, #tpu.memory_space<smem>>
    %927 = vector.broadcast %926 : f32 to vector<16x16xf32>
    %928 = arith.mulf %927, %913 : vector<16x16xf32>
    %929 = arith.addf %911, %928 : vector<16x16xf32>
    %c0_119 = arith.constant 0 : index
    %c1_120 = arith.constant 1 : index
    %c0_121 = arith.constant 0 : index
    %930 = vector.load %arg8[%c0_119, %c1_120, %c0_121] : memref<4x18x18xf32, #tpu.memory_space<vmem>>, vector<4x16x16xf32>
    %931 = vector.extract_strided_slice %930 {offsets = [0, 0, 0], sizes = [1, 16, 16], strides = [1, 1, 1]} : vector<4x16x16xf32> to vector<1x16x16xf32>
    %932 = vector.shape_cast %931 : vector<1x16x16xf32> to vector<16x16xf32>
    %c3_122 = arith.constant 3 : index
    %933 = memref.load %arg5[%c3_122] : memref<144xf32, #tpu.memory_space<smem>>
    %934 = vector.broadcast %933 : f32 to vector<16x16xf32>
    %935 = arith.mulf %934, %932 : vector<16x16xf32>
    %936 = arith.addf %917, %935 : vector<16x16xf32>
    %c39_123 = arith.constant 39 : index
    %937 = memref.load %arg5[%c39_123] : memref<144xf32, #tpu.memory_space<smem>>
    %938 = vector.broadcast %937 : f32 to vector<16x16xf32>
    %939 = arith.mulf %938, %932 : vector<16x16xf32>
    %940 = arith.addf %921, %939 : vector<16x16xf32>
    %c75_124 = arith.constant 75 : index
    %941 = memref.load %arg5[%c75_124] : memref<144xf32, #tpu.memory_space<smem>>
    %942 = vector.broadcast %941 : f32 to vector<16x16xf32>
    %943 = arith.mulf %942, %932 : vector<16x16xf32>
    %944 = arith.addf %925, %943 : vector<16x16xf32>
    %c111_125 = arith.constant 111 : index
    %945 = memref.load %arg5[%c111_125] : memref<144xf32, #tpu.memory_space<smem>>
    %946 = vector.broadcast %945 : f32 to vector<16x16xf32>
    %947 = arith.mulf %946, %932 : vector<16x16xf32>
    %948 = arith.addf %929, %947 : vector<16x16xf32>
    %949 = vector.extract_strided_slice %930 {offsets = [1, 0, 0], sizes = [1, 16, 16], strides = [1, 1, 1]} : vector<4x16x16xf32> to vector<1x16x16xf32>
    %950 = vector.shape_cast %949 : vector<1x16x16xf32> to vector<16x16xf32>
    %c12_126 = arith.constant 12 : index
    %951 = memref.load %arg5[%c12_126] : memref<144xf32, #tpu.memory_space<smem>>
    %952 = vector.broadcast %951 : f32 to vector<16x16xf32>
    %953 = arith.mulf %952, %950 : vector<16x16xf32>
    %954 = arith.addf %936, %953 : vector<16x16xf32>
    %c48_127 = arith.constant 48 : index
    %955 = memref.load %arg5[%c48_127] : memref<144xf32, #tpu.memory_space<smem>>
    %956 = vector.broadcast %955 : f32 to vector<16x16xf32>
    %957 = arith.mulf %956, %950 : vector<16x16xf32>
    %958 = arith.addf %940, %957 : vector<16x16xf32>
    %c84_128 = arith.constant 84 : index
    %959 = memref.load %arg5[%c84_128] : memref<144xf32, #tpu.memory_space<smem>>
    %960 = vector.broadcast %959 : f32 to vector<16x16xf32>
    %961 = arith.mulf %960, %950 : vector<16x16xf32>
    %962 = arith.addf %944, %961 : vector<16x16xf32>
    %c120_129 = arith.constant 120 : index
    %963 = memref.load %arg5[%c120_129] : memref<144xf32, #tpu.memory_space<smem>>
    %964 = vector.broadcast %963 : f32 to vector<16x16xf32>
    %965 = arith.mulf %964, %950 : vector<16x16xf32>
    %966 = arith.addf %948, %965 : vector<16x16xf32>
    %967 = vector.extract_strided_slice %930 {offsets = [2, 0, 0], sizes = [1, 16, 16], strides = [1, 1, 1]} : vector<4x16x16xf32> to vector<1x16x16xf32>
    %968 = vector.shape_cast %967 : vector<1x16x16xf32> to vector<16x16xf32>
    %c21_130 = arith.constant 21 : index
    %969 = memref.load %arg5[%c21_130] : memref<144xf32, #tpu.memory_space<smem>>
    %970 = vector.broadcast %969 : f32 to vector<16x16xf32>
    %971 = arith.mulf %970, %968 : vector<16x16xf32>
    %972 = arith.addf %954, %971 : vector<16x16xf32>
    %c57_131 = arith.constant 57 : index
    %973 = memref.load %arg5[%c57_131] : memref<144xf32, #tpu.memory_space<smem>>
    %974 = vector.broadcast %973 : f32 to vector<16x16xf32>
    %975 = arith.mulf %974, %968 : vector<16x16xf32>
    %976 = arith.addf %958, %975 : vector<16x16xf32>
    %c93_132 = arith.constant 93 : index
    %977 = memref.load %arg5[%c93_132] : memref<144xf32, #tpu.memory_space<smem>>
    %978 = vector.broadcast %977 : f32 to vector<16x16xf32>
    %979 = arith.mulf %978, %968 : vector<16x16xf32>
    %980 = arith.addf %962, %979 : vector<16x16xf32>
    %c129_133 = arith.constant 129 : index
    %981 = memref.load %arg5[%c129_133] : memref<144xf32, #tpu.memory_space<smem>>
    %982 = vector.broadcast %981 : f32 to vector<16x16xf32>
    %983 = arith.mulf %982, %968 : vector<16x16xf32>
    %984 = arith.addf %966, %983 : vector<16x16xf32>
    %985 = vector.extract_strided_slice %930 {offsets = [3, 0, 0], sizes = [1, 16, 16], strides = [1, 1, 1]} : vector<4x16x16xf32> to vector<1x16x16xf32>
    %986 = vector.shape_cast %985 : vector<1x16x16xf32> to vector<16x16xf32>
    %c30_134 = arith.constant 30 : index
    %987 = memref.load %arg5[%c30_134] : memref<144xf32, #tpu.memory_space<smem>>
    %988 = vector.broadcast %987 : f32 to vector<16x16xf32>
    %989 = arith.mulf %988, %986 : vector<16x16xf32>
    %990 = arith.addf %972, %989 : vector<16x16xf32>
    %c66_135 = arith.constant 66 : index
    %991 = memref.load %arg5[%c66_135] : memref<144xf32, #tpu.memory_space<smem>>
    %992 = vector.broadcast %991 : f32 to vector<16x16xf32>
    %993 = arith.mulf %992, %986 : vector<16x16xf32>
    %994 = arith.addf %976, %993 : vector<16x16xf32>
    %c102_136 = arith.constant 102 : index
    %995 = memref.load %arg5[%c102_136] : memref<144xf32, #tpu.memory_space<smem>>
    %996 = vector.broadcast %995 : f32 to vector<16x16xf32>
    %997 = arith.mulf %996, %986 : vector<16x16xf32>
    %998 = arith.addf %980, %997 : vector<16x16xf32>
    %c138_137 = arith.constant 138 : index
    %999 = memref.load %arg5[%c138_137] : memref<144xf32, #tpu.memory_space<smem>>
    %1000 = vector.broadcast %999 : f32 to vector<16x16xf32>
    %1001 = arith.mulf %1000, %986 : vector<16x16xf32>
    %1002 = arith.addf %984, %1001 : vector<16x16xf32>
    %c0_138 = arith.constant 0 : index
    %c1_139 = arith.constant 1 : index
    %c1_140 = arith.constant 1 : index
    %1003 = vector.load %arg8[%c0_138, %c1_139, %c1_140] : memref<4x18x18xf32, #tpu.memory_space<vmem>>, vector<4x16x16xf32>
    %1004 = vector.extract_strided_slice %1003 {offsets = [0, 0, 0], sizes = [1, 16, 16], strides = [1, 1, 1]} : vector<4x16x16xf32> to vector<1x16x16xf32>
    %1005 = vector.shape_cast %1004 : vector<1x16x16xf32> to vector<16x16xf32>
    %c4_141 = arith.constant 4 : index
    %1006 = memref.load %arg5[%c4_141] : memref<144xf32, #tpu.memory_space<smem>>
    %1007 = vector.broadcast %1006 : f32 to vector<16x16xf32>
    %1008 = arith.mulf %1007, %1005 : vector<16x16xf32>
    %1009 = arith.addf %990, %1008 : vector<16x16xf32>
    %c40_142 = arith.constant 40 : index
    %1010 = memref.load %arg5[%c40_142] : memref<144xf32, #tpu.memory_space<smem>>
    %1011 = vector.broadcast %1010 : f32 to vector<16x16xf32>
    %1012 = arith.mulf %1011, %1005 : vector<16x16xf32>
    %1013 = arith.addf %994, %1012 : vector<16x16xf32>
    %c76_143 = arith.constant 76 : index
    %1014 = memref.load %arg5[%c76_143] : memref<144xf32, #tpu.memory_space<smem>>
    %1015 = vector.broadcast %1014 : f32 to vector<16x16xf32>
    %1016 = arith.mulf %1015, %1005 : vector<16x16xf32>
    %1017 = arith.addf %998, %1016 : vector<16x16xf32>
    %c112_144 = arith.constant 112 : index
    %1018 = memref.load %arg5[%c112_144] : memref<144xf32, #tpu.memory_space<smem>>
    %1019 = vector.broadcast %1018 : f32 to vector<16x16xf32>
    %1020 = arith.mulf %1019, %1005 : vector<16x16xf32>
    %1021 = arith.addf %1002, %1020 : vector<16x16xf32>
    %1022 = vector.extract_strided_slice %1003 {offsets = [1, 0, 0], sizes = [1, 16, 16], strides = [1, 1, 1]} : vector<4x16x16xf32> to vector<1x16x16xf32>
    %1023 = vector.shape_cast %1022 : vector<1x16x16xf32> to vector<16x16xf32>
    %c13_145 = arith.constant 13 : index
    %1024 = memref.load %arg5[%c13_145] : memref<144xf32, #tpu.memory_space<smem>>
    %1025 = vector.broadcast %1024 : f32 to vector<16x16xf32>
    %1026 = arith.mulf %1025, %1023 : vector<16x16xf32>
    %1027 = arith.addf %1009, %1026 : vector<16x16xf32>
    %c49_146 = arith.constant 49 : index
    %1028 = memref.load %arg5[%c49_146] : memref<144xf32, #tpu.memory_space<smem>>
    %1029 = vector.broadcast %1028 : f32 to vector<16x16xf32>
    %1030 = arith.mulf %1029, %1023 : vector<16x16xf32>
    %1031 = arith.addf %1013, %1030 : vector<16x16xf32>
    %c85_147 = arith.constant 85 : index
    %1032 = memref.load %arg5[%c85_147] : memref<144xf32, #tpu.memory_space<smem>>
    %1033 = vector.broadcast %1032 : f32 to vector<16x16xf32>
    %1034 = arith.mulf %1033, %1023 : vector<16x16xf32>
    %1035 = arith.addf %1017, %1034 : vector<16x16xf32>
    %c121_148 = arith.constant 121 : index
    %1036 = memref.load %arg5[%c121_148] : memref<144xf32, #tpu.memory_space<smem>>
    %1037 = vector.broadcast %1036 : f32 to vector<16x16xf32>
    %1038 = arith.mulf %1037, %1023 : vector<16x16xf32>
    %1039 = arith.addf %1021, %1038 : vector<16x16xf32>
    %1040 = vector.extract_strided_slice %1003 {offsets = [2, 0, 0], sizes = [1, 16, 16], strides = [1, 1, 1]} : vector<4x16x16xf32> to vector<1x16x16xf32>
    %1041 = vector.shape_cast %1040 : vector<1x16x16xf32> to vector<16x16xf32>
    %c22_149 = arith.constant 22 : index
    %1042 = memref.load %arg5[%c22_149] : memref<144xf32, #tpu.memory_space<smem>>
    %1043 = vector.broadcast %1042 : f32 to vector<16x16xf32>
    %1044 = arith.mulf %1043, %1041 : vector<16x16xf32>
    %1045 = arith.addf %1027, %1044 : vector<16x16xf32>
    %c58_150 = arith.constant 58 : index
    %1046 = memref.load %arg5[%c58_150] : memref<144xf32, #tpu.memory_space<smem>>
    %1047 = vector.broadcast %1046 : f32 to vector<16x16xf32>
    %1048 = arith.mulf %1047, %1041 : vector<16x16xf32>
    %1049 = arith.addf %1031, %1048 : vector<16x16xf32>
    %c94_151 = arith.constant 94 : index
    %1050 = memref.load %arg5[%c94_151] : memref<144xf32, #tpu.memory_space<smem>>
    %1051 = vector.broadcast %1050 : f32 to vector<16x16xf32>
    %1052 = arith.mulf %1051, %1041 : vector<16x16xf32>
    %1053 = arith.addf %1035, %1052 : vector<16x16xf32>
    %c130_152 = arith.constant 130 : index
    %1054 = memref.load %arg5[%c130_152] : memref<144xf32, #tpu.memory_space<smem>>
    %1055 = vector.broadcast %1054 : f32 to vector<16x16xf32>
    %1056 = arith.mulf %1055, %1041 : vector<16x16xf32>
    %1057 = arith.addf %1039, %1056 : vector<16x16xf32>
    %1058 = vector.extract_strided_slice %1003 {offsets = [3, 0, 0], sizes = [1, 16, 16], strides = [1, 1, 1]} : vector<4x16x16xf32> to vector<1x16x16xf32>
    %1059 = vector.shape_cast %1058 : vector<1x16x16xf32> to vector<16x16xf32>
    %c31_153 = arith.constant 31 : index
    %1060 = memref.load %arg5[%c31_153] : memref<144xf32, #tpu.memory_space<smem>>
    %1061 = vector.broadcast %1060 : f32 to vector<16x16xf32>
    %1062 = arith.mulf %1061, %1059 : vector<16x16xf32>
    %1063 = arith.addf %1045, %1062 : vector<16x16xf32>
    %c67_154 = arith.constant 67 : index
    %1064 = memref.load %arg5[%c67_154] : memref<144xf32, #tpu.memory_space<smem>>
    %1065 = vector.broadcast %1064 : f32 to vector<16x16xf32>
    %1066 = arith.mulf %1065, %1059 : vector<16x16xf32>
    %1067 = arith.addf %1049, %1066 : vector<16x16xf32>
    %c103_155 = arith.constant 103 : index
    %1068 = memref.load %arg5[%c103_155] : memref<144xf32, #tpu.memory_space<smem>>
    %1069 = vector.broadcast %1068 : f32 to vector<16x16xf32>
    %1070 = arith.mulf %1069, %1059 : vector<16x16xf32>
    %1071 = arith.addf %1053, %1070 : vector<16x16xf32>
    %c139_156 = arith.constant 139 : index
    %1072 = memref.load %arg5[%c139_156] : memref<144xf32, #tpu.memory_space<smem>>
    %1073 = vector.broadcast %1072 : f32 to vector<16x16xf32>
    %1074 = arith.mulf %1073, %1059 : vector<16x16xf32>
    %1075 = arith.addf %1057, %1074 : vector<16x16xf32>
    %c0_157 = arith.constant 0 : index
    %c1_158 = arith.constant 1 : index
    %c2_159 = arith.constant 2 : index
    %1076 = vector.load %arg8[%c0_157, %c1_158, %c2_159] : memref<4x18x18xf32, #tpu.memory_space<vmem>>, vector<4x16x16xf32>
    %1077 = vector.extract_strided_slice %1076 {offsets = [0, 0, 0], sizes = [1, 16, 16], strides = [1, 1, 1]} : vector<4x16x16xf32> to vector<1x16x16xf32>
    %1078 = vector.shape_cast %1077 : vector<1x16x16xf32> to vector<16x16xf32>
    %c5_160 = arith.constant 5 : index
    %1079 = memref.load %arg5[%c5_160] : memref<144xf32, #tpu.memory_space<smem>>
    %1080 = vector.broadcast %1079 : f32 to vector<16x16xf32>
    %1081 = arith.mulf %1080, %1078 : vector<16x16xf32>
    %1082 = arith.addf %1063, %1081 : vector<16x16xf32>
    %c41_161 = arith.constant 41 : index
    %1083 = memref.load %arg5[%c41_161] : memref<144xf32, #tpu.memory_space<smem>>
    %1084 = vector.broadcast %1083 : f32 to vector<16x16xf32>
    %1085 = arith.mulf %1084, %1078 : vector<16x16xf32>
    %1086 = arith.addf %1067, %1085 : vector<16x16xf32>
    %c77_162 = arith.constant 77 : index
    %1087 = memref.load %arg5[%c77_162] : memref<144xf32, #tpu.memory_space<smem>>
    %1088 = vector.broadcast %1087 : f32 to vector<16x16xf32>
    %1089 = arith.mulf %1088, %1078 : vector<16x16xf32>
    %1090 = arith.addf %1071, %1089 : vector<16x16xf32>
    %c113_163 = arith.constant 113 : index
    %1091 = memref.load %arg5[%c113_163] : memref<144xf32, #tpu.memory_space<smem>>
    %1092 = vector.broadcast %1091 : f32 to vector<16x16xf32>
    %1093 = arith.mulf %1092, %1078 : vector<16x16xf32>
    %1094 = arith.addf %1075, %1093 : vector<16x16xf32>
    %1095 = vector.extract_strided_slice %1076 {offsets = [1, 0, 0], sizes = [1, 16, 16], strides = [1, 1, 1]} : vector<4x16x16xf32> to vector<1x16x16xf32>
    %1096 = vector.shape_cast %1095 : vector<1x16x16xf32> to vector<16x16xf32>
    %c14_164 = arith.constant 14 : index
    %1097 = memref.load %arg5[%c14_164] : memref<144xf32, #tpu.memory_space<smem>>
    %1098 = vector.broadcast %1097 : f32 to vector<16x16xf32>
    %1099 = arith.mulf %1098, %1096 : vector<16x16xf32>
    %1100 = arith.addf %1082, %1099 : vector<16x16xf32>
    %c50_165 = arith.constant 50 : index
    %1101 = memref.load %arg5[%c50_165] : memref<144xf32, #tpu.memory_space<smem>>
    %1102 = vector.broadcast %1101 : f32 to vector<16x16xf32>
    %1103 = arith.mulf %1102, %1096 : vector<16x16xf32>
    %1104 = arith.addf %1086, %1103 : vector<16x16xf32>
    %c86_166 = arith.constant 86 : index
    %1105 = memref.load %arg5[%c86_166] : memref<144xf32, #tpu.memory_space<smem>>
    %1106 = vector.broadcast %1105 : f32 to vector<16x16xf32>
    %1107 = arith.mulf %1106, %1096 : vector<16x16xf32>
    %1108 = arith.addf %1090, %1107 : vector<16x16xf32>
    %c122_167 = arith.constant 122 : index
    %1109 = memref.load %arg5[%c122_167] : memref<144xf32, #tpu.memory_space<smem>>
    %1110 = vector.broadcast %1109 : f32 to vector<16x16xf32>
    %1111 = arith.mulf %1110, %1096 : vector<16x16xf32>
    %1112 = arith.addf %1094, %1111 : vector<16x16xf32>
    %1113 = vector.extract_strided_slice %1076 {offsets = [2, 0, 0], sizes = [1, 16, 16], strides = [1, 1, 1]} : vector<4x16x16xf32> to vector<1x16x16xf32>
    %1114 = vector.shape_cast %1113 : vector<1x16x16xf32> to vector<16x16xf32>
    %c23_168 = arith.constant 23 : index
    %1115 = memref.load %arg5[%c23_168] : memref<144xf32, #tpu.memory_space<smem>>
    %1116 = vector.broadcast %1115 : f32 to vector<16x16xf32>
    %1117 = arith.mulf %1116, %1114 : vector<16x16xf32>
    %1118 = arith.addf %1100, %1117 : vector<16x16xf32>
    %c59_169 = arith.constant 59 : index
    %1119 = memref.load %arg5[%c59_169] : memref<144xf32, #tpu.memory_space<smem>>
    %1120 = vector.broadcast %1119 : f32 to vector<16x16xf32>
    %1121 = arith.mulf %1120, %1114 : vector<16x16xf32>
    %1122 = arith.addf %1104, %1121 : vector<16x16xf32>
    %c95_170 = arith.constant 95 : index
    %1123 = memref.load %arg5[%c95_170] : memref<144xf32, #tpu.memory_space<smem>>
    %1124 = vector.broadcast %1123 : f32 to vector<16x16xf32>
    %1125 = arith.mulf %1124, %1114 : vector<16x16xf32>
    %1126 = arith.addf %1108, %1125 : vector<16x16xf32>
    %c131_171 = arith.constant 131 : index
    %1127 = memref.load %arg5[%c131_171] : memref<144xf32, #tpu.memory_space<smem>>
    %1128 = vector.broadcast %1127 : f32 to vector<16x16xf32>
    %1129 = arith.mulf %1128, %1114 : vector<16x16xf32>
    %1130 = arith.addf %1112, %1129 : vector<16x16xf32>
    %1131 = vector.extract_strided_slice %1076 {offsets = [3, 0, 0], sizes = [1, 16, 16], strides = [1, 1, 1]} : vector<4x16x16xf32> to vector<1x16x16xf32>
    %1132 = vector.shape_cast %1131 : vector<1x16x16xf32> to vector<16x16xf32>
    %c32_172 = arith.constant 32 : index
    %1133 = memref.load %arg5[%c32_172] : memref<144xf32, #tpu.memory_space<smem>>
    %1134 = vector.broadcast %1133 : f32 to vector<16x16xf32>
    %1135 = arith.mulf %1134, %1132 : vector<16x16xf32>
    %1136 = arith.addf %1118, %1135 : vector<16x16xf32>
    %c68_173 = arith.constant 68 : index
    %1137 = memref.load %arg5[%c68_173] : memref<144xf32, #tpu.memory_space<smem>>
    %1138 = vector.broadcast %1137 : f32 to vector<16x16xf32>
    %1139 = arith.mulf %1138, %1132 : vector<16x16xf32>
    %1140 = arith.addf %1122, %1139 : vector<16x16xf32>
    %c104_174 = arith.constant 104 : index
    %1141 = memref.load %arg5[%c104_174] : memref<144xf32, #tpu.memory_space<smem>>
    %1142 = vector.broadcast %1141 : f32 to vector<16x16xf32>
    %1143 = arith.mulf %1142, %1132 : vector<16x16xf32>
    %1144 = arith.addf %1126, %1143 : vector<16x16xf32>
    %c140_175 = arith.constant 140 : index
    %1145 = memref.load %arg5[%c140_175] : memref<144xf32, #tpu.memory_space<smem>>
    %1146 = vector.broadcast %1145 : f32 to vector<16x16xf32>
    %1147 = arith.mulf %1146, %1132 : vector<16x16xf32>
    %1148 = arith.addf %1130, %1147 : vector<16x16xf32>
    %c0_176 = arith.constant 0 : index
    %c2_177 = arith.constant 2 : index
    %c0_178 = arith.constant 0 : index
    %1149 = vector.load %arg8[%c0_176, %c2_177, %c0_178] : memref<4x18x18xf32, #tpu.memory_space<vmem>>, vector<4x16x16xf32>
    %1150 = vector.extract_strided_slice %1149 {offsets = [0, 0, 0], sizes = [1, 16, 16], strides = [1, 1, 1]} : vector<4x16x16xf32> to vector<1x16x16xf32>
    %1151 = vector.shape_cast %1150 : vector<1x16x16xf32> to vector<16x16xf32>
    %c6_179 = arith.constant 6 : index
    %1152 = memref.load %arg5[%c6_179] : memref<144xf32, #tpu.memory_space<smem>>
    %1153 = vector.broadcast %1152 : f32 to vector<16x16xf32>
    %1154 = arith.mulf %1153, %1151 : vector<16x16xf32>
    %1155 = arith.addf %1136, %1154 : vector<16x16xf32>
    %c42_180 = arith.constant 42 : index
    %1156 = memref.load %arg5[%c42_180] : memref<144xf32, #tpu.memory_space<smem>>
    %1157 = vector.broadcast %1156 : f32 to vector<16x16xf32>
    %1158 = arith.mulf %1157, %1151 : vector<16x16xf32>
    %1159 = arith.addf %1140, %1158 : vector<16x16xf32>
    %c78_181 = arith.constant 78 : index
    %1160 = memref.load %arg5[%c78_181] : memref<144xf32, #tpu.memory_space<smem>>
    %1161 = vector.broadcast %1160 : f32 to vector<16x16xf32>
    %1162 = arith.mulf %1161, %1151 : vector<16x16xf32>
    %1163 = arith.addf %1144, %1162 : vector<16x16xf32>
    %c114_182 = arith.constant 114 : index
    %1164 = memref.load %arg5[%c114_182] : memref<144xf32, #tpu.memory_space<smem>>
    %1165 = vector.broadcast %1164 : f32 to vector<16x16xf32>
    %1166 = arith.mulf %1165, %1151 : vector<16x16xf32>
    %1167 = arith.addf %1148, %1166 : vector<16x16xf32>
    %1168 = vector.extract_strided_slice %1149 {offsets = [1, 0, 0], sizes = [1, 16, 16], strides = [1, 1, 1]} : vector<4x16x16xf32> to vector<1x16x16xf32>
    %1169 = vector.shape_cast %1168 : vector<1x16x16xf32> to vector<16x16xf32>
    %c15_183 = arith.constant 15 : index
    %1170 = memref.load %arg5[%c15_183] : memref<144xf32, #tpu.memory_space<smem>>
    %1171 = vector.broadcast %1170 : f32 to vector<16x16xf32>
    %1172 = arith.mulf %1171, %1169 : vector<16x16xf32>
    %1173 = arith.addf %1155, %1172 : vector<16x16xf32>
    %c51_184 = arith.constant 51 : index
    %1174 = memref.load %arg5[%c51_184] : memref<144xf32, #tpu.memory_space<smem>>
    %1175 = vector.broadcast %1174 : f32 to vector<16x16xf32>
    %1176 = arith.mulf %1175, %1169 : vector<16x16xf32>
    %1177 = arith.addf %1159, %1176 : vector<16x16xf32>
    %c87_185 = arith.constant 87 : index
    %1178 = memref.load %arg5[%c87_185] : memref<144xf32, #tpu.memory_space<smem>>
    %1179 = vector.broadcast %1178 : f32 to vector<16x16xf32>
    %1180 = arith.mulf %1179, %1169 : vector<16x16xf32>
    %1181 = arith.addf %1163, %1180 : vector<16x16xf32>
    %c123_186 = arith.constant 123 : index
    %1182 = memref.load %arg5[%c123_186] : memref<144xf32, #tpu.memory_space<smem>>
    %1183 = vector.broadcast %1182 : f32 to vector<16x16xf32>
    %1184 = arith.mulf %1183, %1169 : vector<16x16xf32>
    %1185 = arith.addf %1167, %1184 : vector<16x16xf32>
    %1186 = vector.extract_strided_slice %1149 {offsets = [2, 0, 0], sizes = [1, 16, 16], strides = [1, 1, 1]} : vector<4x16x16xf32> to vector<1x16x16xf32>
    %1187 = vector.shape_cast %1186 : vector<1x16x16xf32> to vector<16x16xf32>
    %c24_187 = arith.constant 24 : index
    %1188 = memref.load %arg5[%c24_187] : memref<144xf32, #tpu.memory_space<smem>>
    %1189 = vector.broadcast %1188 : f32 to vector<16x16xf32>
    %1190 = arith.mulf %1189, %1187 : vector<16x16xf32>
    %1191 = arith.addf %1173, %1190 : vector<16x16xf32>
    %c60_188 = arith.constant 60 : index
    %1192 = memref.load %arg5[%c60_188] : memref<144xf32, #tpu.memory_space<smem>>
    %1193 = vector.broadcast %1192 : f32 to vector<16x16xf32>
    %1194 = arith.mulf %1193, %1187 : vector<16x16xf32>
    %1195 = arith.addf %1177, %1194 : vector<16x16xf32>
    %c96_189 = arith.constant 96 : index
    %1196 = memref.load %arg5[%c96_189] : memref<144xf32, #tpu.memory_space<smem>>
    %1197 = vector.broadcast %1196 : f32 to vector<16x16xf32>
    %1198 = arith.mulf %1197, %1187 : vector<16x16xf32>
    %1199 = arith.addf %1181, %1198 : vector<16x16xf32>
    %c132_190 = arith.constant 132 : index
    %1200 = memref.load %arg5[%c132_190] : memref<144xf32, #tpu.memory_space<smem>>
    %1201 = vector.broadcast %1200 : f32 to vector<16x16xf32>
    %1202 = arith.mulf %1201, %1187 : vector<16x16xf32>
    %1203 = arith.addf %1185, %1202 : vector<16x16xf32>
    %1204 = vector.extract_strided_slice %1149 {offsets = [3, 0, 0], sizes = [1, 16, 16], strides = [1, 1, 1]} : vector<4x16x16xf32> to vector<1x16x16xf32>
    %1205 = vector.shape_cast %1204 : vector<1x16x16xf32> to vector<16x16xf32>
    %c33_191 = arith.constant 33 : index
    %1206 = memref.load %arg5[%c33_191] : memref<144xf32, #tpu.memory_space<smem>>
    %1207 = vector.broadcast %1206 : f32 to vector<16x16xf32>
    %1208 = arith.mulf %1207, %1205 : vector<16x16xf32>
    %1209 = arith.addf %1191, %1208 : vector<16x16xf32>
    %c69_192 = arith.constant 69 : index
    %1210 = memref.load %arg5[%c69_192] : memref<144xf32, #tpu.memory_space<smem>>
    %1211 = vector.broadcast %1210 : f32 to vector<16x16xf32>
    %1212 = arith.mulf %1211, %1205 : vector<16x16xf32>
    %1213 = arith.addf %1195, %1212 : vector<16x16xf32>
    %c105_193 = arith.constant 105 : index
    %1214 = memref.load %arg5[%c105_193] : memref<144xf32, #tpu.memory_space<smem>>
    %1215 = vector.broadcast %1214 : f32 to vector<16x16xf32>
    %1216 = arith.mulf %1215, %1205 : vector<16x16xf32>
    %1217 = arith.addf %1199, %1216 : vector<16x16xf32>
    %c141_194 = arith.constant 141 : index
    %1218 = memref.load %arg5[%c141_194] : memref<144xf32, #tpu.memory_space<smem>>
    %1219 = vector.broadcast %1218 : f32 to vector<16x16xf32>
    %1220 = arith.mulf %1219, %1205 : vector<16x16xf32>
    %1221 = arith.addf %1203, %1220 : vector<16x16xf32>
    %c0_195 = arith.constant 0 : index
    %c2_196 = arith.constant 2 : index
    %c1_197 = arith.constant 1 : index
    %1222 = vector.load %arg8[%c0_195, %c2_196, %c1_197] : memref<4x18x18xf32, #tpu.memory_space<vmem>>, vector<4x16x16xf32>
    %1223 = vector.extract_strided_slice %1222 {offsets = [0, 0, 0], sizes = [1, 16, 16], strides = [1, 1, 1]} : vector<4x16x16xf32> to vector<1x16x16xf32>
    %1224 = vector.shape_cast %1223 : vector<1x16x16xf32> to vector<16x16xf32>
    %c7_198 = arith.constant 7 : index
    %1225 = memref.load %arg5[%c7_198] : memref<144xf32, #tpu.memory_space<smem>>
    %1226 = vector.broadcast %1225 : f32 to vector<16x16xf32>
    %1227 = arith.mulf %1226, %1224 : vector<16x16xf32>
    %1228 = arith.addf %1209, %1227 : vector<16x16xf32>
    %c43_199 = arith.constant 43 : index
    %1229 = memref.load %arg5[%c43_199] : memref<144xf32, #tpu.memory_space<smem>>
    %1230 = vector.broadcast %1229 : f32 to vector<16x16xf32>
    %1231 = arith.mulf %1230, %1224 : vector<16x16xf32>
    %1232 = arith.addf %1213, %1231 : vector<16x16xf32>
    %c79_200 = arith.constant 79 : index
    %1233 = memref.load %arg5[%c79_200] : memref<144xf32, #tpu.memory_space<smem>>
    %1234 = vector.broadcast %1233 : f32 to vector<16x16xf32>
    %1235 = arith.mulf %1234, %1224 : vector<16x16xf32>
    %1236 = arith.addf %1217, %1235 : vector<16x16xf32>
    %c115_201 = arith.constant 115 : index
    %1237 = memref.load %arg5[%c115_201] : memref<144xf32, #tpu.memory_space<smem>>
    %1238 = vector.broadcast %1237 : f32 to vector<16x16xf32>
    %1239 = arith.mulf %1238, %1224 : vector<16x16xf32>
    %1240 = arith.addf %1221, %1239 : vector<16x16xf32>
    %1241 = vector.extract_strided_slice %1222 {offsets = [1, 0, 0], sizes = [1, 16, 16], strides = [1, 1, 1]} : vector<4x16x16xf32> to vector<1x16x16xf32>
    %1242 = vector.shape_cast %1241 : vector<1x16x16xf32> to vector<16x16xf32>
    %c16_202 = arith.constant 16 : index
    %1243 = memref.load %arg5[%c16_202] : memref<144xf32, #tpu.memory_space<smem>>
    %1244 = vector.broadcast %1243 : f32 to vector<16x16xf32>
    %1245 = arith.mulf %1244, %1242 : vector<16x16xf32>
    %1246 = arith.addf %1228, %1245 : vector<16x16xf32>
    %c52_203 = arith.constant 52 : index
    %1247 = memref.load %arg5[%c52_203] : memref<144xf32, #tpu.memory_space<smem>>
    %1248 = vector.broadcast %1247 : f32 to vector<16x16xf32>
    %1249 = arith.mulf %1248, %1242 : vector<16x16xf32>
    %1250 = arith.addf %1232, %1249 : vector<16x16xf32>
    %c88_204 = arith.constant 88 : index
    %1251 = memref.load %arg5[%c88_204] : memref<144xf32, #tpu.memory_space<smem>>
    %1252 = vector.broadcast %1251 : f32 to vector<16x16xf32>
    %1253 = arith.mulf %1252, %1242 : vector<16x16xf32>
    %1254 = arith.addf %1236, %1253 : vector<16x16xf32>
    %c124_205 = arith.constant 124 : index
    %1255 = memref.load %arg5[%c124_205] : memref<144xf32, #tpu.memory_space<smem>>
    %1256 = vector.broadcast %1255 : f32 to vector<16x16xf32>
    %1257 = arith.mulf %1256, %1242 : vector<16x16xf32>
    %1258 = arith.addf %1240, %1257 : vector<16x16xf32>
    %1259 = vector.extract_strided_slice %1222 {offsets = [2, 0, 0], sizes = [1, 16, 16], strides = [1, 1, 1]} : vector<4x16x16xf32> to vector<1x16x16xf32>
    %1260 = vector.shape_cast %1259 : vector<1x16x16xf32> to vector<16x16xf32>
    %c25_206 = arith.constant 25 : index
    %1261 = memref.load %arg5[%c25_206] : memref<144xf32, #tpu.memory_space<smem>>
    %1262 = vector.broadcast %1261 : f32 to vector<16x16xf32>
    %1263 = arith.mulf %1262, %1260 : vector<16x16xf32>
    %1264 = arith.addf %1246, %1263 : vector<16x16xf32>
    %c61_207 = arith.constant 61 : index
    %1265 = memref.load %arg5[%c61_207] : memref<144xf32, #tpu.memory_space<smem>>
    %1266 = vector.broadcast %1265 : f32 to vector<16x16xf32>
    %1267 = arith.mulf %1266, %1260 : vector<16x16xf32>
    %1268 = arith.addf %1250, %1267 : vector<16x16xf32>
    %c97_208 = arith.constant 97 : index
    %1269 = memref.load %arg5[%c97_208] : memref<144xf32, #tpu.memory_space<smem>>
    %1270 = vector.broadcast %1269 : f32 to vector<16x16xf32>
    %1271 = arith.mulf %1270, %1260 : vector<16x16xf32>
    %1272 = arith.addf %1254, %1271 : vector<16x16xf32>
    %c133_209 = arith.constant 133 : index
    %1273 = memref.load %arg5[%c133_209] : memref<144xf32, #tpu.memory_space<smem>>
    %1274 = vector.broadcast %1273 : f32 to vector<16x16xf32>
    %1275 = arith.mulf %1274, %1260 : vector<16x16xf32>
    %1276 = arith.addf %1258, %1275 : vector<16x16xf32>
    %1277 = vector.extract_strided_slice %1222 {offsets = [3, 0, 0], sizes = [1, 16, 16], strides = [1, 1, 1]} : vector<4x16x16xf32> to vector<1x16x16xf32>
    %1278 = vector.shape_cast %1277 : vector<1x16x16xf32> to vector<16x16xf32>
    %c34_210 = arith.constant 34 : index
    %1279 = memref.load %arg5[%c34_210] : memref<144xf32, #tpu.memory_space<smem>>
    %1280 = vector.broadcast %1279 : f32 to vector<16x16xf32>
    %1281 = arith.mulf %1280, %1278 : vector<16x16xf32>
    %1282 = arith.addf %1264, %1281 : vector<16x16xf32>
    %c70_211 = arith.constant 70 : index
    %1283 = memref.load %arg5[%c70_211] : memref<144xf32, #tpu.memory_space<smem>>
    %1284 = vector.broadcast %1283 : f32 to vector<16x16xf32>
    %1285 = arith.mulf %1284, %1278 : vector<16x16xf32>
    %1286 = arith.addf %1268, %1285 : vector<16x16xf32>
    %c106_212 = arith.constant 106 : index
    %1287 = memref.load %arg5[%c106_212] : memref<144xf32, #tpu.memory_space<smem>>
    %1288 = vector.broadcast %1287 : f32 to vector<16x16xf32>
    %1289 = arith.mulf %1288, %1278 : vector<16x16xf32>
    %1290 = arith.addf %1272, %1289 : vector<16x16xf32>
    %c142_213 = arith.constant 142 : index
    %1291 = memref.load %arg5[%c142_213] : memref<144xf32, #tpu.memory_space<smem>>
    %1292 = vector.broadcast %1291 : f32 to vector<16x16xf32>
    %1293 = arith.mulf %1292, %1278 : vector<16x16xf32>
    %1294 = arith.addf %1276, %1293 : vector<16x16xf32>
    %c0_214 = arith.constant 0 : index
    %c2_215 = arith.constant 2 : index
    %c2_216 = arith.constant 2 : index
    %1295 = vector.load %arg8[%c0_214, %c2_215, %c2_216] : memref<4x18x18xf32, #tpu.memory_space<vmem>>, vector<4x16x16xf32>
    %1296 = vector.extract_strided_slice %1295 {offsets = [0, 0, 0], sizes = [1, 16, 16], strides = [1, 1, 1]} : vector<4x16x16xf32> to vector<1x16x16xf32>
    %1297 = vector.shape_cast %1296 : vector<1x16x16xf32> to vector<16x16xf32>
    %c8_217 = arith.constant 8 : index
    %1298 = memref.load %arg5[%c8_217] : memref<144xf32, #tpu.memory_space<smem>>
    %1299 = vector.broadcast %1298 : f32 to vector<16x16xf32>
    %1300 = arith.mulf %1299, %1297 : vector<16x16xf32>
    %1301 = arith.addf %1282, %1300 : vector<16x16xf32>
    %c44_218 = arith.constant 44 : index
    %1302 = memref.load %arg5[%c44_218] : memref<144xf32, #tpu.memory_space<smem>>
    %1303 = vector.broadcast %1302 : f32 to vector<16x16xf32>
    %1304 = arith.mulf %1303, %1297 : vector<16x16xf32>
    %1305 = arith.addf %1286, %1304 : vector<16x16xf32>
    %c80_219 = arith.constant 80 : index
    %1306 = memref.load %arg5[%c80_219] : memref<144xf32, #tpu.memory_space<smem>>
    %1307 = vector.broadcast %1306 : f32 to vector<16x16xf32>
    %1308 = arith.mulf %1307, %1297 : vector<16x16xf32>
    %1309 = arith.addf %1290, %1308 : vector<16x16xf32>
    %c116_220 = arith.constant 116 : index
    %1310 = memref.load %arg5[%c116_220] : memref<144xf32, #tpu.memory_space<smem>>
    %1311 = vector.broadcast %1310 : f32 to vector<16x16xf32>
    %1312 = arith.mulf %1311, %1297 : vector<16x16xf32>
    %1313 = arith.addf %1294, %1312 : vector<16x16xf32>
    %1314 = vector.extract_strided_slice %1295 {offsets = [1, 0, 0], sizes = [1, 16, 16], strides = [1, 1, 1]} : vector<4x16x16xf32> to vector<1x16x16xf32>
    %1315 = vector.shape_cast %1314 : vector<1x16x16xf32> to vector<16x16xf32>
    %c17_221 = arith.constant 17 : index
    %1316 = memref.load %arg5[%c17_221] : memref<144xf32, #tpu.memory_space<smem>>
    %1317 = vector.broadcast %1316 : f32 to vector<16x16xf32>
    %1318 = arith.mulf %1317, %1315 : vector<16x16xf32>
    %1319 = arith.addf %1301, %1318 : vector<16x16xf32>
    %c53_222 = arith.constant 53 : index
    %1320 = memref.load %arg5[%c53_222] : memref<144xf32, #tpu.memory_space<smem>>
    %1321 = vector.broadcast %1320 : f32 to vector<16x16xf32>
    %1322 = arith.mulf %1321, %1315 : vector<16x16xf32>
    %1323 = arith.addf %1305, %1322 : vector<16x16xf32>
    %c89_223 = arith.constant 89 : index
    %1324 = memref.load %arg5[%c89_223] : memref<144xf32, #tpu.memory_space<smem>>
    %1325 = vector.broadcast %1324 : f32 to vector<16x16xf32>
    %1326 = arith.mulf %1325, %1315 : vector<16x16xf32>
    %1327 = arith.addf %1309, %1326 : vector<16x16xf32>
    %c125_224 = arith.constant 125 : index
    %1328 = memref.load %arg5[%c125_224] : memref<144xf32, #tpu.memory_space<smem>>
    %1329 = vector.broadcast %1328 : f32 to vector<16x16xf32>
    %1330 = arith.mulf %1329, %1315 : vector<16x16xf32>
    %1331 = arith.addf %1313, %1330 : vector<16x16xf32>
    %1332 = vector.extract_strided_slice %1295 {offsets = [2, 0, 0], sizes = [1, 16, 16], strides = [1, 1, 1]} : vector<4x16x16xf32> to vector<1x16x16xf32>
    %1333 = vector.shape_cast %1332 : vector<1x16x16xf32> to vector<16x16xf32>
    %c26_225 = arith.constant 26 : index
    %1334 = memref.load %arg5[%c26_225] : memref<144xf32, #tpu.memory_space<smem>>
    %1335 = vector.broadcast %1334 : f32 to vector<16x16xf32>
    %1336 = arith.mulf %1335, %1333 : vector<16x16xf32>
    %1337 = arith.addf %1319, %1336 : vector<16x16xf32>
    %c62_226 = arith.constant 62 : index
    %1338 = memref.load %arg5[%c62_226] : memref<144xf32, #tpu.memory_space<smem>>
    %1339 = vector.broadcast %1338 : f32 to vector<16x16xf32>
    %1340 = arith.mulf %1339, %1333 : vector<16x16xf32>
    %1341 = arith.addf %1323, %1340 : vector<16x16xf32>
    %c98_227 = arith.constant 98 : index
    %1342 = memref.load %arg5[%c98_227] : memref<144xf32, #tpu.memory_space<smem>>
    %1343 = vector.broadcast %1342 : f32 to vector<16x16xf32>
    %1344 = arith.mulf %1343, %1333 : vector<16x16xf32>
    %1345 = arith.addf %1327, %1344 : vector<16x16xf32>
    %c134_228 = arith.constant 134 : index
    %1346 = memref.load %arg5[%c134_228] : memref<144xf32, #tpu.memory_space<smem>>
    %1347 = vector.broadcast %1346 : f32 to vector<16x16xf32>
    %1348 = arith.mulf %1347, %1333 : vector<16x16xf32>
    %1349 = arith.addf %1331, %1348 : vector<16x16xf32>
    %1350 = vector.extract_strided_slice %1295 {offsets = [3, 0, 0], sizes = [1, 16, 16], strides = [1, 1, 1]} : vector<4x16x16xf32> to vector<1x16x16xf32>
    %1351 = vector.shape_cast %1350 : vector<1x16x16xf32> to vector<16x16xf32>
    %c35_229 = arith.constant 35 : index
    %1352 = memref.load %arg5[%c35_229] : memref<144xf32, #tpu.memory_space<smem>>
    %1353 = vector.broadcast %1352 : f32 to vector<16x16xf32>
    %1354 = arith.mulf %1353, %1351 : vector<16x16xf32>
    %1355 = arith.addf %1337, %1354 : vector<16x16xf32>
    %c71_230 = arith.constant 71 : index
    %1356 = memref.load %arg5[%c71_230] : memref<144xf32, #tpu.memory_space<smem>>
    %1357 = vector.broadcast %1356 : f32 to vector<16x16xf32>
    %1358 = arith.mulf %1357, %1351 : vector<16x16xf32>
    %1359 = arith.addf %1341, %1358 : vector<16x16xf32>
    %c107_231 = arith.constant 107 : index
    %1360 = memref.load %arg5[%c107_231] : memref<144xf32, #tpu.memory_space<smem>>
    %1361 = vector.broadcast %1360 : f32 to vector<16x16xf32>
    %1362 = arith.mulf %1361, %1351 : vector<16x16xf32>
    %1363 = arith.addf %1345, %1362 : vector<16x16xf32>
    %c143_232 = arith.constant 143 : index
    %1364 = memref.load %arg5[%c143_232] : memref<144xf32, #tpu.memory_space<smem>>
    %1365 = vector.broadcast %1364 : f32 to vector<16x16xf32>
    %1366 = arith.mulf %1365, %1351 : vector<16x16xf32>
    %1367 = arith.addf %1349, %1366 : vector<16x16xf32>
    %1368 = vector.extract_strided_slice %3 {offsets = [0, 0, 0], sizes = [1, 16, 16], strides = [1, 1, 1]} : vector<4x16x16xf32> to vector<1x16x16xf32>
    %1369 = vector.shape_cast %1368 : vector<1x16x16xf32> to vector<16x16xf32>
    %1370 = arith.addf %1369, %1355 : vector<16x16xf32>
    %c0_233 = arith.constant 0 : index
    %c0_234 = arith.constant 0 : index
    %c0_235 = arith.constant 0 : index
    %c0_236 = arith.constant 0 : index
    %1371 = vector.load %arg7[%c0_233, %c0_234, %c0_235, %c0_236] : memref<1x4x16x16xf32, #tpu.memory_space<vmem>>, vector<1x1x16x16xf32>
    %1372 = vector.shape_cast %1371 : vector<1x1x16x16xf32> to vector<16x16xf32>
    %1373 = vector.shape_cast %1370 : vector<16x16xf32> to vector<1x1x16x16xf32>
    tpu.vector_store %arg7[%c0_233, %c0_234, %c0_235, %c0_236], %1373 {strides = array<i32>} : memref<1x4x16x16xf32, #tpu.memory_space<vmem>>, vector<1x1x16x16xf32>,
    %1374 = vector.extract_strided_slice %3 {offsets = [1, 0, 0], sizes = [1, 16, 16], strides = [1, 1, 1]} : vector<4x16x16xf32> to vector<1x16x16xf32>
    %1375 = vector.shape_cast %1374 : vector<1x16x16xf32> to vector<16x16xf32>
    %1376 = arith.addf %1375, %1359 : vector<16x16xf32>
    %c0_237 = arith.constant 0 : index
    %c1_238 = arith.constant 1 : index
    %c0_239 = arith.constant 0 : index
    %c0_240 = arith.constant 0 : index
    %1377 = vector.load %arg7[%c0_237, %c1_238, %c0_239, %c0_240] : memref<1x4x16x16xf32, #tpu.memory_space<vmem>>, vector<1x1x16x16xf32>
    %1378 = vector.shape_cast %1377 : vector<1x1x16x16xf32> to vector<16x16xf32>
    %1379 = vector.shape_cast %1376 : vector<16x16xf32> to vector<1x1x16x16xf32>
    tpu.vector_store %arg7[%c0_237, %c1_238, %c0_239, %c0_240], %1379 {strides = array<i32>} : memref<1x4x16x16xf32, #tpu.memory_space<vmem>>, vector<1x1x16x16xf32>,
    %1380 = vector.extract_strided_slice %3 {offsets = [2, 0, 0], sizes = [1, 16, 16], strides = [1, 1, 1]} : vector<4x16x16xf32> to vector<1x16x16xf32>
    %1381 = vector.shape_cast %1380 : vector<1x16x16xf32> to vector<16x16xf32>
    %1382 = arith.addf %1381, %1363 : vector<16x16xf32>
    %c0_241 = arith.constant 0 : index
    %c2_242 = arith.constant 2 : index
    %c0_243 = arith.constant 0 : index
    %c0_244 = arith.constant 0 : index
    %1383 = vector.load %arg7[%c0_241, %c2_242, %c0_243, %c0_244] : memref<1x4x16x16xf32, #tpu.memory_space<vmem>>, vector<1x1x16x16xf32>
    %1384 = vector.shape_cast %1383 : vector<1x1x16x16xf32> to vector<16x16xf32>
    %1385 = vector.shape_cast %1382 : vector<16x16xf32> to vector<1x1x16x16xf32>
    tpu.vector_store %arg7[%c0_241, %c2_242, %c0_243, %c0_244], %1385 {strides = array<i32>} : memref<1x4x16x16xf32, #tpu.memory_space<vmem>>, vector<1x1x16x16xf32>,
    %1386 = vector.extract_strided_slice %3 {offsets = [3, 0, 0], sizes = [1, 16, 16], strides = [1, 1, 1]} : vector<4x16x16xf32> to vector<1x16x16xf32>
    %1387 = vector.shape_cast %1386 : vector<1x16x16xf32> to vector<16x16xf32>
    %1388 = arith.addf %1387, %1367 : vector<16x16xf32>
    %c0_245 = arith.constant 0 : index
    %c3_246 = arith.constant 3 : index
    %c0_247 = arith.constant 0 : index
    %c0_248 = arith.constant 0 : index
    %1389 = vector.load %arg7[%c0_245, %c3_246, %c0_247, %c0_248] : memref<1x4x16x16xf32, #tpu.memory_space<vmem>>, vector<1x1x16x16xf32>
    %1390 = vector.shape_cast %1389 : vector<1x1x16x16xf32> to vector<16x16xf32>
    %1391 = vector.shape_cast %1388 : vector<16x16xf32> to vector<1x1x16x16xf32>
    tpu.vector_store %arg7[%c0_245, %c3_246, %c0_247, %c0_248], %1391 {strides = array<i32>} : memref<1x4x16x16xf32, #tpu.memory_space<vmem>>, vector<1x1x16x16xf32>,
    return
  }
  func.func @transform_0(%arg0: i32) -> (i32, i32, i32, i32) {
    %c0_i32 = arith.constant 0 : i32
    %c0_i32_0 = arith.constant 0 : i32
    %c0_i32_1 = arith.constant 0 : i32
    %c0_i32_2 = arith.constant 0 : i32
    return %arg0, %c0_i32, %c0_i32_0, %c0_i32_1 : i32, i32, i32, i32
  }
  func.func @transform_1(%arg0: i32) -> i32 {
    %c0_i32 = arith.constant 0 : i32
    %c0_i32_0 = arith.constant 0 : i32
    return %c0_i32 : i32
  }
  func.func @transform_2(%arg0: i32) -> i32 {
    %c0_i32 = arith.constant 0 : i32
    %c0_i32_0 = arith.constant 0 : i32
    return %c0_i32 : i32
  }
  func.func @transform_3(%arg0: i32) -> i32 {
    %c0_i32 = arith.constant 0 : i32
    %c0_i32_0 = arith.constant 0 : i32
    return %c0_i32 : i32
  }
  func.func @transform_4(%arg0: i32) -> i32 {
    %c0_i32 = arith.constant 0 : i32
    %c0_i32_0 = arith.constant 0 : i32
    return %c0_i32 : i32
  }
  func.func @transform_5(%arg0: i32) -> i32 {
    %c0_i32 = arith.constant 0 : i32
    %c0_i32_0 = arith.constant 0 : i32
    return %c0_i32 : i32
  }
  func.func @transform_6(%arg0: i32) -> (i32, i32, i32, i32) {
    %c0_i32 = arith.constant 0 : i32
    %c0_i32_0 = arith.constant 0 : i32
    %c0_i32_1 = arith.constant 0 : i32
    %c0_i32_2 = arith.constant 0 : i32
    return %arg0, %c0_i32, %c0_i32_0, %c0_i32_1 : i32, i32, i32, i32
  }
}

</mosaic_0001>

<bundles_post_ra>
// kernel: resblock2_forward.1
= control target key start
LH: loop header
LB: loop body
LE: loop exit
PB: predicated region body
PF: predicated region fallthrough
CT: control target
= control target key end

     0   :  { %s7722_s0 = inlined_call_operand.vmem [shape: f32[2,4,16,16], index: 0, kind: input, shape index: {}]   ;;  %s7723_s1 = inlined_call_operand.vmem [shape: f32[144], index: 1, kind: input, shape index: {}]   ;;  %s7724_s2 = inlined_call_operand.vmem [shape: f32[4], index: 2, kind: input, shape index: {}]   ;;  %s7725_s3 = inlined_call_operand.<no memory space> [shape: f32[1], index: 3, kind: input, shape index: {}]   ;;  %s7726_s4 = inlined_call_operand.vmem [shape: f32[144], index: 4, kind: input, shape index: {}]   ;;  %s7727_s5 = inlined_call_operand.vmem [shape: f32[4], index: 5, kind: input, shape index: {}]   ;;  %s7728_s6 = inlined_call_operand.hbm [shape: f32[2,4,16,16], index: 6, kind: output, shape index: {}]  }
   0x1   :  { %7809 = sst [smem:[#allocation176_spill]] %s7722_s0 }
   0x2   :  { %7810 = sst [smem:[#allocation177_spill]] %s7723_s1 }
   0x3   :  { %7811 = sst [smem:[#allocation178_spill]] %s7724_s2 }
   0x4   :  { %7812 = sst [smem:[#allocation179_spill]] %s7726_s4 }
   0x5   :  { %7813 = sst [smem:[#allocation180_spill]] %s7727_s5 }
   0x6   :  { %7814 = sst [smem:[#allocation181_spill]] %s7728_s6 }
   0x7   :  { %11 = sst [smem:[#allocation3]] %s7725_s3 }
   0x8   :  { %12 = vsyncpa [#allocation6], 0 }
   0x9   :  { %13 = vsyncpa [#allocation8], 0 }
   0xa   :  { %14 = vsyncpa [#allocation11], 0 }
   0xb   :  { %15 = vsyncpa [#allocation5], 0 }
   0xc   :  { %17 = vsyncpa [#allocation5 + $0x1], 0  ;;  %s4523_s23 = smov 0   ;;  %s4525_s24 = smov 0  }
   0xd   :  { %s4527_s25 = smov 0   ;;  %s4529_s26 = smov 0  }
   0xe LB: > { %7815 = sst [smem:[#allocation17_spill]] %s4460_s23  ;;  %s4544_s3 = sadd.s32 4294967295, %s4472_s26   ;;  %s4472_s26 = sphi %s4529_s26, %s8361_s26   ;;  %s4468_s25 = sphi %s4527_s25, %s8364_s25   ;;  %s4464_s24 = sphi %s4525_s24, %s8363_s24   ;;  %s4460_s23 = sphi %s4523_s23, %s8362_s23  }
   0xf   : > { %7816 = sst [smem:[#allocation18_spill]] %s4464_s24  ;;  %s3900_s27 = sadd.s32 4294967294, %s4472_s26  }
  0x10   : > { %7817 = sst [smem:[#allocation19_spill]] %s4468_s25  ;;  %s4548_s28 = sadd.s32 1, %s4472_s26  }
  0x11   : > { %7818 = sst [smem:[#allocation20_spill]] %s4472_s26  ;;  %s161_s29 = sadd.s32 1, %s4468_s25 }
  0x12   : > { %7819 = sst [smem:[#allocation21_spill]] %s4544_s3  ;;  %s158_s30 = ssub.s32 %s4472_s26, %s4548_s28 }
  0x13   : > { %7820 = sst [smem:[#allocation22_spill]] %s4548_s28  ;;  %p171_p0 = scmp.ne.s32.totalorder %s4468_s25, %s4464_s24 }
  0x14   : > { %p159_p1 = scmp.eq.s32.totalorder %s158_s30, 0  ;;  %p172_p2 = scmp.eq.s32.totalorder %s4544_s3, 1 }
  0x15   : > { %p177_p3 = scmp.ne.s32.totalorder %s4464_s24, %s4460_s23  ;;  %p178_p4 = scmp.eq.s32.totalorder %s3900_s27, 1 }
  0x16   : > { %s4559_s7 = scalar_select %p159_p1, %s4468_s25, %s161_s29  }
  0x17   : > { %p4561_p5 = por %p172_p2, %p171_p0  ;;  %p4565_p6 = por %p178_p4, %p177_p3 }
  0x18   : > { %7821 = sst [smem:[#allocation23_spill]] %s4559_s7  ;;  %p3901_p7 = scmp.ge.s32.totalorder %s4472_s26, 1 }
  0x19   : > { %s7822_s8 = scalar_select %p4561_p5, 1, 0 }
  0x1a   : > { %s7824_s9 = scalar_select %p4565_p6, 1, 0 }
  0x1b   : > { %7823 = sst [smem:[#allocation24_spill]] %s7822_s8  ;;  %p185_p8 = scmp.lt.s32.totalorder %s4472_s26, 3 }
  0x1c   : > { %7825 = sst [smem:[#allocation25_spill]] %s7824_s9  ;;  %p7729_p9 = scmp.eq.s32.totalorder %s4544_s3, 0 }
  0x1d   : > { %p4572_p10 = pnand %p3901_p7, %p185_p8  ;;  %s7827_s2 = sld [smem:[#allocation178_spill]] }
  0x1e   : > { %s7828_s1 = sld [smem:[#allocation177_spill]]  ;;  %s7830_s4 = sld [smem:[#allocation179_spill]] }
  0x1f   : > { %s7826_s10 = scalar_select %p4572_p10, 1, 0 }
  0x20   : > { %p4238_p11 = pneg %p4572_p10  ;;  %s7831_s5 = sld [smem:[#allocation180_spill]] }
  0x22   : > { %p4586_p12 = pnand %p7729_p9, %p4238_p11 }
  0x23   : > { %s209_s13 = sshll.u32 %s7827_s2, 4  ;;  %s210_s13 = int_to_ptr.vmem [resolvable:$true] %s209_s13 }
  0x24   : > { %s198_s16 = sshll.u32 %s7828_s1, 4  ;;  %s223_s20 = sshll.u32 %s7830_s4, 4  ;;  %s199_s16 = int_to_ptr.vmem [resolvable:$true] %s198_s16  ;;  %s4593_s20 = int_to_ptr.vmem [resolvable:$true] %s223_s20 }
  0x25   : > { %s4338_s29 = scalar_lea.vmem %s210_s13, 16  ;;  %p4340_p0 = pneg %p4586_p12 }
  0x26   : > { %s234_s27 = sshll.u32 %s7831_s5, 4  ;;  %p4339_p13 = scmp.ne.s32.totalorder %s210_s13, %s4338_s29  ;;  %s235_s27 = int_to_ptr.vmem [resolvable:$true] %s234_s27 }
  0x27   : > { %p4346_p3 = scmp.lt.s32.totalorder %s210_s13, %s210_s13  ;;  %p4347_p4 = scmp.lt.s32.totalorder %s4338_s29, %s4338_s29 }
  0x28   : > { %p4341_p1 = pnand %p4340_p0, %p4339_p13 }
  0x29   : > { %p4348_p7 = por %p4347_p4, %p4346_p3 }
  0x2a   : > { %p4342_p2 = pneg %p4341_p1 }
  0x2c   : > { %p4349_p8 = pnand %p4348_p7, %p4342_p2 }
  0x2e   : > { %4352 = shalt.err (!%p4349_p8)
}
  0x2f   : > { %s4474_s30 = smov [#allocation7]   ;;  %s4353_s11 = scalar_lea.vmem %s199_s16, 32 }
  0x30   : > { %4244 = dma.vmem_to_smem (!%p4586_p12), %s210_s13, 16, %s4474_s30, [#allocation8]  }
  0x31   : > { %p4354_p11 = scmp.ne.s32.totalorder %s199_s16, %s4353_s11  ;;  %p4361_p5 = scmp.lt.s32.totalorder %s199_s16, %s199_s16 }
  0x32   : > { %p4362_p10 = scmp.lt.s32.totalorder %s4353_s11, %s4353_s11 }
  0x33   : > { %p4356_p9 = pnand %p4354_p11, %p4340_p0 }
  0x34   : > { %p4363_p13 = por %p4362_p10, %p4361_p5 }
  0x35   : > { %p4357_p6 = pneg %p4356_p9 }
  0x37   : > { %p4364_p1 = pnand %p4363_p13, %p4357_p6 }
  0x39   : > { %4367 = shalt.err (!%p4364_p1)
}
  0x3a   : > { %s4475_s12 = smov [#allocation4]   ;;  %s4368_s13 = scalar_lea.vmem %s4593_s20, 32 }
  0x3b   : > { %4241 = dma.vmem_to_smem (!%p4586_p12), %s199_s16, 32, %s4475_s12, [#allocation6]  }
  0x3c   : > { %p4369_p2 = scmp.ne.s32.totalorder %s4593_s20, %s4368_s13  ;;  %p4376_p9 = scmp.lt.s32.totalorder %s4593_s20, %s4593_s20 }
  0x3d   : > { %p4377_p7 = scmp.lt.s32.totalorder %s4368_s13, %s4368_s13 }
  0x3e   : > { %p4371_p3 = pnand %p4369_p2, %p4340_p0 }
  0x3f   : > { %p4378_p5 = por %p4377_p7, %p4376_p9 }
  0x40   : > { %p4372_p4 = pneg %p4371_p3 }
  0x42   : > { %p4379_p6 = pnand %p4378_p5, %p4372_p4 }
  0x44   : > { %4382 = shalt.err (!%p4379_p6)
}
  0x45   : > { %s4476_s14 = smov [#allocation9]   ;;  %s4383_s18 = scalar_lea.vmem %s235_s27, 16 }
  0x46   : > { %4247 = dma.vmem_to_smem (!%p4586_p12), %s4593_s20, 32, %s4476_s14, [#allocation8]  }
  0x47   : > { %p4384_p10 = scmp.ne.s32.totalorder %s235_s27, %s4383_s18  ;;  %p4391_p13 = scmp.lt.s32.totalorder %s235_s27, %s235_s27 }
  0x48   : > { %p4392_p1 = scmp.lt.s32.totalorder %s4383_s18, %s4383_s18 }
  0x49   : > { %p4386_p8 = pnand %p4384_p10, %p4340_p0 }
  0x4a   : > { %p4393_p2 = por %p4392_p1, %p4391_p13 }
  0x4b   : > { %p4387_p11 = pneg %p4386_p8 }
  0x4d   : > { %p4394_p3 = pnand %p4393_p2, %p4387_p11 }
  0x4f   : > { %4397 = shalt.err (!%p4394_p3)
}
  0x50   : > { %s4477_s19 = smov [#allocation10]   ;;  %p7832_p4 = scmp.ne.s32.totalorder %s7826_s10, 0 }
  0x51   : > { %4250 = dma.vmem_to_smem (!%p4586_p12), %s235_s27, 16, %s4477_s19, [#allocation11]  }
  0x52   : > { %255 = sbr.rel (%p7832_p4) target bundleno = 1386 (0x56a), region = 44 }
  0x59   : > { %p7833_p9 = scmp.eq.s32.totalorder %s4544_s3, 0 }
  0x5b   : > { %4443 = dma.done.wait (%p7833_p9), [#allocation6], 32   ;;  %p7834_p7 = pmov %p7833_p9 }
  0x5d   : > { %4445 = vsyncadd (%p7834_p7), [#allocation6], 4294967264  ;;  %p7835_p0 = pmov %p7834_p7 }
  0x5f   : > { %4447 = dma.done.wait (%p7835_p0), [#allocation8], 48   ;;  %p7836_p5 = pmov %p7835_p0 }
  0x60   : > { %p7837_p6 = pmov %p7835_p0 }
  0x61   : > { %4449 = vsyncadd (%p7836_p5), [#allocation8], 4294967248 }
  0x62   : > { %4451 = dma.done.wait (%p7837_p6), [#allocation11], 16   ;;  %p7838_p12 = pmov %p7835_p0 }
  0x64   : > { %4453 = vsyncadd (%p7838_p12), [#allocation11], 4294967280 }
  0x65   : > { %273 = sfence }
  0x66   : > { %p298_p10 = scmp.lt.s32.totalorder %s4544_s3, 1  ;;  %vm303_vm0 = vcmask 146432   ;;  %vm306_vm1 = vcmask 140288   ;;  %v4478_v0 = vmov 0.0   ;;  %s7839_s0 = sld [smem:[#allocation176_spill]]  ;;  %vm357_vm2 = vcmask 138248  }
  0x67   : > { %308 = vst.msk [vmem:[#allocation2 + $0x18] sm:$0xff] %vm303_vm0, %v4478_v0  ;;  %309 = vst.msk [vmem:[#allocation2 + $0x20] sm:$0xff] %vm303_vm0, %v4478_v0  ;;  %s7734_s27 = smov 1   ;;  %s3933_s29 = sld [smem:[#allocation4 + $0x1]]  ;;  %vm3765_vm11 = vcmask 130048  }
  0x68   : > { %304 = vst.msk [vmem:[#allocation2] sm:$0xff] %vm303_vm0, %v4478_v0  ;;  %305 = vst.msk [vmem:[#allocation2 + $0x8] sm:$0xff] %vm303_vm0, %v4478_v0  ;;  %s299_s10 = scalar_select %p298_p10, %s4544_s3, 1 }
  0x69   : > { %311 = vst.msk [vmem:[#allocation2 + $0x30] sm:$0xff] %vm303_vm0, %v4478_v0  ;;  %312 = vst.msk [vmem:[#allocation2 + $0x38] sm:$0xff] %vm303_vm0, %v4478_v0  ;;  %s3934_s30 = sld [smem:[#allocation4 + $0x25]]  ;;  %s4672_s11 = sld [smem:[#allocation4 + $0x49]] }
  0x6a   : > { %314 = vst.msk [vmem:[#allocation2 + $0x48] sm:$0xff] %vm303_vm0, %v4478_v0  ;;  %315 = vst.msk [vmem:[#allocation2 + $0x50] sm:$0xff] %vm303_vm0, %v4478_v0  ;;  %s4218_s17 = sshll.u32 %s299_s10, 6  ;;  %s3936_s12 = sld [smem:[#allocation4 + $0x6d]] }
  0x6b   : > { %310 = vst.msk [vmem:[#allocation2 + $0x28] sm:$0x3] %vm306_vm1, %v4478_v0  ;;  %307 = vst.msk [vmem:[#allocation2 + $0x10] sm:$0x3] %vm306_vm1, %v4478_v0  ;;  %s7732_s13 = smov 127   ;;  %s4680_s14 = sld [smem:[#allocation4 + $0xa]] }
  0x6c   : > { %313 = vst.msk [vmem:[#allocation2 + $0x40] sm:$0x3] %vm306_vm1, %v4478_v0  ;;  %316 = vst.msk [vmem:[#allocation2 + $0x58] sm:$0x3] %vm306_vm1, %v4478_v0  ;;  %s4650_s22 = scalar_lea.vmem %s7839_s0, %s4218_s17  ;;  %s3938_s15 = sld [smem:[#allocation4 + $0x2e]] }
  0x6d   : > { %7840 = sst [smem:[#allocation26_spill]] %s4650_s22  ;;  %v319_v1 = vld [vmem:[%s4650_s22 + $0x10] sm:$0xff]  ;;  %v317_v2 = vld [vmem:[%s4650_s22] sm:$0xff]  ;;  %v320_v3 = vld [vmem:[%s4650_s22 + $0x18] sm:$0xff]  ;;  %v479_v13 = vstv %s3933_s29  ;;  %s3939_s16 = sld [smem:[#allocation4 + $0x52]] }
  0x6e   : > { %337 = vrot.lane.b32.xlu1 %v319_v1, %s7734_s27  ;;  %333 = vrot.lane.b32.xlu0 %v317_v2, %s7734_s27  ;;  %v318_v4 = vld [vmem:[%s4650_s22 + $0x8] sm:$0xff]  ;;  %v321_v6 = vld [vmem:[%s4650_s22 + $0x20] sm:$0xff]  ;;  %s3940_s18 = sld [smem:[#allocation4 + $0x76]]  ;;  %s3941_s19 = sld [smem:[#allocation4 + $0x13]] }
  0x6f   : > { %v322_v5 = vld [vmem:[%s4650_s22 + $0x28] sm:$0xff]  ;;  %v324_v7 = vld [vmem:[%s4650_s22 + $0x38] sm:$0xff]  ;;  %v323_v8 = vld [vmem:[%s4650_s22 + $0x30] sm:$0xff]  ;;  %v493_v18 = vstv %s3934_s30  ;;  %s3942_s10 = sld [smem:[#allocation4 + $0x37]]  ;;  %s3943_s17 = sld [smem:[#allocation4 + $0x5b]] }
  0x70   : > { %v507_v24 = vstv %s4672_s11  ;;  %v521_v27 = vstv %s3936_s12  ;;  %s3944_s20 = sld [smem:[#allocation4 + $0x7f]]  ;;  %s3945_s21 = sld [smem:[#allocation4 + $0x1c]] }
  0x71   : > { %v535_v28 = vstv %s4680_s14  ;;  %s3946_s29 = sld [smem:[#allocation4 + $0x40]]  ;;  %s3947_s30 = sld [smem:[#allocation4 + $0x64]] }
  0x72   : > { %339 = vrot.lane.b32.xlu1 %v320_v3, %s7734_s27  ;;  %335 = vrot.lane.b32.xlu0 %v318_v4, %s7734_s27  ;;  %v549_v34 = vstv %s3938_s15  ;;  %s3948_s11 = sld [smem:[#allocation4 + $0x88]]  ;;  %s3949_s12 = sld [smem:[#allocation4 + $0x2]] }
  0x73   : > { %v563_v38 = vstv %s3939_s16  ;;  %s3950_s14 = sld [smem:[#allocation4 + $0x26]]  ;;  %s3951_s15 = sld [smem:[#allocation4 + $0x4a]] }
  0x74   : > { %v577_v41 = vstv %s3940_s18  ;;  %v591_v42 = vstv %s3941_s19  ;;  %s3952_s16 = sld [smem:[#allocation4 + $0x6e]]  ;;  %s7736_s18 = smov 126  }
  0x75   : > { %v605_v47 = vstv %s3942_s10  ;;  %v619_v52 = vstv %s3943_s17  ;;  %s3953_s19 = sld [smem:[#allocation4 + $0xb]]  ;;  %s3954_s10 = sld [smem:[#allocation4 + $0x2f]] }
  0x76   : > { %343 = vrot.lane.b32.xlu1 %v322_v5, %s7734_s27  ;;  %341 = vrot.lane.b32.xlu0 %v321_v6, %s7734_s27  ;;  %v633_v55 = vstv %s3944_s20  ;;  %v647_v56 = vstv %s3945_s21  ;;  %s3955_s17 = sld [smem:[#allocation4 + $0x53]]  ;;  %s3956_s20 = sld [smem:[#allocation4 + $0x77]] }
  0x77   : > { %v661_v61 = vstv %s3946_s29  ;;  %v675_v2 = vstv %s3947_s30  ;;  %s3957_s21 = sld [smem:[#allocation4 + $0x14]]  ;;  %s3958_s29 = sld [smem:[#allocation4 + $0x38]] }
  0x78   : > { %v689_v5 = vstv %s3948_s11  ;;  %s3959_s30 = sld [smem:[#allocation4 + $0x5c]]  ;;  %s3960_s11 = sld [smem:[#allocation4 + $0x80]] }
  0x79   : > { %s5491_s0 = sld [smem:[#allocation4 + $0x6c]]  ;;  %s5498_s1 = sld [smem:[#allocation4 + $0x36]] }
  0x7a   : > { %347 = vrot.lane.b32.xlu1 %v324_v7, %s7734_s27  ;;  %345 = vrot.lane.b32.xlu0 %v323_v8, %s7734_s27  ;;  %v703_v8 = vstv %s3949_s12  ;;  %s3961_s12 = sld [smem:[#allocation4 + $0x1d]]  ;;  %s5489_s27 = sld [smem:[#allocation7 + $0x3]] }
  0x7b   : > { %s5504_s2 = sld [smem:[#allocation4 + $0x5a]]  ;;  %s7958_s4 = smov 126  }
  0x7c   : > { %s5509_s5 = sld [smem:[#allocation4 + $0x3f]]  ;;  %s5511_s7 = sld [smem:[#allocation4 + $0x63]] }
  0x7d   : > { %s5514_s25 = sld [smem:[#allocation4 + $0x7e]]  ;;  %s5516_s28 = sld [smem:[#allocation4 + $0x87]] }
  0x7e   : > { %s5523_s9 = sld [smem:[#allocation4 + $0x27]]  ;;  %s5529_s23 = sld [smem:[#allocation4 + $0x4b]] }
  0x7f   : > { %7951 = sst [smem:[#allocation137_spill]] %s5491_s0  ;;  %s5531_s26 = sld [smem:[#allocation4 + $0x6f]] }
  0x80   : > { %7950 = sst [smem:[#allocation136_spill]] %s5489_s27  ;;  %s5534_s6 = sld [smem:[#allocation4 + $0xc]] }
  0x81   : > { %7954 = sst [smem:[#allocation140_spill]] %s5498_s1  ;;  %s5536_s8 = sld [smem:[#allocation4 + $0x30]] }
  0x82   : > { %7956 = sst [smem:[#allocation142_spill]] %s5504_s2  ;;  %s5539_s3 = sld [smem:[#allocation4 + $0x54]] }
  0x83   : > { %7959 = sst [smem:[#allocation144_spill]] %s5509_s5  ;;  %s5548_s24 = sld [smem:[#allocation4 + $0x2a]] }
  0x84   : > { %7960 = sst [smem:[#allocation145_spill]] %s5511_s7  ;;  %s5541_s22 = sld [smem:[#allocation4 + $0x78]] }
  0x85   : > { %7961 = sst [smem:[#allocation146_spill]] %s5514_s25  ;;  %s5610_s1 = sld [smem:[#allocation4 + $0x18]] }
  0x86   : > { %7963 = sst [smem:[#allocation148_spill]] %s5523_s9  ;;  %s5612_s0 = sld [smem:[#allocation4 + $0x3c]] }
  0x87   : > { %7965 = sst [smem:[#allocation150_spill]] %s5529_s23  ;;  %s5634_s23 = sld [smem:[#allocation4 + $0x45]] }
  0x88   : > { %7966 = sst [smem:[#allocation151_spill]] %s5531_s26  ;;  %s5553_s26 = sld [smem:[#allocation4 + $0x4e]] }
  0x89   : > { %7967 = sst [smem:[#allocation152_spill]] %s5536_s8  ;;  %s5560_s8 = sld [smem:[#allocation4 + $0x33]] }
  0x8a   : > { %7968 = sst [smem:[#allocation153_spill]] %s5539_s3  ;;  %s5555_s3 = sld [smem:[#allocation4 + $0x72]] }
  0x8b   : > { %7969 = sst [smem:[#allocation154_spill]] %s5541_s22  ;;  %s5558_s22 = sld [smem:[#allocation4 + $0xf]] }
  0x8c   : > { %7972 = sst [smem:[#allocation157_spill]] %s5548_s24  ;;  %s5564_s24 = sld [smem:[#allocation4 + $0x15]] }
  0x8d   : > { %s5628_s5 = sld [smem:[#allocation4 + $0x84]]  ;;  %s5636_s9 = sld [smem:[#allocation4 + $0x69]] }
  0x8e   : > { %7974 = sst [smem:[#allocation159_spill]] %s5553_s26  ;;  %s5643_s26 = sld [smem:[#allocation4 + $0x8d]] }
  0x8f   : > { %7976 = sst [smem:[#allocation161_spill]] %s5560_s8 }
  0x90   : > { %7975 = sst [smem:[#allocation160_spill]] %s5555_s3  ;;  %s5573_s3 = sld [smem:[#allocation4 + $0x39]] }
  0x91   : > { %s5575_s8 = sld [smem:[#allocation4 + $0x5d]] }
  0xe0   : > { %v338_v9 = vpop.permute.xlu1 %337  ;;  %v334_v10 = vpop.permute.xlu0 %333 }
  0xe1   : > { %360 = vst.msk [vmem:[#allocation2 + $0x19] sm:$0xff] %vm357_vm2, %v338_v9  ;;  %358 = vst.msk [vmem:[#allocation2 + $0x1] sm:$0xff] %vm357_vm2, %v334_v10 }
  0xe4   : > { %v340_v11 = vpop.permute.xlu1 %339  ;;  %v336_v12 = vpop.permute.xlu0 %335 }
  0xe5   : > { %361 = vst.msk [vmem:[#allocation2 + $0x21] sm:$0xff] %vm357_vm2, %v340_v11  ;;  %359 = vst.msk [vmem:[#allocation2 + $0x9] sm:$0xff] %vm357_vm2, %v336_v12  ;;  %v717_v11 = vstv %s3950_s14  ;;  %s3962_s14 = sld [smem:[#allocation4 + $0x41]] }
  0xe8   : > { %v4674_v14 = vld [vmem:[#allocation2] sm:$0xff]  ;;  %v344_v15 = vpop.permute.xlu1 %343  ;;  %v342_v16 = vpop.permute.xlu0 %341  ;;  %v4697_v30 = vld [vmem:[#allocation2 + $0x18] sm:$0xff] }
  0xe9   : > { %363 = vst.msk [vmem:[#allocation2 + $0x39] sm:$0xff] %vm357_vm2, %v344_v15  ;;  %362 = vst.msk [vmem:[#allocation2 + $0x31] sm:$0xff] %vm357_vm2, %v342_v16  ;;  %v480_v17 = vmul.f32 %v479_v13, %v4674_v14  ;;  %v494_v22 = vmul.f32 %v493_v18, %v4674_v14  ;;  %v508_v25 = vmul.f32 %v507_v24, %v4674_v14  ;;  %v731_v15 = vstv %s3951_s15  ;;  %s3963_s15 = sld [smem:[#allocation4 + $0x65]] }
  0xea   : > { %v522_v29 = vmul.f32 %v521_v27, %v4674_v14  ;;  %v536_v32 = vmul.f32 %v535_v28, %v4697_v30  ;;  %v550_v36 = vmul.f32 %v549_v34, %v4697_v30  ;;  %v564_v39 = vmul.f32 %v563_v38, %v4697_v30 }
  0xeb   : > { %484 = vrot.lane.b32.xlu0 %v480_v17, %s7732_s13  ;;  %v578_v43 = vmul.f32 %v577_v41, %v4697_v30  ;;  %v704_v9 = vmul.f32 %v703_v8, %v4674_v14  ;;  %v718_v12 = vmul.f32 %v717_v11, %v4674_v14  ;;  %v732_v16 = vmul.f32 %v731_v15, %v4674_v14 }
  0xec   : > { %v348_v19 = vpop.permute.xlu1 %347  ;;  %v346_v20 = vpop.permute.xlu0 %345  ;;  %v4682_v21 = vld [vmem:[#allocation2 + $0x8] sm:$0xff]  ;;  %v4706_v35 = vld [vmem:[#allocation2 + $0x20] sm:$0xff] }
  0xed   : > { %365 = vst.msk [vmem:[#allocation2 + $0x51] sm:$0xff] %vm357_vm2, %v348_v19  ;;  %364 = vst.msk [vmem:[#allocation2 + $0x49] sm:$0xff] %vm357_vm2, %v346_v20  ;;  %v481_v23 = vmul.f32 %v479_v13, %v4682_v21  ;;  %v495_v26 = vmul.f32 %v493_v18, %v4682_v21  ;;  %v509_v31 = vmul.f32 %v507_v24, %v4682_v21  ;;  %v745_v18 = vstv %s3952_s16  ;;  %s3964_s16 = sld [smem:[#allocation4 + $0x89]] }
  0xee   : > { %v523_v33 = vmul.f32 %v521_v27, %v4682_v21  ;;  %v537_v37 = vmul.f32 %v535_v28, %v4706_v35  ;;  %v551_v40 = vmul.f32 %v549_v34, %v4706_v35  ;;  %v565_v45 = vmul.f32 %v563_v38, %v4706_v35 }
  0xef   : > { %498 = vrot.lane.b32.xlu0 %v494_v22, %s7732_s13  ;;  %486 = vrot.lane.b32.xlu1 %v481_v23, %s7732_s13  ;;  %v579_v48 = vmul.f32 %v577_v41, %v4706_v35  ;;  %v705_v13 = vmul.f32 %v703_v8, %v4682_v21  ;;  %v719_v17 = vmul.f32 %v717_v11, %v4682_v21  ;;  %v759_v22 = vstv %s3953_s19  ;;  %s4816_s19 = sld [smem:[#allocation4 + $0x4]] }
  0xf0   : > { %v4717_v44 = vld [vmem:[#allocation2 + $0x30] sm:$0xff]  ;;  %v4724_v49 = vld [vmem:[#allocation2 + $0x38] sm:$0xff]  ;;  %v746_v19 = vmul.f32 %v745_v18, %v4674_v14  ;;  %v733_v20 = vmul.f32 %v731_v15, %v4682_v21  ;;  %v760_v23 = vmul.f32 %v759_v22, %v4697_v30  ;;  %v747_v24 = vmul.f32 %v745_v18, %v4682_v21 }
  0xf1   : > { %v592_v46 = vmul.f32 %v591_v42, %v4717_v44  ;;  %v606_v50 = vmul.f32 %v605_v47, %v4717_v44  ;;  %v593_v51 = vmul.f32 %v591_v42, %v4724_v49  ;;  %v620_v53 = vmul.f32 %v619_v52, %v4717_v44  ;;  %v4881_v18 = vld [vmem:[#allocation2 + $0x19] sm:$0xff] }
  0xf2   : > { %v607_v54 = vmul.f32 %v605_v47, %v4724_v49  ;;  %v634_v57 = vmul.f32 %v633_v55, %v4717_v44  ;;  %v621_v59 = vmul.f32 %v619_v52, %v4724_v49  ;;  %v635_v62 = vmul.f32 %v633_v55, %v4724_v49 }
  0xf3   : > { %512 = vrot.lane.b32.xlu0 %v508_v25, %s7732_s13  ;;  %500 = vrot.lane.b32.xlu1 %v495_v26, %s7732_s13  ;;  %v773_v25 = vstv %s3954_s10  ;;  %v761_v26 = vmul.f32 %v759_v22, %v4706_v35  ;;  %v787_v27 = vstv %s3955_s17  ;;  %s4826_s10 = sld [smem:[#allocation4 + $0x28]]  ;;  %s4839_s17 = sld [smem:[#allocation4 + $0x4c]] }
  0xf4   : > { %v4737_v58 = vld [vmem:[#allocation2 + $0x48] sm:$0xff]  ;;  %v4744_v63 = vld [vmem:[#allocation2 + $0x50] sm:$0xff]  ;;  %v774_v14 = vmul.f32 %v773_v25, %v4697_v30  ;;  %v788_v28 = vmul.f32 %v787_v27, %v4697_v30  ;;  %v775_v21 = vmul.f32 %v773_v25, %v4706_v35  ;;  %v857_v41 = vstv %s3960_s11  ;;  %s4898_s11 = sld [smem:[#allocation4 + $0x79]] }
  0xf5   : > { %v648_v60 = vmul.f32 %v647_v56, %v4737_v58  ;;  %v662_v0 = vmul.f32 %v661_v61, %v4737_v58  ;;  %v649_v1 = vmul.f32 %v647_v56, %v4744_v63  ;;  %v676_v3 = vmul.f32 %v675_v2, %v4737_v58 }
  0xf6   : > { %v663_v4 = vmul.f32 %v661_v61, %v4744_v63  ;;  %v690_v6 = vmul.f32 %v689_v5, %v4737_v58  ;;  %v677_v7 = vmul.f32 %v675_v2, %v4744_v63  ;;  %v691_v10 = vmul.f32 %v689_v5, %v4744_v63  ;;  %v4852_v5 = vld [vmem:[#allocation2 + $0x9] sm:$0xff] }
  0xf7   : > { %526 = vrot.lane.b32.xlu0 %v522_v29, %s7732_s13  ;;  %514 = vrot.lane.b32.xlu1 %v509_v31, %s7732_s13  ;;  %v801_v29 = vstv %s3956_s20  ;;  %v858_v42 = vmul.f32 %v857_v41, %v4717_v44  ;;  %v859_v47 = vmul.f32 %v857_v41, %v4724_v49  ;;  %v899_v52 = vstv %s3963_s15  ;;  %s4850_s20 = sld [smem:[#allocation4 + $0x70]]  ;;  %s4935_s15 = sld [smem:[#allocation4 + $0x5e]] }
  0xf8   : > { %v802_v31 = vmul.f32 %v801_v29, %v4697_v30  ;;  %v913_v56 = vstv %s3964_s16  ;;  %s4946_s16 = sld [smem:[#allocation4 + $0x82]] }
  0xfb   : > { %540 = vrot.lane.b32.xlu0 %v536_v32, %s7732_s13  ;;  %528 = vrot.lane.b32.xlu1 %v523_v33, %s7732_s13  ;;  %v789_v32 = vmul.f32 %v787_v27, %v4706_v35  ;;  %v815_v33 = vstv %s3957_s21  ;;  %s4863_s21 = sld [smem:[#allocation4 + $0xd]]  ;;  %v4900_v27 = vld [vmem:[#allocation2 + $0x21] sm:$0xff] }
  0xfc   : > { %v816_v34 = vmul.f32 %v815_v33, %v4717_v44  ;;  %v817_v38 = vmul.f32 %v815_v33, %v4724_v49 }
  0xfd   : > { %v1073_v15 = vstv %s4850_s20  ;;  %s4994_s20 = sld [smem:[#allocation4 + $0x8b]] }
  0xff   : > { %554 = vrot.lane.b32.xlu0 %v550_v36, %s7732_s13  ;;  %542 = vrot.lane.b32.xlu1 %v537_v37, %s7732_s13  ;;  %v803_v36 = vmul.f32 %v801_v29, %v4706_v35  ;;  %v829_v37 = vstv %s3958_s29  ;;  %s4874_s29 = sld [smem:[#allocation4 + $0x31]] }
 0x100   : > { %v830_v30 = vmul.f32 %v829_v37, %v4717_v44  ;;  %v831_v35 = vmul.f32 %v829_v37, %v4724_v49 }
 0x101   : > { %v1087_v22 = vstv %s4863_s21  ;;  %s3997_s21 = sld [smem:[#allocation4 + $0x5]] }
 0x103   : > { %568 = vrot.lane.b32.xlu0 %v564_v39, %s7732_s13  ;;  %556 = vrot.lane.b32.xlu1 %v551_v40, %s7732_s13  ;;  %v843_v39 = vstv %s3959_s30  ;;  %s4887_s30 = sld [smem:[#allocation4 + $0x55]] }
 0x104   : > { %v844_v40 = vmul.f32 %v843_v39, %v4717_v44 }
 0x107   : > { %582 = vrot.lane.b32.xlu0 %v578_v43, %s7732_s13  ;;  %570 = vrot.lane.b32.xlu1 %v565_v45, %s7732_s13  ;;  %v845_v43 = vmul.f32 %v843_v39, %v4724_v49  ;;  %v871_v45 = vstv %s3961_s12  ;;  %s4911_s12 = sld [smem:[#allocation4 + $0x16]] }
 0x10b   : > { %596 = vrot.lane.b32.xlu0 %v592_v46, %s7732_s13  ;;  %584 = vrot.lane.b32.xlu1 %v579_v48, %s7732_s13  ;;  %v872_v46 = vmul.f32 %v871_v45, %v4737_v58  ;;  %v885_v48 = vstv %s3962_s14  ;;  %s4922_s14 = sld [smem:[#allocation4 + $0x3a]] }
 0x10c   : > { %v886_v44 = vmul.f32 %v885_v48, %v4737_v58  ;;  %v887_v55 = vmul.f32 %v885_v48, %v4744_v63 }
 0x10f   : > { %610 = vrot.lane.b32.xlu0 %v606_v50, %s7732_s13  ;;  %598 = vrot.lane.b32.xlu1 %v593_v51, %s7732_s13  ;;  %v873_v51 = vmul.f32 %v871_v45, %v4744_v63 }
 0x111   : > { %v1157_v48 = vstv %s4922_s14  ;;  %s4002_s14 = sld [smem:[#allocation4 + $0x32]] }
 0x113   : > { %624 = vrot.lane.b32.xlu0 %v620_v53, %s7732_s13  ;;  %612 = vrot.lane.b32.xlu1 %v607_v54, %s7732_s13  ;;  %v900_v53 = vmul.f32 %v899_v52, %v4737_v58 }
 0x117   : > { %638 = vrot.lane.b32.xlu0 %v634_v57, %s7732_s13  ;;  %626 = vrot.lane.b32.xlu1 %v621_v59, %s7732_s13  ;;  %v914_v59 = vmul.f32 %v913_v56, %v4737_v58  ;;  %v915_v58 = vmul.f32 %v913_v56, %v4744_v63  ;;  %v1171_v56 = vstv %s4935_s15  ;;  %s4003_s15 = sld [smem:[#allocation4 + $0x56]] }
 0x11b   : > { %652 = vrot.lane.b32.xlu0 %v648_v60, %s7732_s13  ;;  %640 = vrot.lane.b32.xlu1 %v635_v62, %s7732_s13  ;;  %v4833_v60 = vld [vmem:[#allocation2 + $0x1] sm:$0xff]  ;;  %v901_v62 = vmul.f32 %v899_v52, %v4744_v63 }
 0x11f   : > { %666 = vrot.lane.b32.xlu0 %v662_v0, %s7732_s13  ;;  %654 = vrot.lane.b32.xlu1 %v649_v1, %s7732_s13  ;;  %v1031_v0 = vstv %s4816_s19  ;;  %s4959_s19 = sld [smem:[#allocation4 + $0x1f]] }
 0x120   : > { %v1032_v2 = vmul.f32 %v1031_v0, %v4833_v60 }
 0x123   : > { %680 = vrot.lane.b32.xlu0 %v676_v3, %s7732_s13  ;;  %668 = vrot.lane.b32.xlu1 %v663_v4, %s7732_s13  ;;  %v1045_v4 = vstv %s4826_s10  ;;  %s4970_s10 = sld [smem:[#allocation4 + $0x43]] }
 0x127   : > { %694 = vrot.lane.b32.xlu0 %v690_v6, %s7732_s13  ;;  %682 = vrot.lane.b32.xlu1 %v677_v7, %s7732_s13  ;;  %v1046_v7 = vmul.f32 %v1045_v4, %v4833_v60 }
 0x12b   : > { %708 = vrot.lane.b32.xlu0 %v704_v9, %s7736_s18  ;;  %696 = vrot.lane.b32.xlu1 %v691_v10, %s7732_s13  ;;  %v1033_v9 = vmul.f32 %v1031_v0, %v4852_v5  ;;  %v1059_v10 = vstv %s4839_s17  ;;  %s4983_s17 = sld [smem:[#allocation4 + $0x67]] }
 0x12c   : > { %v1060_v11 = vmul.f32 %v1059_v10, %v4833_v60 }
 0x12f   : > { %722 = vrot.lane.b32.xlu0 %v718_v12, %s7736_s18  ;;  %710 = vrot.lane.b32.xlu1 %v705_v13, %s7736_s18  ;;  %v1047_v13 = vmul.f32 %v1045_v4, %v4852_v5 }
 0x133   : > { %736 = vrot.lane.b32.xlu0 %v732_v16, %s7736_s18  ;;  %724 = vrot.lane.b32.xlu1 %v719_v17, %s7736_s18  ;;  %v1074_v17 = vmul.f32 %v1073_v15, %v4833_v60 }
 0x137   : > { %750 = vrot.lane.b32.xlu0 %v746_v19, %s7736_s18  ;;  %738 = vrot.lane.b32.xlu1 %v733_v20, %s7736_s18  ;;  %v1061_v20 = vmul.f32 %v1059_v10, %v4852_v5 }
 0x13b   : > { %764 = vrot.lane.b32.xlu0 %v760_v23, %s7736_s18  ;;  %752 = vrot.lane.b32.xlu1 %v747_v24, %s7736_s18  ;;  %v1088_v24 = vmul.f32 %v1087_v22, %v4881_v18 }
 0x13f   : > { %778 = vrot.lane.b32.xlu0 %v774_v14, %s7736_s18  ;;  %766 = vrot.lane.b32.xlu1 %v761_v26, %s7736_s18  ;;  %v1075_v14 = vmul.f32 %v1073_v15, %v4852_v5  ;;  %v1101_v26 = vstv %s4874_s29  ;;  %s3998_s29 = sld [smem:[#allocation4 + $0x29]] }
 0x140   : > { %v1103_v37 = vmul.f32 %v1101_v26, %v4900_v27 }
 0x143   : > { %792 = vrot.lane.b32.xlu0 %v788_v28, %s7736_s18  ;;  %780 = vrot.lane.b32.xlu1 %v775_v21, %s7736_s18  ;;  %v1102_v21 = vmul.f32 %v1101_v26, %v4881_v18 }
 0x147   : > { %806 = vrot.lane.b32.xlu0 %v802_v31, %s7736_s18  ;;  %794 = vrot.lane.b32.xlu1 %v789_v32, %s7736_s18  ;;  %v1089_v31 = vmul.f32 %v1087_v22, %v4900_v27  ;;  %v1115_v32 = vstv %s4887_s30  ;;  %s3999_s30 = sld [smem:[#allocation4 + $0x4d]] }
 0x148   : > { %v1117_v41 = vmul.f32 %v1115_v32, %v4900_v27 }
 0x14b   : > { %820 = vrot.lane.b32.xlu0 %v816_v34, %s7736_s18  ;;  %808 = vrot.lane.b32.xlu1 %v803_v36, %s7736_s18  ;;  %v1116_v34 = vmul.f32 %v1115_v32, %v4881_v18 }
 0x14f   : > { %834 = vrot.lane.b32.xlu0 %v830_v30, %s7736_s18  ;;  %822 = vrot.lane.b32.xlu1 %v817_v38, %s7736_s18  ;;  %v1129_v30 = vstv %s4898_s11  ;;  %s4000_s11 = sld [smem:[#allocation4 + $0x71]] }
 0x150   : > { %v1130_v39 = vmul.f32 %v1129_v30, %v4881_v18 }
 0x153   : > { %848 = vrot.lane.b32.xlu0 %v844_v40, %s7736_s18  ;;  %836 = vrot.lane.b32.xlu1 %v831_v35, %s7736_s18  ;;  %v4929_v40 = vld [vmem:[#allocation2 + $0x31] sm:$0xff] }
 0x154   : > { %v1158_v52 = vmul.f32 %v1157_v48, %v4929_v40 }
 0x157   : > { %862 = vrot.lane.b32.xlu0 %v858_v42, %s7736_s18  ;;  %850 = vrot.lane.b32.xlu1 %v845_v43, %s7736_s18  ;;  %v1143_v42 = vstv %s4911_s12  ;;  %s4001_s12 = sld [smem:[#allocation4 + $0xe]] }
 0x158   : > { %v1144_v45 = vmul.f32 %v1143_v42, %v4929_v40 }
 0x15b   : > { %876 = vrot.lane.b32.xlu0 %v872_v46, %s7736_s18  ;;  %864 = vrot.lane.b32.xlu1 %v859_v47, %s7736_s18  ;;  %v1131_v47 = vmul.f32 %v1129_v30, %v4900_v27 }
 0x15d   : > { %v4812_v50 = vpop.permute.xlu0 %484 }
 0x15f   : > { %890 = vrot.lane.b32.xlu0 %v886_v44, %s7736_s18  ;;  %878 = vrot.lane.b32.xlu1 %v873_v51, %s7736_s18  ;;  %v4948_v44 = vld [vmem:[#allocation2 + $0x39] sm:$0xff] }
 0x161   : > { %v4820_v49 = vpop.permute.xlu0 %498  ;;  %v4823_v54 = vpop.permute.xlu1 %486 }
 0x163   : > { %904 = vrot.lane.b32.xlu0 %v900_v53, %s7736_s18  ;;  %892 = vrot.lane.b32.xlu1 %v887_v55, %s7736_s18  ;;  %v1145_v55 = vmul.f32 %v1143_v42, %v4948_v44  ;;  %v1241_v42 = vstv %s4994_s20  ;;  %s4008_s20 = sld [smem:[#allocation4 + $0x83]] }
 0x165   : > { %v4830_v57 = vpop.permute.xlu0 %512  ;;  %v4835_v61 = vpop.permute.xlu1 %500 }
 0x167   : > { %918 = vrot.lane.b32.xlu0 %v914_v59, %s7736_s18  ;;  %906 = vrot.lane.b32.xlu1 %v901_v62, %s7736_s18  ;;  %v1172_v62 = vmul.f32 %v1171_v56, %v4929_v40 }
 0x169   : > { %v4843_v1 = vpop.permute.xlu0 %526  ;;  %v4846_v3 = vpop.permute.xlu1 %514 }
 0x16b   : > { %1036 = vrot.lane.b32.xlu0 %v1032_v2, %s7732_s13  ;;  %920 = vrot.lane.b32.xlu1 %v915_v58, %s7736_s18  ;;  %v1159_v2 = vmul.f32 %v1157_v48, %v4948_v44  ;;  %v1185_v58 = vstv %s4946_s16  ;;  %s4004_s16 = sld [smem:[#allocation4 + $0x7a]] }
 0x16c   : > { %v1187_v22 = vmul.f32 %v1185_v58, %v4948_v44 }
 0x16d   : > { %v4856_v6 = vpop.permute.xlu0 %540  ;;  %v4859_v8 = vpop.permute.xlu1 %528 }
 0x16e   : > { %7841 = vst [vmem:[#allocation27_spill] sm:$0xff] %v4859_v8 }
 0x16f   : > { %1050 = vrot.lane.b32.xlu0 %v1046_v7, %s7732_s13  ;;  %1038 = vrot.lane.b32.xlu1 %v1033_v9, %s7732_s13  ;;  %v1186_v7 = vmul.f32 %v1185_v58, %v4929_v40  ;;  %v4977_v9 = vld [vmem:[#allocation2 + $0x49] sm:$0xff] }
 0x171   : > { %v4867_v63 = vpop.permute.xlu0 %554  ;;  %v4870_v12 = vpop.permute.xlu1 %542 }
 0x173   : > { %1064 = vrot.lane.b32.xlu0 %v1060_v11, %s7732_s13  ;;  %1052 = vrot.lane.b32.xlu1 %v1047_v13, %s7732_s13  ;;  %v1173_v11 = vmul.f32 %v1171_v56, %v4948_v44  ;;  %v1199_v13 = vstv %s4959_s19  ;;  %s4005_s19 = sld [smem:[#allocation4 + $0x17]] }
 0x175   : > { %v4878_v16 = vpop.permute.xlu0 %568  ;;  %v4883_v19 = vpop.permute.xlu1 %556 }
 0x177   : > { %1078 = vrot.lane.b32.xlu0 %v1074_v17, %s7732_s13  ;;  %1066 = vrot.lane.b32.xlu1 %v1061_v20, %s7732_s13  ;;  %v1200_v17 = vmul.f32 %v1199_v13, %v4977_v9 }
 0x179   : > { %v4891_v23 = vpop.permute.xlu0 %582  ;;  %v4894_v25 = vpop.permute.xlu1 %570 }
 0x17a   : > { %7842 = vst [vmem:[#allocation28_spill] sm:$0xff] %v4894_v25 }
 0x17b   : > { %1092 = vrot.lane.b32.xlu0 %v1088_v24, %s7732_s13  ;;  %1080 = vrot.lane.b32.xlu1 %v1075_v14, %s7732_s13  ;;  %v1213_v24 = vstv %s4970_s10  ;;  %v4996_v14 = vld [vmem:[#allocation2 + $0x51] sm:$0xff]  ;;  %s4006_s10 = sld [smem:[#allocation4 + $0x3b]] }
 0x17c   : > { %v1201_v32 = vmul.f32 %v1199_v13, %v4996_v14  ;;  %v1243_v58 = vmul.f32 %v1241_v42, %v4996_v14 }
 0x17d   : > { %v4904_v28 = vpop.permute.xlu0 %596  ;;  %v4907_v29 = vpop.permute.xlu1 %584 }
 0x17e   : > { %7843 = vst [vmem:[#allocation29_spill] sm:$0xff] %v4907_v29 }
 0x17f   : > { %1106 = vrot.lane.b32.xlu0 %v1102_v21, %s7732_s13  ;;  %1094 = vrot.lane.b32.xlu1 %v1089_v31, %s7732_s13  ;;  %v1214_v21 = vmul.f32 %v1213_v24, %v4977_v9 }
 0x181   : > { %v4915_v33 = vpop.permute.xlu0 %610  ;;  %v4918_v36 = vpop.permute.xlu1 %598 }
 0x183   : > { %1120 = vrot.lane.b32.xlu0 %v1116_v34, %s7732_s13  ;;  %1108 = vrot.lane.b32.xlu1 %v1103_v37, %s7732_s13  ;;  %v1227_v34 = vstv %s4983_s17  ;;  %s4007_s17 = sld [smem:[#allocation4 + $0x5f]] }
 0x184   : > { %v1228_v30 = vmul.f32 %v1227_v34, %v4977_v9 }
 0x185   : > { %v4926_v38 = vpop.permute.xlu0 %624  ;;  %v4931_v35 = vpop.permute.xlu1 %612 }
 0x187   : > { %1134 = vrot.lane.b32.xlu0 %v1130_v39, %s7732_s13  ;;  %1122 = vrot.lane.b32.xlu1 %v1117_v41, %s7732_s13  ;;  %v1215_v41 = vmul.f32 %v1213_v24, %v4996_v14  ;;  %v1283_v24 = vstv %s3999_s30  ;;  %s5120_s30 = sld [smem:[#allocation4 + $0x68]] }
 0x189   : > { %v4939_v43 = vpop.permute.xlu0 %638  ;;  %v4942_v46 = vpop.permute.xlu1 %626 }
 0x18a   : > { %7844 = vst [vmem:[#allocation30_spill] sm:$0xff] %v4939_v43  ;;  %7845 = vst [vmem:[#allocation31_spill] sm:$0xff] %v4942_v46 }
 0x18b   : > { %1148 = vrot.lane.b32.xlu0 %v1144_v45, %s7732_s13  ;;  %1136 = vrot.lane.b32.xlu1 %v1131_v47, %s7732_s13  ;;  %v1242_v47 = vmul.f32 %v1241_v42, %v4977_v9 }
 0x18d   : > { %v4952_v51 = vpop.permute.xlu0 %652  ;;  %v4955_v53 = vpop.permute.xlu1 %640 }
 0x18e   : > { %7846 = vst [vmem:[#allocation32_spill] sm:$0xff] %v4955_v53 }
 0x18f   : > { %1162 = vrot.lane.b32.xlu0 %v1158_v52, %s7732_s13  ;;  %1150 = vrot.lane.b32.xlu1 %v1145_v55, %s7732_s13  ;;  %v1229_v52 = vmul.f32 %v1227_v34, %v4996_v14  ;;  %v1255_v55 = vstv %s3997_s21  ;;  %s4009_s21 = sld [smem:[#allocation4 + $0x20]] }
 0x191   : > { %v4963_v59 = vpop.permute.xlu0 %666  ;;  %v4966_v0 = vpop.permute.xlu1 %654 }
 0x193   : > { %1176 = vrot.lane.b32.xlu0 %v1172_v62, %s7732_s13  ;;  %1164 = vrot.lane.b32.xlu1 %v1159_v2, %s7732_s13  ;;  %v1256_v62 = vmul.f32 %v1255_v55, %v4833_v60 }
 0x195   : > { %v4974_v4 = vpop.permute.xlu0 %680  ;;  %v4979_v10 = vpop.permute.xlu1 %668 }
 0x196   : > { %7847 = vst [vmem:[#allocation33_spill] sm:$0xff] %v4974_v4  ;;  %7848 = vst [vmem:[#allocation34_spill] sm:$0xff] %v4979_v10 }
 0x197   : > { %1190 = vrot.lane.b32.xlu0 %v1186_v7, %s7732_s13  ;;  %1178 = vrot.lane.b32.xlu1 %v1173_v11, %s7732_s13  ;;  %v1269_v7 = vstv %s3998_s29  ;;  %s4010_s29 = sld [smem:[#allocation4 + $0x44]] }
 0x198   : > { %v1270_v13 = vmul.f32 %v1269_v7, %v4833_v60 }
 0x199   : > { %v4987_v15 = vpop.permute.xlu0 %694  ;;  %v4990_v20 = vpop.permute.xlu1 %682 }
 0x19a   : > { %7849 = vst [vmem:[#allocation35_spill] sm:$0xff] %v4987_v15  ;;  %7850 = vst [vmem:[#allocation36_spill] sm:$0xff] %v4990_v20 }
 0x19b   : > { %1204 = vrot.lane.b32.xlu0 %v1200_v17, %s7732_s13  ;;  %1192 = vrot.lane.b32.xlu1 %v1187_v22, %s7732_s13  ;;  %v1257_v22 = vmul.f32 %v1255_v55, %v4852_v5  ;;  %v1285_v55 = vmul.f32 %v1283_v24, %v4852_v5 }
 0x19d   : > { %v5000_v26 = vpop.permute.xlu0 %708  ;;  %v5003_v31 = vpop.permute.xlu1 %696 }
 0x19e   : > { %7851 = vst [vmem:[#allocation37_spill] sm:$0xff] %v5003_v31 }
 0x19f   : > { %1218 = vrot.lane.b32.xlu0 %v1214_v21, %s7732_s13  ;;  %1206 = vrot.lane.b32.xlu1 %v1201_v32, %s7732_s13  ;;  %v1284_v32 = vmul.f32 %v1283_v24, %v4833_v60 }
 0x1a1   : > { %v5009_v37 = vpop.permute.xlu0 %722  ;;  %v5012_v39 = vpop.permute.xlu1 %710 }
 0x1a3   : > { %1232 = vrot.lane.b32.xlu0 %v1228_v30, %s7732_s13  ;;  %1220 = vrot.lane.b32.xlu1 %v1215_v41, %s7732_s13  ;;  %v1271_v30 = vmul.f32 %v1269_v7, %v4852_v5  ;;  %v1297_v41 = vstv %s4000_s11  ;;  %s5130_s11 = sld [smem:[#allocation4 + $0x8c]] }
 0x1a5   : > { %v5018_v45 = vpop.permute.xlu0 %736  ;;  %v5021_v48 = vpop.permute.xlu1 %724 }
 0x1a6   : > { %7852 = vst [vmem:[#allocation38_spill] sm:$0xff] %v5018_v45  ;;  %7853 = vst [vmem:[#allocation39_spill] sm:$0xff] %v5021_v48 }
 0x1a7   : > { %1246 = vrot.lane.b32.xlu0 %v1242_v47, %s7732_s13  ;;  %1234 = vrot.lane.b32.xlu1 %v1229_v52, %s7732_s13  ;;  %v1298_v47 = vmul.f32 %v1297_v41, %v4833_v60 }
 0x1a9   : > { %v5026_v56 = vpop.permute.xlu0 %750  ;;  %v5029_v2 = vpop.permute.xlu1 %738 }
 0x1aa   : > { %7854 = vst [vmem:[#allocation40_spill] sm:$0xff] %v5026_v56  ;;  %7855 = vst [vmem:[#allocation41_spill] sm:$0xff] %v5029_v2  ;;  %v1381_v2 = vstv %s4006_s10  ;;  %s5200_s10 = sld [smem:[#allocation4 + $0x34]] }
 0x1ab   : > { %1260 = vrot.lane.b32.xlu0 %v1256_v62, %s7736_s18  ;;  %1248 = vrot.lane.b32.xlu1 %v1243_v58, %s7732_s13  ;;  %v1311_v62 = vstv %s4001_s12  ;;  %s5141_s12 = sld [smem:[#allocation4 + $0x7]] }
 0x1ac   : > { %v1312_v7 = vmul.f32 %v1311_v62, %v4881_v18 }
 0x1ad   : > { %v5034_v11 = vpop.permute.xlu0 %764  ;;  %v5037_v17 = vpop.permute.xlu1 %752 }
 0x1ae   : > { %7856 = vst [vmem:[#allocation42_spill] sm:$0xff] %v5037_v17  ;;  %v1367_v17 = vstv %s4005_s19  ;;  %s5189_s19 = sld [smem:[#allocation4 + $0x10]] }
 0x1af   : > { %1274 = vrot.lane.b32.xlu0 %v1270_v13, %s7736_s18  ;;  %1262 = vrot.lane.b32.xlu1 %v1257_v22, %s7736_s18  ;;  %v1299_v22 = vmul.f32 %v1297_v41, %v4852_v5 }
 0x1b1   : > { %v5042_v21 = vpop.permute.xlu0 %778  ;;  %v5045_v34 = vpop.permute.xlu1 %766 }
 0x1b2   : > { %7857 = vst [vmem:[#allocation43_spill] sm:$0xff] %v5042_v21  ;;  %7858 = vst [vmem:[#allocation44_spill] sm:$0xff] %v5045_v34 }
 0x1b3   : > { %1288 = vrot.lane.b32.xlu0 %v1284_v32, %s7736_s18  ;;  %1276 = vrot.lane.b32.xlu1 %v1271_v30, %s7736_s18  ;;  %v1325_v32 = vstv %s4002_s14  ;;  %s5152_s14 = sld [smem:[#allocation4 + $0x2b]] }
 0x1b4   : > { %v1326_v24 = vmul.f32 %v1325_v32, %v4881_v18 }
 0x1b5   : > { %v5050_v42 = vpop.permute.xlu0 %792  ;;  %v5053_v52 = vpop.permute.xlu1 %780 }
 0x1b6   : > { %7859 = vst [vmem:[#allocation45_spill] sm:$0xff] %v5050_v42  ;;  %7860 = vst [vmem:[#allocation46_spill] sm:$0xff] %v5053_v52 }
 0x1b7   : > { %1302 = vrot.lane.b32.xlu0 %v1298_v47, %s7736_s18  ;;  %1290 = vrot.lane.b32.xlu1 %v1285_v55, %s7736_s18  ;;  %v1313_v47 = vmul.f32 %v1311_v62, %v4900_v27  ;;  %v1339_v55 = vstv %s4003_s15  ;;  %s5165_s15 = sld [smem:[#allocation4 + $0x4f]] }
 0x1b8   : > { %v1340_v41 = vmul.f32 %v1339_v55, %v4881_v18 }
 0x1b9   : > { %v5058_v58 = vpop.permute.xlu0 %806  ;;  %v5061_v13 = vpop.permute.xlu1 %794 }
 0x1ba   : > { %7861 = vst [vmem:[#allocation47_spill] sm:$0xff] %v5058_v58  ;;  %7862 = vst [vmem:[#allocation48_spill] sm:$0xff] %v5061_v13  ;;  %v1353_v13 = vstv %s4004_s16  ;;  %s5176_s16 = sld [smem:[#allocation4 + $0x73]] }
 0x1bb   : > { %1316 = vrot.lane.b32.xlu0 %v1312_v7, %s7736_s18  ;;  %1304 = vrot.lane.b32.xlu1 %v1299_v22, %s7736_s18  ;;  %v1327_v22 = vmul.f32 %v1325_v32, %v4900_v27 }
 0x1bd   : > { %v5066_v60 = vpop.permute.xlu0 %820  ;;  %v5069_v30 = vpop.permute.xlu1 %808 }
 0x1be   : > { %7863 = vst [vmem:[#allocation49_spill] sm:$0xff] %v5069_v30 }
 0x1bf   : > { %1330 = vrot.lane.b32.xlu0 %v1326_v24, %s7736_s18  ;;  %1318 = vrot.lane.b32.xlu1 %v1313_v47, %s7736_s18  ;;  %v1354_v24 = vmul.f32 %v1353_v13, %v4881_v18  ;;  %v1341_v47 = vmul.f32 %v1339_v55, %v4900_v27  ;;  %v1382_v55 = vmul.f32 %v1381_v2, %v4929_v40 }
 0x1c1   : > { %v5074_v5 = vpop.permute.xlu0 %834  ;;  %v5077_v7 = vpop.permute.xlu1 %822 }
 0x1c2   : > { %7864 = vst [vmem:[#allocation50_spill] sm:$0xff] %v5074_v5  ;;  %7865 = vst [vmem:[#allocation51_spill] sm:$0xff] %v5077_v7 }
 0x1c3   : > { %1344 = vrot.lane.b32.xlu0 %v1340_v41, %s7736_s18  ;;  %1332 = vrot.lane.b32.xlu1 %v1327_v22, %s7736_s18  ;;  %v1368_v41 = vmul.f32 %v1367_v17, %v4929_v40  ;;  %v1355_v22 = vmul.f32 %v1353_v13, %v4900_v27 }
 0x1c5   : > { %v5082_v62 = vpop.permute.xlu0 %848  ;;  %v5085_v30 = vpop.permute.xlu1 %836 }
 0x1c6   : > { %7866 = vst [vmem:[#allocation52_spill] sm:$0xff] %v5082_v62  ;;  %7867 = vst [vmem:[#allocation53_spill] sm:$0xff] %v5085_v30  ;;  %v1423_v30 = vstv %s4009_s21  ;;  %s5237_s21 = sld [smem:[#allocation4 + $0x19]] }
 0x1c7   : > { %1358 = vrot.lane.b32.xlu0 %v1354_v24, %s7736_s18  ;;  %1346 = vrot.lane.b32.xlu1 %v1341_v47, %s7736_s18  ;;  %v1369_v47 = vmul.f32 %v1367_v17, %v4948_v44 }
 0x1c9   : > { %v5090_v32 = vpop.permute.xlu0 %862  ;;  %v5093_v58 = vpop.permute.xlu1 %850 }
 0x1ca   : > { %7868 = vst [vmem:[#allocation54_spill] sm:$0xff] %v5090_v32  ;;  %7869 = vst [vmem:[#allocation55_spill] sm:$0xff] %v5093_v58  ;;  %v1395_v32 = vstv %s4007_s17  ;;  %v1409_v58 = vstv %s4008_s20  ;;  %s5213_s17 = sld [smem:[#allocation4 + $0x58]]  ;;  %s5224_s20 = sld [smem:[#allocation4 + $0x7c]] }
 0x1cb   : > { %1372 = vrot.lane.b32.xlu0 %v1368_v41, %s7736_s18  ;;  %1360 = vrot.lane.b32.xlu1 %v1355_v22, %s7736_s18  ;;  %v1396_v13 = vmul.f32 %v1395_v32, %v4929_v40  ;;  %v1383_v22 = vmul.f32 %v1381_v2, %v4948_v44 }
 0x1cd   : > { %v5098_v18 = vpop.permute.xlu0 %876  ;;  %v5101_v24 = vpop.permute.xlu1 %864 }
 0x1ce   : > { %7870 = vst [vmem:[#allocation56_spill] sm:$0xff] %v5098_v18  ;;  %7871 = vst [vmem:[#allocation57_spill] sm:$0xff] %v5101_v24 }
 0x1cf   : > { %1386 = vrot.lane.b32.xlu0 %v1382_v55, %s7736_s18  ;;  %1374 = vrot.lane.b32.xlu1 %v1369_v47, %s7736_s18  ;;  %v1410_v55 = vmul.f32 %v1409_v58, %v4929_v40  ;;  %v1397_v47 = vmul.f32 %v1395_v32, %v4948_v44  ;;  %v1411_v40 = vmul.f32 %v1409_v58, %v4948_v44 }
 0x1d0   : > { %v1681_v62 = vstv %s5224_s20  ;;  %s4048_s20 = sld [smem:[#allocation4 + $0x74]] }
 0x1d1   : > { %v5106_v27 = vpop.permute.xlu0 %890  ;;  %v5109_v41 = vpop.permute.xlu1 %878 }
 0x1d2   : > { %7872 = vst [vmem:[#allocation58_spill] sm:$0xff] %v5106_v27  ;;  %7873 = vst [vmem:[#allocation59_spill] sm:$0xff] %v5109_v41 }
 0x1d3   : > { %1400 = vrot.lane.b32.xlu0 %v1396_v13, %s7736_s18  ;;  %1388 = vrot.lane.b32.xlu1 %v1383_v22, %s7736_s18  ;;  %v1424_v13 = vmul.f32 %v1423_v30, %v4977_v9 }
 0x1d5   : > { %v5114_v17 = vpop.permute.xlu0 %904  ;;  %v5117_v24 = vpop.permute.xlu1 %892 }
 0x1d6   : > { %7874 = vst [vmem:[#allocation60_spill] sm:$0xff] %v5114_v17  ;;  %7875 = vst [vmem:[#allocation61_spill] sm:$0xff] %v5117_v24  ;;  %v1437_v17 = vstv %s4010_s29  ;;  %v1451_v24 = vstv %s5120_s30  ;;  %s5248_s29 = sld [smem:[#allocation4 + $0x3d]]  ;;  %s5261_s30 = sld [smem:[#allocation4 + $0x61]] }
 0x1d7   : > { %1414 = vrot.lane.b32.xlu0 %v1410_v55, %s7736_s18  ;;  %1402 = vrot.lane.b32.xlu1 %v1397_v47, %s7736_s18  ;;  %v1438_v55 = vmul.f32 %v1437_v17, %v4977_v9  ;;  %v1452_v58 = vmul.f32 %v1451_v24, %v4977_v9 }
 0x1d9   : > { %v5124_v2 = vpop.permute.xlu0 %918  ;;  %v5127_v22 = vpop.permute.xlu1 %906 }
 0x1da   : > { %7876 = vst [vmem:[#allocation62_spill] sm:$0xff] %v5124_v2  ;;  %7877 = vst [vmem:[#allocation63_spill] sm:$0xff] %v5127_v22  ;;  %v1425_v2 = vmul.f32 %v1423_v30, %v4996_v14  ;;  %v1653_v22 = vstv %s5200_s10  ;;  %s4046_s10 = sld [smem:[#allocation4 + $0x2c]] }
 0x1db   : > { %1428 = vrot.lane.b32.xlu0 %v1424_v13, %s7736_s18  ;;  %1416 = vrot.lane.b32.xlu1 %v1411_v40, %s7736_s18  ;;  %v1439_v40 = vmul.f32 %v1437_v17, %v4996_v14 }
 0x1dc   : > { %v1709_v31 = vstv %s5248_s29  ;;  %s4050_s29 = sld [smem:[#allocation4 + $0x35]] }
 0x1dd   : > { %v5134_v32 = vpop.permute.xlu0 %1036  ;;  %v5137_v47 = vpop.permute.xlu1 %920 }
 0x1de   : > { %7878 = vst [vmem:[#allocation64_spill] sm:$0xff] %v5134_v32  ;;  %7879 = vst [vmem:[#allocation65_spill] sm:$0xff] %v5137_v47  ;;  %v1465_v32 = vstv %s5130_s11  ;;  %v1583_v47 = vstv %s5141_s12  ;;  %s5272_s11 = sld [smem:[#allocation4 + $0x85]]  ;;  %s5285_s12 = sld [smem:[#allocation4 + $0x22]] }
 0x1df   : > { %1442 = vrot.lane.b32.xlu0 %v1438_v55, %s7736_s18  ;;  %1430 = vrot.lane.b32.xlu1 %v1425_v2, %s7736_s18  ;;  %v1466_v2 = vmul.f32 %v1465_v32, %v4977_v9  ;;  %v5159_v55 = vld [vmem:[#allocation2 + $0x2] sm:$0xff]  ;;  %v1467_v9 = vmul.f32 %v1465_v32, %v4996_v14 }
 0x1e1   : > { %v5145_v44 = vpop.permute.xlu0 %1050  ;;  %v5148_v13 = vpop.permute.xlu1 %1038 }
 0x1e2   : > { %7880 = vst [vmem:[#allocation66_spill] sm:$0xff] %v5145_v44  ;;  %7881 = vst [vmem:[#allocation67_spill] sm:$0xff] %v5148_v13  ;;  %v1453_v13 = vmul.f32 %v1451_v24, %v4996_v14  ;;  %v5178_v24 = vld [vmem:[#allocation2 + $0xa] sm:$0xff] }
 0x1e3   : > { %1456 = vrot.lane.b32.xlu0 %v1452_v58, %s7736_s18  ;;  %1444 = vrot.lane.b32.xlu1 %v1439_v40, %s7736_s18  ;;  %v1584_v58 = vmul.f32 %v1583_v47, %v5159_v55 }
 0x1e4   : > { %v1737_v41 = vstv %s5272_s11  ;;  %s4052_s11 = sld [smem:[#allocation4 + $0x7d]] }
 0x1e5   : > { %v5156_v30 = vpop.permute.xlu0 %1064  ;;  %v5161_v44 = vpop.permute.xlu1 %1052 }
 0x1e6   : > { %7882 = vst [vmem:[#allocation68_spill] sm:$0xff] %v5156_v30  ;;  %7883 = vst [vmem:[#allocation69_spill] sm:$0xff] %v5161_v44  ;;  %v1597_v30 = vstv %s5152_s14  ;;  %v1611_v44 = vstv %s5165_s15  ;;  %s5296_s14 = sld [smem:[#allocation4 + $0x46]]  ;;  %s5309_s15 = sld [smem:[#allocation4 + $0x6a]] }
 0x1e7   : > { %1470 = vrot.lane.b32.xlu0 %v1466_v2, %s7736_s18  ;;  %1458 = vrot.lane.b32.xlu1 %v1453_v13, %s7736_s18  ;;  %v1598_v13 = vmul.f32 %v1597_v30, %v5159_v55  ;;  %v1612_v32 = vmul.f32 %v1611_v44, %v5159_v55 }
 0x1e9   : > { %v5169_v17 = vpop.permute.xlu0 %1078  ;;  %v5172_v40 = vpop.permute.xlu1 %1066 }
 0x1ea   : > { %7884 = vst [vmem:[#allocation70_spill] sm:$0xff] %v5169_v17  ;;  %7885 = vst [vmem:[#allocation71_spill] sm:$0xff] %v5172_v40  ;;  %v1585_v40 = vmul.f32 %v1583_v47, %v5178_v24 }
 0x1eb   : > { %1588 = vrot.lane.b32.xlu0 %v1584_v58, %s7732_s13  ;;  %1472 = vrot.lane.b32.xlu1 %v1467_v9, %s7736_s18  ;;  %v1599_v9 = vmul.f32 %v1597_v30, %v5178_v24 }
 0x1ec   : > { %v1765_v52 = vstv %s5296_s14  ;;  %s4054_s14 = sld [smem:[#allocation4 + $0x3e]] }
 0x1ed   : > { %v5182_v2 = vpop.permute.xlu0 %1092  ;;  %v5185_v17 = vpop.permute.xlu1 %1080 }
 0x1ee   : > { %7886 = vst [vmem:[#allocation72_spill] sm:$0xff] %v5182_v2  ;;  %7887 = vst [vmem:[#allocation73_spill] sm:$0xff] %v5185_v17  ;;  %v1625_v2 = vstv %s5176_s16  ;;  %s5320_s16 = sld [smem:[#allocation4 + $0x8e]] }
 0x1ef   : > { %1602 = vrot.lane.b32.xlu0 %v1598_v13, %s7732_s13  ;;  %1590 = vrot.lane.b32.xlu1 %v1585_v40, %s7732_s13  ;;  %v1626_v40 = vmul.f32 %v1625_v2, %v5159_v55  ;;  %v5207_v13 = vld [vmem:[#allocation2 + $0x1a] sm:$0xff] }
 0x1f1   : > { %v5193_v14 = vpop.permute.xlu0 %1106  ;;  %v5196_v58 = vpop.permute.xlu1 %1094 }
 0x1f2   : > { %7888 = vst [vmem:[#allocation74_spill] sm:$0xff] %v5193_v14  ;;  %7889 = vst [vmem:[#allocation75_spill] sm:$0xff] %v5196_v58  ;;  %v1613_v58 = vmul.f32 %v1611_v44, %v5178_v24  ;;  %v1639_v14 = vstv %s5189_s19  ;;  %v5226_v44 = vld [vmem:[#allocation2 + $0x22] sm:$0xff]  ;;  %s4045_s19 = sld [smem:[#allocation4 + $0x8]] }
 0x1f3   : > { %1616 = vrot.lane.b32.xlu0 %v1612_v32, %s7732_s13  ;;  %1604 = vrot.lane.b32.xlu1 %v1599_v9, %s7732_s13  ;;  %v1640_v32 = vmul.f32 %v1639_v14, %v5207_v13 }
 0x1f5   : > { %v5204_v47 = vpop.permute.xlu0 %1120  ;;  %v5209_v17 = vpop.permute.xlu1 %1108 }
 0x1f6   : > { %7890 = vst [vmem:[#allocation76_spill] sm:$0xff] %v5204_v47  ;;  %7891 = vst [vmem:[#allocation77_spill] sm:$0xff] %v5209_v17  ;;  %v1627_v47 = vmul.f32 %v1625_v2, %v5178_v24  ;;  %v1667_v17 = vstv %s5213_s17  ;;  %s4047_s17 = sld [smem:[#allocation4 + $0x50]] }
 0x1f7   : > { %1630 = vrot.lane.b32.xlu0 %v1626_v40, %s7732_s13  ;;  %1618 = vrot.lane.b32.xlu1 %v1613_v58, %s7732_s13  ;;  %v1654_v58 = vmul.f32 %v1653_v22, %v5207_v13 }
 0x1f9   : > { %v5217_v30 = vpop.permute.xlu0 %1134  ;;  %v5220_v9 = vpop.permute.xlu1 %1122 }
 0x1fa   : > { %7892 = vst [vmem:[#allocation78_spill] sm:$0xff] %v5217_v30  ;;  %7893 = vst [vmem:[#allocation79_spill] sm:$0xff] %v5220_v9  ;;  %v1641_v9 = vmul.f32 %v1639_v14, %v5226_v44 }
 0x1fb   : > { %1644 = vrot.lane.b32.xlu0 %v1640_v32, %s7732_s13  ;;  %1632 = vrot.lane.b32.xlu1 %v1627_v47, %s7732_s13  ;;  %v1668_v47 = vmul.f32 %v1667_v17, %v5207_v13 }
 0x1fd   : > { %v5230_v40 = vpop.permute.xlu0 %1148  ;;  %v5233_v30 = vpop.permute.xlu1 %1136 }
 0x1fe   : > { %7894 = vst [vmem:[#allocation80_spill] sm:$0xff] %v5230_v40  ;;  %7895 = vst [vmem:[#allocation81_spill] sm:$0xff] %v5233_v30  ;;  %v1655_v40 = vmul.f32 %v1653_v22, %v5226_v44 }
 0x1ff   : > { %1658 = vrot.lane.b32.xlu0 %v1654_v58, %s7732_s13  ;;  %1646 = vrot.lane.b32.xlu1 %v1641_v9, %s7732_s13  ;;  %v1682_v9 = vmul.f32 %v1681_v62, %v5207_v13  ;;  %v5255_v58 = vld [vmem:[#allocation2 + $0x32] sm:$0xff] }
 0x201   : > { %v5241_v2 = vpop.permute.xlu0 %1162  ;;  %v5244_v32 = vpop.permute.xlu1 %1150 }
 0x202   : > { %7896 = vst [vmem:[#allocation82_spill] sm:$0xff] %v5241_v2  ;;  %7897 = vst [vmem:[#allocation83_spill] sm:$0xff] %v5244_v32  ;;  %v1669_v32 = vmul.f32 %v1667_v17, %v5226_v44  ;;  %v1695_v2 = vstv %s5237_s21  ;;  %v5274_v17 = vld [vmem:[#allocation2 + $0x3a] sm:$0xff]  ;;  %s4049_s21 = sld [smem:[#allocation4 + $0x11]] }
 0x203   : > { %1672 = vrot.lane.b32.xlu0 %v1668_v47, %s7732_s13  ;;  %1660 = vrot.lane.b32.xlu1 %v1655_v40, %s7732_s13  ;;  %v1696_v40 = vmul.f32 %v1695_v2, %v5255_v58 }
 0x205   : > { %v5252_v14 = vpop.permute.xlu0 %1176  ;;  %v5257_v30 = vpop.permute.xlu1 %1164 }
 0x206   : > { %7898 = vst [vmem:[#allocation84_spill] sm:$0xff] %v5252_v14  ;;  %7899 = vst [vmem:[#allocation85_spill] sm:$0xff] %v5257_v30  ;;  %v1683_v14 = vmul.f32 %v1681_v62, %v5226_v44  ;;  %v1723_v30 = vstv %s5261_s30  ;;  %s4051_s30 = sld [smem:[#allocation4 + $0x59]] }
 0x207   : > { %1686 = vrot.lane.b32.xlu0 %v1682_v9, %s7732_s13  ;;  %1674 = vrot.lane.b32.xlu1 %v1669_v32, %s7732_s13  ;;  %v1710_v32 = vmul.f32 %v1709_v31, %v5255_v58 }
 0x209   : > { %v5265_v22 = vpop.permute.xlu0 %1190  ;;  %v5268_v47 = vpop.permute.xlu1 %1178 }
 0x20a   : > { %7900 = vst [vmem:[#allocation86_spill] sm:$0xff] %v5265_v22  ;;  %7901 = vst [vmem:[#allocation87_spill] sm:$0xff] %v5268_v47  ;;  %v1697_v47 = vmul.f32 %v1695_v2, %v5274_v17 }
 0x20b   : > { %1700 = vrot.lane.b32.xlu0 %v1696_v40, %s7732_s13  ;;  %1688 = vrot.lane.b32.xlu1 %v1683_v14, %s7732_s13  ;;  %v1724_v14 = vmul.f32 %v1723_v30, %v5255_v58 }
 0x20d   : > { %v5278_v9 = vpop.permute.xlu0 %1204  ;;  %v5281_v22 = vpop.permute.xlu1 %1192 }
 0x20e   : > { %7902 = vst [vmem:[#allocation88_spill] sm:$0xff] %v5278_v9  ;;  %7903 = vst [vmem:[#allocation89_spill] sm:$0xff] %v5281_v22  ;;  %v1711_v9 = vmul.f32 %v1709_v31, %v5274_v17 }
 0x20f   : > { %1714 = vrot.lane.b32.xlu0 %v1710_v32, %s7732_s13  ;;  %1702 = vrot.lane.b32.xlu1 %v1697_v47, %s7732_s13  ;;  %v1738_v47 = vmul.f32 %v1737_v41, %v5255_v58  ;;  %v5303_v32 = vld [vmem:[#allocation2 + $0x4a] sm:$0xff] }
 0x211   : > { %v5289_v62 = vpop.permute.xlu0 %1218  ;;  %v5292_v40 = vpop.permute.xlu1 %1206 }
 0x212   : > { %7904 = vst [vmem:[#allocation90_spill] sm:$0xff] %v5289_v62  ;;  %7905 = vst [vmem:[#allocation91_spill] sm:$0xff] %v5292_v40  ;;  %v1725_v40 = vmul.f32 %v1723_v30, %v5274_v17  ;;  %v1751_v62 = vstv %s5285_s12  ;;  %v5322_v30 = vld [vmem:[#allocation2 + $0x52] sm:$0xff]  ;;  %s4053_s12 = sld [smem:[#allocation4 + $0x1a]] }
 0x213   : > { %1728 = vrot.lane.b32.xlu0 %v1724_v14, %s7732_s13  ;;  %1716 = vrot.lane.b32.xlu1 %v1711_v9, %s7732_s13  ;;  %v1752_v9 = vmul.f32 %v1751_v62, %v5303_v32 }
 0x215   : > { %v5300_v2 = vpop.permute.xlu0 %1232  ;;  %v5305_v22 = vpop.permute.xlu1 %1220 }
 0x216   : > { %7906 = vst [vmem:[#allocation92_spill] sm:$0xff] %v5300_v2  ;;  %7907 = vst [vmem:[#allocation93_spill] sm:$0xff] %v5305_v22  ;;  %v1739_v2 = vmul.f32 %v1737_v41, %v5274_v17  ;;  %v1779_v22 = vstv %s5309_s15  ;;  %s4055_s15 = sld [smem:[#allocation4 + $0x62]] }
 0x217   : > { %1742 = vrot.lane.b32.xlu0 %v1738_v47, %s7732_s13  ;;  %1730 = vrot.lane.b32.xlu1 %v1725_v40, %s7732_s13  ;;  %v1766_v40 = vmul.f32 %v1765_v52, %v5303_v32 }
 0x219   : > { %v5313_v31 = vpop.permute.xlu0 %1246  ;;  %v5316_v14 = vpop.permute.xlu1 %1234 }
 0x21a   : > { %7908 = vst [vmem:[#allocation94_spill] sm:$0xff] %v5313_v31  ;;  %7909 = vst [vmem:[#allocation95_spill] sm:$0xff] %v5316_v14  ;;  %v1753_v14 = vmul.f32 %v1751_v62, %v5322_v30 }
 0x21b   : > { %1756 = vrot.lane.b32.xlu0 %v1752_v9, %s7732_s13  ;;  %1744 = vrot.lane.b32.xlu1 %v1739_v2, %s7732_s13  ;;  %v1780_v9 = vmul.f32 %v1779_v22, %v5303_v32  ;;  %v1767_v2 = vmul.f32 %v1765_v52, %v5322_v30 }
 0x21d   : > { %v5326_v47 = vpop.permute.xlu0 %1260  ;;  %v5329_v31 = vpop.permute.xlu1 %1248 }
 0x21e   : > { %7910 = vst [vmem:[#allocation96_spill] sm:$0xff] %v5326_v47  ;;  %7911 = vst [vmem:[#allocation97_spill] sm:$0xff] %v5329_v31  ;;  %v1793_v47 = vstv %s5320_s16  ;;  %s5422_s16 = sld [smem:[#allocation4 + $0x86]] }
 0x21f   : > { %1770 = vrot.lane.b32.xlu0 %v1766_v40, %s7732_s13  ;;  %1758 = vrot.lane.b32.xlu1 %v1753_v14, %s7732_s13  ;;  %v1794_v40 = vmul.f32 %v1793_v47, %v5303_v32  ;;  %v1781_v14 = vmul.f32 %v1779_v22, %v5322_v30 }
 0x221   : > { %v5335_v41 = vpop.permute.xlu0 %1274  ;;  %v5338_v56 = vpop.permute.xlu1 %1262 }
 0x222   : > { %7912 = vst [vmem:[#allocation98_spill] sm:$0xff] %v5335_v41  ;;  %7913 = vst [vmem:[#allocation99_spill] sm:$0xff] %v5338_v56  ;;  %v1807_v41 = vstv %s4045_s19  ;;  %s5432_s19 = sld [smem:[#allocation4 + $0x23]] }
 0x223   : > { %1784 = vrot.lane.b32.xlu0 %v1780_v9, %s7732_s13  ;;  %1772 = vrot.lane.b32.xlu1 %v1767_v2, %s7732_s13  ;;  %v1808_v9 = vmul.f32 %v1807_v41, %v5159_v55  ;;  %v1795_v2 = vmul.f32 %v1793_v47, %v5322_v30 }
 0x225   : > { %v5344_v62 = vpop.permute.xlu0 %1288  ;;  %v5347_v31 = vpop.permute.xlu1 %1276 }
 0x226   : > { %7914 = vst [vmem:[#allocation100_spill] sm:$0xff] %v5344_v62  ;;  %7915 = vst [vmem:[#allocation101_spill] sm:$0xff] %v5347_v31  ;;  %v1821_v62 = vstv %s4046_s10  ;;  %s5443_s10 = sld [smem:[#allocation4 + $0x47]] }
 0x227   : > { %1798 = vrot.lane.b32.xlu0 %v1794_v40, %s7732_s13  ;;  %1786 = vrot.lane.b32.xlu1 %v1781_v14, %s7732_s13  ;;  %v1822_v40 = vmul.f32 %v1821_v62, %v5159_v55  ;;  %v1809_v14 = vmul.f32 %v1807_v41, %v5178_v24 }
 0x229   : > { %v5352_v52 = vpop.permute.xlu0 %1302  ;;  %v5355_v56 = vpop.permute.xlu1 %1290 }
 0x22a   : > { %7916 = vst [vmem:[#allocation102_spill] sm:$0xff] %v5352_v52  ;;  %7917 = vst [vmem:[#allocation103_spill] sm:$0xff] %v5355_v56  ;;  %v1835_v52 = vstv %s4047_s17  ;;  %s5454_s17 = sld [smem:[#allocation4 + $0x6b]] }
 0x22b   : > { %1812 = vrot.lane.b32.xlu0 %v1808_v9, %s7736_s18  ;;  %1800 = vrot.lane.b32.xlu1 %v1795_v2, %s7732_s13  ;;  %v1836_v9 = vmul.f32 %v1835_v52, %v5159_v55  ;;  %v1823_v2 = vmul.f32 %v1821_v62, %v5178_v24  ;;  %s5486_s13 = sld [smem:[#allocation4 + $0x51]] }
 0x22d   : > { %v5360_v22 = vpop.permute.xlu0 %1316  ;;  %v5363_v31 = vpop.permute.xlu1 %1304 }
 0x22e   : > { %7918 = vst [vmem:[#allocation104_spill] sm:$0xff] %v5360_v22  ;;  %7919 = vst [vmem:[#allocation105_spill] sm:$0xff] %v5363_v31  ;;  %v1849_v22 = vstv %s4048_s20  ;;  %s5456_s20 = sld [smem:[#allocation7]] }
 0x22f   : > { %1826 = vrot.lane.b32.xlu0 %v1822_v40, %s7736_s18  ;;  %1814 = vrot.lane.b32.xlu1 %v1809_v14, %s7736_s18  ;;  %v1850_v40 = vmul.f32 %v1849_v22, %v5159_v55  ;;  %v1837_v14 = vmul.f32 %v1835_v52, %v5178_v24 }
 0x231   : > { %v5368_v47 = vpop.permute.xlu0 %1330  ;;  %v5371_v56 = vpop.permute.xlu1 %1318  ;;  %7949 = sst [smem:[#allocation135_spill]] %s5486_s13  ;;  %s5602_s13 = sld [smem:[#allocation4 + $0x8a]] }
 0x232   : > { %7920 = vst [vmem:[#allocation106_spill] sm:$0xff] %v5368_v47  ;;  %7921 = vst [vmem:[#allocation107_spill] sm:$0xff] %v5371_v56  ;;  %v1863_v47 = vstv %s4049_s21  ;;  %s5459_s21 = sld [smem:[#allocation4]] }
 0x233   : > { %1840 = vrot.lane.b32.xlu0 %v1836_v9, %s7736_s18  ;;  %1828 = vrot.lane.b32.xlu1 %v1823_v2, %s7736_s18  ;;  %v1864_v9 = vmul.f32 %v1863_v47, %v5207_v13  ;;  %v1851_v2 = vmul.f32 %v1849_v22, %v5178_v24 }
 0x234   : > { %7940 = sst [smem:[#allocation126_spill]] %s5456_s20  ;;  %s5591_s20 = sld [smem:[#allocation4 + $0x1e]] }
 0x235   : > { %v5376_v41 = vpop.permute.xlu0 %1344  ;;  %v5379_v31 = vpop.permute.xlu1 %1332  ;;  %s7995_s2 = sld [smem:[#allocation126_spill]] }
 0x236   : > { %7922 = vst [vmem:[#allocation108_spill] sm:$0xff] %v5376_v41  ;;  %7923 = vst [vmem:[#allocation109_spill] sm:$0xff] %v5379_v31  ;;  %v1877_v41 = vstv %s4050_s29  ;;  %v1919_v31 = vstv %s4053_s12  ;;  %s5461_s29 = sld [smem:[#allocation4 + $0x24]]  ;;  %s5471_s12 = sld [smem:[#allocation4 + $0x48]] }
 0x237   : > { %1854 = vrot.lane.b32.xlu0 %v1850_v40, %s7736_s18  ;;  %1842 = vrot.lane.b32.xlu1 %v1837_v14, %s7736_s18  ;;  %v1878_v52 = vmul.f32 %v1877_v41, %v5207_v13  ;;  %v1865_v14 = vmul.f32 %v1863_v47, %v5226_v44 }
 0x239   : > { %v5384_v62 = vpop.permute.xlu0 %1358  ;;  %v5387_v56 = vpop.permute.xlu1 %1346 }
 0x23a   : > { %7924 = vst [vmem:[#allocation110_spill] sm:$0xff] %v5384_v62  ;;  %7925 = vst [vmem:[#allocation111_spill] sm:$0xff] %v5387_v56  ;;  %v1891_v62 = vstv %s4051_s30  ;;  %v1905_v56 = vstv %s4052_s11  ;;  %s5464_s30 = sld [smem:[#allocation4 + $0x9]] }
 0x23b   : > { %1868 = vrot.lane.b32.xlu0 %v1864_v9, %s7736_s18  ;;  %1856 = vrot.lane.b32.xlu1 %v1851_v2, %s7736_s18  ;;  %v1892_v22 = vmul.f32 %v1891_v62, %v5207_v13  ;;  %v1879_v2 = vmul.f32 %v1877_v41, %v5226_v44  ;;  %s5466_s11 = sld [smem:[#allocation7 + $0x1]] }
 0x23c   : > { %7941 = sst [smem:[#allocation127_spill]] %s5461_s29  ;;  %s5593_s29 = sld [smem:[#allocation4 + $0x42]] }
 0x23d   : > { %v5392_v55 = vpop.permute.xlu0 %1372  ;;  %v5395_v40 = vpop.permute.xlu1 %1360  ;;  %7945 = sst [smem:[#allocation131_spill]] %s5471_s12  ;;  %s5620_s12 = sld [smem:[#allocation4 + $0x60]] }
 0x23e   : > { %7926 = vst [vmem:[#allocation112_spill] sm:$0xff] %v5392_v55  ;;  %7927 = vst [vmem:[#allocation113_spill] sm:$0xff] %v5395_v40  ;;  %s7994_s27 = sld [smem:[#allocation127_spill]]  ;;  %s7999_s25 = sld [smem:[#allocation131_spill]] }
 0x23f   : > { %1882 = vrot.lane.b32.xlu0 %v1878_v52, %s7736_s18  ;;  %1870 = vrot.lane.b32.xlu1 %v1865_v14, %s7736_s18  ;;  %v1906_v52 = vmul.f32 %v1905_v56, %v5207_v13  ;;  %v1893_v14 = vmul.f32 %v1891_v62, %v5226_v44 }
 0x240   : > { %7942 = sst [smem:[#allocation128_spill]] %s5464_s30  ;;  %s5586_s30 = sld [smem:[#allocation4 + $0x7b]] }
 0x241   : > { %v5400_v24 = vpop.permute.xlu0 %1386  ;;  %v5403_v9 = vpop.permute.xlu1 %1374  ;;  %7943 = sst [smem:[#allocation129_spill]] %s5466_s11 }
 0x242   : > { %7928 = vst [vmem:[#allocation114_spill] sm:$0xff] %v5400_v24  ;;  %7929 = vst [vmem:[#allocation115_spill] sm:$0xff] %v5403_v9  ;;  %s7984_s11 = sld [smem:[#allocation151_spill]] }
 0x243   : > { %1896 = vrot.lane.b32.xlu0 %v1892_v22, %s7736_s18  ;;  %1884 = vrot.lane.b32.xlu1 %v1879_v2, %s7736_s18  ;;  %v1920_v22 = vmul.f32 %v1919_v31, %v5255_v58  ;;  %v1907_v2 = vmul.f32 %v1905_v56, %v5226_v44  ;;  %7992 = sst [smem:[#allocation151_spill]] %s5628_s5  ;;  %s8022_s5 = sld [smem:[#allocation144_spill]] }
 0x244   : > { %v8011_v42 = vstv %s7999_s25  ;;  %v8028_v43 = vstv %s7999_s25  ;;  %s8040_s25 = sld [smem:[#allocation145_spill]] }
 0x245   : > { %v5408_v47 = vpop.permute.xlu0 %1400  ;;  %v5411_v40 = vpop.permute.xlu1 %1388 }
 0x246   : > { %7930 = vst [vmem:[#allocation116_spill] sm:$0xff] %v5408_v47  ;;  %7931 = vst [vmem:[#allocation117_spill] sm:$0xff] %v5411_v40  ;;  %v1933_v47 = vstv %s4054_s14  ;;  %v1975_v40 = vstv %s5432_s19  ;;  %s5477_s14 = sld [smem:[#allocation4 + $0x8f]]  ;;  %s5484_s19 = sld [smem:[#allocation7 + $0x2]] }
 0x247   : > { %1910 = vrot.lane.b32.xlu0 %v1906_v52, %s7736_s18  ;;  %1898 = vrot.lane.b32.xlu1 %v1893_v14, %s7736_s18  ;;  %v1934_v62 = vmul.f32 %v1933_v47, %v5255_v58  ;;  %v1921_v14 = vmul.f32 %v1919_v31, %v5274_v17  ;;  %7980 = sst [smem:[#allocation165_spill]] %s5586_s30 }
 0x249   : > { %v5416_v41 = vpop.permute.xlu0 %1414  ;;  %v5419_v9 = vpop.permute.xlu1 %1402 }
 0x24a   : > { %7932 = vst [vmem:[#allocation118_spill] sm:$0xff] %v5416_v41  ;;  %7933 = vst [vmem:[#allocation119_spill] sm:$0xff] %v5419_v9  ;;  %v1947_v41 = vstv %s4055_s15  ;;  %v1961_v9 = vstv %s5422_s16  ;;  %s5479_s15 = sld [smem:[#allocation4 + $0x12]]  ;;  %s5481_s16 = sld [smem:[#allocation4 + $0x2d]] }
 0x24b   : > { %1924 = vrot.lane.b32.xlu0 %v1920_v22, %s7736_s18  ;;  %1912 = vrot.lane.b32.xlu1 %v1907_v2, %s7736_s18  ;;  %v1948_v44 = vmul.f32 %v1947_v41, %v5255_v58  ;;  %v1935_v2 = vmul.f32 %v1933_v47, %v5274_v17  ;;  %v1976_v47 = vmul.f32 %v1975_v40, %v5303_v32 }
 0x24c   : > { %7948 = sst [smem:[#allocation134_spill]] %s5484_s19  ;;  %s7981_s19 = sld [smem:[#allocation152_spill]] }
 0x24d   : > { %v5426_v13 = vpop.permute.xlu0 %1428  ;;  %v5429_v52 = vpop.permute.xlu1 %1416  ;;  %7987 = sst [smem:[#allocation152_spill]] %s5610_s1  ;;  %s8012_s1 = sld [smem:[#allocation140_spill]] }
 0x24e   : > { %7934 = vst [vmem:[#allocation120_spill] sm:$0xff] %v5426_v13  ;;  %7935 = vst [vmem:[#allocation121_spill] sm:$0xff] %v5429_v52  ;;  %v1949_v52 = vmul.f32 %v1947_v41, %v5274_v17 }
 0x24f   : > { %1938 = vrot.lane.b32.xlu0 %v1934_v62, %s7736_s18  ;;  %1926 = vrot.lane.b32.xlu1 %v1921_v14, %s7736_s18  ;;  %v1962_v62 = vmul.f32 %v1961_v9, %v5255_v58 }
 0x250   : > { %7947 = sst [smem:[#allocation133_spill]] %s5481_s16  ;;  %s5600_s16 = sld [smem:[#allocation4 + $0x66]]  ;;  %v8010_v27 = vstv %s5479_s15 }
 0x251   : > { %v5436_v56 = vpop.permute.xlu0 %1442  ;;  %v5439_v22 = vpop.permute.xlu1 %1430  ;;  %s8004_s7 = sld [smem:[#allocation133_spill]] }
 0x252   : > { %7936 = vst [vmem:[#allocation122_spill] sm:$0xff] %v5436_v56  ;;  %7937 = vst [vmem:[#allocation123_spill] sm:$0xff] %v5439_v22 }
 0x253   : > { %1952 = vrot.lane.b32.xlu0 %v1948_v44, %s7736_s18  ;;  %1940 = vrot.lane.b32.xlu1 %v1935_v2, %s7736_s18  ;;  %v1963_v44 = vmul.f32 %v1961_v9, %v5274_v17  ;;  %v1989_v2 = vstv %s5443_s10  ;;  %s5496_s10 = sld [smem:[#allocation4 + $0x1b]] }
 0x254   : > { %v1990_v9 = vmul.f32 %v1989_v2, %v5303_v32 }
 0x255   : > { %v5447_v31 = vpop.permute.xlu0 %1456  ;;  %v5450_v14 = vpop.permute.xlu1 %1444 }
 0x256   : > { %7938 = vst [vmem:[#allocation124_spill] sm:$0xff] %v5447_v31  ;;  %7939 = vst [vmem:[#allocation125_spill] sm:$0xff] %v5450_v14  ;;  %v7998_v31 = vstv %s7994_s27  ;;  %s8016_s27 = sld [smem:[#allocation135_spill]] }
 0x257   : > { %1966 = vrot.lane.b32.xlu0 %v1962_v62, %s7736_s18  ;;  %1954 = vrot.lane.b32.xlu1 %v1949_v52, %s7736_s18  ;;  %v1977_v62 = vmul.f32 %v1975_v40, %v5322_v30  ;;  %v8009_v55 = vmov %v7998_v31  ;;  %v8014_v7 = vstv %s8004_s7  ;;  %v8024_v5 = vstv %s8004_s7  ;;  %s8033_s7 = sld [smem:[#allocation136_spill]] }
 0x259   : > { %v5468_v58 = vpop.permute.xlu0 %1470  ;;  %v5473_v41 = vpop.permute.xlu1 %1458  ;;  %7953 = sst [smem:[#allocation139_spill]] %s5496_s10 }
 0x25a   : > { %7944 = vst [vmem:[#allocation130_spill] sm:$0xff] %v5468_v58  ;;  %7946 = vst [vmem:[#allocation132_spill] sm:$0xff] %v5473_v41  ;;  %s7997_s10 = sld [smem:[#allocation128_spill]] }
 0x25b   : > { %1980 = vrot.lane.b32.xlu0 %v1976_v47, %s7736_s18  ;;  %1968 = vrot.lane.b32.xlu1 %v1963_v44, %s7736_s18  ;;  %v2003_v47 = vstv %s5454_s17  ;;  %s5506_s18 = sld [smem:[#allocation4 + $0x75]]  ;;  %s5521_s17 = sld [smem:[#allocation4 + $0x3]] }
 0x25c   : > { %v2004_v40 = vmul.f32 %v2003_v47, %v5303_v32  ;;  %s8008_s30 = sld [smem:[#allocation139_spill]]  ;;  %v8027_v34 = vstv %s8016_s27 }
 0x25d   : > { %v5493_v17 = vpop.permute.xlu0 %1588  ;;  %v5500_v52 = vpop.permute.xlu1 %1472 }
 0x25e   : > { %7952 = vst [vmem:[#allocation138_spill] sm:$0xff] %v5493_v17  ;;  %7955 = vst [vmem:[#allocation141_spill] sm:$0xff] %v5500_v52  ;;  %v2017_v52 = vstv %s5477_s14  ;;  %s5546_s14 = sld [smem:[#allocation4 + $0x6]] }
 0x25f   : > { %1994 = vrot.lane.b32.xlu0 %v1990_v9, %s7958_s4  ;;  %1982 = vrot.lane.b32.xlu1 %v1977_v62, %s7958_s4  ;;  %v1991_v9 = vmul.f32 %v1989_v2, %v5322_v30  ;;  %v2018_v2 = vmul.f32 %v2017_v52, %v5303_v32  ;;  %v2019_v32 = vmul.f32 %v2017_v52, %v5322_v30 }
 0x260   : > { %v8003_v14 = vstv %s7997_s10  ;;  %s8019_s10 = sld [smem:[#allocation137_spill]] }
 0x261   : > { %7957 = sst [smem:[#allocation143_spill]] %s5506_s18  ;;  %v5518_v44 = vpop.permute.xlu0 %1602  ;;  %v5525_v17 = vpop.permute.xlu1 %1590  ;;  %s5626_s18 = sld [smem:[#allocation4 + $0x21]]  ;;  %v8006_v24 = vmov %v8003_v14 }
 0x262   : > { %7962 = vst [vmem:[#allocation147_spill] sm:$0xff] %v5518_v44  ;;  %7964 = vst [vmem:[#allocation149_spill] sm:$0xff] %v5525_v17  ;;  %v2005_v17 = vmul.f32 %v2003_v47, %v5322_v30 }
 0x263   : > { %2008 = vrot.lane.b32.xlu0 %v2004_v40, %s7958_s4  ;;  %1996 = vrot.lane.b32.xlu1 %v1991_v9, %s7958_s4  ;;  %v383_v9 = vstv %s5459_s21  ;;  %s5584_s21 = sld [smem:[#allocation4 + $0x81]] }
 0x264   : > { %7971 = sst [smem:[#allocation156_spill]] %s5546_s14  ;;  %s5566_s14 = sld [smem:[#allocation4 + $0x57]] }
 0x265   : > { %v5543_v62 = vpop.permute.xlu0 %1616  ;;  %v5550_v40 = vpop.permute.xlu1 %1604 }
 0x266   : > { %7970 = vst [vmem:[#allocation155_spill] sm:$0xff] %v5543_v62  ;;  %7973 = vst [vmem:[#allocation158_spill] sm:$0xff] %v5550_v40  ;;  %v4306_v40 = vld [vmem:[#allocation2] sm:$0xff] }
 0x267   : > { %2022 = vrot.lane.b32.xlu0 %v2018_v2, %s7958_s4  ;;  %2010 = vrot.lane.b32.xlu1 %v2005_v17, %s7958_s4  ;;  %v390_v22 = vmul.f32 %v4306_v40, %v7998_v31  ;;  %v396_v52 = vmul.f32 %v4306_v40, %v8011_v42  ;;  %v8018_v42 = vstv %s8008_s30  ;;  %v4312_v31 = vld [vmem:[#allocation2 + $0x38] sm:$0xff] }
 0x269   : > { %v5568_v47 = vpop.permute.xlu0 %1630  ;;  %v5577_v17 = vpop.permute.xlu1 %1618 }
 0x26a   : > { %7977 = sst [smem:[#allocation162_spill]] %s5566_s14  ;;  %7978 = vst [vmem:[#allocation163_spill] sm:$0xff] %v5568_v47  ;;  %7979 = vst [vmem:[#allocation164_spill] sm:$0xff] %v5577_v17  ;;  %v4307_v47 = vld [vmem:[#allocation2 + $0x8] sm:$0xff]  ;;  %s8002_s14 = sld [smem:[#allocation129_spill]]  ;;  %v4308_v17 = vld [vmem:[#allocation2 + $0x18] sm:$0xff] }
 0x26b   : > { %2024 = vrot.lane.b32.xlu1 %v2019_v32, %s7958_s4  ;;  %s7985_s4 = sld [smem:[#allocation154_spill]]  ;;  %v384_v32 = vmul.f32 %v4306_v40, %v383_v9  ;;  %v385_v2 = vmul.f32 %v4307_v47, %v383_v9  ;;  %v391_v20 = vmul.f32 %v4307_v47, %v8009_v55  ;;  %v414_v48 = vmul.f32 %v4308_v17, %v8014_v7 }
 0x26c   : > { %v420_v10 = vmul.f32 %v4308_v17, %v8027_v34  ;;  %v8036_v34 = vstv %s8022_s5  ;;  %s8087_s5 = sld [smem:[#allocation150_spill]] }
 0x26d   : > { %v5604_v58 = vpop.permute.xlu0 %1644  ;;  %v5614_v41 = vpop.permute.xlu1 %1632 }
 0x26e   : > { %7983 = vst [vmem:[#allocation166_spill] sm:$0xff] %v5604_v58  ;;  %7989 = vst [vmem:[#allocation167_spill] sm:$0xff] %v5614_v41  ;;  %v408_v41 = vmul.f32 %v4308_v17, %v8003_v14 }
 0x270   : > { %v8013_v53 = vstv %s8002_s14  ;;  %s8034_s14 = sld [smem:[#allocation143_spill]] }
 0x271   : > { %v5638_v30 = vpop.permute.xlu0 %1658  ;;  %v5645_v62 = vpop.permute.xlu1 %1646 }
 0x272   : > { %7993 = vst [vmem:[#allocation168_spill] sm:$0xff] %v5638_v30  ;;  %7996 = vst [vmem:[#allocation169_spill] sm:$0xff] %v5645_v62  ;;  %v8001_v30 = vstv %s7995_s2  ;;  %v4309_v62 = vld [vmem:[#allocation2 + $0x20] sm:$0xff]  ;;  %s8015_s2 = sld [smem:[#allocation134_spill]] }
 0x273   : > { %v386_v58 = vadd.f32 %v384_v32, %v8001_v30  ;;  %v409_v9 = vmul.f32 %v4309_v62, %v8006_v24  ;;  %v8007_v13 = vmov %v8001_v30  ;;  %v4310_v32 = vld [vmem:[#allocation2 + $0x30] sm:$0xff]  ;;  %v392_v24 = vadd.f32 %v390_v22, %v8013_v53 }
 0x274   : > { %v432_v14 = vmul.f32 %v4310_v32, %v8010_v27  ;;  %v4311_v27 = vld [vmem:[#allocation2 + $0x48] sm:$0xff] }
 0x275   : > { %v5659_v44 = vpop.permute.xlu0 %1672  ;;  %v5667_v56 = vpop.permute.xlu1 %1660  ;;  %v410_v30 = vadd.f32 %v408_v41, %v386_v58  ;;  %v456_v15 = vmul.f32 %v4311_v27, %v8018_v42  ;;  %v415_v58 = vmul.f32 %v4309_v62, %v8024_v5  ;;  %v8025_v41 = vmov %v8013_v53  ;;  %v4313_v53 = vld [vmem:[#allocation2 + $0x50] sm:$0xff] }
 0x276   : > { %8000 = vst [vmem:[#allocation170_spill] sm:$0xff] %v5659_v44  ;;  %8005 = vst [vmem:[#allocation171_spill] sm:$0xff] %v5667_v56  ;;  %v387_v44 = vadd.f32 %v385_v2, %v8007_v13  ;;  %v8020_v56 = vstv %s5479_s15  ;;  %v8023_v13 = vstv %s8012_s1  ;;  %s8029_s15 = sld [smem:[#allocation142_spill]] }
 0x277   : > { %v433_v46 = vmul.f32 %v4312_v31, %v8020_v56  ;;  %v438_v55 = vmul.f32 %v4310_v32, %v8023_v13  ;;  %v434_v45 = vadd.f32 %v432_v14, %v410_v30  ;;  %v397_v56 = vmul.f32 %v4307_v47, %v8028_v43 }
 0x278   : > { %v411_v7 = vadd.f32 %v409_v9, %v387_v44  ;;  %v8026_v42 = vstv %s8015_s2  ;;  %v416_v44 = vadd.f32 %v414_v48, %v392_v24  ;;  %v8031_v9 = vstv %s8019_s10  ;;  %s6213_s10 = sld [smem:[#allocation9 + $0x9]] }
 0x279   : > { %v5688_v2 = vpop.permute.xlu0 %1686  ;;  %v5695_v22 = vpop.permute.xlu1 %1674  ;;  %v398_v29 = vadd.f32 %v396_v52, %v8026_v42  ;;  %v402_v13 = vmul.f32 %v4306_v40, %v8031_v9  ;;  %v8032_v18 = vmov %v8031_v9  ;;  %v458_v52 = vadd.f32 %v456_v15, %v434_v45 }
 0x27a   : > { %8017 = vst [vmem:[#allocation172_spill] sm:$0xff] %v5688_v2  ;;  %8021 = vst [vmem:[#allocation173_spill] sm:$0xff] %v5695_v22  ;;  %v393_v2 = vadd.f32 %v391_v20, %v8025_v41  ;;  %v8030_v22 = vstv %s8008_s30  ;;  %v403_v5 = vmul.f32 %v4307_v47, %v8032_v18  ;;  %v462_v30 = vmul.f32 %v4311_v27, %v8036_v34  ;;  %s8043_s30 = sld [smem:[#allocation146_spill]] }
 0x27b   : > { %v457_v25 = vmul.f32 %v4313_v53, %v8030_v22  ;;  %v8037_v43 = vstv %s8012_s1  ;;  %v8038_v41 = vmov %v8036_v34  ;;  %v435_v48 = vadd.f32 %v433_v46, %v411_v7  ;;  %s8072_s1 = sld [smem:[#allocation148_spill]] }
 0x27c   : > { %v439_v14 = vmul.f32 %v4312_v31, %v8037_v43  ;;  %v463_v22 = vmul.f32 %v4313_v53, %v8038_v41  ;;  %v440_v40 = vadd.f32 %v438_v55, %v416_v44  ;;  %v417_v24 = vadd.f32 %v415_v58, %v393_v2 }
 0x27d   : > { %v5715_v20 = vpop.permute.xlu0 %1700  ;;  %v5723_v42 = vpop.permute.xlu1 %1688  ;;  %v8041_v9 = vstv %s8029_s15  ;;  %v490_v47 = vadd.f32 %v4812_v50, %v458_v52  ;;  %v8042_v15 = vstv %s8016_s27  ;;  %v8044_v34 = vstv %s8015_s2  ;;  %s6207_s2 = sld [smem:[#allocation10]]  ;;  %s6215_s15 = sld [smem:[#allocation10 + $0x1]] }
 0x27e   : > { %8035 = vst [vmem:[#allocation174_spill] sm:$0xff] %v5715_v20  ;;  %8039 = vst [vmem:[#allocation175_spill] sm:$0xff] %v5723_v42  ;;  %v444_v18 = vmul.f32 %v4310_v32, %v8041_v9  ;;  %v422_v20 = vadd.f32 %v420_v10, %v398_v29  ;;  %v421_v45 = vmul.f32 %v4309_v62, %v8042_v15  ;;  %v8045_v43 = vstv %s8033_s7  ;;  %s6209_s27 = sld [smem:[#allocation9]]  ;;  %s6219_s7 = sld [smem:[#allocation9 + $0x24]] }
 0x27f   : > { %v399_v21 = vadd.f32 %v397_v56, %v8044_v34  ;;  %v404_v4 = vadd.f32 %v402_v13, %v8045_v43  ;;  %v8046_v41 = vstv %s8034_s14  ;;  %v8048_v55 = vmov %v8045_v43  ;;  %s6221_s14 = sld [smem:[#allocation9 + $0x2d]] }
 0x280   : > { %v426_v42 = vmul.f32 %v4308_v17, %v8046_v41  ;;  %v8047_v8 = vmov %v8046_v41  ;;  %v405_v2 = vadd.f32 %v403_v5, %v8048_v55  ;;  %v459_v58 = vadd.f32 %v457_v25, %v435_v48 }
 0x281   : > { %v427_v46 = vmul.f32 %v4309_v62, %v8047_v8  ;;  %v5740_v7 = vpop.permute.xlu0 %1714  ;;  %v464_v50 = vadd.f32 %v462_v30, %v440_v40  ;;  %v8049_v29 = vstv %s8040_s25  ;;  %v546_v44 = vadd.f32 %v4856_v6, %v490_v47  ;;  %v5745_v56 = vpop.permute.xlu1 %1702  ;;  %s6225_s25 = sld [smem:[#allocation9 + $0x12]] }
 0x282   : > { %v468_v10 = vmul.f32 %v4311_v27, %v8049_v29  ;;  %v441_v13 = vadd.f32 %v439_v14, %v417_v24  ;;  %v446_v52 = vadd.f32 %v444_v18, %v422_v20  ;;  %v445_v17 = vmul.f32 %v4312_v31, %v8041_v9  ;;  %v8057_v9 = vld [vmem:[#allocation33_spill] sm:$0xff] }
 0x283   : > { %v8050_v15 = vstv %s8043_s30  ;;  %v504_v62 = vadd.f32 %v4820_v49, %v464_v50  ;;  %v423_v5 = vadd.f32 %v421_v45, %v399_v21  ;;  %v8051_v25 = vstv %s5516_s28  ;;  %s8191_s28 = sld [smem:[#allocation159_spill]]  ;;  %s6227_s30 = sld [smem:[#allocation10 + $0x2]] }
 0x284   : > { %v450_v8 = vmul.f32 %v4310_v32, %v8050_v15  ;;  %v474_v48 = vmul.f32 %v4311_v27, %v8051_v25  ;;  %v602_v30 = vadd.f32 %v4904_v28, %v546_v44  ;;  %v491_v40 = vadd.f32 %v4823_v54, %v459_v58 }
 0x285   : > { %v428_v6 = vadd.f32 %v426_v42, %v404_v4  ;;  %v429_v47 = vadd.f32 %v427_v46, %v405_v2  ;;  %v8052_v34 = vmov %v8050_v15  ;;  %v5758_v14 = vpop.permute.xlu0 %1728  ;;  %v470_v20 = vadd.f32 %v468_v10, %v446_v52  ;;  %v5764_v21 = vpop.permute.xlu1 %1716 }
 0x286   : > { %v451_v43 = vmul.f32 %v4312_v31, %v8052_v34  ;;  %v8053_v24 = vmov %v8049_v29  ;;  %v560_v32 = vadd.f32 %v4867_v63, %v504_v62  ;;  %v658_v49 = vadd.f32 %v4952_v51, %v602_v30  ;;  %v8065_v34 = vld [vmem:[#allocation38_spill] sm:$0xff] }
 0x287   : > { %v469_v18 = vmul.f32 %v4313_v53, %v8053_v24  ;;  %v465_v27 = vadd.f32 %v463_v22, %v441_v13  ;;  %v452_v45 = vadd.f32 %v450_v8, %v428_v6  ;;  %v8054_v28 = vmov %v8051_v25  ;;  %v8059_v8 = vld [vmem:[#allocation56_spill] sm:$0xff]  ;;  %v8064_v6 = vld [vmem:[#allocation29_spill] sm:$0xff] }
 0x288   : > { %v475_v41 = vmul.f32 %v4313_v53, %v8054_v28  ;;  %v547_v54 = vadd.f32 %v4870_v12, %v491_v40  ;;  %v518_v4 = vadd.f32 %v4830_v57, %v470_v20  ;;  %v447_v31 = vadd.f32 %v445_v17, %v423_v5  ;;  %v8058_v17 = vld [vmem:[#allocation43_spill] sm:$0xff]  ;;  %v8063_v40 = vld [vmem:[#allocation44_spill] sm:$0xff]  ;;  %v8066_v20 = vld [vmem:[#allocation50_spill] sm:$0xff] }
 0x289   : > { %v616_v42 = vadd.f32 %v4915_v33, %v560_v32  ;;  %v714_v46 = vadd.f32 %v5000_v26, %v658_v49  ;;  %v505_v55 = vadd.f32 %v4835_v61, %v465_v27  ;;  %v476_v63 = vadd.f32 %v474_v48, %v452_v45  ;;  %v5774_v22 = vpop.permute.xlu0 %1742  ;;  %v5779_v50 = vpop.permute.xlu1 %1730  ;;  %v8068_v27 = vld [vmem:[#allocation31_spill] sm:$0xff] }
 0x28a   : > { %v453_v2 = vadd.f32 %v451_v43, %v429_v47  ;;  %v603_v51 = vadd.f32 %v4918_v36, %v547_v54  ;;  %v471_v58 = vadd.f32 %v469_v18, %v447_v31  ;;  %v574_v53 = vadd.f32 %v4878_v16, %v518_v4  ;;  %v5787_v16 = vld [vmem:[#allocation2 + $0x1] sm:$0xff]  ;;  %v5811_v18 = vld [vmem:[#allocation2 + $0x19] sm:$0xff] }
 0x28b   : > { %v672_v12 = vadd.f32 %v4963_v59, %v616_v42  ;;  %v770_v57 = vadd.f32 %v5034_v11, %v714_v46  ;;  %v532_v33 = vadd.f32 %v4843_v1, %v476_v63  ;;  %v561_v61 = vadd.f32 %v4883_v19, %v505_v55  ;;  %v8069_v28 = vld [vmem:[#allocation35_spill] sm:$0xff]  ;;  %v8073_v55 = vld [vmem:[#allocation32_spill] sm:$0xff] }
 0x28c   : > { %v477_v26 = vadd.f32 %v475_v41, %v453_v2  ;;  %v659_v29 = vadd.f32 %v4966_v0, %v603_v51  ;;  %v630_v36 = vadd.f32 %v4926_v38, %v574_v53  ;;  %v8055_v59 = vstv %s5521_s17  ;;  %v8056_v38 = vld [vmem:[#allocation27_spill] sm:$0xff]  ;;  %v8074_v2 = vld [vmem:[#allocation45_spill] sm:$0xff]  ;;  %v8075_v53 = vld [vmem:[#allocation58_spill] sm:$0xff] }
 0x28d   : > { %v728_v10 = vadd.f32 %v5009_v37, %v672_v12  ;;  %v826_v44 = vadd.f32 %v5066_v60, %v770_v57  ;;  %v936_v11 = vmul.f32 %v5787_v16, %v8055_v59  ;;  %v519_v13 = vadd.f32 %v4846_v3, %v471_v58  ;;  %v5796_v0 = vpop.permute.xlu0 %1756  ;;  %v5802_v5 = vpop.permute.xlu1 %1744  ;;  %v8060_v3 = vld [vmem:[#allocation28_spill] sm:$0xff]  ;;  %v8070_v54 = vld [vmem:[#allocation39_spill] sm:$0xff] }
 0x28e   : > { %v588_v1 = vadd.f32 %v4891_v23, %v532_v33  ;;  %v617_v52 = vadd.f32 %v4931_v35, %v561_v61  ;;  %v715_v19 = vadd.f32 %v5012_v39, %v659_v29  ;;  %v533_v37 = vadd.f32 %v8056_v38, %v477_v26  ;;  %v8061_v23 = vld [vmem:[#allocation30_spill] sm:$0xff]  ;;  %v8071_v31 = vld [vmem:[#allocation51_spill] sm:$0xff]  ;;  %v8076_v33 = vld [vmem:[#allocation36_spill] sm:$0xff] }
 0x28f   : > { %v686_v60 = vadd.f32 %v8057_v9, %v630_v36  ;;  %v784_v15 = vadd.f32 %v8058_v17, %v728_v10  ;;  %v882_v62 = vadd.f32 %v8059_v8, %v826_v44  ;;  %v575_v25 = vadd.f32 %v8060_v3, %v519_v13  ;;  %v8062_v35 = vld [vmem:[#allocation34_spill] sm:$0xff]  ;;  %v8077_v61 = vld [vmem:[#allocation40_spill] sm:$0xff]  ;;  %v8079_v44 = vld [vmem:[#allocation59_spill] sm:$0xff] }
 0x290   : > { %v644_v48 = vadd.f32 %v8061_v23, %v588_v1  ;;  %v673_v30 = vadd.f32 %v8062_v35, %v617_v52  ;;  %v771_v39 = vadd.f32 %v8063_v40, %v715_v19  ;;  %v589_v47 = vadd.f32 %v8064_v6, %v533_v37  ;;  %v8078_v36 = vld [vmem:[#allocation46_spill] sm:$0xff]  ;;  %v8080_v13 = vld [vmem:[#allocation37_spill] sm:$0xff]  ;;  %v8081_v52 = vld [vmem:[#allocation52_spill] sm:$0xff] }
 0x291   : > { %v742_v43 = vadd.f32 %v8065_v34, %v686_v60  ;;  %v840_v24 = vadd.f32 %v8066_v20, %v784_v15  ;;  %v8067_v32 = vstv %s5534_s6  ;;  %v631_v45 = vadd.f32 %v8068_v27, %v575_v25  ;;  %v5820_v46 = vpop.permute.xlu0 %1770  ;;  %v5825_v57 = vpop.permute.xlu1 %1758  ;;  %v4316_v38 = vld [vmem:[#allocation2 + $0x9] sm:$0xff]  ;;  %v8085_v8 = vld [vmem:[#allocation47_spill] sm:$0xff]  ;;  %v8089_v40 = vld [vmem:[#allocation42_spill] sm:$0xff]  ;;  %s8098_s6 = sld [smem:[#allocation153_spill]] }
 0x292   : > { %v960_v49 = vmul.f32 %v5811_v18, %v8067_v32  ;;  %v700_v41 = vadd.f32 %v8069_v28, %v644_v48  ;;  %v729_v4 = vadd.f32 %v8070_v54, %v673_v30  ;;  %v827_v42 = vadd.f32 %v8071_v31, %v771_v39  ;;  %v8084_v17 = vld [vmem:[#allocation41_spill] sm:$0xff]  ;;  %v4317_v23 = vld [vmem:[#allocation2 + $0x21] sm:$0xff]  ;;  %v8092_v27 = vld [vmem:[#allocation54_spill] sm:$0xff] }
 0x293   : > { %v645_v63 = vadd.f32 %v8073_v55, %v589_v47  ;;  %v798_v51 = vadd.f32 %v8074_v2, %v742_v43  ;;  %v938_v58 = vadd.f32 %v936_v11, %v882_v62  ;;  %v896_v12 = vadd.f32 %v8075_v53, %v840_v24  ;;  %v8086_v3 = vld [vmem:[#allocation53_spill] sm:$0xff]  ;;  %v8090_v34 = vld [vmem:[#allocation60_spill] sm:$0xff]  ;;  %v8099_v53 = vld [vmem:[#allocation55_spill] sm:$0xff] }
 0x294   : > { %v687_v26 = vadd.f32 %v8076_v33, %v631_v45  ;;  %v756_v29 = vadd.f32 %v8077_v61, %v700_v41  ;;  %v785_v10 = vadd.f32 %v8078_v36, %v729_v4  ;;  %v883_v59 = vadd.f32 %v8079_v44, %v827_v42  ;;  %v8091_v24 = vld [vmem:[#allocation48_spill] sm:$0xff]  ;;  %v8093_v41 = vld [vmem:[#allocation61_spill] sm:$0xff]  ;;  %v8102_v36 = vld [vmem:[#allocation62_spill] sm:$0xff] }
 0x295   : > { %v701_v1 = vadd.f32 %v8080_v13, %v645_v63  ;;  %v854_v19 = vadd.f32 %v8081_v52, %v798_v51  ;;  %v8082_v37 = vstv %s5521_s17  ;;  %v8083_v9 = vstv %s8072_s1  ;;  %v5843_v30 = vpop.permute.xlu0 %1784  ;;  %v5847_v20 = vpop.permute.xlu1 %1772  ;;  %v8094_v4 = vld [vmem:[#allocation49_spill] sm:$0xff]  ;;  %s6203_s17 = sld [smem:[#allocation9 + $0x76]]  ;;  %s8263_s1 = smov 127  }
 0x296   : > { %v937_v11 = vmul.f32 %v4316_v38, %v8082_v37  ;;  %v942_v60 = vmul.f32 %v5787_v16, %v8083_v9  ;;  %v743_v15 = vadd.f32 %v8084_v17, %v687_v26  ;;  %v812_v62 = vadd.f32 %v8085_v8, %v756_v29  ;;  %v4318_v2 = vld [vmem:[#allocation2 + $0x31] sm:$0xff] }
 0x297   : > { %v841_v25 = vadd.f32 %v8086_v3, %v785_v10  ;;  %v8088_v48 = vmov %v8067_v32  ;;  %v757_v39 = vadd.f32 %v8089_v40, %v701_v1  ;;  %v962_v6 = vadd.f32 %v960_v49, %v938_v58  ;;  %v4319_v40 = vld [vmem:[#allocation2 + $0x49] sm:$0xff] }
 0x298   : > { %v961_v35 = vmul.f32 %v4317_v23, %v8088_v48  ;;  %v944_v47 = vadd.f32 %v942_v60, %v896_v12  ;;  %v910_v43 = vadd.f32 %v8090_v34, %v854_v19  ;;  %v799_v32 = vadd.f32 %v8091_v24, %v743_v15  ;;  %v8104_v60 = vld [vmem:[#allocation63_spill] sm:$0xff] }
 0x299   : > { %v868_v45 = vadd.f32 %v8092_v27, %v812_v62  ;;  %v939_v28 = vadd.f32 %v937_v11, %v883_v59  ;;  %v897_v54 = vadd.f32 %v8093_v41, %v841_v25  ;;  %v813_v31 = vadd.f32 %v8094_v4, %v757_v39  ;;  %v5867_v44 = vpop.permute.xlu0 %1798  ;;  %v8103_v59 = vld [vmem:[#allocation57_spill] sm:$0xff]  ;;  %v5870_v37 = vpop.permute.xlu1 %1786 }
 0x29a   : > { %v8095_v42 = vstv %s7981_s19  ;;  %v8096_v63 = vstv %s8087_s5  ;;  %v8097_v51 = vstv %s5564_s24  ;;  %v855_v12 = vadd.f32 %v8099_v53, %v799_v32  ;;  %v8107_v25 = vld [vmem:[#allocation65_spill] sm:$0xff]  ;;  %s8175_s24 = sld [smem:[#allocation157_spill]]  ;;  %s6230_s5 = sld [smem:[#allocation9 + $0x36]] }
 0x29b   : > { %v966_v55 = vmul.f32 %v5811_v18, %v8095_v42  ;;  %v948_v49 = vmul.f32 %v5787_v16, %v8096_v63  ;;  %v984_v58 = vmul.f32 %v4318_v2, %v8097_v51  ;;  %v8100_v33 = vmov %v8083_v9  ;;  %s6199_s19 = sld [smem:[#allocation9 + $0x52]] }
 0x29c   : > { %v943_v26 = vmul.f32 %v4316_v38, %v8100_v33  ;;  %v8101_v61 = vmov %v8095_v42  ;;  %v924_v10 = vadd.f32 %v8102_v36, %v868_v45  ;;  %v869_v13 = vadd.f32 %v8103_v59, %v813_v31  ;;  %v4320_v45 = vld [vmem:[#allocation2 + $0x39] sm:$0xff] }
 0x29d   : > { %v967_v29 = vmul.f32 %v4317_v23, %v8101_v61  ;;  %v968_v1 = vadd.f32 %v966_v55, %v944_v47  ;;  %v950_v52 = vadd.f32 %v948_v49, %v910_v43  ;;  %v986_v19 = vadd.f32 %v984_v58, %v962_v6  ;;  %v5890_v41 = vpop.permute.xlu0 %1812 }
 0x29e   : > { %v963_v11 = vadd.f32 %v961_v35, %v939_v28  ;;  %v945_v9 = vadd.f32 %v943_v26, %v897_v54  ;;  %v911_v17 = vadd.f32 %v8104_v60, %v855_v12  ;;  %v8105_v15 = vstv %s7984_s11  ;;  %v8116_v26 = vld [vmem:[#allocation64_spill] sm:$0xff]  ;;  %s6089_s11 = sld [smem:[#allocation3]] }
 0x29f   : > { %v954_v8 = vmul.f32 %v5787_v16, %v8105_v15  ;;  %v8106_v62 = vstv %s8098_s6  ;;  %v925_v48 = vadd.f32 %v8107_v25, %v869_v13  ;;  %v8108_v39 = vstv %s5591_s20  ;;  %s8217_s20 = sld [smem:[#allocation165_spill]]  ;;  %s6232_s6 = sld [smem:[#allocation9 + $0x48]] }
 0x2a0   : > { %v972_v3 = vmul.f32 %v5811_v18, %v8106_v62  ;;  %v1008_v47 = vmul.f32 %v4319_v40, %v8108_v39  ;;  %v8109_v6 = vstv %s5573_s3  ;;  %v8110_v43 = vmov %v8096_v63  ;;  %v5894_v63 = vpop.permute.xlu1 %1800  ;;  %s8189_s3 = sld [smem:[#allocation161_spill]] }
 0x2a1   : > { %v990_v34 = vmul.f32 %v4318_v2, %v8109_v6  ;;  %v949_v35 = vmul.f32 %v4316_v38, %v8110_v43  ;;  %v8111_v24 = vmov %v8106_v62  ;;  %v956_v27 = vadd.f32 %v954_v8, %v924_v10  ;;  %8114 = vst [vmem:[#allocation27_spill] sm:$0xff] %v5894_v63 }
 0x2a2   : > { %v973_v32 = vmul.f32 %v4317_v23, %v8111_v24  ;;  %v8112_v16 = vmov %v8097_v51  ;;  %v974_v54 = vadd.f32 %v972_v3, %v950_v52  ;;  %v8113_v4 = vmov %v8105_v15  ;;  %v8123_v3 = vld [vmem:[#allocation72_spill] sm:$0xff] }
 0x2a3   : > { %v985_v28 = vmul.f32 %v4320_v45, %v8112_v16  ;;  %v955_v31 = vmul.f32 %v4316_v38, %v8113_v4  ;;  %v1010_v42 = vadd.f32 %v1008_v47, %v986_v19  ;;  %v992_v55 = vadd.f32 %v990_v34, %v968_v1  ;;  %v4321_v19 = vld [vmem:[#allocation2 + $0x51] sm:$0xff] }
 0x2a4   : > { %v969_v49 = vadd.f32 %v967_v29, %v945_v9  ;;  %v951_v51 = vadd.f32 %v949_v35, %v911_v17  ;;  %v8115_v58 = vstv %s7985_s4  ;;  %v8117_v36 = vstv %s5593_s29  ;;  %v8125_v35 = vld [vmem:[#allocation66_spill] sm:$0xff]  ;;  %s8135_s4 = sld [smem:[#allocation156_spill]]  ;;  %s8228_s29 = sld [smem:[#allocation151_spill]] }
 0x2a5   : > { %v978_v53 = vmul.f32 %v5811_v18, %v8115_v58  ;;  %v987_v12 = vadd.f32 %v985_v28, %v963_v11  ;;  %v957_v33 = vadd.f32 %v955_v31, %v925_v48  ;;  %v1042_v61 = vadd.f32 %v8116_v26, %v1010_v42  ;;  %v5910_v18 = vpop.permute.xlu0 %1826  ;;  %v5915_v48 = vpop.permute.xlu1 %1814  ;;  %v8127_v28 = vld [vmem:[#allocation80_spill] sm:$0xff]  ;;  %v8128_v31 = vld [vmem:[#allocation67_spill] sm:$0xff] }
 0x2a6   : > { %v1014_v10 = vmul.f32 %v4319_v40, %v8117_v36  ;;  %v8118_v59 = vstv %s5575_s8  ;;  %v8119_v52 = vmov %v8115_v58  ;;  %v8120_v60 = vmov %v8108_v39  ;;  %s8193_s8 = sld [smem:[#allocation152_spill]] }
 0x2a7   : > { %v996_v38 = vmul.f32 %v4318_v2, %v8118_v59  ;;  %v980_v13 = vadd.f32 %v978_v53, %v956_v27  ;;  %v979_v1 = vmul.f32 %v4317_v23, %v8119_v52  ;;  %v1009_v29 = vmul.f32 %v4321_v19, %v8120_v60  ;;  %v8136_v60 = vld [vmem:[#allocation75_spill] sm:$0xff] }
 0x2a8   : > { %v8121_v9 = vmov %v8109_v6  ;;  %v1016_v11 = vadd.f32 %v1014_v10, %v992_v55  ;;  %v8122_v15 = vmov %v8117_v36  ;;  %v1098_v25 = vadd.f32 %v8123_v3, %v1042_v61  ;;  %v8133_v61 = vld [vmem:[#allocation88_spill] sm:$0xff]  ;;  %v8140_v3 = vld [vmem:[#allocation69_spill] sm:$0xff] }
 0x2a9   : > { %v991_v17 = vmul.f32 %v4320_v45, %v8121_v9  ;;  %v1015_v8 = vmul.f32 %v4321_v19, %v8122_v15  ;;  %v998_v62 = vadd.f32 %v996_v38, %v974_v54  ;;  %v975_v23 = vadd.f32 %v973_v32, %v951_v51  ;;  %v5928_v32 = vpop.permute.xlu0 %1840  ;;  %v5934_v10 = vpop.permute.xlu1 %1828 }
 0x2aa   : > { %v1011_v39 = vadd.f32 %v1009_v29, %v987_v12  ;;  %v8124_v6 = vstv %s5584_s21  ;;  %v981_v43 = vadd.f32 %v979_v1, %v957_v33  ;;  %v1056_v24 = vadd.f32 %v8125_v35, %v1016_v11  ;;  %v8132_v12 = vld [vmem:[#allocation74_spill] sm:$0xff]  ;;  %v8142_v35 = vld [vmem:[#allocation83_spill] sm:$0xff]  ;;  %s6205_s21 = sld [smem:[#allocation9 + $0x13]] }
 0x2ab   : > { %v993_v47 = vadd.f32 %v991_v17, %v969_v49  ;;  %v1002_v34 = vmul.f32 %v4318_v2, %v8124_v6  ;;  %v8126_v27 = vstv %s5600_s16  ;;  %v1154_v4 = vadd.f32 %v8127_v28, %v1098_v25  ;;  %v8138_v11 = vld [vmem:[#allocation82_spill] sm:$0xff]  ;;  %s6197_s16 = sld [smem:[#allocation9 + $0x2e]] }
 0x2ac   : > { %v1020_v16 = vmul.f32 %v4319_v40, %v8126_v27  ;;  %v1043_v54 = vadd.f32 %v8128_v31, %v1011_v39  ;;  %v8129_v42 = vmov %v8118_v59  ;;  %v8130_v58 = vmov %v8126_v27 }
 0x2ad   : > { %v997_v55 = vmul.f32 %v4320_v45, %v8129_v42  ;;  %v1021_v53 = vmul.f32 %v4321_v19, %v8130_v58  ;;  %v1004_v26 = vadd.f32 %v1002_v34, %v980_v13  ;;  %v8131_v2 = vmov %v8124_v6  ;;  %v8137_v13 = vld [vmem:[#allocation68_spill] sm:$0xff]  ;;  %v8149_v58 = vld [vmem:[#allocation77_spill] sm:$0xff] }
 0x2ae   : > { %v1022_v49 = vadd.f32 %v1020_v16, %v998_v62  ;;  %v1003_v51 = vmul.f32 %v4320_v45, %v8131_v2  ;;  %v1112_v33 = vadd.f32 %v8132_v12, %v1056_v24  ;;  %v1210_v36 = vadd.f32 %v8133_v61, %v1154_v4  ;;  %v8139_v62 = vld [vmem:[#allocation96_spill] sm:$0xff]  ;;  %v8144_v24 = vld [vmem:[#allocation90_spill] sm:$0xff] }
 0x2af   : > { %v1017_v59 = vadd.f32 %v1015_v8, %v993_v47  ;;  %v999_v38 = vadd.f32 %v997_v55, %v975_v23  ;;  %v8134_v52 = vstv %s5602_s13  ;;  %v1099_v29 = vadd.f32 %v8136_v60, %v1043_v54  ;;  %v5946_v23 = vpop.permute.xlu0 %1854  ;;  %v8143_v47 = vld [vmem:[#allocation76_spill] sm:$0xff]  ;;  %v5956_v54 = vpop.permute.xlu1 %1842  ;;  %v8148_v55 = vld [vmem:[#allocation70_spill] sm:$0xff]  ;;  %s8204_s13 = sld [smem:[#allocation162_spill]] }
 0x2b0   : > { %v1026_v1 = vmul.f32 %v4319_v40, %v8134_v52  ;;  %v1070_v9 = vadd.f32 %v8137_v13, %v1022_v49  ;;  %v1005_v17 = vadd.f32 %v1003_v51, %v981_v43  ;;  %v1168_v15 = vadd.f32 %v8138_v11, %v1112_v33  ;;  %v8145_v16 = vld [vmem:[#allocation104_spill] sm:$0xff]  ;;  %8147 = vst [vmem:[#allocation33_spill] sm:$0xff] %v5956_v54  ;;  %v8150_v49 = vld [vmem:[#allocation91_spill] sm:$0xff]  ;;  %v8152_v61 = vld [vmem:[#allocation98_spill] sm:$0xff] }
 0x2b1   : > { %v1266_v45 = vadd.f32 %v8139_v62, %v1210_v36  ;;  %v1057_v25 = vadd.f32 %v8140_v3, %v1017_v59  ;;  %v8141_v6 = vmov %v8134_v52  ;;  %v1155_v8 = vadd.f32 %v8142_v35, %v1099_v29  ;;  %v5951_v43 = vld [vmem:[#allocation2 + $0x2] sm:$0xff]  ;;  %v8155_v29 = vld [vmem:[#allocation78_spill] sm:$0xff]  ;;  %v8158_v62 = vld [vmem:[#allocation73_spill] sm:$0xff] }
 0x2b2   : > { %v1028_v39 = vadd.f32 %v1026_v1, %v1004_v26  ;;  %v1027_v34 = vmul.f32 %v4321_v19, %v8141_v6  ;;  %v1126_v40 = vadd.f32 %v8143_v47, %v1070_v9  ;;  %v1224_v27 = vadd.f32 %v8144_v24, %v1168_v15  ;;  %v8151_v12 = vld [vmem:[#allocation84_spill] sm:$0xff]  ;;  %v8154_v1 = vld [vmem:[#allocation71_spill] sm:$0xff]  ;;  %v8156_v9 = vld [vmem:[#allocation85_spill] sm:$0xff] }
 0x2b3   : > { %v1322_v28 = vadd.f32 %v8145_v16, %v1266_v45  ;;  %v8146_v4 = vstv %s8135_s4  ;;  %v1023_v42 = vadd.f32 %v1021_v53, %v999_v38  ;;  %v1113_v26 = vadd.f32 %v8149_v58, %v1057_v25  ;;  %v8153_v59 = vld [vmem:[#allocation112_spill] sm:$0xff]  ;;  %v8157_v53 = vld [vmem:[#allocation99_spill] sm:$0xff]  ;;  %v5968_v15 = vpop.permute.xlu0 %1868  ;;  %v8160_v25 = vld [vmem:[#allocation106_spill] sm:$0xff]  ;;  %v5974_v35 = vpop.permute.xlu1 %1856 }
 0x2b4   : > { %v1488_v31 = vmul.f32 %v5951_v43, %v8146_v4  ;;  %v1084_v19 = vadd.f32 %v8148_v55, %v1028_v39  ;;  %v1211_v2 = vadd.f32 %v8150_v49, %v1155_v8  ;;  %v1029_v51 = vadd.f32 %v1027_v34, %v1005_v17  ;;  %v8159_v17 = vld [vmem:[#allocation92_spill] sm:$0xff]  ;;  %8162 = vst [vmem:[#allocation43_spill] sm:$0xff] %v5974_v35  ;;  %v8163_v8 = vld [vmem:[#allocation79_spill] sm:$0xff] }
 0x2b5   : > { %v1182_v33 = vadd.f32 %v8151_v12, %v1126_v40  ;;  %v1280_v36 = vadd.f32 %v8152_v61, %v1224_v27  ;;  %v1378_v52 = vadd.f32 %v8153_v59, %v1322_v28  ;;  %v1071_v60 = vadd.f32 %v8154_v1, %v1023_v42  ;;  %v8161_v6 = vld [vmem:[#allocation120_spill] sm:$0xff]  ;;  %v8164_v40 = vld [vmem:[#allocation86_spill] sm:$0xff]  ;;  %v8165_v27 = vld [vmem:[#allocation93_spill] sm:$0xff] }
 0x2b6   : > { %v1140_v13 = vadd.f32 %v8155_v29, %v1084_v19  ;;  %v1169_v11 = vadd.f32 %v8156_v9, %v1113_v26  ;;  %v1267_v38 = vadd.f32 %v8157_v53, %v1211_v2  ;;  %v1085_v45 = vadd.f32 %v8158_v62, %v1029_v51  ;;  %v8166_v28 = vld [vmem:[#allocation107_spill] sm:$0xff]  ;;  %v8167_v42 = vld [vmem:[#allocation81_spill] sm:$0xff]  ;;  %v8168_v19 = vld [vmem:[#allocation100_spill] sm:$0xff] }
 0x2b7   : > { %v1238_v3 = vadd.f32 %v8159_v17, %v1182_v33  ;;  %v1336_v39 = vadd.f32 %v8160_v25, %v1280_v36  ;;  %v1434_v34 = vadd.f32 %v8161_v6, %v1378_v52  ;;  %v1127_v47 = vadd.f32 %v8163_v8, %v1071_v60  ;;  %v8169_v26 = vld [vmem:[#allocation114_spill] sm:$0xff]  ;;  %v8171_v33 = vld [vmem:[#allocation87_spill] sm:$0xff]  ;;  %v8173_v52 = vld [vmem:[#allocation101_spill] sm:$0xff] }
 0x2b8   : > { %v1196_v24 = vadd.f32 %v8164_v40, %v1140_v13  ;;  %v1225_v16 = vadd.f32 %v8165_v27, %v1169_v11  ;;  %v1323_v4 = vadd.f32 %v8166_v28, %v1267_v38  ;;  %v1141_v55 = vadd.f32 %v8167_v42, %v1085_v45  ;;  %v5983_v2 = vld [vmem:[#allocation2 + $0x1a] sm:$0xff]  ;;  %v5992_v13 = vpop.permute.xlu0 %1882  ;;  %v8176_v9 = vld [vmem:[#allocation89_spill] sm:$0xff]  ;;  %v8177_v53 = vld [vmem:[#allocation108_spill] sm:$0xff] }
 0x2b9   : > { %v1294_v58 = vadd.f32 %v8168_v19, %v1238_v3  ;;  %v1392_v49 = vadd.f32 %v8169_v26, %v1336_v39  ;;  %v8170_v51 = vstv %s5558_s22  ;;  %v1183_v61 = vadd.f32 %v8171_v33, %v1127_v47  ;;  %v8172_v36 = vld [vmem:[#allocation94_spill] sm:$0xff]  ;;  %v8174_v60 = vld [vmem:[#allocation115_spill] sm:$0xff]  ;;  %v5997_v3 = vpop.permute.xlu1 %1870  ;;  %v8181_v47 = vld [vmem:[#allocation109_spill] sm:$0xff] }
 0x2ba   : > { %v1512_v12 = vmul.f32 %v5983_v2, %v8170_v51  ;;  %v1252_v59 = vadd.f32 %v8172_v36, %v1196_v24  ;;  %v1281_v1 = vadd.f32 %v8173_v52, %v1225_v16  ;;  %v1379_v29 = vadd.f32 %v8174_v60, %v1323_v4  ;;  %v8178_v45 = vld [vmem:[#allocation122_spill] sm:$0xff]  ;;  %v8179_v25 = vld [vmem:[#allocation95_spill] sm:$0xff]  ;;  %v8183_v16 = vld [vmem:[#allocation97_spill] sm:$0xff] }
 0x2bb   : > { %v1197_v11 = vadd.f32 %v8176_v9, %v1141_v55  ;;  %v1350_v38 = vadd.f32 %v8177_v53, %v1294_v58  ;;  %v1490_v62 = vadd.f32 %v1488_v31, %v1434_v34  ;;  %v1448_v17 = vadd.f32 %v8178_v45, %v1392_v49  ;;  %v8180_v6 = vld [vmem:[#allocation102_spill] sm:$0xff]  ;;  %v8182_v24 = vld [vmem:[#allocation123_spill] sm:$0xff]  ;;  %v8184_v4 = vld [vmem:[#allocation116_spill] sm:$0xff] }
 0x2bc   : > { %v1239_v39 = vadd.f32 %v8179_v25, %v1183_v61  ;;  %v1308_v8 = vadd.f32 %v8180_v6, %v1252_v59  ;;  %v1337_v40 = vadd.f32 %v8181_v47, %v1281_v1  ;;  %v1435_v27 = vadd.f32 %v8182_v24, %v1379_v29  ;;  %v4324_v55 = vld [vmem:[#allocation2 + $0xa] sm:$0xff]  ;;  %v8187_v26 = vld [vmem:[#allocation103_spill] sm:$0xff]  ;;  %v8188_v51 = vld [vmem:[#allocation110_spill] sm:$0xff]  ;;  %v6015_v60 = vpop.permute.xlu0 %1896 }
 0x2bd   : > { %v1253_v28 = vadd.f32 %v8183_v16, %v1197_v11  ;;  %v1406_v42 = vadd.f32 %v8184_v4, %v1350_v38  ;;  %v8185_v19 = vstv %s8135_s4  ;;  %v8186_v34 = vstv %s8175_s24  ;;  %v8190_v61 = vld [vmem:[#allocation117_spill] sm:$0xff]  ;;  %v4325_v59 = vld [vmem:[#allocation2 + $0x22] sm:$0xff]  ;;  %v6019_v25 = vpop.permute.xlu1 %1884  ;;  %s6234_s4 = sld [smem:[#allocation9 + $0x1b]] }
 0x2be   : > { %v1489_v31 = vmul.f32 %v4324_v55, %v8185_v19  ;;  %v1494_v58 = vmul.f32 %v5951_v43, %v8186_v34  ;;  %v1295_v49 = vadd.f32 %v8187_v26, %v1239_v39  ;;  %v1364_v33 = vadd.f32 %v8188_v51, %v1308_v8  ;;  %v8194_v29 = vld [vmem:[#allocation105_spill] sm:$0xff]  ;;  %v8195_v38 = vld [vmem:[#allocation124_spill] sm:$0xff]  ;;  %v8196_v39 = vld [vmem:[#allocation111_spill] sm:$0xff] }
 0x2bf   : > { %v1393_v36 = vadd.f32 %v8190_v61, %v1337_v40  ;;  %v8192_v52 = vstv %s5558_s22  ;;  %v1309_v9 = vadd.f32 %v8194_v29, %v1253_v28  ;;  %v1514_v11 = vadd.f32 %v1512_v12, %v1490_v62  ;;  %v8197_v8 = vld [vmem:[#allocation118_spill] sm:$0xff]  ;;  %v8198_v24 = vld [vmem:[#allocation125_spill] sm:$0xff]  ;;  %s8202_s22 = sld [smem:[#allocation160_spill]]  ;;  %v8225_v35 = vld [vmem:[#allocation138_spill] sm:$0xff] }
 0x2c0   : > { %v1513_v1 = vmul.f32 %v4325_v59, %v8192_v52  ;;  %v1496_v53 = vadd.f32 %v1494_v58, %v1448_v17  ;;  %v1462_v45 = vadd.f32 %v8195_v38, %v1406_v42  ;;  %v1351_v6 = vadd.f32 %v8196_v39, %v1295_v49  ;;  %v8199_v4 = vld [vmem:[#allocation113_spill] sm:$0xff]  ;;  %v8205_v58 = vld [vmem:[#allocation119_spill] sm:$0xff]  ;;  %v8208_v61 = vld [vmem:[#allocation130_spill] sm:$0xff]  ;;  %v6039_v52 = vpop.permute.xlu0 %1910 }
 0x2c1   : > { %v1420_v47 = vadd.f32 %v8197_v8, %v1364_v33  ;;  %v1491_v40 = vadd.f32 %v1489_v31, %v1435_v27  ;;  %v1449_v16 = vadd.f32 %v8198_v24, %v1393_v36  ;;  %v1365_v19 = vadd.f32 %v8199_v4, %v1309_v9  ;;  %v4326_v62 = vld [vmem:[#allocation2 + $0x32] sm:$0xff]  ;;  %8209 = vst [vmem:[#allocation56_spill] sm:$0xff] %v6039_v52  ;;  %v6042_v24 = vpop.permute.xlu1 %1898 }
 0x2c2   : > { %v8200_v34 = vstv %s8189_s3  ;;  %v8201_v28 = vstv %s8191_s28  ;;  %v8203_v17 = vstv %s8193_s8  ;;  %v1407_v49 = vadd.f32 %v8205_v58, %v1351_v6  ;;  %v8210_v29 = vld [vmem:[#allocation121_spill] sm:$0xff]  ;;  %8211 = vst [vmem:[#allocation28_spill] sm:$0xff] %v6042_v24  ;;  %s6242_s3 = sld [smem:[#allocation9 + $0x3f]] }
 0x2c3   : > { %v1518_v26 = vmul.f32 %v5983_v2, %v8200_v34  ;;  %v1500_v12 = vmul.f32 %v5951_v43, %v8201_v28  ;;  %v1536_v42 = vmul.f32 %v4326_v62, %v8203_v17  ;;  %v8206_v51 = vstv %s8175_s24  ;;  %s6236_s24 = sld [smem:[#allocation9 + $0x51]] }
 0x2c4   : > { %v1495_v33 = vmul.f32 %v4324_v55, %v8206_v51  ;;  %v8207_v27 = vmov %v8200_v34  ;;  %v1476_v36 = vadd.f32 %v8208_v61, %v1420_v47  ;;  %v1421_v9 = vadd.f32 %v8210_v29, %v1365_v19  ;;  %v8212_v34 = vld [vmem:[#allocation132_spill] sm:$0xff]  ;;  %v4327_v19 = vld [vmem:[#allocation2 + $0x4a] sm:$0xff]  ;;  %v6062_v29 = vpop.permute.xlu0 %1924 }
 0x2c5   : > { %v1519_v31 = vmul.f32 %v4325_v59, %v8207_v27  ;;  %v1520_v38 = vadd.f32 %v1518_v26, %v1496_v53  ;;  %v1502_v39 = vadd.f32 %v1500_v12, %v1462_v45  ;;  %v1538_v8 = vadd.f32 %v1536_v42, %v1514_v11  ;;  %v8215_v27 = vld [vmem:[#allocation141_spill] sm:$0xff] }
 0x2c6   : > { %v1515_v6 = vadd.f32 %v1513_v1, %v1491_v40  ;;  %v1497_v4 = vadd.f32 %v1495_v33, %v1449_v16  ;;  %v1463_v28 = vadd.f32 %v8212_v34, %v1407_v49  ;;  %v8213_v17 = vstv %s8202_s22  ;;  %v4328_v49 = vld [vmem:[#allocation2 + $0x3a] sm:$0xff]  ;;  %s6251_s22 = sld [smem:[#allocation10 + $0x3]] }
 0x2c7   : > { %v1506_v47 = vmul.f32 %v5951_v43, %v8213_v17  ;;  %v8214_v58 = vstv %s8204_s13  ;;  %v1477_v61 = vadd.f32 %v8215_v27, %v1421_v9  ;;  %v8216_v53 = vstv %s5626_s18  ;;  %s6255_s13 = sld [smem:[#allocation9 + $0x6c]] }
 0x2c8   : > { %v1524_v51 = vmul.f32 %v5983_v2, %v8214_v58  ;;  %v1560_v45 = vmul.f32 %v4327_v19, %v8216_v53  ;;  %v8218_v11 = vstv %s5612_s0  ;;  %v8219_v12 = vstv %s8191_s28  ;;  %v6066_v53 = vpop.permute.xlu1 %1912  ;;  %s6244_s28 = sld [smem:[#allocation9 + $0x5a]] }
 0x2c9   : > { %v1542_v26 = vmul.f32 %v4326_v62, %v8218_v11  ;;  %v1501_v1 = vmul.f32 %v4324_v55, %v8219_v12  ;;  %v8220_v40 = vmov %v8214_v58  ;;  %v1508_v42 = vadd.f32 %v1506_v47, %v1476_v36  ;;  %8223 = vst [vmem:[#allocation30_spill] sm:$0xff] %v6066_v53 }
 0x2ca   : > { %v1525_v16 = vmul.f32 %v4325_v59, %v8220_v40  ;;  %v8221_v43 = vstv %s8193_s8  ;;  %v1526_v9 = vadd.f32 %v1524_v51, %v1502_v39  ;;  %v8222_v34 = vmov %v8213_v17  ;;  %s6249_s8 = sld [smem:[#allocation9 + $0x63]] }
 0x2cb   : > { %v1537_v33 = vmul.f32 %v4328_v49, %v8221_v43  ;;  %v1507_v17 = vmul.f32 %v4324_v55, %v8222_v34  ;;  %v1562_v58 = vadd.f32 %v1560_v45, %v1538_v8  ;;  %v1544_v27 = vadd.f32 %v1542_v26, %v1520_v38  ;;  %v4329_v45 = vld [vmem:[#allocation2 + $0x52] sm:$0xff] }
 0x2cc   : > { %v1521_v11 = vadd.f32 %v1519_v31, %v1497_v4  ;;  %v1503_v12 = vadd.f32 %v1501_v1, %v1463_v28  ;;  %v8224_v36 = vstv %s8217_s20  ;;  %v8226_v63 = vstv %s5634_s23  ;;  %v6082_v1 = vpop.permute.xlu0 %1938  ;;  %v6087_v34 = vpop.permute.xlu1 %1926  ;;  %s6185_s23 = sld [smem:[#allocation9 + $0x1]]  ;;  %s6257_s20 = sld [smem:[#allocation9 + $0x75]] }
 0x2cd   : > { %v1530_v47 = vmul.f32 %v5983_v2, %v8224_v36  ;;  %v1539_v40 = vadd.f32 %v1537_v33, %v1515_v6  ;;  %v1509_v43 = vadd.f32 %v1507_v17, %v1477_v61  ;;  %v1594_v24 = vadd.f32 %v8225_v35, %v1562_v58  ;;  %v8233_v61 = vld [vmem:[#allocation166_spill] sm:$0xff] }
 0x2ce   : > { %v1566_v39 = vmul.f32 %v4327_v19, %v8226_v63  ;;  %v8227_v51 = vstv %s5620_s12  ;;  %v8229_v8 = vmov %v8224_v36  ;;  %v8230_v26 = vstv %s5626_s18  ;;  %s6192_s18 = sld [smem:[#allocation9 + $0x6d]] }
 0x2cf   : > { %v1548_v52 = vmul.f32 %v4326_v62, %v8227_v51  ;;  %v1532_v55 = vadd.f32 %v1530_v47, %v1508_v42  ;;  %v1531_v38 = vmul.f32 %v4325_v59, %v8229_v8  ;;  %v1561_v31 = vmul.f32 %v4329_v45, %v8230_v26  ;;  %v8235_v51 = vld [vmem:[#allocation147_spill] sm:$0xff]  ;;  %v8237_v26 = vld [vmem:[#allocation174_spill] sm:$0xff] }
 0x2d0   : > { %v8231_v4 = vstv %s5612_s0  ;;  %v1568_v2 = vadd.f32 %v1566_v39, %v1544_v27  ;;  %v8232_v6 = vmov %v8226_v63  ;;  %v1650_v33 = vadd.f32 %v8233_v61, %v1594_v24  ;;  %s8256_s0 = smov 1  }
 0x2d1   : > { %v1543_v28 = vmul.f32 %v4328_v49, %v8231_v4  ;;  %v1567_v35 = vmul.f32 %v4329_v45, %v8232_v6  ;;  %v1550_v63 = vadd.f32 %v1548_v52, %v1526_v9  ;;  %v1527_v59 = vadd.f32 %v1525_v16, %v1503_v12  ;;  %v8238_v9 = vld [vmem:[#allocation149_spill] sm:$0xff]  ;;  %v6102_v16 = vpop.permute.xlu0 %1952 }
 0x2d2   : > { %v1563_v42 = vadd.f32 %v1561_v31, %v1539_v40  ;;  %v8234_v58 = vstv %s8228_s29  ;;  %v1533_v47 = vadd.f32 %v1531_v38, %v1509_v43  ;;  %v1608_v27 = vadd.f32 %v8235_v51, %v1568_v2  ;;  %v8242_v40 = vld [vmem:[#allocation168_spill] sm:$0xff]  ;;  %v6108_v31 = vpop.permute.xlu1 %1940  ;;  %s6263_s29 = sld [smem:[#allocation9 + $0x7e]] }
 0x2d3   : > { %v1545_v17 = vadd.f32 %v1543_v28, %v1521_v11  ;;  %v1554_v36 = vmul.f32 %v4326_v62, %v8234_v58  ;;  %v8236_v39 = vstv %s5636_s9  ;;  %v1706_v52 = vadd.f32 %v8237_v26, %v1650_v33  ;;  %s6190_s9 = sld [smem:[#allocation9 + $0x49]] }
 0x2d4   : > { %v1572_v8 = vmul.f32 %v4327_v19, %v8236_v39  ;;  %v1595_v24 = vadd.f32 %v8238_v9, %v1563_v42  ;;  %v8239_v4 = vstv %s5620_s12  ;;  %v8240_v61 = vmov %v8236_v39  ;;  %s6194_s12 = sld [smem:[#allocation9 + $0xa]] }
 0x2d5   : > { %v1549_v6 = vmul.f32 %v4328_v49, %v8239_v4  ;;  %v1573_v53 = vmul.f32 %v4329_v45, %v8240_v61  ;;  %v1556_v54 = vadd.f32 %v1554_v36, %v1532_v55  ;;  %v8241_v62 = vmov %v8234_v58  ;;  %v8244_v58 = vld [vmem:[#allocation169_spill] sm:$0xff]  ;;  %v8245_v55 = vld [vmem:[#allocation155_spill] sm:$0xff]  ;;  %v8249_v4 = vld [vmem:[#allocation163_spill] sm:$0xff] }
 0x2d6   : > { %v1574_v11 = vadd.f32 %v1572_v8, %v1550_v63  ;;  %v1555_v12 = vmul.f32 %v4328_v49, %v8241_v62  ;;  %v1664_v43 = vadd.f32 %v8242_v40, %v1608_v27  ;;  %v1762_v38 = vadd.f32 %v5796_v0, %v1706_v52  ;;  %v8246_v8 = vld [vmem:[#allocation158_spill] sm:$0xff]  ;;  %v8252_v40 = vld [vmem:[#allocation172_spill] sm:$0xff] }
 0x2d7   : > { %v1569_v28 = vadd.f32 %v1567_v35, %v1545_v17  ;;  %v1551_v2 = vadd.f32 %v1549_v6, %v1527_v59  ;;  %v8243_v33 = vstv %s5643_s26  ;;  %v1651_v51 = vadd.f32 %v8244_v58, %v1595_v24  ;;  %v6120_v59 = vpop.permute.xlu0 %1966  ;;  %v8248_v17 = vld [vmem:[#allocation170_spill] sm:$0xff]  ;;  %s6188_s26 = sld [smem:[#allocation9 + $0x25]] }
 0x2d8   : > { %v1578_v42 = vmul.f32 %v4327_v19, %v8243_v33  ;;  %v1622_v36 = vadd.f32 %v8245_v55, %v1574_v11  ;;  %v1557_v39 = vadd.f32 %v1555_v12, %v1533_v47  ;;  %v1720_v63 = vadd.f32 %v5740_v7, %v1664_v43  ;;  %v6125_v47 = vpop.permute.xlu1 %1954  ;;  %v8251_v12 = vld [vmem:[#allocation164_spill] sm:$0xff] }
 0x2d9   : > { %v1818_v49 = vadd.f32 %v5890_v41, %v1762_v38  ;;  %v1609_v27 = vadd.f32 %v8246_v8, %v1569_v28  ;;  %v8247_v0 = vmov %v8243_v33  ;;  %v1707_v35 = vadd.f32 %v5745_v56, %v1651_v51 }
 0x2da   : > { %v1580_v26 = vadd.f32 %v1578_v42, %v1556_v54  ;;  %v1579_v52 = vmul.f32 %v4329_v45, %v8247_v0  ;;  %v1678_v19 = vadd.f32 %v8248_v17, %v1622_v36  ;;  %v1776_v9 = vadd.f32 %v5820_v46, %v1720_v63  ;;  %v8250_v54 = vld [vmem:[#allocation171_spill] sm:$0xff] }
 0x2db   : > { %v1874_v24 = vadd.f32 %v5968_v15, %v1818_v49  ;;  %v6128_v7 = vstv %s6089_s11  ;;  %v1575_v41 = vadd.f32 %v1573_v53, %v1551_v2  ;;  %v1665_v61 = vadd.f32 %v8250_v54, %v1609_v27  ;;  %v1981_v28 = vpop.permute.xlu0 %1980  ;;  %v8253_v2 = vld [vmem:[#allocation167_spill] sm:$0xff]  ;;  %s6274_s11 = sld [smem:[#allocation9 + $0x87]] }
 0x2dc   : > { %v1636_v6 = vadd.f32 %v8249_v4, %v1580_v26  ;;  %v1763_v45 = vadd.f32 %v5825_v57, %v1707_v35  ;;  %v1581_v56 = vadd.f32 %v1579_v52, %v1557_v39  ;;  %v1734_v11 = vadd.f32 %v5758_v14, %v1678_v19  ;;  %v1969_v14 = vpop.permute.xlu1 %1968  ;;  %v8259_v4 = vld [vmem:[#allocation27_spill] sm:$0xff] }
 0x2dd   : > { %v1832_v62 = vadd.f32 %v5910_v18, %v1776_v9  ;;  %v1930_v46 = vadd.f32 %v6062_v29, %v1874_v24  ;;  %v1623_v15 = vadd.f32 %v8251_v12, %v1575_v41  ;;  %v1721_v38 = vadd.f32 %v5764_v21, %v1665_v61  ;;  %v8254_v18 = vld [vmem:[#allocation173_spill] sm:$0xff] }
 0x2de   : > { %v1692_v43 = vadd.f32 %v8252_v40, %v1636_v6  ;;  %v1819_v53 = vadd.f32 %v5915_v48, %v1763_v45  ;;  %v1637_v33 = vadd.f32 %v8253_v2, %v1581_v56  ;;  %v1790_v57 = vadd.f32 %v5843_v30, %v1734_v11  ;;  %v8255_v30 = vld [vmem:[#allocation175_spill] sm:$0xff]  ;;  %v8260_v6 = vld [vmem:[#allocation28_spill] sm:$0xff]  ;;  %v8261_v56 = vld [vmem:[#allocation43_spill] sm:$0xff] }
 0x2df   : > { %v1888_v42 = vadd.f32 %v5992_v13, %v1832_v62  ;;  %v1986_v58 = vadd.f32 %v1981_v28, %v1930_v46  ;;  %v1679_v51 = vadd.f32 %v8254_v18, %v1623_v15  ;;  %v1777_v55 = vadd.f32 %v5847_v20, %v1721_v38  ;;  %v8262_v38 = vld [vmem:[#allocation30_spill] sm:$0xff] }
 0x2e0   : > { %v1748_v29 = vadd.f32 %v5774_v22, %v1692_v43  ;;  %v1875_v36 = vadd.f32 %v5997_v3, %v1819_v53  ;;  %v1846_v21 = vadd.f32 %v5928_v32, %v1790_v57  ;;  %v1693_v63 = vadd.f32 %v8255_v30, %v1637_v33  ;;  %v1995_v22 = vpop.permute.xlu0 %1994  ;;  %v1983_v27 = vpop.permute.xlu1 %1982 }
 0x2e1   : > { %v1944_v48 = vadd.f32 %v6082_v1, %v1888_v42  ;;  %v2034_v39 = vmul.f32 %v6128_v7, %v1986_v58  ;;  %vm2031_vm3 = vcmp.gt.f32.partialorder %v1986_v58, 0.0  ;;  %v1735_v13 = vadd.f32 %v5779_v50, %v1679_v51 }
 0x2e2   : > { %v1833_v49 = vadd.f32 %v5934_v10, %v1777_v55  ;;  %v1931_v8 = vadd.f32 %v6087_v34, %v1875_v36  ;;  %v1804_v20 = vadd.f32 %v5867_v44, %v1748_v29  ;;  %v1902_v3 = vadd.f32 %v6015_v60, %v1846_v21  ;;  %v8257_v60 = vld [vmem:[#allocation33_spill] sm:$0xff] }
 0x2e3   : > { %v2000_v32 = vadd.f32 %v1995_v22, %v1944_v48  ;;  %v2036_v26 = vsel %vm2031_vm3, %v1986_v58, %v2034_v39  ;;  %v1749_v1 = vadd.f32 %v5802_v5, %v1693_v63  ;;  %v1791_v0 = vadd.f32 %v5870_v37, %v1735_v13  ;;  %v8258_v37 = vld [vmem:[#allocation56_spill] sm:$0xff] }
 0x2e4   : > { %v1889_v52 = vadd.f32 %v6019_v25, %v1833_v49  ;;  %v1987_v35 = vadd.f32 %v1983_v27, %v1931_v8  ;;  %2040 = vrot.lane.b32.xlu0 %v2036_v26, %s8256_s0  ;;  %v1860_v50 = vadd.f32 %v5946_v23, %v1804_v20  ;;  %v1958_v10 = vadd.f32 %v6102_v16, %v1902_v3  ;;  %v2009_v19 = vpop.permute.xlu0 %2008  ;;  %v1997_v9 = vpop.permute.xlu1 %1996 }
 0x2e5   : > { %v2050_v44 = vmul.f32 %v6128_v7, %v2000_v32  ;;  %vm2048_vm4 = vcmp.gt.f32.partialorder %v2000_v32, 0.0  ;;  %v1847_v34 = vadd.f32 %v8257_v60, %v1791_v0  ;;  %v1805_v23 = vadd.f32 %v8259_v4, %v1749_v1 }
 0x2e6   : > { %v1945_v17 = vadd.f32 %v6108_v31, %v1889_v52  ;;  %v2035_v5 = vmul.f32 %v6128_v7, %v1987_v35  ;;  %vm2032_vm5 = vcmp.gt.f32.partialorder %v1987_v35, 0.0  ;;  %v1916_v25 = vadd.f32 %v8258_v37, %v1860_v50 }
 0x2e7   : > { %v2014_v24 = vadd.f32 %v2009_v19, %v1958_v10  ;;  %v2052_v41 = vsel %vm2048_vm4, %v2000_v32, %v2050_v44  ;;  %v1903_v16 = vadd.f32 %v8260_v6, %v1847_v34  ;;  %v1861_v11 = vadd.f32 %v8261_v56, %v1805_v23 }
 0x2e8   : > { %v2001_v54 = vadd.f32 %v1997_v9, %v1945_v17  ;;  %v2037_v61 = vsel %vm2032_vm5, %v1987_v35, %v2035_v5  ;;  %2056 = vrot.lane.b32.xlu0 %v2052_v41, %s8256_s0  ;;  %v1972_v45 = vadd.f32 %v6120_v59, %v1916_v25  ;;  %v2023_v12 = vpop.permute.xlu0 %2022  ;;  %v2011_v15 = vpop.permute.xlu1 %2010  ;;  %v2212_v36 = vstv %s6185_s23  ;;  %s6405_s23 = sld [smem:[#allocation9 + $0x5b]] }
 0x2e9   : > { %v2067_v31 = vmul.f32 %v6128_v7, %v2014_v24  ;;  %2042 = vrot.lane.b32.xlu1 %v2037_v61, %s8256_s0  ;;  %vm2065_vm6 = vcmp.gt.f32.partialorder %v2014_v24, 0.0  ;;  %v1959_v62 = vadd.f32 %v6125_v47, %v1903_v16  ;;  %v1917_v53 = vadd.f32 %v8262_v38, %v1861_v11 }
 0x2ea   : > { %v2051_v46 = vmul.f32 %v6128_v7, %v2001_v54  ;;  %vm2049_vm7 = vcmp.gt.f32.partialorder %v2001_v54, 0.0  ;;  %v2028_v40 = vadd.f32 %v2023_v12, %v1972_v45  ;;  %v2226_v63 = vstv %s6188_s26  ;;  %s4090_s26 = sld [smem:[#allocation9 + $0x7f]] }
 0x2eb   : > { %v2069_v43 = vsel %vm2065_vm6, %v2014_v24, %v2067_v31  ;;  %v2015_v28 = vadd.f32 %v2011_v15, %v1959_v62  ;;  %v1973_v33 = vadd.f32 %v1969_v14, %v1917_v53  ;;  %v2240_v3 = vstv %s6190_s9  ;;  %s4091_s9 = sld [smem:[#allocation9 + $0x1c]] }
 0x2ec   : > { %v2053_v59 = vsel %vm2049_vm7, %v2001_v54, %v2051_v46  ;;  %2073 = vrot.lane.b32.xlu0 %v2069_v43, %s8256_s0  ;;  %v2084_v2 = vmul.f32 %v6128_v7, %v2028_v40  ;;  %vm2082_vm8 = vcmp.gt.f32.partialorder %v2028_v40, 0.0  ;;  %v2025_v57 = vpop.permute.xlu1 %2024  ;;  %v2254_v27 = vstv %s6192_s18  ;;  %s4092_s18 = sld [smem:[#allocation9 + $0x40]] }
 0x2ed   : > { %2058 = vrot.lane.b32.xlu1 %v2053_v59, %s8256_s0  ;;  %v2068_v47 = vmul.f32 %v6128_v7, %v2015_v28  ;;  %vm2066_vm9 = vcmp.gt.f32.partialorder %v2015_v28, 0.0  ;;  %v2029_v58 = vadd.f32 %v2025_v57, %v1973_v33  ;;  %v2268_v32 = vstv %s6194_s12  ;;  %s4093_s12 = sld [smem:[#allocation9 + $0x64]] }
 0x2ee   : > { %v2086_v42 = vsel %vm2082_vm8, %v2028_v40, %v2084_v2  ;;  %v2282_v26 = vstv %s6197_s16  ;;  %v2296_v1 = vstv %s6199_s19  ;;  %v2310_v35 = vstv %s6203_s17  ;;  %s4094_s16 = sld [smem:[#allocation9 + $0x88]]  ;;  %s4095_s19 = sld [smem:[#allocation9 + $0x2]] }
 0x2ef   : > { %v2070_v18 = vsel %vm2066_vm9, %v2015_v28, %v2068_v47  ;;  %v2085_v51 = vmul.f32 %v6128_v7, %v2029_v58  ;;  %vm2083_vm10 = vcmp.gt.f32.partialorder %v2029_v58, 0.0  ;;  %v2324_v50 = vstv %s6205_s21  ;;  %s4096_s17 = sld [smem:[#allocation9 + $0x26]]  ;;  %s4097_s21 = sld [smem:[#allocation9 + $0x4a]] }
 0x2f0   : > { %2090 = vrot.lane.b32.xlu0 %v2086_v42, %s8256_s0  ;;  %v2100_v10 = vstv %s6207_s2  ;;  %v2116_v60 = vstv %s6209_s27  ;;  %v2140_v34 = vstv %s6213_s10  ;;  %s4098_s2 = sld [smem:[#allocation9 + $0x6e]]  ;;  %s8265_s27 = smov 126  }
 0x2f1   : > { %2075 = vrot.lane.b32.xlu1 %v2070_v18, %s8256_s0  ;;  %v2087_v29 = vsel %vm2083_vm10, %v2029_v58, %v2085_v51  ;;  %v2102_v17 = vstv %s6215_s15  ;;  %v2122_v5 = vstv %s6219_s7  ;;  %v2146_v19 = vstv %s6221_s14  ;;  %s4099_s10 = sld [smem:[#allocation9 + $0xb]]  ;;  %s4100_s15 = sld [smem:[#allocation9 + $0x2f]] }
 0x2f2   : > { %v2104_v37 = vstv %s6227_s30  ;;  %v2164_v25 = vstv %s6225_s25  ;;  %v2170_v9 = vstv %s6230_s5  ;;  %v2128_v24 = vstv %s6232_s6  ;;  %s4101_s7 = sld [smem:[#allocation9 + $0x53]]  ;;  %s4102_s14 = sld [smem:[#allocation9 + $0x77]] }
 0x2f3   : > { %v2188_v6 = vstv %s6234_s4  ;;  %v2152_v16 = vstv %s6236_s24  ;;  %v2194_v31 = vstv %s6242_s3  ;;  %v2176_v56 = vstv %s6244_s28  ;;  %s4103_s25 = sld [smem:[#allocation9 + $0x14]]  ;;  %s4104_s30 = sld [smem:[#allocation9 + $0x38]] }
 0x2f4   : > { %v2200_v11 = vstv %s6249_s8  ;;  %v2106_v62 = vstv %s6251_s22  ;;  %v2134_v46 = vstv %s6255_s13  ;;  %v2158_v12 = vstv %s6257_s20  ;;  %s4105_s5 = sld [smem:[#allocation9 + $0x5c]]  ;;  %s4106_s6 = sld [smem:[#allocation9 + $0x80]] }
 0x2f5   : > { %2092 = vrot.lane.b32.xlu1 %v2087_v29, %s8256_s0  ;;  %v2182_v28 = vstv %s6263_s29  ;;  %v2206_v51 = vstv %s6274_s11  ;;  %s6362_s0 = sld [smem:[#allocation9 + $0x37]]  ;;  %s4107_s4 = sld [smem:[#allocation9 + $0x1d]] }
 0x2f6   : > { %s4108_s24 = sld [smem:[#allocation9 + $0x41]]  ;;  %s4109_s3 = sld [smem:[#allocation9 + $0x65]] }
 0x2f7   : > { %s4110_s28 = sld [smem:[#allocation9 + $0x89]]  ;;  %s6532_s8 = sld [smem:[#allocation9 + $0x4]] }
 0x2f8   : > { %s6542_s22 = sld [smem:[#allocation9 + $0x28]]  ;;  %s6555_s13 = sld [smem:[#allocation9 + $0x4c]] }
 0x2f9   : > { %s6566_s20 = sld [smem:[#allocation9 + $0x70]]  ;;  %s6579_s29 = sld [smem:[#allocation9 + $0xd]] }
 0x2fa   : > { %s6590_s11 = sld [smem:[#allocation9 + $0x31]] }
 0x356   : > { %v2041_v14 = vpop.permute.xlu0 %2040 }
 0x357   : > { %2046 = vst.msk [vmem:[#allocation2 + $0x1] sm:$0xff] %vm357_vm2, %v2041_v14 }
 0x35a   : > { %v2057_v55 = vpop.permute.xlu0 %2056 }
 0x35b   : > { %v2043_v7 = vpop.permute.xlu1 %2042  ;;  %2063 = vst.msk [vmem:[#allocation2 + $0x19] sm:$0xff] %vm357_vm2, %v2057_v55 }
 0x35c   : > { %2047 = vst.msk [vmem:[#allocation2 + $0x9] sm:$0xff] %vm357_vm2, %v2043_v7 }
 0x35e   : > { %v2074_v21 = vpop.permute.xlu0 %2073  ;;  %v6211_v48 = vld [vmem:[#allocation2] sm:$0xff] }
 0x35f   : > { %v2059_v39 = vpop.permute.xlu1 %2058  ;;  %2080 = vst.msk [vmem:[#allocation2 + $0x31] sm:$0xff] %vm357_vm2, %v2074_v21  ;;  %v2213_v30 = vmul.f32 %v2212_v36, %v6211_v48  ;;  %v2227_v22 = vmul.f32 %v2226_v63, %v6211_v48  ;;  %v2241_v52 = vmul.f32 %v2240_v3, %v6211_v48  ;;  %v2255_v41 = vmul.f32 %v2254_v27, %v6211_v48 }
 0x360   : > { %2064 = vst.msk [vmem:[#allocation2 + $0x21] sm:$0xff] %vm357_vm2, %v2059_v39  ;;  %v2117_v23 = vmul.f32 %v2116_v60, %v6211_v48  ;;  %v2123_v53 = vmul.f32 %v2122_v5, %v6211_v48  ;;  %v2129_v58 = vmul.f32 %v2128_v24, %v6211_v48  ;;  %v2135_v18 = vmul.f32 %v2134_v46, %v6211_v48 }
 0x361   : > { %2217 = vrot.lane.b32.xlu0 %v2213_v30, %s8263_s1 }
 0x362   : > { %v2091_v13 = vpop.permute.xlu0 %2090  ;;  %v6285_v4 = vld [vmem:[#allocation2 + $0x18] sm:$0xff]  ;;  %v2119_v59 = vadd.f32 %v2117_v23, %v2100_v10  ;;  %v2125_v21 = vadd.f32 %v2123_v53, %v2102_v17 }
 0x363   : > { %v2076_v49 = vpop.permute.xlu1 %2075  ;;  %2097 = vst.msk [vmem:[#allocation2 + $0x49] sm:$0xff] %vm357_vm2, %v2091_v13  ;;  %v6239_v8 = vld [vmem:[#allocation2 + $0x8] sm:$0xff]  ;;  %v2269_v15 = vmul.f32 %v2268_v32, %v6285_v4  ;;  %v2141_v38 = vmul.f32 %v2140_v34, %v6285_v4  ;;  %v2147_v39 = vmul.f32 %v2146_v19, %v6285_v4 }
 0x364   : > { %2081 = vst.msk [vmem:[#allocation2 + $0x39] sm:$0xff] %vm357_vm2, %v2076_v49  ;;  %v2214_v20 = vmul.f32 %v2212_v36, %v6239_v8  ;;  %v2228_v44 = vmul.f32 %v2226_v63, %v6239_v8  ;;  %v2242_v54 = vmul.f32 %v2240_v3, %v6239_v8  ;;  %v2118_v33 = vmul.f32 %v2116_v60, %v6239_v8 }
 0x365   : > { %2231 = vrot.lane.b32.xlu0 %v2227_v22, %s8263_s1  ;;  %v2256_v57 = vmul.f32 %v2254_v27, %v6239_v8  ;;  %v2143_v29 = vadd.f32 %v2141_v38, %v2119_v59  ;;  %v2283_v36 = vmul.f32 %v2282_v26, %v6285_v4  ;;  %v2124_v27 = vmul.f32 %v2122_v5, %v6239_v8 }
 0x366   : > { %2219 = vrot.lane.b32.xlu1 %v2214_v20, %s8263_s1  ;;  %v6293_v45 = vld [vmem:[#allocation2 + $0x30] sm:$0xff]  ;;  %v2120_v55 = vadd.f32 %v2118_v33, %v2100_v10  ;;  %v2149_v20 = vadd.f32 %v2147_v39, %v2125_v21  ;;  %v2131_v5 = vadd.f32 %v2129_v58, %v2104_v37  ;;  %v2130_v38 = vmul.f32 %v2128_v24, %v6239_v8 }
 0x367   : > { %v2093_v0 = vpop.permute.xlu1 %2092  ;;  %v6291_v61 = vld [vmem:[#allocation2 + $0x20] sm:$0xff]  ;;  %v2165_v2 = vmul.f32 %v2164_v25, %v6293_v45  ;;  %v2171_v30 = vmul.f32 %v2170_v9, %v6293_v45  ;;  %v2137_v33 = vadd.f32 %v2135_v18, %v2106_v62  ;;  %v2325_v21 = vmul.f32 %v2324_v50, %v6293_v45 }
 0x368   : > { %2098 = vst.msk [vmem:[#allocation2 + $0x51] sm:$0xff] %vm357_vm2, %v2093_v0  ;;  %v2142_v47 = vmul.f32 %v2140_v34, %v6291_v61  ;;  %v2270_v63 = vmul.f32 %v2268_v32, %v6291_v61  ;;  %v2148_v0 = vmul.f32 %v2146_v19, %v6291_v61  ;;  %v2297_v32 = vmul.f32 %v2296_v1, %v6285_v4 }
 0x369   : > { %2245 = vrot.lane.b32.xlu0 %v2241_v52, %s8263_s1  ;;  %v2167_v13 = vadd.f32 %v2165_v2, %v2143_v29  ;;  %v2173_v60 = vadd.f32 %v2171_v30, %v2149_v20  ;;  %v2126_v34 = vadd.f32 %v2124_v27, %v2102_v17  ;;  %v2153_v19 = vmul.f32 %v2152_v16, %v6285_v4 }
 0x36a   : > { %2233 = vrot.lane.b32.xlu1 %v2228_v44, %s8263_s1  ;;  %v6308_v43 = vld [vmem:[#allocation2 + $0x48] sm:$0xff]  ;;  %v2144_v49 = vadd.f32 %v2142_v47, %v2120_v55  ;;  %v2177_v17 = vmul.f32 %v2176_v56, %v6293_v45  ;;  %v2154_v53 = vmul.f32 %v2152_v16, %v6291_v61  ;;  %v2132_v47 = vadd.f32 %v2130_v38, %v2104_v37 }
 0x36b   : > { %v6306_v40 = vld [vmem:[#allocation2 + $0x38] sm:$0xff]  ;;  %v2189_v14 = vmul.f32 %v2188_v6, %v6308_v43  ;;  %v2195_v3 = vmul.f32 %v2194_v31, %v6308_v43  ;;  %v2183_v16 = vmul.f32 %v2182_v28, %v6293_v45  ;;  %v2136_v29 = vmul.f32 %v2134_v46, %v6239_v8 }
 0x36c   : > { %v2166_v7 = vmul.f32 %v2164_v25, %v6306_v40  ;;  %v2172_v44 = vmul.f32 %v2170_v9, %v6306_v40  ;;  %v2284_v25 = vmul.f32 %v2282_v26, %v6291_v61  ;;  %v2201_v26 = vmul.f32 %v2200_v11, %v6308_v43 }
 0x36d   : > { %2259 = vrot.lane.b32.xlu0 %v2255_v41, %s8263_s1  ;;  %v6348_v52 = vadd.f32 %v2189_v14, %v2167_v13  ;;  %v6370_v23 = vadd.f32 %v2195_v3, %v2173_v60  ;;  %v2178_v24 = vmul.f32 %v2176_v56, %v6306_v40  ;;  %v2156_v56 = vadd.f32 %v2154_v53, %v2132_v47 }
 0x36e   : > { %2247 = vrot.lane.b32.xlu1 %v2242_v54, %s8263_s1  ;;  %v2168_v10 = vadd.f32 %v2166_v7, %v2144_v49  ;;  %v2155_v54 = vadd.f32 %v2153_v19, %v2131_v5  ;;  %v2160_v55 = vmul.f32 %v2158_v12, %v6291_v61  ;;  %v2184_v46 = vmul.f32 %v2182_v28, %v6306_v40 }
 0x36f   : > { %v6317_v42 = vld [vmem:[#allocation2 + $0x50] sm:$0xff]  ;;  %v2338_v39 = vstv %s6362_s0  ;;  %v2180_v30 = vadd.f32 %v2178_v24, %v2156_v56  ;;  %v2366_v27 = vstv %s4090_s26  ;;  %v2394_v60 = vstv %s4092_s18  ;;  %s6603_s0 = sld [smem:[#allocation9 + $0x55]]  ;;  %s6627_s26 = sld [smem:[#allocation9 + $0x16]] }
 0x370   : > { %v2190_v22 = vmul.f32 %v2188_v6, %v6317_v42  ;;  %v2196_v41 = vmul.f32 %v2194_v31, %v6317_v42  ;;  %v2150_v6 = vadd.f32 %v2148_v0, %v2126_v34  ;;  %v2311_v31 = vmul.f32 %v2310_v35, %v6285_v4  ;;  %s6651_s18 = sld [smem:[#allocation9 + $0x5e]] }
 0x371   : > { %2273 = vrot.lane.b32.xlu0 %v2269_v15, %s8263_s1  ;;  %v2298_v15 = vmul.f32 %v2296_v1, %v6291_v61  ;;  %v2179_v2 = vadd.f32 %v2177_v17, %v2155_v54  ;;  %v2159_v1 = vmul.f32 %v2158_v12, %v6285_v4  ;;  %v2202_v14 = vmul.f32 %v2200_v11, %v6317_v42 }
 0x372   : > { %2261 = vrot.lane.b32.xlu1 %v2256_v57, %s8263_s1  ;;  %v6364_v9 = vadd.f32 %v2190_v22, %v2168_v10  ;;  %v2174_v59 = vadd.f32 %v2172_v44, %v2150_v6  ;;  %v2207_v57 = vmul.f32 %v2206_v51, %v6308_v43  ;;  %v2312_v11 = vmul.f32 %v2310_v35, %v6291_v61 }
 0x373   : > { %v6409_v18 = vadd.f32 %v2201_v26, %v2179_v2  ;;  %v2161_v37 = vadd.f32 %v2159_v1, %v2137_v33  ;;  %v2208_v13 = vmul.f32 %v2206_v51, %v6317_v42  ;;  %v2339_v49 = vmul.f32 %v2338_v39, %v6293_v45 }
 0x374   : > { %v6407_v58 = vadd.f32 %v2196_v41, %v2174_v59  ;;  %v2326_v22 = vmul.f32 %v2324_v50, %v6306_v40  ;;  %v2352_v35 = vstv %s6405_s23  ;;  %v2340_v3 = vmul.f32 %v2338_v39, %v6306_v40  ;;  %s6614_s23 = sld [smem:[#allocation9 + $0x79]] }
 0x375   : > { %2287 = vrot.lane.b32.xlu0 %v2283_v36, %s8263_s1  ;;  %v2185_v7 = vadd.f32 %v2183_v16, %v2161_v37  ;;  %v2138_v36 = vadd.f32 %v2136_v29, %v2106_v62  ;;  %v6440_v62 = vadd.f32 %v2202_v14, %v2180_v30  ;;  %v2353_v51 = vmul.f32 %v2352_v35, %v6293_v45 }
 0x376   : > { %2275 = vrot.lane.b32.xlu1 %v2270_v63, %s8263_s1  ;;  %v2367_v50 = vmul.f32 %v2366_v27, %v6293_v45  ;;  %v2354_v0 = vmul.f32 %v2352_v35, %v6306_v40  ;;  %v2368_v44 = vmul.f32 %v2366_v27, %v6306_v40  ;;  %v2395_v34 = vmul.f32 %v2394_v60, %v6308_v43 }
 0x377   : > { %v6434_v12 = vadd.f32 %v2207_v57, %v2185_v7  ;;  %v2162_v63 = vadd.f32 %v2160_v55, %v2138_v36  ;;  %v2408_v19 = vstv %s4093_s12  ;;  %v2396_v41 = vmul.f32 %v2394_v60, %v6317_v42  ;;  %s6662_s12 = sld [smem:[#allocation9 + $0x82]] }
 0x378   : > { %v2422_v17 = vstv %s4094_s16  ;;  %v2410_v54 = vmul.f32 %v2408_v19, %v6317_v42  ;;  %v2436_v26 = vstv %s4095_s19  ;;  %v2450_v38 = vstv %s4096_s17  ;;  %s6675_s16 = sld [smem:[#allocation9 + $0x1f]]  ;;  %s6686_s19 = sld [smem:[#allocation9 + $0x43]] }
 0x379   : > { %2301 = vrot.lane.b32.xlu0 %v2297_v32, %s8263_s1  ;;  %v2186_v28 = vadd.f32 %v2184_v46, %v2162_v63  ;;  %v2380_v32 = vstv %s4091_s9  ;;  %v2423_v6 = vmul.f32 %v2422_v17, %v6308_v43  ;;  %v2451_v53 = vmul.f32 %v2450_v38, %v6211_v48  ;;  %s6638_s9 = sld [smem:[#allocation9 + $0x3a]]  ;;  %s6699_s17 = sld [smem:[#allocation9 + $0x67]] }
 0x37a   : > { %2289 = vrot.lane.b32.xlu1 %v2284_v25, %s8263_s1  ;;  %v2381_v10 = vmul.f32 %v2380_v32, %v6308_v43  ;;  %v2382_v5 = vmul.f32 %v2380_v32, %v6317_v42  ;;  %v2409_v25 = vmul.f32 %v2408_v19, %v6308_v43  ;;  %v2438_v59 = vmul.f32 %v2436_v26, %v6239_v8 }
 0x37b   : > { %v6448_v20 = vadd.f32 %v2208_v13, %v2186_v28  ;;  %v2464_v2 = vstv %s4097_s21  ;;  %v2452_v1 = vmul.f32 %v2450_v38, %v6239_v8  ;;  %v2478_v47 = vstv %s4098_s2  ;;  %s6710_s21 = sld [smem:[#allocation9 + $0x8b]]  ;;  %s6723_s2 = sld [smem:[#allocation9 + $0x5]] }
 0x37c   : > { %v2465_v33 = vmul.f32 %v2464_v2, %v6211_v48  ;;  %v2479_v24 = vmul.f32 %v2478_v47, %v6211_v48  ;;  %v2466_v16 = vmul.f32 %v2464_v2, %v6239_v8  ;;  %v2492_v57 = vstv %s4099_s10  ;;  %s6734_s10 = sld [smem:[#allocation9 + $0x29]] }
 0x37d   : > { %2315 = vrot.lane.b32.xlu0 %v2311_v31, %s8263_s1  ;;  %8264 = vst [vmem:[#allocation34_spill] sm:$0xff] %v6448_v20  ;;  %v2424_v31 = vmul.f32 %v2422_v17, %v6317_v42  ;;  %v2493_v37 = vmul.f32 %v2492_v57, %v6285_v4  ;;  %v2480_v29 = vmul.f32 %v2478_v47, %v6239_v8  ;;  %v2506_v56 = vstv %s4100_s15  ;;  %s6745_s15 = sld [smem:[#allocation9 + $0x4d]] }
 0x37e   : > { %2303 = vrot.lane.b32.xlu1 %v2298_v15, %s8263_s1  ;;  %v2437_v15 = vmul.f32 %v2436_v26, %v6211_v48  ;;  %v2507_v48 = vmul.f32 %v2506_v56, %v6285_v4  ;;  %v2494_v14 = vmul.f32 %v2492_v57, %v6291_v61  ;;  %v2520_v55 = vstv %s4101_s7  ;;  %s6752_s7 = sld [smem:[#allocation9 + $0x71]] }
 0x37f   : > { %v2521_v7 = vmul.f32 %v2520_v55, %v6285_v4  ;;  %v2508_v8 = vmul.f32 %v2506_v56, %v6291_v61  ;;  %v2534_v36 = vstv %s4102_s14  ;;  %v2548_v39 = vstv %s4103_s25  ;;  %s6758_s14 = sld [smem:[#allocation9 + $0xe]]  ;;  %s6760_s25 = sld [smem:[#allocation9 + $0x32]] }
 0x380   : > { %v2535_v46 = vmul.f32 %v2534_v36, %v6285_v4  ;;  %v2549_v30 = vmul.f32 %v2548_v39, %v6293_v45  ;;  %v2562_v63 = vstv %s4104_s30  ;;  %v2550_v13 = vmul.f32 %v2548_v39, %v6306_v40  ;;  %s6763_s30 = sld [smem:[#allocation9 + $0x56]] }
 0x381   : > { %2329 = vrot.lane.b32.xlu0 %v2325_v21, %s8263_s1  ;;  %v2522_v21 = vmul.f32 %v2520_v55, %v6291_v61  ;;  %v2563_v4 = vmul.f32 %v2562_v63, %v6293_v45  ;;  %v2576_v28 = vstv %s4105_s5  ;;  %v2646_v19 = vstv %s4110_s28  ;;  %s6765_s5 = sld [smem:[#allocation9 + $0x7a]]  ;;  %s6783_s28 = sld [smem:[#allocation9 + $0x27]] }
 0x382   : > { %2317 = vrot.lane.b32.xlu1 %v2312_v11, %s8263_s1  ;;  %v2536_v11 = vmul.f32 %v2534_v36, %v6291_v61  ;;  %v2564_v61 = vmul.f32 %v2562_v63, %v6306_v40  ;;  %v2764_v26 = vstv %s6532_s8  ;;  %s6785_s8 = sld [smem:[#allocation9 + $0x30]] }
 0x385   : > { %2343 = vrot.lane.b32.xlu0 %v2339_v49, %s8263_s1  ;;  %v2577_v49 = vmul.f32 %v2576_v28, %v6293_v45 }
 0x386   : > { %2331 = vrot.lane.b32.xlu1 %v2326_v22, %s8263_s1  ;;  %v2590_v22 = vstv %s4106_s6  ;;  %s6768_s6 = sld [smem:[#allocation9 + $0x17]] }
 0x387   : > { %v2591_v35 = vmul.f32 %v2590_v22, %v6293_v45 }
 0x389   : > { %2357 = vrot.lane.b32.xlu0 %v2353_v51, %s8263_s1  ;;  %v2578_v51 = vmul.f32 %v2576_v28, %v6306_v40 }
 0x38a   : > { %2345 = vrot.lane.b32.xlu1 %v2340_v3, %s8263_s1  ;;  %v2604_v3 = vstv %s4107_s4  ;;  %s6770_s4 = sld [smem:[#allocation9 + $0x3]] }
 0x38b   : > { %v2605_v27 = vmul.f32 %v2604_v3, %v6308_v43 }
 0x38d   : > { %2371 = vrot.lane.b32.xlu0 %v2367_v50, %s8263_s1  ;;  %v2592_v50 = vmul.f32 %v2590_v22, %v6306_v40 }
 0x38e   : > { %2359 = vrot.lane.b32.xlu1 %v2354_v0, %s8263_s1  ;;  %v2618_v0 = vstv %s4108_s24  ;;  %s6775_s24 = sld [smem:[#allocation9 + $0xc]] }
 0x38f   : > { %v2619_v45 = vmul.f32 %v2618_v0, %v6308_v43 }
 0x391   : > { %2385 = vrot.lane.b32.xlu0 %v2381_v10, %s8263_s1  ;;  %v2606_v10 = vmul.f32 %v2604_v3, %v6317_v42  ;;  %v2862_v3 = vstv %s6614_s23  ;;  %s6808_s23 = sld [smem:[#allocation9 + $0x20]] }
 0x392   : > { %2373 = vrot.lane.b32.xlu1 %v2368_v44, %s8263_s1  ;;  %v2632_v44 = vstv %s4109_s3  ;;  %s6777_s3 = sld [smem:[#allocation9 + $0x3b]] }
 0x393   : > { %v2633_v60 = vmul.f32 %v2632_v44, %v6308_v43 }
 0x395   : > { %2399 = vrot.lane.b32.xlu0 %v2395_v34, %s8263_s1 }
 0x396   : > { %2387 = vrot.lane.b32.xlu1 %v2382_v5, %s8263_s1  ;;  %v2620_v5 = vmul.f32 %v2618_v0, %v6317_v42 }
 0x399   : > { %2413 = vrot.lane.b32.xlu0 %v2409_v25, %s8263_s1 }
 0x39a   : > { %2401 = vrot.lane.b32.xlu1 %v2396_v41, %s8263_s1  ;;  %v2647_v41 = vmul.f32 %v2646_v19, %v6308_v43  ;;  %v2648_v43 = vmul.f32 %v2646_v19, %v6317_v42 }
 0x39d   : > { %2427 = vrot.lane.b32.xlu0 %v2423_v6, %s8263_s1  ;;  %v2634_v6 = vmul.f32 %v2632_v44, %v6317_v42  ;;  %v2876_v44 = vstv %s6627_s26  ;;  %s6810_s26 = sld [smem:[#allocation9 + $0x15]] }
 0x39e   : > { %2415 = vrot.lane.b32.xlu1 %v2410_v54, %s8263_s1  ;;  %v6552_v54 = vld [vmem:[#allocation2 + $0x1] sm:$0xff] }
 0x3a1   : > { %2441 = vrot.lane.b32.xlu0 %v2437_v15, %s8265_s27 }
 0x3a2   : > { %2429 = vrot.lane.b32.xlu1 %v2424_v31, %s8263_s1  ;;  %v2765_v31 = vmul.f32 %v2764_v26, %v6552_v54 }
 0x3a5   : > { %2455 = vrot.lane.b32.xlu0 %v2451_v53, %s8265_s27  ;;  %v2778_v53 = vstv %s6542_s22  ;;  %s6788_s22 = sld [smem:[#allocation9 + $0x5f]] }
 0x3a6   : > { %2443 = vrot.lane.b32.xlu1 %v2438_v59, %s8265_s27  ;;  %v6569_v59 = vld [vmem:[#allocation2 + $0x9] sm:$0xff] }
 0x3a7   : > { %v2766_v47 = vmul.f32 %v2764_v26, %v6569_v59  ;;  %v6665_v26 = vld [vmem:[#allocation2 + $0x39] sm:$0xff] }
 0x3a9   : > { %2469 = vrot.lane.b32.xlu0 %v2465_v33, %s8265_s27  ;;  %v2779_v33 = vmul.f32 %v2778_v53, %v6552_v54 }
 0x3aa   : > { %2457 = vrot.lane.b32.xlu1 %v2452_v1, %s8265_s27 }
 0x3ad   : > { %2483 = vrot.lane.b32.xlu0 %v2479_v24, %s8265_s27  ;;  %v2792_v24 = vstv %s6555_s13  ;;  %s6790_s13 = sld [smem:[#allocation9 + $0x4b]] }
 0x3ae   : > { %2471 = vrot.lane.b32.xlu1 %v2466_v16, %s8265_s27  ;;  %v2793_v16 = vmul.f32 %v2792_v24, %v6552_v54  ;;  %v2794_v55 = vmul.f32 %v2792_v24, %v6569_v59 }
 0x3b1   : > { %2497 = vrot.lane.b32.xlu0 %v2493_v37, %s8265_s27  ;;  %v2780_v37 = vmul.f32 %v2778_v53, %v6569_v59 }
 0x3b2   : > { %2485 = vrot.lane.b32.xlu1 %v2480_v29, %s8265_s27  ;;  %v2806_v29 = vstv %s6566_s20  ;;  %s6793_s20 = sld [smem:[#allocation9 + $0x54]] }
 0x3b3   : > { %v2808_v39 = vmul.f32 %v2806_v29, %v6569_v59  ;;  %v2680_v20 = vstv %s6790_s13  ;;  %s7312_s13 = sld [smem:[#allocation9 + $0x22]] }
 0x3b5   : > { %2511 = vrot.lane.b32.xlu0 %v2507_v48, %s8265_s27  ;;  %v2807_v48 = vmul.f32 %v2806_v29, %v6552_v54 }
 0x3b6   : > { %2499 = vrot.lane.b32.xlu1 %v2494_v14, %s8265_s27 }
 0x3b9   : > { %2525 = vrot.lane.b32.xlu0 %v2521_v7, %s8265_s27  ;;  %v6600_v7 = vld [vmem:[#allocation2 + $0x19] sm:$0xff] }
 0x3ba   : > { %2513 = vrot.lane.b32.xlu1 %v2508_v8, %s8265_s27  ;;  %v2820_v8 = vstv %s6579_s29  ;;  %s6795_s29 = sld [smem:[#allocation9 + $0x83]] }
 0x3bd   : > { %2539 = vrot.lane.b32.xlu0 %v2535_v46, %s8265_s27  ;;  %v2821_v46 = vmul.f32 %v2820_v8, %v6600_v7 }
 0x3be   : > { %2527 = vrot.lane.b32.xlu1 %v2522_v21, %s8265_s27 }
 0x3c1   : > { %2553 = vrot.lane.b32.xlu0 %v2549_v30, %s8265_s27  ;;  %v2834_v30 = vstv %s6590_s11  ;;  %s6800_s11 = sld [smem:[#allocation9 + $0x6f]] }
 0x3c2   : > { %2541 = vrot.lane.b32.xlu1 %v2536_v11, %s8265_s27  ;;  %v6617_v11 = vld [vmem:[#allocation2 + $0x21] sm:$0xff] }
 0x3c3   : > { %v2822_v28 = vmul.f32 %v2820_v8, %v6617_v11 }
 0x3c5   : > { %2567 = vrot.lane.b32.xlu0 %v2563_v4, %s8265_s27  ;;  %v2835_v4 = vmul.f32 %v2834_v30, %v6600_v7 }
 0x3c6   : > { %2555 = vrot.lane.b32.xlu1 %v2550_v13, %s8265_s27 }
 0x3c9   : > { %2581 = vrot.lane.b32.xlu0 %v2577_v49, %s8265_s27  ;;  %v2848_v49 = vstv %s6603_s0  ;;  %s6802_s0 = sld [smem:[#allocation9 + $0x78]] }
 0x3ca   : > { %2569 = vrot.lane.b32.xlu1 %v2564_v61, %s8265_s27  ;;  %v2849_v22 = vmul.f32 %v2848_v49, %v6600_v7 }
 0x3cd   : > { %2595 = vrot.lane.b32.xlu0 %v2591_v35, %s8265_s27 }
 0x3ce   : > { %2583 = vrot.lane.b32.xlu1 %v2578_v51, %s8265_s27  ;;  %v2836_v51 = vmul.f32 %v2834_v30, %v6617_v11  ;;  %v6696_v30 = vld [vmem:[#allocation2 + $0x49] sm:$0xff] }
 0x3d1   : > { %2609 = vrot.lane.b32.xlu0 %v2605_v27, %s8265_s27 }
 0x3d2   : > { %2597 = vrot.lane.b32.xlu1 %v2592_v50, %s8265_s27  ;;  %v2863_v50 = vmul.f32 %v2862_v3, %v6600_v7 }
 0x3d3   : > { %v6528_v32 = vpop.permute.xlu0 %2217 }
 0x3d5   : > { %2623 = vrot.lane.b32.xlu0 %v2619_v45, %s8265_s27  ;;  %v2850_v45 = vmul.f32 %v2848_v49, %v6617_v11 }
 0x3d6   : > { %2611 = vrot.lane.b32.xlu1 %v2606_v10, %s8265_s27  ;;  %v6648_v10 = vld [vmem:[#allocation2 + $0x31] sm:$0xff] }
 0x3d7   : > { %v6536_v40 = vpop.permute.xlu0 %2231 }
 0x3d8   : > { %v6539_v34 = vpop.permute.xlu1 %2219 }
 0x3d9   : > { %2637 = vrot.lane.b32.xlu0 %v2633_v60, %s8265_s27 }
 0x3da   : > { %2625 = vrot.lane.b32.xlu1 %v2620_v5, %s8265_s27  ;;  %v2877_v5 = vmul.f32 %v2876_v44, %v6648_v10 }
 0x3db   : > { %v6546_v25 = vpop.permute.xlu0 %2245 }
 0x3dc   : > { %v6549_v17 = vpop.permute.xlu1 %2233 }
 0x3dd   : > { %2651 = vrot.lane.b32.xlu0 %v2647_v41, %s8265_s27  ;;  %v2864_v41 = vmul.f32 %v2862_v3, %v6617_v11  ;;  %v2946_v3 = vstv %s6686_s19  ;;  %s6825_s19 = sld [smem:[#allocation9 + $0x68]] }
 0x3de   : > { %2639 = vrot.lane.b32.xlu1 %v2634_v6, %s8265_s27  ;;  %v2890_v6 = vstv %s6638_s9  ;;  %s6813_s9 = sld [smem:[#allocation9 + $0x1e]] }
 0x3df   : > { %v6559_v15 = vpop.permute.xlu0 %2259  ;;  %v2892_v29 = vmul.f32 %v2890_v6, %v6665_v26 }
 0x3e0   : > { %v6562_v38 = vpop.permute.xlu1 %2247 }
 0x3e1   : > { %2769 = vrot.lane.b32.xlu0 %v2765_v31, %s8263_s1 }
 0x3e2   : > { %2653 = vrot.lane.b32.xlu1 %v2648_v43, %s8265_s27  ;;  %v2891_v43 = vmul.f32 %v2890_v6, %v6648_v10  ;;  %v2960_v6 = vstv %s6699_s17  ;;  %s6827_s17 = sld [smem:[#allocation9 + $0x5d]] }
 0x3e3   : > { %v6572_v2 = vpop.permute.xlu0 %2273 }
 0x3e4   : > { %v6575_v1 = vpop.permute.xlu1 %2261 }
 0x3e5   : > { %8266 = vst [vmem:[#allocation44_spill] sm:$0xff] %v6575_v1  ;;  %2783 = vrot.lane.b32.xlu0 %v2779_v33, %s8263_s1  ;;  %v2878_v33 = vmul.f32 %v2876_v44, %v6665_v26  ;;  %v2947_v44 = vmul.f32 %v2946_v3, %v6696_v30 }
 0x3e6   : > { %2771 = vrot.lane.b32.xlu1 %v2766_v47, %s8263_s1  ;;  %v2904_v47 = vstv %s6651_s18  ;;  %s6815_s18 = sld [smem:[#allocation9 + $0x44]] }
 0x3e7   : > { %v6583_v42 = vpop.permute.xlu0 %2287 }
 0x3e8   : > { %v6586_v57 = vpop.permute.xlu1 %2275 }
 0x3e9   : > { %2797 = vrot.lane.b32.xlu0 %v2793_v16, %s8263_s1  ;;  %v2905_v16 = vmul.f32 %v2904_v47, %v6648_v10 }
 0x3ea   : > { %2785 = vrot.lane.b32.xlu1 %v2780_v37, %s8263_s1 }
 0x3eb   : > { %v6594_v56 = vpop.permute.xlu0 %2301 }
 0x3ec   : > { %v6597_v14 = vpop.permute.xlu1 %2289 }
 0x3ed   : > { %2811 = vrot.lane.b32.xlu0 %v2807_v48, %s8263_s1  ;;  %v2918_v48 = vstv %s6662_s12  ;;  %s6818_s12 = sld [smem:[#allocation9 + $0x39]] }
 0x3ee   : > { %2799 = vrot.lane.b32.xlu1 %v2794_v55, %s8263_s1  ;;  %v2919_v8 = vmul.f32 %v2918_v48, %v6648_v10 }
 0x3ef   : > { %v6607_v36 = vpop.permute.xlu0 %2315 }
 0x3f0   : > { %8267 = vst [vmem:[#allocation29_spill] sm:$0xff] %v6607_v36  ;;  %v6610_v21 = vpop.permute.xlu1 %2303 }
 0x3f1   : > { %8268 = vst [vmem:[#allocation38_spill] sm:$0xff] %v6610_v21  ;;  %2825 = vrot.lane.b32.xlu0 %v2821_v46, %s8263_s1 }
 0x3f2   : > { %2813 = vrot.lane.b32.xlu1 %v2808_v39, %s8263_s1  ;;  %v2906_v39 = vmul.f32 %v2904_v47, %v6665_v26 }
 0x3f3   : > { %v6620_v63 = vpop.permute.xlu0 %2329 }
 0x3f4   : > { %v6623_v13 = vpop.permute.xlu1 %2317 }
 0x3f5   : > { %8269 = vst [vmem:[#allocation50_spill] sm:$0xff] %v6623_v13  ;;  %2839 = vrot.lane.b32.xlu0 %v2835_v4, %s8263_s1  ;;  %v2932_v4 = vstv %s6675_s16  ;;  %s6820_s16 = sld [smem:[#allocation9 + $0x42]]  ;;  %v3114_v13 = vstv %s6777_s3  ;;  %s7270_s3 = sld [smem:[#allocation9 + $0x19]] }
 0x3f6   : > { %2827 = vrot.lane.b32.xlu1 %v2822_v28, %s8263_s1  ;;  %v2933_v49 = vmul.f32 %v2932_v4, %v6696_v30  ;;  %v6922_v36 = vmul.f32 %v3114_v13, %v6665_v26 }
 0x3f7   : > { %v6631_v61 = vpop.permute.xlu0 %2343 }
 0x3f8   : > { %v6634_v35 = vpop.permute.xlu1 %2331 }
 0x3f9   : > { %2853 = vrot.lane.b32.xlu0 %v2849_v22, %s8263_s1 }
 0x3fa   : > { %2841 = vrot.lane.b32.xlu1 %v2836_v51, %s8263_s1  ;;  %v2920_v51 = vmul.f32 %v2918_v48, %v6665_v26 }
 0x3fb   : > { %v6642_v27 = vpop.permute.xlu0 %2357 }
 0x3fc   : > { %v6645_v0 = vpop.permute.xlu1 %2345 }
 0x3fd   : > { %8270 = vst [vmem:[#allocation31_spill] sm:$0xff] %v6645_v0  ;;  %2867 = vrot.lane.b32.xlu0 %v2863_v50, %s8263_s1  ;;  %v6713_v50 = vld [vmem:[#allocation2 + $0x51] sm:$0xff] }
 0x3fe   : > { %2855 = vrot.lane.b32.xlu1 %v2850_v45, %s8263_s1 }
 0x3ff   : > { %v6655_v60 = vpop.permute.xlu0 %2371 }
 0x400   : > { %8271 = vst [vmem:[#allocation35_spill] sm:$0xff] %v6655_v60  ;;  %v6658_v19 = vpop.permute.xlu1 %2359  ;;  %v2223_v60 = vadd.f32 %v6528_v32, %v6348_v52  ;;  %v6903_v52 = vmul.f32 %v3114_v13, %v6648_v10  ;;  %v6938_v13 = vmul.f32 %v2680_v20, %v6552_v54 }
 0x401   : > { %8272 = vst [vmem:[#allocation39_spill] sm:$0xff] %v6658_v19  ;;  %2881 = vrot.lane.b32.xlu0 %v2877_v5, %s8263_s1  ;;  %v3128_v19 = vstv %s6788_s22  ;;  %s7303_s22 = sld [smem:[#allocation9 + $0x85]] }
 0x402   : > { %2869 = vrot.lane.b32.xlu1 %v2864_v41, %s8263_s1  ;;  %v2934_v41 = vmul.f32 %v2932_v4, %v6713_v50  ;;  %v2962_v4 = vmul.f32 %v2960_v6, %v6713_v50  ;;  %v2279_v32 = vadd.f32 %v6572_v2, %v2223_v60  ;;  %v6925_v2 = vmul.f32 %v3128_v19, %v6648_v10 }
 0x403   : > { %v6668_v31 = vpop.permute.xlu0 %2385 }
 0x404   : > { %v6671_v53 = vpop.permute.xlu1 %2373 }
 0x405   : > { %8273 = vst [vmem:[#allocation51_spill] sm:$0xff] %v6671_v53  ;;  %2895 = vrot.lane.b32.xlu0 %v2891_v43, %s8263_s1  ;;  %v3072_v53 = vstv %s6763_s30  ;;  %s7209_s30 = sld [smem:[#allocation9 + $0x73]] }
 0x406   : > { %2883 = vrot.lane.b32.xlu1 %v2878_v33, %s8263_s1  ;;  %v2961_v33 = vmul.f32 %v2960_v6, %v6696_v30 }
 0x407   : > { %v6679_v24 = vpop.permute.xlu0 %2399 }
 0x408   : > { %v6682_v37 = vpop.permute.xlu1 %2387 }
 0x409   : > { %2909 = vrot.lane.b32.xlu0 %v2905_v16, %s8263_s1  ;;  %v2948_v16 = vmul.f32 %v2946_v3, %v6713_v50 }
 0x40a   : > { %2897 = vrot.lane.b32.xlu1 %v2892_v29, %s8263_s1  ;;  %v2974_v29 = vstv %s6710_s21  ;;  %s6834_s21 = sld [smem:[#allocation9 + $0x66]] }
 0x40b   : > { %v6690_v55 = vpop.permute.xlu0 %2413 }
 0x40c   : > { %8274 = vst [vmem:[#allocation32_spill] sm:$0xff] %v6690_v55  ;;  %v6693_v46 = vpop.permute.xlu1 %2401 }
 0x40d   : > { %8275 = vst [vmem:[#allocation45_spill] sm:$0xff] %v6693_v46  ;;  %2923 = vrot.lane.b32.xlu0 %v2919_v8, %s8263_s1  ;;  %v2975_v8 = vmul.f32 %v2974_v29, %v6696_v30 }
 0x40e   : > { %2911 = vrot.lane.b32.xlu1 %v2906_v39, %s8263_s1 }
 0x40f   : > { %v6703_v28 = vpop.permute.xlu0 %2427 }
 0x410   : > { %8276 = vst [vmem:[#allocation58_spill] sm:$0xff] %v6703_v28  ;;  %v6706_v22 = vpop.permute.xlu1 %2415  ;;  %v2674_v28 = vstv %s6783_s28  ;;  %s7281_s28 = sld [smem:[#allocation9 + $0x3d]] }
 0x411   : > { %8277 = vst [vmem:[#allocation36_spill] sm:$0xff] %v6706_v22  ;;  %2937 = vrot.lane.b32.xlu0 %v2933_v49, %s8263_s1  ;;  %v2988_v49 = vstv %s6723_s2  ;;  %s6836_s2 = sld [smem:[#allocation9 + $0x81]]  ;;  %v3100_v22 = vstv %s6768_s6  ;;  %v6928_v60 = vmul.f32 %v2674_v28, %v6569_v59  ;;  %s7233_s6 = sld [smem:[#allocation9 + $0x34]] }
 0x412   : > { %2925 = vrot.lane.b32.xlu1 %v2920_v51, %s8263_s1  ;;  %v2989_v3 = vmul.f32 %v2988_v49, %v6552_v54  ;;  %v3101_v46 = vmul.f32 %v3100_v22, %v6648_v10 }
 0x413   : > { %v6716_v45 = vpop.permute.xlu0 %2441 }
 0x414   : > { %v6719_v5 = vpop.permute.xlu1 %2429 }
 0x415   : > { %8278 = vst [vmem:[#allocation40_spill] sm:$0xff] %v6719_v5  ;;  %2951 = vrot.lane.b32.xlu0 %v2947_v44, %s8263_s1  ;;  %v3044_v5 = vstv %s6758_s14  ;;  %s7173_s14 = sld [smem:[#allocation9 + $0x2b]] }
 0x416   : > { %2939 = vrot.lane.b32.xlu1 %v2934_v41, %s8263_s1  ;;  %v2976_v41 = vmul.f32 %v2974_v29, %v6713_v50 }
 0x417   : > { %v6727_v43 = vpop.permute.xlu0 %2455 }
 0x418   : > { %v6730_v47 = vpop.permute.xlu1 %2443 }
 0x419   : > { %8279 = vst [vmem:[#allocation46_spill] sm:$0xff] %v6730_v47  ;;  %2965 = vrot.lane.b32.xlu0 %v2961_v33, %s8263_s1  ;;  %v3002_v33 = vstv %s6734_s10  ;;  %s6842_s10 = sld [smem:[#allocation9 + $0x8a]] }
 0x41a   : > { %2953 = vrot.lane.b32.xlu1 %v2948_v16, %s8263_s1  ;;  %v3003_v16 = vmul.f32 %v3002_v33, %v6552_v54 }
 0x41b   : > { %v6738_v48 = vpop.permute.xlu0 %2469 }
 0x41c   : > { %8280 = vst [vmem:[#allocation59_spill] sm:$0xff] %v6738_v48  ;;  %v6741_v39 = vpop.permute.xlu1 %2457  ;;  %v2704_v48 = vstv %s6793_s20  ;;  %s7317_s20 = sld [smem:[#allocation9 + $0x46]] }
 0x41d   : > { %8281 = vst [vmem:[#allocation37_spill] sm:$0xff] %v6741_v39  ;;  %2979 = vrot.lane.b32.xlu0 %v2975_v8, %s8263_s1  ;;  %v2990_v8 = vmul.f32 %v2988_v49, %v6569_v59  ;;  %v2698_v39 = vstv %s6785_s8  ;;  %s7294_s8 = sld [smem:[#allocation9 + $0x61]] }
 0x41e   : > { %2967 = vrot.lane.b32.xlu1 %v2962_v4, %s8263_s1  ;;  %v3016_v4 = vstv %s6745_s15  ;;  %s7106_s15 = sld [smem:[#allocation9 + $0x8c]] }
 0x41f   : > { %v6749_v51 = vpop.permute.xlu0 %2483  ;;  %v3017_v49 = vmul.f32 %v3016_v4, %v6552_v54 }
 0x420   : > { %8282 = vst [vmem:[#allocation52_spill] sm:$0xff] %v6749_v51  ;;  %v6754_v44 = vpop.permute.xlu1 %2471  ;;  %v3086_v51 = vstv %s6765_s5  ;;  %s7222_s5 = sld [smem:[#allocation9 + $0x10]] }
 0x421   : > { %8283 = vst [vmem:[#allocation41_spill] sm:$0xff] %v6754_v44  ;;  %2993 = vrot.lane.b32.xlu0 %v2989_v3, %s8265_s27  ;;  %v3058_v44 = vstv %s6760_s25  ;;  %v3087_v47 = vmul.f32 %v3086_v51, %v6600_v7  ;;  %s7196_s25 = sld [smem:[#allocation9 + $0x4f]] }
 0x422   : > { %2981 = vrot.lane.b32.xlu1 %v2976_v41, %s8263_s1 }
 0x423   : > { %v6772_v6 = vpop.permute.xlu0 %2497 }
 0x424   : > { %v6779_v29 = vpop.permute.xlu1 %2485 }
 0x425   : > { %8284 = vst [vmem:[#allocation47_spill] sm:$0xff] %v6779_v29  ;;  %3007 = vrot.lane.b32.xlu0 %v3003_v16, %s8265_s27  ;;  %v3004_v16 = vmul.f32 %v3002_v33, %v6569_v59  ;;  %v3030_v29 = vstv %s6752_s7  ;;  %s7140_s7 = sld [smem:[#allocation9 + $0x7]] }
 0x426   : > { %2995 = vrot.lane.b32.xlu1 %v2990_v8, %s8265_s27  ;;  %v3031_v8 = vmul.f32 %v3030_v29, %v6552_v54 }
 0x427   : > { %v6797_v3 = vpop.permute.xlu0 %2511 }
 0x428   : > { %8285 = vst [vmem:[#allocation53_spill] sm:$0xff] %v6797_v3  ;;  %v6804_v41 = vpop.permute.xlu1 %2499  ;;  %v3074_v3 = vmul.f32 %v3072_v53, %v6617_v11 }
 0x429   : > { %8286 = vst [vmem:[#allocation42_spill] sm:$0xff] %v6804_v41  ;;  %3021 = vrot.lane.b32.xlu0 %v3017_v49, %s8265_s27 }
 0x42a   : > { %3009 = vrot.lane.b32.xlu1 %v3004_v16, %s8265_s27  ;;  %v3018_v16 = vmul.f32 %v3016_v4, %v6569_v59  ;;  %v2668_v4 = vstv %s6770_s4  ;;  %s7246_s4 = sld [smem:[#allocation9 + $0x58]] }
 0x42b   : > { %v6822_v33 = vpop.permute.xlu0 %2525 }
 0x42c   : > { %8287 = vst [vmem:[#allocation60_spill] sm:$0xff] %v6822_v33  ;;  %v6829_v49 = vpop.permute.xlu1 %2513 }
 0x42d   : > { %8288 = vst [vmem:[#allocation48_spill] sm:$0xff] %v6829_v49  ;;  %3035 = vrot.lane.b32.xlu0 %v3031_v8, %s8265_s27  ;;  %v2692_v49 = vstv %s6775_s24  ;;  %v3045_v8 = vmul.f32 %v3044_v5, %v6600_v7  ;;  %s7257_s24 = sld [smem:[#allocation9 + $0x7c]] }
 0x42e   : > { %3023 = vrot.lane.b32.xlu1 %v3018_v16, %s8265_s27  ;;  %v3032_v16 = vmul.f32 %v3030_v29, %v6569_v59  ;;  %v3059_v29 = vmul.f32 %v3058_v44, %v6600_v7  ;;  %v6912_v21 = vmul.f32 %v2692_v49, %v6617_v11 }
 0x42f   : > { %v6848_v33 = vpop.permute.xlu0 %2539 }
 0x430   : > { %8289 = vst [vmem:[#allocation54_spill] sm:$0xff] %v6848_v33  ;;  %v6854_v1 = vpop.permute.xlu1 %2527  ;;  %v6915_v33 = vmul.f32 %v2674_v28, %v6552_v54  ;;  %v2224_v28 = vadd.f32 %v6539_v34, %v6364_v9  ;;  %v6960_v9 = vmul.f32 %v2680_v20, %v6569_v59  ;;  %v6963_v34 = vmul.f32 %v2704_v48, %v6617_v11 }
 0x431   : > { %8290 = vst [vmem:[#allocation61_spill] sm:$0xff] %v6854_v1  ;;  %3049 = vrot.lane.b32.xlu0 %v3045_v8, %s8265_s27  ;;  %v3046_v8 = vmul.f32 %v3044_v5, %v6617_v11  ;;  %v3073_v1 = vmul.f32 %v3072_v53, %v6600_v7  ;;  %v3088_v5 = vmul.f32 %v3086_v51, %v6617_v11 }
 0x432   : > { %3037 = vrot.lane.b32.xlu1 %v3032_v16, %s8265_s27  ;;  %v3060_v16 = vmul.f32 %v3058_v44, %v6617_v11  ;;  %v6894_v44 = vmul.f32 %v2668_v4, %v6552_v54  ;;  %v6900_v53 = vmul.f32 %v3100_v22, %v6665_v26  ;;  %v6909_v51 = vmul.f32 %v2668_v4, %v6569_v59 }
 0x433   : > { %v6868_v55 = vpop.permute.xlu0 %2553  ;;  %v6919_v22 = vmul.f32 %v2698_v39, %v6600_v7  ;;  %v2335_v4 = vadd.f32 %v6620_v63, %v2279_v32  ;;  %v8294_v63 = vstv %s6795_s29 }
 0x434   : > { %v6874_v0 = vpop.permute.xlu1 %2541 }
 0x435   : > { %8291 = vst [vmem:[#allocation49_spill] sm:$0xff] %v6874_v0  ;;  %3063 = vrot.lane.b32.xlu0 %v3059_v29, %s8265_s27  ;;  %v6897_v29 = vmul.f32 %v2692_v49, %v6600_v7  ;;  %v2237_v49 = vadd.f32 %v6536_v40, %v6370_v23  ;;  %v6945_v23 = vmul.f32 %v2704_v48, %v6600_v7 }
 0x436   : > { %3051 = vrot.lane.b32.xlu1 %v3046_v8, %s8265_s27  ;;  %v6948_v40 = vmul.f32 %v3128_v19, %v6665_v26  ;;  %v2391_v32 = vadd.f32 %v6668_v31, %v2335_v4  ;;  %v2280_v19 = vadd.f32 %v6586_v57, %v2224_v28  ;;  %v2251_v48 = vadd.f32 %v6546_v25, %v6409_v18 }
 0x437   : > { %v6891_v41 = vpop.permute.xlu0 %2567  ;;  %8293 = vst [vmem:[#allocation62_spill] sm:$0xff] %v6945_v23  ;;  %v2238_v4 = vadd.f32 %v6549_v17, %v6407_v58  ;;  %v8299_v18 = vstv %s6800_s11  ;;  %v8301_v58 = vstv %s6813_s9  ;;  %s7395_s9 = sld [smem:[#allocation9 + $0x74]] }
 0x438   : > { %v6906_v8 = vpop.permute.xlu1 %2555  ;;  %v2336_v28 = vadd.f32 %v6634_v35, %v2280_v19  ;;  %v7000_v25 = vmul.f32 %v8299_v18, %v6569_v59  ;;  %v2741_v17 = vmul.f32 %v8301_v58, %v6696_v30  ;;  %v8306_v18 = vstv %s6818_s12 }
 0x439   : > { %3077 = vrot.lane.b32.xlu0 %v3073_v1, %s8265_s27  ;;  %v6935_v1 = vmul.f32 %v2698_v39, %v6617_v11  ;;  %v6953_v39 = vmul.f32 %v8294_v63, %v6648_v10  ;;  %v8295_v63 = vstv %s6800_s11  ;;  %v2294_v35 = vadd.f32 %v6597_v14, %v2238_v4  ;;  %s7346_s11 = sld [smem:[#allocation9 + $0x8e]] }
 0x43a   : > { %3065 = vrot.lane.b32.xlu1 %v3060_v16, %s8265_s27  ;;  %v2293_v16 = vadd.f32 %v6583_v42, %v2237_v49  ;;  %v6970_v23 = vmul.f32 %v8295_v63, %v6552_v54  ;;  %v8296_v42 = vstv %s6802_s0  ;;  %v8297_v49 = vstv %s6795_s29  ;;  %s7326_s29 = sld [smem:[#allocation9 + $0x6a]] }
 0x43b   : > { %8292 = vst [vmem:[#allocation55_spill] sm:$0xff] %v6935_v1  ;;  %v6942_v0 = vpop.permute.xlu0 %2581  ;;  %v6975_v31 = vmul.f32 %v8296_v42, %v6600_v7  ;;  %v6980_v20 = vmul.f32 %v8297_v49, %v6665_v26  ;;  %v8298_v54 = vstv %s6808_s23  ;;  %v2392_v59 = vadd.f32 %v6682_v37, %v2336_v28 }
 0x43c   : > { %v6957_v1 = vpop.permute.xlu1 %2569  ;;  %v2349_v57 = vadd.f32 %v6631_v61, %v2293_v16  ;;  %v6990_v7 = vmul.f32 %v8298_v54, %v6696_v30  ;;  %v8300_v61 = vstv %s6810_s26  ;;  %v2252_v37 = vadd.f32 %v6562_v38, %v6440_v62  ;;  %v8305_v54 = vld [vmem:[#allocation46_spill] sm:$0xff]  ;;  %v8311_v62 = vld [vmem:[#allocation45_spill] sm:$0xff]  ;;  %s7387_s26 = sld [smem:[#allocation9 + $0x50]] }
 0x43d   : > { %3091 = vrot.lane.b32.xlu0 %v3087_v47, %s8265_s27  ;;  %v2447_v47 = vadd.f32 %v6716_v45, %v2391_v32  ;;  %v2717_v45 = vmul.f32 %v8300_v61, %v6648_v10  ;;  %v8302_v19 = vmov %v8300_v61  ;;  %v2448_v4 = vadd.f32 %v8305_v54, %v2392_v59  ;;  %v8308_v61 = vld [vmem:[#allocation32_spill] sm:$0xff] }
 0x43e   : > { %3079 = vrot.lane.b32.xlu1 %v3074_v3, %s8265_s27  ;;  %v2307_v3 = vadd.f32 %v6594_v56, %v2251_v48  ;;  %v2405_v16 = vadd.f32 %v6679_v24, %v2349_v57  ;;  %v7019_v49 = vmul.f32 %v8302_v19, %v6665_v26  ;;  %v8303_v56 = vmov %v8301_v58 }
 0x43f   : > { %v6995_v63 = vpop.permute.xlu0 %2595  ;;  %v2503_v32 = vadd.f32 %v6772_v6, %v2447_v47  ;;  %v7024_v24 = vmul.f32 %v8303_v56, %v6713_v50  ;;  %v2265_v6 = vadd.f32 %v6559_v15, %v6434_v12  ;;  %v2723_v12 = vmul.f32 %v8306_v18, %v6648_v10  ;;  %v8307_v15 = vld [vmem:[#allocation29_spill] sm:$0xff] }
 0x440   : > { %v7008_v42 = vpop.permute.xlu1 %2583  ;;  %v2363_v48 = vadd.f32 %v6642_v27, %v2307_v3  ;;  %v2461_v57 = vadd.f32 %v6727_v43, %v2405_v16  ;;  %v8309_v3 = vld [vmem:[#allocation53_spill] sm:$0xff]  ;;  %v8313_v59 = vstv %s6820_s16 }
 0x441   : > { %3105 = vrot.lane.b32.xlu0 %v3101_v46, %s8265_s27  ;;  %v2559_v14 = vadd.f32 %v6868_v55, %v2503_v32  ;;  %v8304_v46 = vld [vmem:[#allocation31_spill] sm:$0xff]  ;;  %v2321_v27 = vadd.f32 %v8307_v15, %v2265_v6  ;;  %v8310_v32 = vld [vmem:[#allocation38_spill] sm:$0xff]  ;;  %v2747_v56 = vmul.f32 %v8313_v59, %v6696_v30 }
 0x442   : > { %3093 = vrot.lane.b32.xlu1 %v3088_v5, %s8265_s27  ;;  %v2350_v47 = vadd.f32 %v8304_v46, %v2294_v35  ;;  %v2419_v43 = vadd.f32 %v8308_v61, %v2363_v48  ;;  %v2517_v55 = vadd.f32 %v8309_v3, %v2461_v57  ;;  %v2308_v58 = vadd.f32 %v8310_v32, %v2252_v37  ;;  %v8312_v35 = vld [vmem:[#allocation42_spill] sm:$0xff]  ;;  %v8314_v6 = vld [vmem:[#allocation35_spill] sm:$0xff] }
 0x443   : > { %v2610_v28 = vpop.permute.xlu0 %2609  ;;  %v2504_v19 = vadd.f32 %v8312_v35, %v2448_v4  ;;  %v2377_v46 = vadd.f32 %v8314_v6, %v2321_v27  ;;  %v8315_v48 = vld [vmem:[#allocation59_spill] sm:$0xff]  ;;  %v8316_v37 = vld [vmem:[#allocation34_spill] sm:$0xff]  ;;  %v8323_v35 = vld [vmem:[#allocation36_spill] sm:$0xff] }
 0x444   : > { %v7042_v16 = vpop.permute.xlu1 %2597  ;;  %v2615_v5 = vadd.f32 %v2610_v28, %v2559_v14  ;;  %v2406_v38 = vadd.f32 %v8311_v62, %v2350_v47  ;;  %v2475_v54 = vadd.f32 %v8315_v48, %v2419_v43  ;;  %v2573_v57 = vadd.f32 %v6891_v41, %v2517_v55  ;;  %v8317_v47 = vld [vmem:[#allocation44_spill] sm:$0xff]  ;;  %v8318_v28 = vld [vmem:[#allocation39_spill] sm:$0xff]  ;;  %v8320_v27 = vld [vmem:[#allocation58_spill] sm:$0xff] }
 0x445   : > { %3119 = vrot.lane.b32.xlu0 %v6903_v52, %s8265_s27  ;;  %v2266_v4 = vadd.f32 %v8317_v47, %v8316_v37  ;;  %v2364_v18 = vadd.f32 %v8318_v28, %v2308_v58  ;;  %v8319_v52 = vld [vmem:[#allocation37_spill] sm:$0xff]  ;;  %v2560_v61 = vadd.f32 %v6906_v8, %v2504_v19  ;;  %v2433_v32 = vadd.f32 %v8320_v27, %v2377_v46  ;;  %v8321_v43 = vld [vmem:[#allocation60_spill] sm:$0xff]  ;;  %v8328_v28 = vld [vmem:[#allocation54_spill] sm:$0xff] }
 0x446   : > { %v2671_v14 = vadd.f32 %v6894_v44, %v2615_v5  ;;  %3107 = vrot.lane.b32.xlu1 %v6900_v53, %s8265_s27  ;;  %v2462_v15 = vadd.f32 %v8319_v52, %v2406_v38  ;;  %v2531_v62 = vadd.f32 %v8321_v43, %v2475_v54  ;;  %v8322_v5 = vld [vmem:[#allocation50_spill] sm:$0xff]  ;;  %v8324_v6 = vld [vmem:[#allocation48_spill] sm:$0xff]  ;;  %v8326_v54 = vld [vmem:[#allocation51_spill] sm:$0xff] }
 0x447   : > { %v2624_v3 = vpop.permute.xlu0 %2623  ;;  %v2322_v53 = vadd.f32 %v8322_v5, %v2266_v4  ;;  %v2420_v59 = vadd.f32 %v8323_v35, %v2364_v18  ;;  %v8325_v8 = vld [vmem:[#allocation52_spill] sm:$0xff] }
 0x448   : > { %v2695_v41 = vadd.f32 %v6897_v29, %v2671_v14  ;;  %v2612_v44 = vpop.permute.xlu1 %2611  ;;  %v2629_v55 = vadd.f32 %v2624_v3, %v2573_v57  ;;  %v2518_v48 = vadd.f32 %v8324_v6, %v2462_v15  ;;  %v2489_v38 = vadd.f32 %v8325_v8, %v2433_v32  ;;  %v8327_v14 = vld [vmem:[#allocation41_spill] sm:$0xff] }
 0x449   : > { %v2616_v58 = vadd.f32 %v2612_v44, %v2560_v61  ;;  %3133 = vrot.lane.b32.xlu0 %v6925_v2, %s8265_s27  ;;  %v2587_v19 = vadd.f32 %v6942_v0, %v2531_v62  ;;  %v2378_v57 = vadd.f32 %v8326_v54, %v2322_v53  ;;  %v2476_v37 = vadd.f32 %v8327_v14, %v2420_v59  ;;  %v8330_v61 = vld [vmem:[#allocation61_spill] sm:$0xff]  ;;  %v8332_v62 = vld [vmem:[#allocation47_spill] sm:$0xff] }
 0x44a   : > { %v2677_v46 = vadd.f32 %v6915_v33, %v2629_v55  ;;  %3121 = vrot.lane.b32.xlu1 %v6922_v36, %s8265_s27  ;;  %v2719_v29 = vadd.f32 %v2717_v45, %v2695_v41  ;;  %v2574_v47 = vadd.f32 %v6957_v1, %v2518_v48  ;;  %v2545_v18 = vadd.f32 %v8328_v28, %v2489_v38  ;;  %v8329_v36 = vld [vmem:[#allocation40_spill] sm:$0xff] }
 0x44b   : > { %v2672_v4 = vadd.f32 %v6909_v51, %v2616_v58  ;;  %v2638_v2 = vpop.permute.xlu0 %2637  ;;  %v2434_v45 = vadd.f32 %v8329_v36, %v2378_v57  ;;  %v2532_v3 = vadd.f32 %v8330_v61, %v2476_v37  ;;  %v8337_v58 = vstv %s6815_s18  ;;  %s7402_s18 = sld [smem:[#allocation9 + $0x11]] }
 0x44c   : > { %v2701_v0 = vadd.f32 %v6919_v22, %v2677_v46  ;;  %v2626_v52 = vpop.permute.xlu1 %2625  ;;  %v2643_v33 = vadd.f32 %v2638_v2, %v2587_v19  ;;  %v7082_v15 = vadd.f32 %v2741_v17, %v2719_v29  ;;  %v2601_v51 = vadd.f32 %v6995_v63, %v2545_v18  ;;  %v8333_v63 = vld [vmem:[#allocation62_spill] sm:$0xff] }
 0x44d   : > { %v2696_v27 = vadd.f32 %v6912_v21, %v2672_v4  ;;  %v2630_v32 = vadd.f32 %v2626_v52, %v2574_v47  ;;  %3147 = vrot.lane.b32.xlu0 %v6953_v39, %s8265_s27  ;;  %v8331_v17 = vstv %s6818_s12  ;;  %v2490_v41 = vadd.f32 %v8332_v62, %v2434_v45  ;;  %s7416_s12 = sld [smem:[#allocation9 + $0x59]] }
 0x44e   : > { %v2683_v1 = vadd.f32 %v6938_v13, %v2643_v33  ;;  %3135 = vrot.lane.b32.xlu1 %v6948_v40, %s8265_s27  ;;  %v2725_v22 = vadd.f32 %v2723_v12, %v2701_v0  ;;  %v2724_v43 = vmul.f32 %v8331_v17, %v6665_v26  ;;  %v2588_v21 = vadd.f32 %v7008_v42, %v2532_v3  ;;  %v8335_v42 = vld [vmem:[#allocation49_spill] sm:$0xff] }
 0x44f   : > { %v2678_v44 = vadd.f32 %v6928_v60, %v2630_v32  ;;  %v2652_v55 = vpop.permute.xlu0 %2651  ;;  %v2720_v39 = vadd.f32 %v7019_v49, %v2696_v27  ;;  %v8334_v12 = vstv %s6827_s17  ;;  %v2546_v59 = vadd.f32 %v8335_v42, %v2490_v41  ;;  %v8336_v60 = vld [vmem:[#allocation55_spill] sm:$0xff]  ;;  %s7434_s17 = sld [smem:[#allocation9 + $0x6]] }
 0x450   : > { %v2707_v13 = vadd.f32 %v8333_v63, %v2683_v1  ;;  %v2640_v5 = vpop.permute.xlu1 %2639  ;;  %v2657_v53 = vadd.f32 %v2652_v55, %v2601_v51  ;;  %v7101_v40 = vadd.f32 %v2747_v56, %v2725_v22  ;;  %v2729_v35 = vmul.f32 %v8334_v12, %v6648_v10  ;;  %v7193_v42 = vld [vmem:[#allocation2 + $0x2] sm:$0xff] }
 0x451   : > { %v2702_v6 = vadd.f32 %v8336_v60, %v2678_v44  ;;  %v2644_v48 = vadd.f32 %v2640_v5, %v2588_v21  ;;  %3161 = vrot.lane.b32.xlu0 %v6990_v7, %s8265_s27  ;;  %v7113_v49 = vadd.f32 %v7024_v24, %v2720_v39  ;;  %v3171_v8 = vmul.f32 %v8337_v58, %v6696_v30 }
 0x452   : > { %v2689_v56 = vadd.f32 %v6970_v23, %v2657_v53  ;;  %3149 = vrot.lane.b32.xlu1 %v6980_v20, %s8265_s27  ;;  %v2731_v38 = vadd.f32 %v2729_v35, %v2707_v13  ;;  %v8338_v19 = vstv %s6834_s21  ;;  %v2602_v29 = vadd.f32 %v7042_v16, %v2546_v59  ;;  %s7436_s21 = sld [smem:[#allocation9 + $0xf]] }
 0x453   : > { %v2753_v46 = vmul.f32 %v8338_v19, %v6696_v30  ;;  %v2684_v7 = vadd.f32 %v6960_v9, %v2644_v48  ;;  %v7126_v24 = vpop.permute.xlu0 %2769  ;;  %v8339_v23 = vstv %s6820_s16  ;;  %v2726_v20 = vadd.f32 %v2724_v43, %v2702_v6  ;;  %s7423_s16 = sld [smem:[#allocation9 + $0x7d]] }
 0x454   : > { %v2748_v54 = vmul.f32 %v8339_v23, %v6713_v50  ;;  %v2713_v57 = vadd.f32 %v6975_v31, %v2689_v56  ;;  %v2654_v14 = vpop.permute.xlu1 %2653  ;;  %v8340_v37 = vstv %s6808_s23  ;;  %v8341_v16 = vstv %s6836_s2  ;;  %s7376_s23 = sld [smem:[#allocation9 + $0x2c]]  ;;  %s7441_s2 = sld [smem:[#allocation9 + $0x3e]] }
 0x455   : > { %v3158_v47 = vmul.f32 %v8340_v37, %v6713_v50  ;;  %v7135_v4 = vadd.f32 %v2753_v46, %v2731_v38  ;;  %v2735_v9 = vmul.f32 %v8341_v16, %v6648_v10  ;;  %v2708_v2 = vadd.f32 %v6963_v34, %v2684_v7  ;;  %3175 = vrot.lane.b32.xlu0 %v3171_v8, %s8265_s27 }
 0x456   : > { %v2658_v28 = vadd.f32 %v2654_v14, %v2602_v29  ;;  %v7144_v31 = vadd.f32 %v2748_v54, %v2726_v20  ;;  %v8342_v18 = vmov %v8334_v12  ;;  %v8343_v52 = vstv %s6802_s0  ;;  %s7363_s0 = sld [smem:[#allocation9 + $0x8]] }
 0x457   : > { %v2730_v0 = vmul.f32 %v8342_v18, %v6665_v26  ;;  %v2712_v33 = vmul.f32 %v8343_v52, %v6617_v11  ;;  %3163 = vrot.lane.b32.xlu1 %v3158_v47, %s8265_s27  ;;  %v2737_v10 = vadd.f32 %v2735_v9, %v2713_v57  ;;  %v8344_v36 = vstv %s6842_s10  ;;  %v7157_v61 = vpop.permute.xlu0 %2783  ;;  %s7443_s10 = sld [smem:[#allocation9 + $0x2a]] }
 0x458   : > { %v2759_v45 = vmul.f32 %v8344_v36, %v6696_v30  ;;  %v2690_v34 = vadd.f32 %v7000_v25, %v2658_v28  ;;  %v8345_v3 = vstv %s6825_s19  ;;  %v8346_v32 = vmov %v8338_v19  ;;  %v7165_v11 = vpop.permute.xlu1 %2771  ;;  %s7428_s19 = sld [smem:[#allocation9 + $0x1a]] }
 0x459   : > { %v3185_v27 = vmul.f32 %v8345_v3, %v6696_v30  ;;  %v2754_v51 = vmul.f32 %v8346_v32, %v6713_v50  ;;  %v2732_v1 = vadd.f32 %v2730_v0, %v2708_v2  ;;  %v8347_v22 = vmov %v8337_v58  ;;  %v7212_v58 = vld [vmem:[#allocation2 + $0xa] sm:$0xff] }
 0x45a   : > { %v3172_v17 = vmul.f32 %v8347_v22, %v6713_v50  ;;  %v3198_v43 = vstv %s7106_s15  ;;  %v7171_v62 = vadd.f32 %v2759_v45, %v2737_v10  ;;  %v2714_v25 = vadd.f32 %v2712_v33, %v2690_v34  ;;  %v7260_v33 = vld [vmem:[#allocation2 + $0x22] sm:$0xff]  ;;  %s7446_s15 = sld [smem:[#allocation9 + $0x33]] }
 0x45b   : > { %3189 = vrot.lane.b32.xlu0 %v3185_v27, %s8265_s27  ;;  %v7176_v41 = vadd.f32 %v2754_v51, %v2732_v1  ;;  %v8348_v21 = vmov %v8341_v16  ;;  %v7182_v55 = vpop.permute.xlu0 %2797  ;;  %v3199_v39 = vmul.f32 %v3198_v43, %v6696_v30  ;;  %v8349_v63 = vmov %v8344_v36  ;;  %v7243_v16 = vld [vmem:[#allocation2 + $0x1a] sm:$0xff] }
 0x45c   : > { %v2736_v44 = vmul.f32 %v8348_v21, %v6665_v26  ;;  %3177 = vrot.lane.b32.xlu1 %v3172_v17, %s8265_s27  ;;  %v2760_v13 = vmul.f32 %v8349_v63, %v6713_v50  ;;  %v7188_v53 = vpop.permute.xlu1 %2785  ;;  %v8350_v12 = vmov %v8345_v3  ;;  %v3316_v59 = vstv %s7140_s7  ;;  %s7448_s7 = sld [smem:[#allocation9 + $0x62]] }
 0x45d   : > { %v3186_v35 = vmul.f32 %v8350_v12, %v6713_v50  ;;  %v3317_v60 = vmul.f32 %v3316_v59, %v7193_v42  ;;  %v3200_v48 = vmul.f32 %v3198_v43, %v6713_v50  ;;  %v3330_v56 = vstv %s7173_s14  ;;  %s7451_s14 = sld [smem:[#allocation9 + $0x4e]] }
 0x45e   : > { %v2738_v5 = vadd.f32 %v2736_v44, %v2714_v25  ;;  %v3331_v38 = vmul.f32 %v3330_v56, %v7193_v42  ;;  %v3318_v46 = vmul.f32 %v3316_v59, %v7212_v58  ;;  %v3344_v29 = vstv %s7196_s25  ;;  %v7291_v44 = vld [vmem:[#allocation2 + $0x32] sm:$0xff]  ;;  %v7306_v59 = vld [vmem:[#allocation2 + $0x3a] sm:$0xff]  ;;  %s7453_s25 = sld [smem:[#allocation9 + $0x57]] }
 0x45f   : > { %3203 = vrot.lane.b32.xlu0 %v3199_v39, %s8265_s27  ;;  %v7202_v30 = vpop.permute.xlu0 %2811  ;;  %v3345_v7 = vmul.f32 %v3344_v29, %v7193_v42  ;;  %v3332_v54 = vmul.f32 %v3330_v56, %v7212_v58  ;;  %v3358_v20 = vstv %s7209_s30  ;;  %v3346_v47 = vmul.f32 %v3344_v29, %v7212_v58  ;;  %s7459_s30 = sld [smem:[#allocation9 + $0x86]] }
 0x460   : > { %v7199_v26 = vadd.f32 %v2760_v13, %v2738_v5  ;;  %3191 = vrot.lane.b32.xlu1 %v3186_v35, %s8265_s27  ;;  %v7205_v6 = vpop.permute.xlu1 %2799  ;;  %v3359_v14 = vmul.f32 %v3358_v20, %v7193_v42  ;;  %v3372_v9 = vstv %s7222_s5  ;;  %v3360_v0 = vmul.f32 %v3358_v20, %v7212_v58  ;;  %s7461_s5 = sld [smem:[#allocation9 + $0x72]] }
 0x461   : > { %v3373_v28 = vmul.f32 %v3372_v9, %v7243_v16  ;;  %v3386_v52 = vstv %s7233_s6  ;;  %v3374_v34 = vmul.f32 %v3372_v9, %v7260_v33  ;;  %v3400_v3 = vstv %s7246_s4  ;;  %s7477_s6 = sld [smem:[#allocation9 + $0x18]]  ;;  %s7483_s4 = sld [smem:[#allocation9 + $0x7b]] }
 0x462   : > { %v3387_v36 = vmul.f32 %v3386_v52, %v7243_v16  ;;  %v3401_v32 = vmul.f32 %v3400_v3, %v7243_v16  ;;  %v3388_v1 = vmul.f32 %v3386_v52, %v7260_v33  ;;  %v3414_v22 = vstv %s7257_s24  ;;  %s7489_s24 = sld [smem:[#allocation9 + $0x23]] }
 0x463   : > { %3321 = vrot.lane.b32.xlu0 %v3317_v60, %s8263_s1  ;;  %v7215_v8 = vpop.permute.xlu0 %2825  ;;  %v3415_v43 = vmul.f32 %v3414_v22, %v7243_v16  ;;  %v3402_v21 = vmul.f32 %v3400_v3, %v7260_v33  ;;  %v3428_v39 = vstv %s7270_s3  ;;  %v3416_v12 = vmul.f32 %v3414_v22, %v7260_v33  ;;  %v7332_v3 = vld [vmem:[#allocation2 + $0x4a] sm:$0xff]  ;;  %s7491_s3 = sld [smem:[#allocation9 + $0x21]] }
 0x464   : > { %3205 = vrot.lane.b32.xlu1 %v3200_v48, %s8265_s27  ;;  %v7218_v19 = vpop.permute.xlu1 %2813  ;;  %v3429_v13 = vmul.f32 %v3428_v39, %v7291_v44  ;;  %v3442_v35 = vstv %s7281_s28  ;;  %s7498_s28 = sld [smem:[#allocation9 + $0x47]] }
 0x465   : > { %v3443_v48 = vmul.f32 %v3442_v35, %v7291_v44  ;;  %v3444_v20 = vmul.f32 %v3442_v35, %v7306_v59 }
 0x467   : > { %3335 = vrot.lane.b32.xlu0 %v3331_v38, %s8263_s1  ;;  %v7226_v50 = vpop.permute.xlu0 %2839  ;;  %v3430_v38 = vmul.f32 %v3428_v39, %v7306_v59 }
 0x468   : > { %3323 = vrot.lane.b32.xlu1 %v3318_v46, %s8263_s1  ;;  %v7229_v23 = vpop.permute.xlu1 %2827  ;;  %v3456_v46 = vstv %s7294_s8  ;;  %s7506_s8 = sld [smem:[#allocation9 + $0x3c]] }
 0x46b   : > { %3349 = vrot.lane.b32.xlu0 %v3345_v7, %s8263_s1  ;;  %v7237_v57 = vpop.permute.xlu0 %2853  ;;  %v3457_v7 = vmul.f32 %v3456_v46, %v7291_v44 }
 0x46c   : > { %3337 = vrot.lane.b32.xlu1 %v3332_v54, %s8263_s1  ;;  %v7240_v37 = vpop.permute.xlu1 %2841 }
 0x46f   : > { %3363 = vrot.lane.b32.xlu0 %v3359_v14, %s8263_s1  ;;  %v7250_v2 = vpop.permute.xlu0 %2867  ;;  %v3470_v14 = vstv %s7303_s22  ;;  %s7517_s22 = sld [smem:[#allocation9 + $0x45]] }
 0x470   : > { %3351 = vrot.lane.b32.xlu1 %v3346_v47, %s8263_s1  ;;  %v7253_v18 = vpop.permute.xlu1 %2855  ;;  %v2817_v47 = vadd.f32 %v7202_v30, %v7171_v62 }
 0x472   : > { %v2873_v52 = vadd.f32 %v7250_v2, %v2817_v47  ;;  %v2789_v2 = vadd.f32 %v7157_v61, %v7101_v40 }
 0x473   : > { %3377 = vrot.lane.b32.xlu0 %v3373_v28, %s8263_s1  ;;  %v7263_v10 = vpop.permute.xlu0 %2881  ;;  %v3471_v28 = vmul.f32 %v3470_v14, %v7291_v44 }
 0x474   : > { %3365 = vrot.lane.b32.xlu1 %v3360_v0, %s8263_s1  ;;  %v7266_v45 = vpop.permute.xlu1 %2869  ;;  %v2775_v0 = vadd.f32 %v7126_v24, %v7082_v15  ;;  %v3498_v24 = vstv %s7317_s20  ;;  %v2845_v40 = vadd.f32 %v7226_v50, %v2789_v2  ;;  %v2790_v50 = vadd.f32 %v7188_v53, %v7144_v31  ;;  %s7546_s20 = sld [smem:[#allocation9 + $0x69]] }
 0x475   : > { %v3499_v35 = vmul.f32 %v3498_v24, %v7332_v3 }
 0x476   : > { %v2831_v62 = vadd.f32 %v7215_v8, %v2775_v0  ;;  %v3472_v8 = vmul.f32 %v3470_v14, %v7306_v59 }
 0x477   : > { %3391 = vrot.lane.b32.xlu0 %v3387_v36, %s8263_s1  ;;  %v7274_v27 = vpop.permute.xlu0 %2895 }
 0x478   : > { %3379 = vrot.lane.b32.xlu1 %v3374_v34, %s8263_s1  ;;  %v7277_v51 = vpop.permute.xlu1 %2883  ;;  %v3458_v34 = vmul.f32 %v3456_v46, %v7306_v59 }
 0x47b   : > { %3405 = vrot.lane.b32.xlu0 %v3401_v32, %s8263_s1  ;;  %v7285_v17 = vpop.permute.xlu0 %2909  ;;  %v3484_v32 = vstv %s7312_s13  ;;  %s7532_s13 = sld [smem:[#allocation9 + $0x60]] }
 0x47c   : > { %3393 = vrot.lane.b32.xlu1 %v3388_v1, %s8263_s1  ;;  %v7288_v25 = vpop.permute.xlu1 %2897  ;;  %v2818_v1 = vadd.f32 %v7218_v19, %v7199_v26  ;;  %v3485_v15 = vmul.f32 %v3484_v32, %v7332_v3  ;;  %v7352_v19 = vld [vmem:[#allocation2 + $0x52] sm:$0xff] }
 0x47d   : > { %v3486_v46 = vmul.f32 %v3484_v32, %v7352_v19  ;;  %v3500_v53 = vmul.f32 %v3498_v24, %v7352_v19 }
 0x47e   : > { %v2874_v26 = vadd.f32 %v7266_v45, %v2818_v1 }
 0x47f   : > { %3419 = vrot.lane.b32.xlu0 %v3415_v43, %s8263_s1  ;;  %v2924_v63 = vpop.permute.xlu0 %2923  ;;  %v2887_v43 = vadd.f32 %v7263_v10, %v2831_v62 }
 0x480   : > { %3407 = vrot.lane.b32.xlu1 %v3402_v21, %s8263_s1  ;;  %v7299_v5 = vpop.permute.xlu1 %2911  ;;  %v2929_v30 = vadd.f32 %v2924_v63, %v2873_v52  ;;  %v2776_v63 = vadd.f32 %v7165_v11, %v7113_v49  ;;  %v2803_v49 = vadd.f32 %v7182_v55, %v7135_v4  ;;  %v2901_v11 = vadd.f32 %v7274_v27, %v2845_v40 }
 0x481   : > { %v2846_v55 = vadd.f32 %v7240_v37, %v2790_v50 }
 0x482   : > { %v2832_v10 = vadd.f32 %v7229_v23, %v2776_v63  ;;  %v3568_v63 = vstv %s7387_s26 }
 0x483   : > { %3433 = vrot.lane.b32.xlu0 %v3429_v13, %s8263_s1  ;;  %v2938_v60 = vpop.permute.xlu0 %2937  ;;  %v3569_v40 = vmul.f32 %v3568_v63, %v7193_v42 }
 0x484   : > { %3421 = vrot.lane.b32.xlu1 %v3416_v12, %s8263_s1  ;;  %v2926_v56 = vpop.permute.xlu1 %2925  ;;  %v2943_v61 = vadd.f32 %v2938_v60, %v2887_v43  ;;  %v2888_v23 = vadd.f32 %v7277_v51, %v2832_v10  ;;  %v3526_v51 = vstv %s7346_s11  ;;  %s7565_s11 = sld [smem:[#allocation9 + $0x6b]] }
 0x485   : > { %v2930_v13 = vadd.f32 %v2926_v56, %v2874_v26  ;;  %v2859_v56 = vadd.f32 %v7237_v57, %v2803_v49  ;;  %v2804_v57 = vadd.f32 %v7205_v6, %v7176_v41  ;;  %v3527_v52 = vmul.f32 %v3526_v51, %v7332_v3 }
 0x486   : > { %v3540_v41 = vstv %s7363_s0  ;;  %s7572_s0 = sld [smem:[#allocation9 + $0x8d]] }
 0x487   : > { %3447 = vrot.lane.b32.xlu0 %v3443_v48, %s8263_s1  ;;  %v2952_v29 = vpop.permute.xlu0 %2951  ;;  %v3512_v48 = vstv %s7326_s29  ;;  %v2915_v14 = vadd.f32 %v7285_v17, %v2859_v56  ;;  %v2860_v17 = vadd.f32 %v7253_v18, %v2804_v57  ;;  %s7560_s29 = sld [smem:[#allocation9 + $0x84]] }
 0x488   : > { %3435 = vrot.lane.b32.xlu1 %v3430_v38, %s8263_s1  ;;  %v2940_v54 = vpop.permute.xlu1 %2939  ;;  %v2957_v4 = vadd.f32 %v2952_v29, %v2901_v11  ;;  %v2902_v29 = vadd.f32 %v7288_v25, %v2846_v55  ;;  %v3514_v62 = vmul.f32 %v3512_v48, %v7352_v19 }
 0x489   : > { %v2944_v27 = vadd.f32 %v2940_v54, %v2888_v23  ;;  %v2916_v6 = vadd.f32 %v7299_v5, %v2860_v17 }
 0x48b   : > { %3461 = vrot.lane.b32.xlu0 %v3457_v7, %s8263_s1  ;;  %v2966_v9 = vpop.permute.xlu0 %2965 }
 0x48c   : > { %3449 = vrot.lane.b32.xlu1 %v3444_v20, %s8263_s1  ;;  %v2954_v36 = vpop.permute.xlu1 %2953  ;;  %v3513_v20 = vmul.f32 %v3512_v48, %v7332_v3  ;;  %v2971_v54 = vadd.f32 %v2966_v9, %v2915_v14 }
 0x48f   : > { %3475 = vrot.lane.b32.xlu0 %v3471_v28, %s8263_s1  ;;  %v2980_v22 = vpop.permute.xlu0 %2979  ;;  %v2958_v28 = vadd.f32 %v2954_v36, %v2902_v29  ;;  %v3541_v36 = vmul.f32 %v3540_v41, %v7193_v42 }
 0x490   : > { %3463 = vrot.lane.b32.xlu1 %v3458_v34, %s8263_s1  ;;  %v2968_v21 = vpop.permute.xlu1 %2967  ;;  %v2985_v39 = vadd.f32 %v2980_v22, %v2929_v30  ;;  %v3528_v22 = vmul.f32 %v3526_v51, %v7352_v19  ;;  %v3624_v51 = vstv %s7416_s12  ;;  %s8353_s12 = sld [smem:[#allocation21_spill]] }
 0x491   : > { %v2972_v18 = vadd.f32 %v2968_v21, %v2916_v6  ;;  %v3626_v6 = vmul.f32 %v3624_v51, %v7260_v33 }
 0x493   : > { %3489 = vrot.lane.b32.xlu0 %v3485_v15, %s8263_s1  ;;  %v2994_v12 = vpop.permute.xlu0 %2993  ;;  %v3554_v15 = vstv %s7376_s23  ;;  %s7587_s23 = sld [smem:[#allocation9 + $0x8f]] }
 0x494   : > { %3477 = vrot.lane.b32.xlu1 %v3472_v8, %s8263_s1  ;;  %v2982_v45 = vpop.permute.xlu1 %2981  ;;  %v2999_v38 = vadd.f32 %v2994_v12, %v2943_v61  ;;  %v3555_v2 = vmul.f32 %v3554_v15, %v7193_v42  ;;  %v3542_v8 = vmul.f32 %v3540_v41, %v7212_v58  ;;  %v3582_v12 = vstv %s7395_s9  ;;  %s8352_s9 = sld [smem:[#allocation26_spill]] }
 0x495   : > { %v2986_v60 = vadd.f32 %v2982_v45, %v2930_v13  ;;  %v3556_v13 = vmul.f32 %v3554_v15, %v7212_v58  ;;  %v3583_v49 = vmul.f32 %v3582_v12, %v7193_v42  ;;  %v3584_v55 = vmul.f32 %v3582_v12, %v7212_v58 }
 0x497   : > { %3503 = vrot.lane.b32.xlu0 %v3499_v35, %s8263_s1  ;;  %v3008_v7 = vpop.permute.xlu0 %3007 }
 0x498   : > { %3491 = vrot.lane.b32.xlu1 %v3486_v46, %s8263_s1  ;;  %v2996_v47 = vpop.permute.xlu1 %2995  ;;  %v3013_v31 = vadd.f32 %v3008_v7, %v2957_v4  ;;  %v3596_v46 = vstv %s7402_s18 }
 0x499   : > { %v3000_v37 = vadd.f32 %v2996_v47, %v2944_v27 }
 0x49b   : > { %3517 = vrot.lane.b32.xlu0 %v3513_v20, %s8263_s1  ;;  %v3022_v0 = vpop.permute.xlu0 %3021 }
 0x49c   : > { %3505 = vrot.lane.b32.xlu1 %v3500_v53, %s8263_s1  ;;  %v3010_v34 = vpop.permute.xlu1 %3009  ;;  %v3027_v32 = vadd.f32 %v3022_v0, %v2971_v54  ;;  %v3598_v53 = vmul.f32 %v3596_v46, %v7260_v33  ;;  %v3638_v0 = vstv %s7423_s16  ;;  %s8354_s16 = sld [smem:[#allocation24_spill]] }
 0x49d   : > { %v3014_v25 = vadd.f32 %v3010_v34, %v2958_v28 }
 0x49f   : > { %3531 = vrot.lane.b32.xlu0 %v3527_v52, %s8263_s1  ;;  %v3036_v9 = vpop.permute.xlu0 %3035 }
 0x4a0   : > { %3519 = vrot.lane.b32.xlu1 %v3514_v62, %s8263_s1  ;;  %v3024_v30 = vpop.permute.xlu1 %3023  ;;  %v3041_v1 = vadd.f32 %v3036_v9, %v2985_v39  ;;  %v3220_v9 = vstv %s7434_s17 }
 0x4a1   : > { %v3028_v24 = vadd.f32 %v3024_v30, %v2972_v18  ;;  %v3666_v30 = vstv %s7441_s2 }
 0x4a2   : > { %v3667_v12 = vmul.f32 %v3666_v30, %v7291_v44  ;;  %p8356_p11 = scmp.ne.s32.totalorder %s8354_s16, 0 }
 0x4a3   : > { %3545 = vrot.lane.b32.xlu0 %v3541_v36, %s8265_s27  ;;  %v3050_v5 = vpop.permute.xlu0 %3049  ;;  %v3244_v36 = vstv %s7436_s21 }
 0x4a4   : > { %3533 = vrot.lane.b32.xlu1 %v3528_v22, %s8263_s1  ;;  %v3038_v43 = vpop.permute.xlu1 %3037  ;;  %v3055_v21 = vadd.f32 %v3050_v5, %v2999_v38  ;;  %s7409_s1 = sld [smem:[#allocation9 + $0x35]]  ;;  %v3570_v38 = vmul.f32 %v3568_v63, %v7212_v58  ;;  %v3250_v22 = vstv %s7446_s15  ;;  %v3680_v5 = vstv %s7448_s7 }
 0x4a5   : > { %v3042_v39 = vadd.f32 %v3038_v43, %v2986_v60  ;;  %v3597_v60 = vmul.f32 %v3596_v46, %v7243_v16  ;;  %v3256_v43 = vstv %s7453_s25  ;;  %v3640_v63 = vmul.f32 %v3638_v0, %v7260_v33  ;;  %s4482_s25 = smov [#allocation12]  }
 0x4a6   : > { %v3681_v46 = vmul.f32 %v3680_v5, %v7291_v44 }
 0x4a7   : > { %3559 = vrot.lane.b32.xlu0 %v3555_v2, %s8265_s27  ;;  %v3064_v26 = vpop.permute.xlu0 %3063  ;;  %v3232_v2 = vstv %s7451_s14 }
 0x4a8   : > { %3547 = vrot.lane.b32.xlu1 %v3542_v8, %s8265_s27  ;;  %v3052_v61 = vpop.permute.xlu1 %3051  ;;  %v3069_v10 = vadd.f32 %v3064_v26, %v3013_v31  ;;  %v3238_v26 = vstv %s7461_s5 }
 0x4a9   : > { %v3056_v35 = vadd.f32 %v3052_v61, %v3000_v37  ;;  %v3625_v37 = vmul.f32 %v3624_v51, %v7243_v16  ;;  %v3221_v61 = vmul.f32 %v3220_v9, %v7193_v42  ;;  %v3262_v51 = vstv %s7483_s4 }
 0x4aa   : > { %v3610_v27 = vstv %s7409_s1 }
 0x4ab   : > { %3573 = vrot.lane.b32.xlu0 %v3569_v40, %s8265_s27  ;;  %v3078_v48 = vpop.permute.xlu0 %3077  ;;  %v3611_v14 = vmul.f32 %v3610_v27, %v7243_v16  ;;  %v3612_v28 = vmul.f32 %v3610_v27, %v7260_v33 }
 0x4ac   : > { %3561 = vrot.lane.b32.xlu1 %v3556_v13, %s8265_s27  ;;  %v3066_v11 = vpop.permute.xlu1 %3065  ;;  %v3083_v45 = vadd.f32 %v3078_v48, %v3027_v32  ;;  %v3639_v32 = vmul.f32 %v3638_v0, %v7243_v16  ;;  %v3246_v48 = vmul.f32 %v3244_v36, %v7260_v33 }
 0x4ad   : > { %v3070_v50 = vadd.f32 %v3066_v11, %v3014_v25  ;;  %v3652_v25 = vstv %s7428_s19  ;;  %s4219_s19 = sshll.u32 %s8353_s12, 10 }
 0x4ae   : > { %v3654_v13 = vmul.f32 %v3652_v25, %v7306_v59 }
 0x4af   : > { %3587 = vrot.lane.b32.xlu0 %v3583_v49, %s8265_s27  ;;  %v3092_v23 = vpop.permute.xlu0 %3091 }
 0x4b0   : > { %3575 = vrot.lane.b32.xlu1 %v3570_v38, %s8265_s27  ;;  %v3080_v56 = vpop.permute.xlu1 %3079  ;;  %v3097_v4 = vadd.f32 %v3092_v23, %v3041_v1  ;;  %v3226_v1 = vstv %s7443_s10  ;;  %v3668_v38 = vmul.f32 %v3666_v30, %v7306_v59  ;;  %s8355_s10 = sld [smem:[#allocation181_spill]] }
 0x4b1   : > { %v3084_v7 = vadd.f32 %v3080_v56, %v3028_v24  ;;  %v3653_v24 = vmul.f32 %v3652_v25, %v7291_v44  ;;  %v3227_v49 = vmul.f32 %v3226_v1, %v7193_v42  ;;  %v7521_v56 = vmul.f32 %v3250_v22, %v7260_v33 }
 0x4b3   : > { %3601 = vrot.lane.b32.xlu0 %v3597_v60, %s8265_s27  ;;  %v3106_v20 = vpop.permute.xlu0 %3105 }
 0x4b4   : > { %3589 = vrot.lane.b32.xlu1 %v3584_v55, %s8265_s27  ;;  %v3094_v47 = vpop.permute.xlu1 %3093  ;;  %v7430_v31 = vadd.f32 %v3106_v20, %v3055_v21  ;;  %v3257_v55 = vmul.f32 %v3256_v43, %v7243_v16 }
 0x4b5   : > { %v7438_v57 = vadd.f32 %v3094_v47, %v3042_v39  ;;  %v3694_v39 = vstv %s7459_s30  ;;  %s4402_s30 = sshll.u32 %s4482_s25, 4  ;;  %s4403_s30 = int_to_ptr.vmem [resolvable:$false] %s4402_s30 }
 0x4b6   : > { %v3695_v20 = vmul.f32 %v3694_v39, %v7291_v44  ;;  %s7672_s15 = scalar_lea.hbm %s8355_s10, %s4219_s19  ;;  %s4404_s5 = scalar_lea.vmem %s4403_s30, 2048 }
 0x4b7   : > { %3615 = vrot.lane.b32.xlu0 %v3611_v14, %s8265_s27  ;;  %v3120_v29 = vpop.permute.xlu0 %3119  ;;  %v3268_v14 = vstv %s7477_s6 }
 0x4b8   : > { %3603 = vrot.lane.b32.xlu1 %v3598_v53, %s8265_s27  ;;  %v3108_v54 = vpop.permute.xlu1 %3107  ;;  %v7455_v17 = vadd.f32 %v3120_v29, %v3069_v10  ;;  %v3245_v10 = vmul.f32 %v3244_v36, %v7243_v16  ;;  %v7539_v53 = vmul.f32 %v3256_v43, %v7260_v33  ;;  %v3239_v29 = vmul.f32 %v3238_v26, %v7193_v42 }
 0x4b9   : > { %v7463_v52 = vadd.f32 %v3108_v54, %v3056_v35  ;;  %v3222_v35 = vmul.f32 %v3220_v9, %v7212_v58  ;;  %v3708_v54 = vstv %s7489_s24  ;;  %v7557_v9 = vmul.f32 %v3238_v26, %v7212_v58 }
 0x4ba   : > { %v3274_v36 = vstv %s7506_s8 }
 0x4bb   : > { %3629 = vrot.lane.b32.xlu0 %v3625_v37, %s8265_s27  ;;  %v3134_v34 = vpop.permute.xlu0 %3133  ;;  %v3696_v37 = vmul.f32 %v3694_v39, %v7306_v59 }
 0x4bc   : > { %3617 = vrot.lane.b32.xlu1 %v3612_v28, %s8265_s27  ;;  %v3122_v62 = vpop.permute.xlu1 %3121  ;;  %v7468_v41 = vadd.f32 %v3134_v34, %v3083_v45  ;;  %v3251_v45 = vmul.f32 %v3250_v22, %v7243_v16  ;;  %v3292_v28 = vstv %s7491_s3 }
 0x4bd   : > { %v7472_v18 = vadd.f32 %v3122_v62, %v3070_v50  ;;  %v3228_v50 = vmul.f32 %v3226_v1, %v7212_v58  ;;  %v3269_v62 = vmul.f32 %v3268_v14, %v7291_v44 }
 0x4bf   : > { %3643 = vrot.lane.b32.xlu0 %v3639_v32, %s8265_s27  ;;  %v3148_v15 = vpop.permute.xlu0 %3147 }
 0x4c0   : > { %3631 = vrot.lane.b32.xlu1 %v3626_v6, %s8265_s27  ;;  %v3136_v21 = vpop.permute.xlu1 %3135  ;;  %v7493_v8 = vadd.f32 %v3148_v15, %v3097_v4  ;;  %v3233_v4 = vmul.f32 %v3232_v2, %v7193_v42  ;;  %v3722_v6 = vstv %s7498_s28  ;;  %v3263_v42 = vmul.f32 %v3262_v51, %v7243_v16 }
 0x4c1   : > { %v7500_v40 = vadd.f32 %v3136_v21, %v3084_v7  ;;  %v3682_v7 = vmul.f32 %v3680_v5, %v7306_v59  ;;  %v3710_v16 = vmul.f32 %v3708_v54, %v7352_v19 }
 0x4c3   : > { %3657 = vrot.lane.b32.xlu0 %v3653_v24, %s8265_s27  ;;  %v3162_v11 = vpop.permute.xlu0 %3161  ;;  %v3298_v24 = vstv %s7517_s22 }
 0x4c4   : > { %3645 = vrot.lane.b32.xlu1 %v3640_v63, %s8265_s27  ;;  %v3150_v23 = vpop.permute.xlu1 %3149  ;;  %v3167_v60 = vadd.f32 %v3162_v11, %v7430_v31  ;;  %v7536_v31 = vmul.f32 %v3232_v2, %v7212_v58  ;;  %v3723_v58 = vmul.f32 %v3722_v6, %v7332_v3  ;;  %v3275_v63 = vmul.f32 %v3274_v36, %v7291_v44 }
 0x4c5   : > { %v7526_v27 = vadd.f32 %v3150_v23, %v7438_v57 }
 0x4c6   : > { %v3223_v47 = vadd.f32 %v3221_v61, %v3167_v60  ;;  %v3270_v61 = vmul.f32 %v3268_v14, %v7306_v59  ;;  %v3286_v14 = vstv %s7560_s29 }
 0x4c7   : > { %3671 = vrot.lane.b32.xlu0 %v3667_v12, %s8265_s27  ;;  %v3176_v57 = vpop.permute.xlu0 %3175  ;;  %v3294_v12 = vmul.f32 %v3292_v28, %v7352_v19 }
 0x4c8   : > { %3659 = vrot.lane.b32.xlu1 %v3654_v13, %s8265_s27  ;;  %v3247_v0 = vadd.f32 %v3245_v10, %v3223_v47  ;;  %v3181_v32 = vadd.f32 %v3176_v57, %v7455_v17  ;;  %v3709_v17 = vmul.f32 %v3708_v54, %v7332_v3  ;;  %v3280_v10 = vstv %s7532_s13 }
 0x4c9   : > { %v3164_v34 = vpop.permute.xlu1 %3163 }
 0x4ca   : > { %v3168_v25 = vadd.f32 %v3164_v34, %v7463_v52  ;;  %v3229_v30 = vadd.f32 %v3227_v49, %v3181_v32  ;;  %v3271_v1 = vadd.f32 %v3269_v62, %v3247_v0  ;;  %v3293_v52 = vmul.f32 %v3292_v28, %v7332_v3 }
 0x4cb   : > { %3685 = vrot.lane.b32.xlu0 %v3681_v46, %s8265_s27  ;;  %v3300_v0 = vmul.f32 %v3298_v24, %v7352_v19  ;;  %v3310_v34 = vstv %s7572_s0 }
 0x4cc   : > { %3673 = vrot.lane.b32.xlu1 %v3668_v38, %s8265_s27  ;;  %v3224_v22 = vadd.f32 %v3222_v35, %v3168_v25  ;;  %v3253_v5 = vadd.f32 %v3251_v45, %v3229_v30  ;;  %v3295_v21 = vadd.f32 %v3293_v52, %v3271_v1  ;;  %v3282_v30 = vmul.f32 %v3280_v10, %v7306_v59 }
 0x4cd   : > { %v3190_v15 = vpop.permute.xlu0 %3189  ;;  %v3311_v1 = vmul.f32 %v3310_v34, %v7332_v3 }
 0x4ce   : > { %v3178_v2 = vpop.permute.xlu1 %3177  ;;  %v3195_v43 = vadd.f32 %v3190_v15, %v7468_v41  ;;  %v3248_v39 = vadd.f32 %v3246_v48, %v3224_v22  ;;  %v3277_v35 = vadd.f32 %v3275_v63, %v3253_v5  ;;  %v3299_v41 = vmul.f32 %v3298_v24, %v7332_v3 }
 0x4cf   : > { %v3182_v26 = vadd.f32 %v3178_v2, %v7472_v18  ;;  %3699 = vrot.lane.b32.xlu0 %v3695_v20, %s8265_s27  ;;  %v3276_v18 = vmul.f32 %v3274_v36, %v7306_v59  ;;  %v3304_v48 = vstv %s7546_s20  ;;  %v3724_v24 = vmul.f32 %v3722_v6, %v7352_v19 }
 0x4d0   : > { %v3235_v13 = vadd.f32 %v3233_v4, %v3195_v43  ;;  %3687 = vrot.lane.b32.xlu1 %v3682_v7, %s8265_s27  ;;  %v3272_v45 = vadd.f32 %v3270_v61, %v3248_v39  ;;  %v3301_v60 = vadd.f32 %v3299_v41, %v3277_v35  ;;  %v3281_v4 = vmul.f32 %v3280_v10, %v7291_v44 }
 0x4d1   : > { %v3230_v49 = vadd.f32 %v3228_v50, %v3182_v26  ;;  %v3204_v11 = vpop.permute.xlu0 %3203  ;;  %v3750_v5 = vstv %s7587_s23  ;;  %v3312_v63 = vmul.f32 %v3310_v34, %v7352_v19 }
 0x4d2   : > { %v3259_v38 = vadd.f32 %v3257_v55, %v3235_v13  ;;  %v3192_v46 = vpop.permute.xlu1 %3191  ;;  %v3209_v23 = vadd.f32 %v3204_v11, %v7493_v8  ;;  %v3296_v20 = vadd.f32 %v3294_v12, %v3272_v45  ;;  %v3736_v55 = vstv %s7565_s11 }
 0x4d3   : > { %v3254_v7 = vadd.f32 %v7521_v56, %v3230_v49  ;;  %v3196_v50 = vadd.f32 %v3192_v46, %v7500_v40  ;;  %3713 = vrot.lane.b32.xlu0 %v3709_v17, %s8265_s27  ;;  %v3305_v8 = vmul.f32 %v3304_v48, %v7332_v3  ;;  %v3264_v17 = vmul.f32 %v3262_v51, %v7260_v33 }
 0x4d4   : > { %v3241_v47 = vadd.f32 %v3239_v29, %v3209_v23  ;;  %3701 = vrot.lane.b32.xlu1 %v3696_v37, %s8265_s27  ;;  %v3283_v57 = vadd.f32 %v3281_v4, %v3259_v38  ;;  %v3287_v29 = vmul.f32 %v3286_v14, %v7291_v44  ;;  %v3737_v52 = vmul.f32 %v3736_v55, %v7332_v3 }
 0x4d5   : > { %v3236_v54 = vadd.f32 %v7536_v31, %v3196_v50  ;;  %v3322_v28 = vpop.permute.xlu0 %3321  ;;  %v3278_v56 = vadd.f32 %v3276_v18, %v3254_v7  ;;  %v3738_v6 = vmul.f32 %v3736_v55, %v7352_v19  ;;  %v3752_v41 = vmul.f32 %v3750_v5, %v7352_v19 }
 0x4d6   : > { %v3265_v40 = vadd.f32 %v3263_v42, %v3241_v47  ;;  %v3206_v32 = vpop.permute.xlu1 %3205  ;;  %v3327_v62 = vadd.f32 %v3322_v28, %v3295_v21  ;;  %v3307_v25 = vadd.f32 %v3305_v8, %v3283_v57  ;;  %v3751_v21 = vmul.f32 %v3750_v5, %v7332_v3 }
 0x4d7   : > { %v3260_v37 = vadd.f32 %v7539_v53, %v3236_v54  ;;  %v3210_v36 = vadd.f32 %v3206_v32, %v7526_v27  ;;  %3727 = vrot.lane.b32.xlu0 %v3723_v58, %s8265_s27  ;;  %v3302_v31 = vadd.f32 %v3300_v0, %v3278_v56  ;;  %v3306_v27 = vmul.f32 %v3304_v48, %v7352_v19 }
 0x4d8   : > { %3715 = vrot.lane.b32.xlu1 %v3710_v16, %s8265_s27  ;;  %v3289_v42 = vadd.f32 %v3287_v29, %v3265_v40 }
 0x4d9   : > { %v3242_v44 = vadd.f32 %v7557_v9, %v3210_v36  ;;  %v3336_v53 = vpop.permute.xlu0 %3335  ;;  %v3284_v22 = vadd.f32 %v3282_v30, %v3260_v37  ;;  %v3288_v9 = vmul.f32 %v3286_v14, %v7306_v59 }
 0x4da   : > { %v3324_v15 = vpop.permute.xlu1 %3323  ;;  %v3341_v58 = vadd.f32 %v3336_v53, %v3301_v60  ;;  %v3313_v33 = vadd.f32 %v3311_v1, %v3289_v42 }
 0x4db   : > { %v3266_v51 = vadd.f32 %v3264_v17, %v3242_v44  ;;  %v3328_v16 = vadd.f32 %v3324_v15, %v3296_v20  ;;  %3741 = vrot.lane.b32.xlu0 %v3737_v52, %s8265_s27  ;;  %v3308_v2 = vadd.f32 %v3306_v27, %v3284_v22 }
 0x4dc   : > { %3729 = vrot.lane.b32.xlu1 %v3724_v24, %s8265_s27 }
 0x4dd   : > { %v3350_v43 = vpop.permute.xlu0 %3349  ;;  %v3290_v39 = vadd.f32 %v3288_v9, %v3266_v51 }
 0x4de   : > { %v3338_v26 = vpop.permute.xlu1 %3337  ;;  %v3355_v61 = vadd.f32 %v3350_v43, %v3307_v25 }
 0x4df   : > { %v3342_v10 = vadd.f32 %v3338_v26, %v3302_v31  ;;  %3755 = vrot.lane.b32.xlu0 %v3751_v21, %s8265_s27  ;;  %v3314_v13 = vadd.f32 %v3312_v63, %v3290_v39 }
 0x4e0   : > { %3743 = vrot.lane.b32.xlu1 %v3738_v6, %s8265_s27 }
 0x4e1   : > { %v3364_v12 = vpop.permute.xlu0 %3363 }
 0x4e2   : > { %v3352_v59 = vpop.permute.xlu1 %3351  ;;  %v3369_v35 = vadd.f32 %v3364_v12, %v3313_v33 }
 0x4e3   : > { %v3356_v49 = vadd.f32 %v3352_v59, %v3308_v2 }
 0x4e4   : > { %3757 = vrot.lane.b32.xlu1 %v3752_v41, %s8265_s27  ;;  %s8351_s27 = sld [smem:[#allocation18_spill]] }
 0x4e5   : > { %v3378_v3 = vpop.permute.xlu0 %3377 }
 0x4e6   : > { %v3366_v11 = vpop.permute.xlu1 %3365  ;;  %v3383_v45 = vadd.f32 %v3378_v3, %v3327_v62 }
 0x4e7   : > { %v3370_v18 = vadd.f32 %v3366_v11, %v3314_v13 }
 0x4e9   : > { %v3392_v48 = vpop.permute.xlu0 %3391 }
 0x4ea   : > { %v3380_v38 = vpop.permute.xlu1 %3379  ;;  %v3397_v46 = vadd.f32 %v3392_v48, %v3341_v58  ;;  %s295_s26 = sand.u32 1, %s8351_s27  }
 0x4eb   : > { %v3384_v23 = vadd.f32 %v3380_v38, %v3328_v16  ;;  %s3912_s18 = sshll.u32 %s295_s26, 6  ;;  %s7681_s7 = scalar_lea.sflag [#allocation5], %s295_s26 }
 0x4ec   : > { %s7640_s1 = scalar_lea.vmem [#allocation12], %s3912_s18 }
 0x4ed   : > { %v3406_v60 = vpop.permute.xlu0 %3405  ;;  %s3797_s17 = sshll.u32 %s7640_s1, 4  ;;  %s7674_s17 = int_to_ptr.vmem [resolvable:$true] %s3797_s17 }
 0x4ee   : > { %v3394_v4 = vpop.permute.xlu1 %3393  ;;  %v3411_v7 = vadd.f32 %v3406_v60, %v3355_v61  ;;  %s4398_s14 = scalar_lea.vmem %s7674_s17, 1024  ;;  %p4405_p2 = scmp.lt.s32.totalorder %s7674_s17, %s4403_s30 }
 0x4ef   : > { %v3398_v50 = vadd.f32 %v3394_v4, %v3342_v10  ;;  %p4399_p8 = scmp.ne.s32.totalorder %s7674_s17, %s4398_s14  ;;  %p4406_p3 = scmp.lt.s32.totalorder %s4404_s5, %s4398_s14 }
 0x4f1   : > { %v3420_v20 = vpop.permute.xlu0 %3419  ;;  %p4400_p13 = pnand %p4399_p8, %p8356_p11  ;;  %p4407_p4 = por %p4406_p3, %p4405_p2 }
 0x4f2   : > { %v3408_v14 = vpop.permute.xlu1 %3407  ;;  %v3425_v47 = vadd.f32 %v3420_v20, %v3369_v35 }
 0x4f3   : > { %v3412_v55 = vadd.f32 %v3408_v14, %v3356_v49  ;;  %p4401_p1 = pneg %p4400_p13 }
 0x4f5   : > { %v3434_v19 = vpop.permute.xlu0 %3433  ;;  %p4408_p9 = pnand %p4407_p4, %p4401_p1 }
 0x4f6   : > { %v3422_v57 = vpop.permute.xlu1 %3421  ;;  %v3439_v8 = vadd.f32 %v3434_v19, %v3383_v45 }
 0x4f7   : > { %v3426_v54 = vadd.f32 %v3422_v57, %v3370_v18 }
 0x4f9   : > { %v3448_v28 = vpop.permute.xlu0 %3447 }
 0x4fa   : > { %v3436_v0 = vpop.permute.xlu1 %3435  ;;  %v3453_v56 = vadd.f32 %v3448_v28, %v3397_v46 }
 0x4fb   : > { %v3440_v34 = vadd.f32 %v3436_v0, %v3384_v23 }
 0x4fd   : > { %v3462_v40 = vpop.permute.xlu0 %3461 }
 0x4fe   : > { %v3450_v32 = vpop.permute.xlu1 %3449  ;;  %v3467_v62 = vadd.f32 %v3462_v40, %v3411_v7 }
 0x4ff   : > { %v3454_v25 = vadd.f32 %v3450_v32, %v3398_v50 }
 0x501   : > { %v3476_v29 = vpop.permute.xlu0 %3475 }
 0x502   : > { %v3464_v37 = vpop.permute.xlu1 %3463  ;;  %v3481_v36 = vadd.f32 %v3476_v29, %v3425_v47 }
 0x503   : > { %v7626_v31 = vadd.f32 %v3464_v37, %v3412_v55 }
 0x505   : > { %v3490_v30 = vpop.permute.xlu0 %3489 }
 0x506   : > { %v3478_v17 = vpop.permute.xlu1 %3477  ;;  %v3495_v41 = vadd.f32 %v3490_v30, %v3439_v8  ;;  %v4330_v8 = vld [vmem:[%s8352_s9] sm:$0xff] }
 0x507   : > { %v7628_v42 = vadd.f32 %v3478_v17, %v3426_v54 }
 0x509   : > { %v3504_v1 = vpop.permute.xlu0 %3503 }
 0x50a   : > { %v3492_v44 = vpop.permute.xlu1 %3491  ;;  %v3509_v45 = vadd.f32 %v3504_v1, %v3453_v56  ;;  %v4331_v1 = vld [vmem:[%s8352_s9 + $0x10] sm:$0xff] }
 0x50b   : > { %v3496_v38 = vadd.f32 %v3492_v44, %v3440_v34 }
 0x50d   : > { %v3518_v53 = vpop.permute.xlu0 %3517 }
 0x50e   : > { %v3506_v52 = vpop.permute.xlu1 %3505  ;;  %v3523_v7 = vadd.f32 %v3518_v53, %v3467_v62 }
 0x50f   : > { %v3510_v47 = vadd.f32 %v3506_v52, %v3454_v25  ;;  %v4332_v52 = vld [vmem:[%s8352_s9 + $0x8] sm:$0xff] }
 0x511   : > { %v3532_v27 = vpop.permute.xlu0 %3531 }
 0x512   : > { %v3520_v22 = vpop.permute.xlu1 %3519  ;;  %v3537_v34 = vadd.f32 %v3532_v27, %v3481_v36 }
 0x513   : > { %v3524_v25 = vadd.f32 %v3520_v22, %v7626_v31 }
 0x515   : > { %v3546_v15 = vpop.permute.xlu0 %3545 }
 0x516   : > { %v7630_v58 = vpop.permute.xlu1 %3533  ;;  %v3551_v3 = vadd.f32 %v3546_v15, %v3495_v41 }
 0x517   : > { %v3538_v22 = vadd.f32 %v7630_v58, %v7628_v42 }
 0x519   : > { %v3560_v24 = vpop.permute.xlu0 %3559 }
 0x51a   : > { %v3548_v5 = vpop.permute.xlu1 %3547  ;;  %v3565_v46 = vadd.f32 %v3560_v24, %v3509_v45 }
 0x51b   : > { %v3552_v60 = vadd.f32 %v3548_v5, %v3496_v38 }
 0x51d   : > { %v3574_v33 = vpop.permute.xlu0 %3573 }
 0x51e   : > { %v3562_v51 = vpop.permute.xlu1 %3561  ;;  %v3579_v19 = vadd.f32 %v3574_v33, %v3523_v7 }
 0x51f   : > { %v3566_v28 = vadd.f32 %v3562_v51, %v3510_v47 }
 0x521   : > { %v3588_v16 = vpop.permute.xlu0 %3587 }
 0x522   : > { %v3576_v2 = vpop.permute.xlu1 %3575  ;;  %v3593_v30 = vadd.f32 %v3588_v16, %v3537_v34 }
 0x523   : > { %v3580_v36 = vadd.f32 %v3576_v2, %v3524_v25  ;;  %v4333_v2 = vld [vmem:[%s8352_s9 + $0x20] sm:$0xff] }
 0x525   : > { %v3602_v9 = vpop.permute.xlu0 %3601 }
 0x526   : > { %v7632_v43 = vpop.permute.xlu1 %3589  ;;  %v3607_v18 = vadd.f32 %v3602_v9, %v3551_v3  ;;  %v4337_v3 = vld [vmem:[%s8352_s9 + $0x38] sm:$0xff] }
 0x529   : > { %v3616_v21 = vpop.permute.xlu0 %3615 }
 0x52a   : > { %v3604_v63 = vpop.permute.xlu1 %3603  ;;  %v3621_v50 = vadd.f32 %v3616_v21, %v3565_v46  ;;  %v3594_v21 = vadd.f32 %v7632_v43, %v3538_v22  ;;  %v4335_v43 = vld [vmem:[%s8352_s9 + $0x30] sm:$0xff] }
 0x52b   : > { %v3608_v55 = vadd.f32 %v3604_v63, %v3552_v60 }
 0x52d   : > { %v3630_v39 = vpop.permute.xlu0 %3629 }
 0x52e   : > { %v3618_v26 = vpop.permute.xlu1 %3617  ;;  %v3635_v40 = vadd.f32 %v3630_v39, %v3579_v19  ;;  %v4334_v39 = vld [vmem:[%s8352_s9 + $0x18] sm:$0xff] }
 0x52f   : > { %v3622_v29 = vadd.f32 %v3618_v26, %v3566_v28 }
 0x531   : > { %v3644_v61 = vpop.permute.xlu0 %3643 }
 0x532   : > { %v3632_v6 = vpop.permute.xlu1 %3631  ;;  %v3649_v24 = vadd.f32 %v3644_v61, %v3593_v30 }
 0x533   : > { %v3636_v33 = vadd.f32 %v3632_v6, %v3580_v36 }
 0x535   : > { %v3658_v10 = vpop.permute.xlu0 %3657 }
 0x536   : > { %v7634_v13 = vpop.permute.xlu1 %3645  ;;  %v3663_v23 = vadd.f32 %v3658_v10, %v3607_v18 }
 0x537   : > { %v3650_v6 = vadd.f32 %v7634_v13, %v3594_v21 }
 0x539   : > { %v3672_v12 = vpop.permute.xlu0 %3671 }
 0x53a   : > { %v3660_v59 = vpop.permute.xlu1 %3659  ;;  %v3677_v57 = vadd.f32 %v3672_v12, %v3621_v50 }
 0x53b   : > { %v3664_v0 = vadd.f32 %v3660_v59, %v3608_v55 }
 0x53d   : > { %v3686_v35 = vpop.permute.xlu0 %3685 }
 0x53e   : > { %v3674_v49 = vpop.permute.xlu1 %3673  ;;  %v3691_v17 = vadd.f32 %v3686_v35, %v3635_v40  ;;  %v4336_v35 = vld [vmem:[%s8352_s9 + $0x28] sm:$0xff] }
 0x53f   : > { %v3678_v53 = vadd.f32 %v3674_v49, %v3622_v29 }
 0x541   : > { %v3700_v11 = vpop.permute.xlu0 %3699 }
 0x542   : > { %v3688_v48 = vpop.permute.xlu1 %3687  ;;  %v3705_v16 = vadd.f32 %v3700_v11, %v3649_v24 }
 0x543   : > { %v3692_v63 = vadd.f32 %v3688_v48, %v3636_v33 }
 0x545   : > { %v3714_v4 = vpop.permute.xlu0 %3713 }
 0x546   : > { %v3702_v20 = vpop.permute.xlu1 %3701  ;;  %v3719_v14 = vadd.f32 %v3714_v4, %v3663_v23 }
 0x547   : > { %v3706_v59 = vadd.f32 %v3702_v20, %v3650_v6 }
 0x548   : > { %v3763_v54 = vadd.f32 %v4330_v8, %v3719_v14 }
 0x549   : > { %v3728_v56 = vpop.permute.xlu0 %3727 }
 0x54a   : > { %3766 = vst.msk [vmem:[%s7640_s1] sm:$0xff] %vm3765_vm11, %v3763_v54  ;;  %v3716_v32 = vpop.permute.xlu1 %3715  ;;  %v3733_v62 = vadd.f32 %v3728_v56, %v3677_v57 }
 0x54b   : > { %v3720_v37 = vadd.f32 %v3716_v32, %v3664_v0 }
 0x54c   : > { %v3768_v44 = vadd.f32 %v4331_v1, %v3733_v62 }
 0x54d   : > { %v3764_v27 = vadd.f32 %v4332_v52, %v3720_v37  ;;  %v3742_v15 = vpop.permute.xlu0 %3741 }
 0x54e   : > { %4207 = vst.msk [vmem:[%s7640_s1 + $0x10] sm:$0xff] %vm3765_vm11, %v3768_v44  ;;  %v3730_v5 = vpop.permute.xlu1 %3729  ;;  %v3747_v31 = vadd.f32 %v3742_v15, %v3691_v17 }
 0x54f   : > { %3767 = vst.msk [vmem:[%s7640_s1 + $0x8] sm:$0xff] %vm3765_vm11, %v3764_v27  ;;  %v3734_v51 = vadd.f32 %v3730_v5, %v3678_v53 }
 0x550   : > { %v3773_v9 = vadd.f32 %v4333_v2, %v3747_v31 }
 0x551   : > { %v3769_v26 = vadd.f32 %v4334_v39, %v3734_v51  ;;  %v3756_v61 = vpop.permute.xlu0 %3755 }
 0x552   : > { %4209 = vst.msk [vmem:[%s7640_s1 + $0x20] sm:$0xff] %vm3765_vm11, %v3773_v9  ;;  %v3744_v42 = vpop.permute.xlu1 %3743  ;;  %v3761_v58 = vadd.f32 %v3756_v61, %v3705_v16 }
 0x553   : > { %4208 = vst.msk [vmem:[%s7640_s1 + $0x18] sm:$0xff] %vm3765_vm11, %v3769_v26  ;;  %v3748_v10 = vadd.f32 %v3744_v42, %v3692_v63 }
 0x554   : > { %v3778_v12 = vadd.f32 %v4335_v43, %v3761_v58 }
 0x555   : > { %v3774_v41 = vadd.f32 %v4336_v35, %v3748_v10 }
 0x556   : > { %4211 = vst.msk [vmem:[%s7640_s1 + $0x30] sm:$0xff] %vm3765_vm11, %v3778_v12  ;;  %v3758_v49 = vpop.permute.xlu1 %3757 }
 0x557   : > { %4210 = vst.msk [vmem:[%s7640_s1 + $0x28] sm:$0xff] %vm3765_vm11, %v3774_v41  ;;  %v3762_v13 = vadd.f32 %v3758_v49, %v3706_v59 }
 0x559   : > { %v3779_v11 = vadd.f32 %v4337_v3, %v3762_v13 }
 0x55b   : > { %4212 = vst.msk [vmem:[%s7640_s1 + $0x38] sm:$0xff] %vm3765_vm11, %v3779_v11 }
 0x55c   : > { %4411 = shalt.err (!%p4408_p9)
}
 0x55d   : > { %s4412_s6 = scalar_lea.hbm %s7672_s15, 1024  ;;  %s4416_s3 = scalar_lea.hbm %s8355_s10, 2048 }
 0x55e   : > { %p4413_p7 = scmp.ne.s32.totalorder %s7672_s15, %s4412_s6  ;;  %p4417_p6 = scmp.lt.u32.totalorder %s7672_s15, %s8355_s10 }
 0x55f   : > { %p4418_p12 = scmp.lt.u32.totalorder %s4416_s3, %s4412_s6  ;;  %p4420_p8 = scmp.lt.u32.totalorder %s4412_s6, %s7672_s15 }
 0x560   : > { %p4414_p0 = pnand %p4413_p7, %p8356_p11 }
 0x561   : > { %p4419_p10 = por %p4418_p12, %p4417_p6 }
 0x562   : > { %p4415_p5 = pneg %p4414_p0 }
 0x563   : > { %p4421_p13 = por %p4420_p8, %p4419_p10 }
 0x565   : > { %p4422_p1 = pnand %p4421_p13, %p4415_p5 }
 0x567   : > { %4425 = shalt.err (!%p4422_p1)
}
 0x568   : > { %s4483_s22 = smov 128   ;;  %s4484_s13 = smov 8  }
 0x569   : > { %4236 = dma.vmem_to_hbm [thread:$0]  (%p8356_p11), %s7674_s17, 1024, %s7672_s15, %s7681_s7, %s4483_s22, %s4483_s22, %s4484_s13  }
 0x56a PF: > { %s8357_s20 = sld [smem:[#allocation20_spill]]  ;;  %s8358_s29 = sld [smem:[#allocation17_spill]] }
 0x56b   : > { %s8359_s11 = sld [smem:[#allocation25_spill]] }
 0x570   : > { %p4263_p2 = scmp.ge.s32.totalorder %s8357_s20, 2  ;;  %s3812_s0 = sand.u32 1, %s8358_s29  }
 0x571   : > { %p8360_p3 = scmp.ne.s32.totalorder %s8359_s11, 0  ;;  %s3813_s23 = scalar_lea.sflag [#allocation5], %s3812_s0 }
 0x573   : > { %p4252_p4 = pnand %p4263_p2, %p8360_p3 }
 0x575   : > { %4455 = dma.done.wait (!%p4252_p4), %s3813_s23, 1024  }
 0x576   : > { %4457 = vsyncadd (!%p4252_p4), %s3813_s23, 4294966272  ;;  %s8361_s26 = sld [smem:[#allocation22_spill]]  ;;  %s8362_s23 = sld [smem:[#allocation18_spill]] }
 0x577   : > { %s8363_s24 = sld [smem:[#allocation19_spill]]  ;;  %s8364_s25 = sld [smem:[#allocation23_spill]] }
 0x57c   : > { %p20_p9 = scmp.ge.s32.totalorder %s8361_s26, 4  }
 0x57e   :  { %22 = sbr.rel (!%p20_p9) target bundleno = 14 (0xe), region = 102 }
 0x585   :  { %3818 = vsyncpa [#allocation5], 1 }
 0x586   :  { %3820 = vsyncpa [#allocation5 + $0x1], 1 }
 0x587   :  { %3821 = vsyncpa [#allocation6], 1 }
 0x588   :  { %3823 = vsyncpa [#allocation6 + $0x1], 1 }
 0x589   :  { %3824 = vsyncpa [#allocation8], 1 }
 0x58a   :  { %3825 = vsyncpa [#allocation11], 1 }

</bundles_post_ra>
